<compile_context>
chip_gen: v7x
topology: tpu7x:2x2x1
jax: 0.10.0
libtpu: 0.0.40
codegen_flags: <defaults>
</compile_context>

<pallas_src>
import jax
import jax.numpy as jnp
from jax import lax
from jax.experimental import pallas as pl
from jax.experimental.pallas import tpu as pltpu

# Module hyper-parameters (from the PyTorch script)
INPUT_NUM = 1
HID_NUM = 50
LAYERS_NUM = 3
OUT_NUM = 1

# Padded, lane-aligned layout used inside the kernel.
HID_PAD = 128               # hidden padded to one full 128-lane tile
GATES_PAD = 4 * HID_PAD     # 512: gate-major, each gate owns one lane tile

# TODO(synk): pandas CSV loading / DataLoader of the original script is data
# plumbing, not part of the forward pass; random inputs are used instead.


def _lstm_kernel(x_ref, wih0_ref, whh0_ref, wf_ref, b_ref, wout_ref, bout_ref,
                 out_ref):
    """Single invocation (grid=(1,)): full recurrence over T timesteps.

    x_ref    : [T, B, 1]              raw input sequence (time-major)
    wih0_ref : [1, GATES_PAD]         layer-0 input weight row (gate-major, padded)
    whh0_ref : [HID_PAD, GATES_PAD]   layer-0 hidden weight^T (padded)
    wf_ref   : [L-1, 2*HID_PAD, GATES_PAD]  fused [W_ih^T ; W_hh^T], layers 1..
    b_ref    : [L, 1, GATES_PAD]      b_ih + b_hh per layer (padded lanes = 0)
    wout_ref : [HID_PAD, OUT_NUM]     output Linear weight^T (padded rows = 0)
    bout_ref : [1, OUT_NUM]
    out_ref  : [B, OUT_NUM]
    """
    HP, GP = HID_PAD, GATES_PAD
    T = x_ref.shape[0]
    B = x_ref.shape[1]

    # Hoisted once, outside the unrolled time loop (JAX does not CSE
    # broadcast_in_dim; T*L re-broadcasts would otherwise be emitted).
    wih0_b = jnp.broadcast_to(wih0_ref[...], (B, GP))                  # [B, GP]
    biases = [jnp.broadcast_to(b_ref[l], (B, GP)) for l in range(LAYERS_NUM)]

    def cell(gates, c_prev):
        # Gate blocks are lane-aligned at 128-lane boundaries: i | f | g | o,
        # so every slice below is a whole-tile view (zero relayout cost).
        s_if = jax.nn.sigmoid(gates[:, : 2 * HP])
        i_g = s_if[:, :HP]
        f_g = s_if[:, HP:]
        g_g = jnp.tanh(gates[:, 2 * HP: 3 * HP])
        o_g = jax.nn.sigmoid(gates[:, 3 * HP:])
        c_new = f_g * c_prev + i_g * g_g
        h_new = o_g * jnp.tanh(c_new)
        return h_new, c_new

    def step(t, carry):
        hs, cs = carry                      # tuples of [B, HP] per layer
        new_hs, new_cs = [], []

        # Layer 0: INPUT_NUM == 1, so the input projection is a VPU
        # lane-broadcast multiply (no MXU push for it).
        xt = x_ref[t]                                                   # [B, 1]
        gates = (xt * wih0_b
                 + jnp.dot(hs[0], whh0_ref[...],
                           preferred_element_type=jnp.float32)
                 + biases[0])
        h_l, c_l = cell(gates, cs[0])
        new_hs.append(h_l)
        new_cs.append(c_l)

        # Layers 1..L-1: ONE fused matmul per layer on concat([h_below, h_prev]).
        for l in range(1, LAYERS_NUM):
            hin = jnp.concatenate([new_hs[l - 1], hs[l]], axis=1)   # [B, 2*HP]
            gates = (jnp.dot(hin, wf_ref[l - 1],
                             preferred_element_type=jnp.float32)
                     + biases[l])
            h_l, c_l = cell(gates, cs[l])
            new_hs.append(h_l)
            new_cs.append(c_l)

        return tuple(new_hs), tuple(new_cs)

    zeros = jnp.zeros((B, HP), jnp.float32)
    init = (tuple(zeros for _ in range(LAYERS_NUM)),
            tuple(zeros for _ in range(LAYERS_NUM)))

    hs, _ = lax.fori_loop(0, T, step, init, unroll=True)

    # Final Linear head on the last timestep of the top layer.
    out_ref[...] = (jnp.dot(hs[-1], wout_ref[...],
                            preferred_element_type=jnp.float32)
                    + bout_ref[...])


def lstm_forward(x, wih0, whh0, wf, b, wout, bout):
    """x: [B, T, INPUT_NUM] float32 (batch_first).  Returns [B, OUT_NUM]."""
    B, T, F_in = x.shape
    HP, GP, L = HID_PAD, GATES_PAD, LAYERS_NUM

    # Time-major view of the (tiny) raw input; everything else happens in-kernel.
    x_tm = jnp.transpose(x, (1, 0, 2))      # [T, B, 1]

    # TODO(synk): for long sequences / large batches, chunk T onto an
    # "arbitrary" grid axis with h/c in VMEM scratch, and add a "parallel"
    # batch axis (second TensorCore on v7x). Unnecessary at these shapes.
    return pl.pallas_call(
        _lstm_kernel,
        out_shape=jax.ShapeDtypeStruct((B, OUT_NUM), jnp.float32),
        grid_spec=pltpu.PrefetchScalarGridSpec(
            num_scalar_prefetch=0,
            grid=(1,),
            in_specs=[
                pl.BlockSpec((T, B, F_in), lambda i: (0, 0, 0)),     # x
                pl.BlockSpec((1, GP), lambda i: (0, 0)),             # wih0 row
                pl.BlockSpec((HP, GP), lambda i: (0, 0)),            # whh0^T
                pl.BlockSpec((L - 1, 2 * HP, GP), lambda i: (0, 0, 0)),  # fused
                pl.BlockSpec((L, 1, GP), lambda i: (0, 0, 0)),       # biases
                pl.BlockSpec((HP, OUT_NUM), lambda i: (0, 0)),       # out W^T
                pl.BlockSpec((1, OUT_NUM), lambda i: (0, 0)),        # out bias
            ],
            out_specs=pl.BlockSpec((B, OUT_NUM), lambda i: (0, 0)),
        ),
        compiler_params=pltpu.CompilerParams(
            dimension_semantics=("arbitrary",)),
    )(x_tm, wih0, whh0, wf, b, wout, bout)


# ---------------------------------------------------------------------------
# Parameter construction / packing
# ---------------------------------------------------------------------------

def init_params(key):
    """PyTorch-style uniform(-1/sqrt(H), 1/sqrt(H)) raw parameters.

    Returns per-layer lists in native PyTorch layout:
      w_ih[l]: [4H, in_dim], w_hh[l]: [4H, H], b_ih[l]: [4H], b_hh[l]: [4H],
      w_out: [OUT, H], b_out: [OUT].
    Gate row order is i | f | g | o (as in nn.LSTM).
    """
    H, L, F = HID_NUM, LAYERS_NUM, INPUT_NUM
    k = 1.0 / jnp.sqrt(jnp.float32(H))
    keys = jax.random.split(key, 4 * L + 2)

    w_ih, w_hh, b_ih, b_hh = [], [], [], []
    for l in range(L):
        in_dim = F if l == 0 else H
        w_ih.append(jax.random.uniform(keys[4 * l + 0], (4 * H, in_dim),
                                       jnp.float32, -k, k))
        w_hh.append(jax.random.uniform(keys[4 * l + 1], (4 * H, H),
                                       jnp.float32, -k, k))
        b_ih.append(jax.random.uniform(keys[4 * l + 2], (4 * H,),
                                       jnp.float32, -k, k))
        b_hh.append(jax.random.uniform(keys[4 * l + 3], (4 * H,),
                                       jnp.float32, -k, k))
    w_out = jax.random.uniform(keys[-2], (OUT_NUM, H), jnp.float32, -k, k)
    b_out = jax.random.uniform(keys[-1], (OUT_NUM,), jnp.float32, -k, k)
    return w_ih, w_hh, b_ih, b_hh, w_out, b_out


def _pad_gates(w_t):
    """[rows, 4*H] -> [rows, 4*HID_PAD]; each gate left-aligned in a 128-lane tile."""
    H, HP = HID_NUM, HID_PAD
    rows = w_t.shape[0]
    out = jnp.zeros((rows, 4 * HP), jnp.float32)
    for g in range(4):
        out = out.at[:, g * HP: g * HP + H].set(w_t[:, g * H:(g + 1) * H])
    return out


def _pad_rows(w, rows):
    out = jnp.zeros((rows, w.shape[1]), jnp.float32)
    return out.at[: w.shape[0]].set(w)


def pack_params(raw):
    """Convert raw PyTorch-layout weights to the kernel's padded fused layout.

    All padding is zero, so dead h/c lanes stay exactly 0 and never feed back
    into the real lanes.
    """
    w_ih, w_hh, b_ih, b_hh, w_out, b_out = raw
    HP = HID_PAD

    wih0 = _pad_gates(w_ih[0].T)                        # [1, GP]
    whh0 = _pad_rows(_pad_gates(w_hh[0].T), HP)         # [HP, GP]

    wf = []
    for l in range(1, LAYERS_NUM):
        wi = _pad_rows(_pad_gates(w_ih[l].T), HP)       # [HP, GP]
        wh = _pad_rows(_pad_gates(w_hh[l].T), HP)       # [HP, GP]
        wf.append(jnp.concatenate([wi, wh], axis=0))    # [2*HP, GP]
    wf = jnp.stack(wf)                                  # [L-1, 2*HP, GP]

    b = jnp.stack([_pad_gates((b_ih[l] + b_hh[l])[None, :])
                   for l in range(LAYERS_NUM)])         # [L, 1, GP]

    wout = _pad_rows(w_out.T, HP)                       # [HP, OUT]
    bout = b_out[None, :]                               # [1, OUT]
    return wih0, whh0, wf, b, wout, bout


# ---------------------------------------------------------------------------
# Pure-JAX reference (unpadded, PyTorch semantics)
# ---------------------------------------------------------------------------

def lstm_ref(x, raw):
    w_ih, w_hh, b_ih, b_hh, w_out, b_out = raw
    B, T, _ = x.shape
    H, L = HID_NUM, LAYERS_NUM
    h = [jnp.zeros((B, H), jnp.float32) for _ in range(L)]
    c = [jnp.zeros((B, H), jnp.float32) for _ in range(L)]
    for t in range(T):
        inp = x[:, t, :]
        for l in range(L):
            if l == 0 and INPUT_NUM == 1:
                # length-1 contraction == scalar multiply (kept exact in f32).
                x_proj = inp * w_ih[0].T
            else:
                x_proj = inp @ w_ih[l].T
            gates = x_proj + h[l] @ w_hh[l].T + b_ih[l] + b_hh[l]
            i_g = jax.nn.sigmoid(gates[:, :H])
            f_g = jax.nn.sigmoid(gates[:, H:2 * H])
            g_g = jnp.tanh(gates[:, 2 * H:3 * H])
            o_g = jax.nn.sigmoid(gates[:, 3 * H:])
            c[l] = f_g * c[l] + i_g * g_g
            h[l] = o_g * jnp.tanh(c[l])
            inp = h[l]
    return h[-1] @ w_out.T + b_out


if __name__ == "__main__":
    key = jax.random.PRNGKey(0)
    k_param, k_x = jax.random.split(key)

    B, T = 2, 8
    x = jax.random.normal(k_x, (B, T, INPUT_NUM), jnp.float32)

    raw = init_params(k_param)
    kern_params = pack_params(raw)

    out = lstm_forward(x, *kern_params)
    out = jax.block_until_ready(out)

    ref = lstm_ref(x, raw)
    assert out.shape == (B, OUT_NUM)
    assert jnp.allclose(out, ref, atol=1e-4, rtol=1e-4), (out, ref)

    print("KERNEL_OK")
</pallas_src>

<mosaic_0001>
module attributes {stable_mosaic.version = 11 : i64} {
  func.func @_lstm_kernel(%arg0: i32, %arg1: memref<8x2x1xf32, #tpu.memory_space<vmem>>, %arg2: memref<1x512xf32, #tpu.memory_space<vmem>>, %arg3: memref<128x512xf32, #tpu.memory_space<vmem>>, %arg4: memref<2x256x512xf32, #tpu.memory_space<vmem>>, %arg5: memref<3x1x512xf32, #tpu.memory_space<vmem>>, %arg6: memref<128x1xf32, #tpu.memory_space<vmem>>, %arg7: memref<1x1xf32, #tpu.memory_space<vmem>>, %arg8: memref<2x1xf32, #tpu.memory_space<vmem>>) attributes {dimension_semantics = [#tpu.dimension_semantics<arbitrary>], iteration_bounds = array<i64: 1>, scalar_prefetch = 0 : i64, scratch_operands = 0 : i64, tpu.core_type = #tpu.core_type<tc>, window_params = [{pipeline_mode = #tpu.pipeline_mode<synchronous>, transform_indices = @transform_0, window_bounds = array<i64: 8, 2, 1>}, {pipeline_mode = #tpu.pipeline_mode<synchronous>, transform_indices = @transform_1, window_bounds = array<i64: 1, 512>}, {pipeline_mode = #tpu.pipeline_mode<synchronous>, transform_indices = @transform_2, window_bounds = array<i64: 128, 512>}, {pipeline_mode = #tpu.pipeline_mode<synchronous>, transform_indices = @transform_3, window_bounds = array<i64: 2, 256, 512>}, {pipeline_mode = #tpu.pipeline_mode<synchronous>, transform_indices = @transform_4, window_bounds = array<i64: 3, 1, 512>}, {pipeline_mode = #tpu.pipeline_mode<synchronous>, transform_indices = @transform_5, window_bounds = array<i64: 128, 1>}, {pipeline_mode = #tpu.pipeline_mode<synchronous>, transform_indices = @transform_6, window_bounds = array<i64: 1, 1>}, {pipeline_mode = #tpu.pipeline_mode<synchronous>, transform_indices = @transform_7, window_bounds = array<i64: 2, 1>}]} {
    %c0 = arith.constant 0 : index
    %c0_0 = arith.constant 0 : index
    %0 = vector.load %arg2[%c0, %c0_0] : memref<1x512xf32, #tpu.memory_space<vmem>>, vector<1x512xf32>
    %1 = vector.shape_cast %0 : vector<1x512xf32> to vector<1x512xf32>
    %2 = vector.broadcast %1 : vector<1x512xf32> to vector<2x512xf32>
    %c0_1 = arith.constant 0 : index
    %c0_2 = arith.constant 0 : index
    %c0_3 = arith.constant 0 : index
    %3 = vector.load %arg5[%c0_1, %c0_2, %c0_3] : memref<3x1x512xf32, #tpu.memory_space<vmem>>, vector<1x1x512xf32>
    %4 = vector.shape_cast %3 : vector<1x1x512xf32> to vector<1x512xf32>
    %5 = vector.shape_cast %4 : vector<1x512xf32> to vector<1x512xf32>
    %6 = vector.broadcast %5 : vector<1x512xf32> to vector<2x512xf32>
    %c1 = arith.constant 1 : index
    %c0_4 = arith.constant 0 : index
    %c0_5 = arith.constant 0 : index
    %7 = vector.load %arg5[%c1, %c0_4, %c0_5] : memref<3x1x512xf32, #tpu.memory_space<vmem>>, vector<1x1x512xf32>
    %8 = vector.shape_cast %7 : vector<1x1x512xf32> to vector<1x512xf32>
    %9 = vector.shape_cast %8 : vector<1x512xf32> to vector<1x512xf32>
    %10 = vector.broadcast %9 : vector<1x512xf32> to vector<2x512xf32>
    %c2 = arith.constant 2 : index
    %c0_6 = arith.constant 0 : index
    %c0_7 = arith.constant 0 : index
    %11 = vector.load %arg5[%c2, %c0_6, %c0_7] : memref<3x1x512xf32, #tpu.memory_space<vmem>>, vector<1x1x512xf32>
    %12 = vector.shape_cast %11 : vector<1x1x512xf32> to vector<1x512xf32>
    %13 = vector.shape_cast %12 : vector<1x512xf32> to vector<1x512xf32>
    %14 = vector.broadcast %13 : vector<1x512xf32> to vector<2x512xf32>
    %cst = arith.constant 0.000000e+00 : f32
    %15 = vector.broadcast %cst : f32 to vector<2x128xf32>
    %c0_i32 = arith.constant 0 : i32
    %16 = arith.index_cast %c0_i32 : i32 to index
    %c0_8 = arith.constant 0 : index
    %c0_9 = arith.constant 0 : index
    %17 = vector.load %arg1[%16, %c0_8, %c0_9] : memref<8x2x1xf32, #tpu.memory_space<vmem>>, vector<1x2x1xf32>
    %18 = vector.shape_cast %17 : vector<1x2x1xf32> to vector<2x1xf32>
    %19 = vector.broadcast %18 : vector<2x1xf32> to vector<2x512xf32>
    %20 = arith.mulf %19, %2 : vector<2x512xf32>
    %c0_10 = arith.constant 0 : index
    %c0_11 = arith.constant 0 : index
    %21 = vector.load %arg3[%c0_10, %c0_11] : memref<128x512xf32, #tpu.memory_space<vmem>>, vector<128x512xf32>
    %cst_12 = arith.constant dense<0.000000e+00> : vector<2x512xf32>
    %22 = tpu.matmul %15, %21, %cst_12 {dimension_numbers = #tpu.dot_dimension_numbers<[1], [0], [0], [1], [0, 0, 1, 1], [], []>} : vector<2x128xf32>, vector<128x512xf32>, vector<2x512xf32> -> vector<2x512xf32>
    %23 = arith.addf %20, %22 : vector<2x512xf32>
    %24 = arith.addf %23, %6 : vector<2x512xf32>
    %25 = vector.extract_strided_slice %24 {offsets = [0, 0], sizes = [2, 256], strides = [1, 1]} : vector<2x512xf32> to vector<2x256xf32>
    %26 = arith.negf %25 : vector<2x256xf32>
    %27 = math.exp %26 : vector<2x256xf32>
    %cst_13 = arith.constant 1.000000e+00 : f32
    %28 = vector.broadcast %cst_13 : f32 to vector<2x256xf32>
    %29 = arith.addf %28, %27 : vector<2x256xf32>
    %30 = arith.divf %28, %29 : vector<2x256xf32>
    %31 = vector.extract_strided_slice %30 {offsets = [0, 0], sizes = [2, 128], strides = [1, 1]} : vector<2x256xf32> to vector<2x128xf32>
    %32 = vector.extract_strided_slice %30 {offsets = [0, 128], sizes = [2, 128], strides = [1, 1]} : vector<2x256xf32> to vector<2x128xf32>
    %33 = vector.extract_strided_slice %24 {offsets = [0, 256], sizes = [2, 128], strides = [1, 1]} : vector<2x512xf32> to vector<2x128xf32>
    %34 = math.tanh %33 : vector<2x128xf32>
    %35 = vector.extract_strided_slice %24 {offsets = [0, 384], sizes = [2, 128], strides = [1, 1]} : vector<2x512xf32> to vector<2x128xf32>
    %36 = arith.negf %35 : vector<2x128xf32>
    %37 = math.exp %36 : vector<2x128xf32>
    %cst_14 = arith.constant 1.000000e+00 : f32
    %38 = vector.broadcast %cst_14 : f32 to vector<2x128xf32>
    %39 = arith.addf %38, %37 : vector<2x128xf32>
    %40 = arith.divf %38, %39 : vector<2x128xf32>
    %41 = arith.mulf %32, %15 : vector<2x128xf32>
    %42 = arith.mulf %31, %34 : vector<2x128xf32>
    %43 = arith.addf %41, %42 : vector<2x128xf32>
    %44 = math.tanh %43 : vector<2x128xf32>
    %45 = arith.mulf %40, %44 : vector<2x128xf32>
    %46 = tpu.concatenate %45, %15 in 1 : vector<2x128xf32>, vector<2x128xf32> -> vector<2x256xf32>
    %c0_15 = arith.constant 0 : index
    %c0_16 = arith.constant 0 : index
    %c0_17 = arith.constant 0 : index
    %47 = vector.load %arg4[%c0_15, %c0_16, %c0_17] : memref<2x256x512xf32, #tpu.memory_space<vmem>>, vector<1x256x512xf32>
    %48 = vector.shape_cast %47 : vector<1x256x512xf32> to vector<256x512xf32>
    %cst_18 = arith.constant dense<0.000000e+00> : vector<2x512xf32>
    %49 = tpu.matmul %46, %48, %cst_18 {dimension_numbers = #tpu.dot_dimension_numbers<[1], [0], [0], [1], [0, 0, 1, 1], [], []>} : vector<2x256xf32>, vector<256x512xf32>, vector<2x512xf32> -> vector<2x512xf32>
    %50 = arith.addf %49, %10 : vector<2x512xf32>
    %51 = vector.extract_strided_slice %50 {offsets = [0, 0], sizes = [2, 256], strides = [1, 1]} : vector<2x512xf32> to vector<2x256xf32>
    %52 = arith.negf %51 : vector<2x256xf32>
    %53 = math.exp %52 : vector<2x256xf32>
    %cst_19 = arith.constant 1.000000e+00 : f32
    %54 = vector.broadcast %cst_19 : f32 to vector<2x256xf32>
    %55 = arith.addf %54, %53 : vector<2x256xf32>
    %56 = arith.divf %54, %55 : vector<2x256xf32>
    %57 = vector.extract_strided_slice %56 {offsets = [0, 0], sizes = [2, 128], strides = [1, 1]} : vector<2x256xf32> to vector<2x128xf32>
    %58 = vector.extract_strided_slice %56 {offsets = [0, 128], sizes = [2, 128], strides = [1, 1]} : vector<2x256xf32> to vector<2x128xf32>
    %59 = vector.extract_strided_slice %50 {offsets = [0, 256], sizes = [2, 128], strides = [1, 1]} : vector<2x512xf32> to vector<2x128xf32>
    %60 = math.tanh %59 : vector<2x128xf32>
    %61 = vector.extract_strided_slice %50 {offsets = [0, 384], sizes = [2, 128], strides = [1, 1]} : vector<2x512xf32> to vector<2x128xf32>
    %62 = arith.negf %61 : vector<2x128xf32>
    %63 = math.exp %62 : vector<2x128xf32>
    %cst_20 = arith.constant 1.000000e+00 : f32
    %64 = vector.broadcast %cst_20 : f32 to vector<2x128xf32>
    %65 = arith.addf %64, %63 : vector<2x128xf32>
    %66 = arith.divf %64, %65 : vector<2x128xf32>
    %67 = arith.mulf %58, %15 : vector<2x128xf32>
    %68 = arith.mulf %57, %60 : vector<2x128xf32>
    %69 = arith.addf %67, %68 : vector<2x128xf32>
    %70 = math.tanh %69 : vector<2x128xf32>
    %71 = arith.mulf %66, %70 : vector<2x128xf32>
    %72 = tpu.concatenate %71, %15 in 1 : vector<2x128xf32>, vector<2x128xf32> -> vector<2x256xf32>
    %c1_21 = arith.constant 1 : index
    %c0_22 = arith.constant 0 : index
    %c0_23 = arith.constant 0 : index
    %73 = vector.load %arg4[%c1_21, %c0_22, %c0_23] : memref<2x256x512xf32, #tpu.memory_space<vmem>>, vector<1x256x512xf32>
    %74 = vector.shape_cast %73 : vector<1x256x512xf32> to vector<256x512xf32>
    %cst_24 = arith.constant dense<0.000000e+00> : vector<2x512xf32>
    %75 = tpu.matmul %72, %74, %cst_24 {dimension_numbers = #tpu.dot_dimension_numbers<[1], [0], [0], [1], [0, 0, 1, 1], [], []>} : vector<2x256xf32>, vector<256x512xf32>, vector<2x512xf32> -> vector<2x512xf32>
    %76 = arith.addf %75, %14 : vector<2x512xf32>
    %77 = vector.extract_strided_slice %76 {offsets = [0, 0], sizes = [2, 256], strides = [1, 1]} : vector<2x512xf32> to vector<2x256xf32>
    %78 = arith.negf %77 : vector<2x256xf32>
    %79 = math.exp %78 : vector<2x256xf32>
    %cst_25 = arith.constant 1.000000e+00 : f32
    %80 = vector.broadcast %cst_25 : f32 to vector<2x256xf32>
    %81 = arith.addf %80, %79 : vector<2x256xf32>
    %82 = arith.divf %80, %81 : vector<2x256xf32>
    %83 = vector.extract_strided_slice %82 {offsets = [0, 0], sizes = [2, 128], strides = [1, 1]} : vector<2x256xf32> to vector<2x128xf32>
    %84 = vector.extract_strided_slice %82 {offsets = [0, 128], sizes = [2, 128], strides = [1, 1]} : vector<2x256xf32> to vector<2x128xf32>
    %85 = vector.extract_strided_slice %76 {offsets = [0, 256], sizes = [2, 128], strides = [1, 1]} : vector<2x512xf32> to vector<2x128xf32>
    %86 = math.tanh %85 : vector<2x128xf32>
    %87 = vector.extract_strided_slice %76 {offsets = [0, 384], sizes = [2, 128], strides = [1, 1]} : vector<2x512xf32> to vector<2x128xf32>
    %88 = arith.negf %87 : vector<2x128xf32>
    %89 = math.exp %88 : vector<2x128xf32>
    %cst_26 = arith.constant 1.000000e+00 : f32
    %90 = vector.broadcast %cst_26 : f32 to vector<2x128xf32>
    %91 = arith.addf %90, %89 : vector<2x128xf32>
    %92 = arith.divf %90, %91 : vector<2x128xf32>
    %93 = arith.mulf %84, %15 : vector<2x128xf32>
    %94 = arith.mulf %83, %86 : vector<2x128xf32>
    %95 = arith.addf %93, %94 : vector<2x128xf32>
    %96 = math.tanh %95 : vector<2x128xf32>
    %97 = arith.mulf %92, %96 : vector<2x128xf32>
    %c1_i32 = arith.constant 1 : i32
    %98 = arith.index_cast %c1_i32 : i32 to index
    %c0_27 = arith.constant 0 : index
    %c0_28 = arith.constant 0 : index
    %99 = vector.load %arg1[%98, %c0_27, %c0_28] : memref<8x2x1xf32, #tpu.memory_space<vmem>>, vector<1x2x1xf32>
    %100 = vector.shape_cast %99 : vector<1x2x1xf32> to vector<2x1xf32>
    %101 = vector.broadcast %100 : vector<2x1xf32> to vector<2x512xf32>
    %102 = arith.mulf %101, %2 : vector<2x512xf32>
    %c0_29 = arith.constant 0 : index
    %c0_30 = arith.constant 0 : index
    %103 = vector.load %arg3[%c0_29, %c0_30] : memref<128x512xf32, #tpu.memory_space<vmem>>, vector<128x512xf32>
    %cst_31 = arith.constant dense<0.000000e+00> : vector<2x512xf32>
    %104 = tpu.matmul %45, %103, %cst_31 {dimension_numbers = #tpu.dot_dimension_numbers<[1], [0], [0], [1], [0, 0, 1, 1], [], []>} : vector<2x128xf32>, vector<128x512xf32>, vector<2x512xf32> -> vector<2x512xf32>
    %105 = arith.addf %102, %104 : vector<2x512xf32>
    %106 = arith.addf %105, %6 : vector<2x512xf32>
    %107 = vector.extract_strided_slice %106 {offsets = [0, 0], sizes = [2, 256], strides = [1, 1]} : vector<2x512xf32> to vector<2x256xf32>
    %108 = arith.negf %107 : vector<2x256xf32>
    %109 = math.exp %108 : vector<2x256xf32>
    %cst_32 = arith.constant 1.000000e+00 : f32
    %110 = vector.broadcast %cst_32 : f32 to vector<2x256xf32>
    %111 = arith.addf %110, %109 : vector<2x256xf32>
    %112 = arith.divf %110, %111 : vector<2x256xf32>
    %113 = vector.extract_strided_slice %112 {offsets = [0, 0], sizes = [2, 128], strides = [1, 1]} : vector<2x256xf32> to vector<2x128xf32>
    %114 = vector.extract_strided_slice %112 {offsets = [0, 128], sizes = [2, 128], strides = [1, 1]} : vector<2x256xf32> to vector<2x128xf32>
    %115 = vector.extract_strided_slice %106 {offsets = [0, 256], sizes = [2, 128], strides = [1, 1]} : vector<2x512xf32> to vector<2x128xf32>
    %116 = math.tanh %115 : vector<2x128xf32>
    %117 = vector.extract_strided_slice %106 {offsets = [0, 384], sizes = [2, 128], strides = [1, 1]} : vector<2x512xf32> to vector<2x128xf32>
    %118 = arith.negf %117 : vector<2x128xf32>
    %119 = math.exp %118 : vector<2x128xf32>
    %cst_33 = arith.constant 1.000000e+00 : f32
    %120 = vector.broadcast %cst_33 : f32 to vector<2x128xf32>
    %121 = arith.addf %120, %119 : vector<2x128xf32>
    %122 = arith.divf %120, %121 : vector<2x128xf32>
    %123 = arith.mulf %114, %43 : vector<2x128xf32>
    %124 = arith.mulf %113, %116 : vector<2x128xf32>
    %125 = arith.addf %123, %124 : vector<2x128xf32>
    %126 = math.tanh %125 : vector<2x128xf32>
    %127 = arith.mulf %122, %126 : vector<2x128xf32>
    %128 = tpu.concatenate %127, %71 in 1 : vector<2x128xf32>, vector<2x128xf32> -> vector<2x256xf32>
    %c0_34 = arith.constant 0 : index
    %c0_35 = arith.constant 0 : index
    %c0_36 = arith.constant 0 : index
    %129 = vector.load %arg4[%c0_34, %c0_35, %c0_36] : memref<2x256x512xf32, #tpu.memory_space<vmem>>, vector<1x256x512xf32>
    %130 = vector.shape_cast %129 : vector<1x256x512xf32> to vector<256x512xf32>
    %cst_37 = arith.constant dense<0.000000e+00> : vector<2x512xf32>
    %131 = tpu.matmul %128, %130, %cst_37 {dimension_numbers = #tpu.dot_dimension_numbers<[1], [0], [0], [1], [0, 0, 1, 1], [], []>} : vector<2x256xf32>, vector<256x512xf32>, vector<2x512xf32> -> vector<2x512xf32>
    %132 = arith.addf %131, %10 : vector<2x512xf32>
    %133 = vector.extract_strided_slice %132 {offsets = [0, 0], sizes = [2, 256], strides = [1, 1]} : vector<2x512xf32> to vector<2x256xf32>
    %134 = arith.negf %133 : vector<2x256xf32>
    %135 = math.exp %134 : vector<2x256xf32>
    %cst_38 = arith.constant 1.000000e+00 : f32
    %136 = vector.broadcast %cst_38 : f32 to vector<2x256xf32>
    %137 = arith.addf %136, %135 : vector<2x256xf32>
    %138 = arith.divf %136, %137 : vector<2x256xf32>
    %139 = vector.extract_strided_slice %138 {offsets = [0, 0], sizes = [2, 128], strides = [1, 1]} : vector<2x256xf32> to vector<2x128xf32>
    %140 = vector.extract_strided_slice %138 {offsets = [0, 128], sizes = [2, 128], strides = [1, 1]} : vector<2x256xf32> to vector<2x128xf32>
    %141 = vector.extract_strided_slice %132 {offsets = [0, 256], sizes = [2, 128], strides = [1, 1]} : vector<2x512xf32> to vector<2x128xf32>
    %142 = math.tanh %141 : vector<2x128xf32>
    %143 = vector.extract_strided_slice %132 {offsets = [0, 384], sizes = [2, 128], strides = [1, 1]} : vector<2x512xf32> to vector<2x128xf32>
    %144 = arith.negf %143 : vector<2x128xf32>
    %145 = math.exp %144 : vector<2x128xf32>
    %cst_39 = arith.constant 1.000000e+00 : f32
    %146 = vector.broadcast %cst_39 : f32 to vector<2x128xf32>
    %147 = arith.addf %146, %145 : vector<2x128xf32>
    %148 = arith.divf %146, %147 : vector<2x128xf32>
    %149 = arith.mulf %140, %69 : vector<2x128xf32>
    %150 = arith.mulf %139, %142 : vector<2x128xf32>
    %151 = arith.addf %149, %150 : vector<2x128xf32>
    %152 = math.tanh %151 : vector<2x128xf32>
    %153 = arith.mulf %148, %152 : vector<2x128xf32>
    %154 = tpu.concatenate %153, %97 in 1 : vector<2x128xf32>, vector<2x128xf32> -> vector<2x256xf32>
    %c1_40 = arith.constant 1 : index
    %c0_41 = arith.constant 0 : index
    %c0_42 = arith.constant 0 : index
    %155 = vector.load %arg4[%c1_40, %c0_41, %c0_42] : memref<2x256x512xf32, #tpu.memory_space<vmem>>, vector<1x256x512xf32>
    %156 = vector.shape_cast %155 : vector<1x256x512xf32> to vector<256x512xf32>
    %cst_43 = arith.constant dense<0.000000e+00> : vector<2x512xf32>
    %157 = tpu.matmul %154, %156, %cst_43 {dimension_numbers = #tpu.dot_dimension_numbers<[1], [0], [0], [1], [0, 0, 1, 1], [], []>} : vector<2x256xf32>, vector<256x512xf32>, vector<2x512xf32> -> vector<2x512xf32>
    %158 = arith.addf %157, %14 : vector<2x512xf32>
    %159 = vector.extract_strided_slice %158 {offsets = [0, 0], sizes = [2, 256], strides = [1, 1]} : vector<2x512xf32> to vector<2x256xf32>
    %160 = arith.negf %159 : vector<2x256xf32>
    %161 = math.exp %160 : vector<2x256xf32>
    %cst_44 = arith.constant 1.000000e+00 : f32
    %162 = vector.broadcast %cst_44 : f32 to vector<2x256xf32>
    %163 = arith.addf %162, %161 : vector<2x256xf32>
    %164 = arith.divf %162, %163 : vector<2x256xf32>
    %165 = vector.extract_strided_slice %164 {offsets = [0, 0], sizes = [2, 128], strides = [1, 1]} : vector<2x256xf32> to vector<2x128xf32>
    %166 = vector.extract_strided_slice %164 {offsets = [0, 128], sizes = [2, 128], strides = [1, 1]} : vector<2x256xf32> to vector<2x128xf32>
    %167 = vector.extract_strided_slice %158 {offsets = [0, 256], sizes = [2, 128], strides = [1, 1]} : vector<2x512xf32> to vector<2x128xf32>
    %168 = math.tanh %167 : vector<2x128xf32>
    %169 = vector.extract_strided_slice %158 {offsets = [0, 384], sizes = [2, 128], strides = [1, 1]} : vector<2x512xf32> to vector<2x128xf32>
    %170 = arith.negf %169 : vector<2x128xf32>
    %171 = math.exp %170 : vector<2x128xf32>
    %cst_45 = arith.constant 1.000000e+00 : f32
    %172 = vector.broadcast %cst_45 : f32 to vector<2x128xf32>
    %173 = arith.addf %172, %171 : vector<2x128xf32>
    %174 = arith.divf %172, %173 : vector<2x128xf32>
    %175 = arith.mulf %166, %95 : vector<2x128xf32>
    %176 = arith.mulf %165, %168 : vector<2x128xf32>
    %177 = arith.addf %175, %176 : vector<2x128xf32>
    %178 = math.tanh %177 : vector<2x128xf32>
    %179 = arith.mulf %174, %178 : vector<2x128xf32>
    %c2_i32 = arith.constant 2 : i32
    %180 = arith.index_cast %c2_i32 : i32 to index
    %c0_46 = arith.constant 0 : index
    %c0_47 = arith.constant 0 : index
    %181 = vector.load %arg1[%180, %c0_46, %c0_47] : memref<8x2x1xf32, #tpu.memory_space<vmem>>, vector<1x2x1xf32>
    %182 = vector.shape_cast %181 : vector<1x2x1xf32> to vector<2x1xf32>
    %183 = vector.broadcast %182 : vector<2x1xf32> to vector<2x512xf32>
    %184 = arith.mulf %183, %2 : vector<2x512xf32>
    %c0_48 = arith.constant 0 : index
    %c0_49 = arith.constant 0 : index
    %185 = vector.load %arg3[%c0_48, %c0_49] : memref<128x512xf32, #tpu.memory_space<vmem>>, vector<128x512xf32>
    %cst_50 = arith.constant dense<0.000000e+00> : vector<2x512xf32>
    %186 = tpu.matmul %127, %185, %cst_50 {dimension_numbers = #tpu.dot_dimension_numbers<[1], [0], [0], [1], [0, 0, 1, 1], [], []>} : vector<2x128xf32>, vector<128x512xf32>, vector<2x512xf32> -> vector<2x512xf32>
    %187 = arith.addf %184, %186 : vector<2x512xf32>
    %188 = arith.addf %187, %6 : vector<2x512xf32>
    %189 = vector.extract_strided_slice %188 {offsets = [0, 0], sizes = [2, 256], strides = [1, 1]} : vector<2x512xf32> to vector<2x256xf32>
    %190 = arith.negf %189 : vector<2x256xf32>
    %191 = math.exp %190 : vector<2x256xf32>
    %cst_51 = arith.constant 1.000000e+00 : f32
    %192 = vector.broadcast %cst_51 : f32 to vector<2x256xf32>
    %193 = arith.addf %192, %191 : vector<2x256xf32>
    %194 = arith.divf %192, %193 : vector<2x256xf32>
    %195 = vector.extract_strided_slice %194 {offsets = [0, 0], sizes = [2, 128], strides = [1, 1]} : vector<2x256xf32> to vector<2x128xf32>
    %196 = vector.extract_strided_slice %194 {offsets = [0, 128], sizes = [2, 128], strides = [1, 1]} : vector<2x256xf32> to vector<2x128xf32>
    %197 = vector.extract_strided_slice %188 {offsets = [0, 256], sizes = [2, 128], strides = [1, 1]} : vector<2x512xf32> to vector<2x128xf32>
    %198 = math.tanh %197 : vector<2x128xf32>
    %199 = vector.extract_strided_slice %188 {offsets = [0, 384], sizes = [2, 128], strides = [1, 1]} : vector<2x512xf32> to vector<2x128xf32>
    %200 = arith.negf %199 : vector<2x128xf32>
    %201 = math.exp %200 : vector<2x128xf32>
    %cst_52 = arith.constant 1.000000e+00 : f32
    %202 = vector.broadcast %cst_52 : f32 to vector<2x128xf32>
    %203 = arith.addf %202, %201 : vector<2x128xf32>
    %204 = arith.divf %202, %203 : vector<2x128xf32>
    %205 = arith.mulf %196, %125 : vector<2x128xf32>
    %206 = arith.mulf %195, %198 : vector<2x128xf32>
    %207 = arith.addf %205, %206 : vector<2x128xf32>
    %208 = math.tanh %207 : vector<2x128xf32>
    %209 = arith.mulf %204, %208 : vector<2x128xf32>
    %210 = tpu.concatenate %209, %153 in 1 : vector<2x128xf32>, vector<2x128xf32> -> vector<2x256xf32>
    %c0_53 = arith.constant 0 : index
    %c0_54 = arith.constant 0 : index
    %c0_55 = arith.constant 0 : index
    %211 = vector.load %arg4[%c0_53, %c0_54, %c0_55] : memref<2x256x512xf32, #tpu.memory_space<vmem>>, vector<1x256x512xf32>
    %212 = vector.shape_cast %211 : vector<1x256x512xf32> to vector<256x512xf32>
    %cst_56 = arith.constant dense<0.000000e+00> : vector<2x512xf32>
    %213 = tpu.matmul %210, %212, %cst_56 {dimension_numbers = #tpu.dot_dimension_numbers<[1], [0], [0], [1], [0, 0, 1, 1], [], []>} : vector<2x256xf32>, vector<256x512xf32>, vector<2x512xf32> -> vector<2x512xf32>
    %214 = arith.addf %213, %10 : vector<2x512xf32>
    %215 = vector.extract_strided_slice %214 {offsets = [0, 0], sizes = [2, 256], strides = [1, 1]} : vector<2x512xf32> to vector<2x256xf32>
    %216 = arith.negf %215 : vector<2x256xf32>
    %217 = math.exp %216 : vector<2x256xf32>
    %cst_57 = arith.constant 1.000000e+00 : f32
    %218 = vector.broadcast %cst_57 : f32 to vector<2x256xf32>
    %219 = arith.addf %218, %217 : vector<2x256xf32>
    %220 = arith.divf %218, %219 : vector<2x256xf32>
    %221 = vector.extract_strided_slice %220 {offsets = [0, 0], sizes = [2, 128], strides = [1, 1]} : vector<2x256xf32> to vector<2x128xf32>
    %222 = vector.extract_strided_slice %220 {offsets = [0, 128], sizes = [2, 128], strides = [1, 1]} : vector<2x256xf32> to vector<2x128xf32>
    %223 = vector.extract_strided_slice %214 {offsets = [0, 256], sizes = [2, 128], strides = [1, 1]} : vector<2x512xf32> to vector<2x128xf32>
    %224 = math.tanh %223 : vector<2x128xf32>
    %225 = vector.extract_strided_slice %214 {offsets = [0, 384], sizes = [2, 128], strides = [1, 1]} : vector<2x512xf32> to vector<2x128xf32>
    %226 = arith.negf %225 : vector<2x128xf32>
    %227 = math.exp %226 : vector<2x128xf32>
    %cst_58 = arith.constant 1.000000e+00 : f32
    %228 = vector.broadcast %cst_58 : f32 to vector<2x128xf32>
    %229 = arith.addf %228, %227 : vector<2x128xf32>
    %230 = arith.divf %228, %229 : vector<2x128xf32>
    %231 = arith.mulf %222, %151 : vector<2x128xf32>
    %232 = arith.mulf %221, %224 : vector<2x128xf32>
    %233 = arith.addf %231, %232 : vector<2x128xf32>
    %234 = math.tanh %233 : vector<2x128xf32>
    %235 = arith.mulf %230, %234 : vector<2x128xf32>
    %236 = tpu.concatenate %235, %179 in 1 : vector<2x128xf32>, vector<2x128xf32> -> vector<2x256xf32>
    %c1_59 = arith.constant 1 : index
    %c0_60 = arith.constant 0 : index
    %c0_61 = arith.constant 0 : index
    %237 = vector.load %arg4[%c1_59, %c0_60, %c0_61] : memref<2x256x512xf32, #tpu.memory_space<vmem>>, vector<1x256x512xf32>
    %238 = vector.shape_cast %237 : vector<1x256x512xf32> to vector<256x512xf32>
    %cst_62 = arith.constant dense<0.000000e+00> : vector<2x512xf32>
    %239 = tpu.matmul %236, %238, %cst_62 {dimension_numbers = #tpu.dot_dimension_numbers<[1], [0], [0], [1], [0, 0, 1, 1], [], []>} : vector<2x256xf32>, vector<256x512xf32>, vector<2x512xf32> -> vector<2x512xf32>
    %240 = arith.addf %239, %14 : vector<2x512xf32>
    %241 = vector.extract_strided_slice %240 {offsets = [0, 0], sizes = [2, 256], strides = [1, 1]} : vector<2x512xf32> to vector<2x256xf32>
    %242 = arith.negf %241 : vector<2x256xf32>
    %243 = math.exp %242 : vector<2x256xf32>
    %cst_63 = arith.constant 1.000000e+00 : f32
    %244 = vector.broadcast %cst_63 : f32 to vector<2x256xf32>
    %245 = arith.addf %244, %243 : vector<2x256xf32>
    %246 = arith.divf %244, %245 : vector<2x256xf32>
    %247 = vector.extract_strided_slice %246 {offsets = [0, 0], sizes = [2, 128], strides = [1, 1]} : vector<2x256xf32> to vector<2x128xf32>
    %248 = vector.extract_strided_slice %246 {offsets = [0, 128], sizes = [2, 128], strides = [1, 1]} : vector<2x256xf32> to vector<2x128xf32>
    %249 = vector.extract_strided_slice %240 {offsets = [0, 256], sizes = [2, 128], strides = [1, 1]} : vector<2x512xf32> to vector<2x128xf32>
    %250 = math.tanh %249 : vector<2x128xf32>
    %251 = vector.extract_strided_slice %240 {offsets = [0, 384], sizes = [2, 128], strides = [1, 1]} : vector<2x512xf32> to vector<2x128xf32>
    %252 = arith.negf %251 : vector<2x128xf32>
    %253 = math.exp %252 : vector<2x128xf32>
    %cst_64 = arith.constant 1.000000e+00 : f32
    %254 = vector.broadcast %cst_64 : f32 to vector<2x128xf32>
    %255 = arith.addf %254, %253 : vector<2x128xf32>
    %256 = arith.divf %254, %255 : vector<2x128xf32>
    %257 = arith.mulf %248, %177 : vector<2x128xf32>
    %258 = arith.mulf %247, %250 : vector<2x128xf32>
    %259 = arith.addf %257, %258 : vector<2x128xf32>
    %260 = math.tanh %259 : vector<2x128xf32>
    %261 = arith.mulf %256, %260 : vector<2x128xf32>
    %c3_i32 = arith.constant 3 : i32
    %262 = arith.index_cast %c3_i32 : i32 to index
    %c0_65 = arith.constant 0 : index
    %c0_66 = arith.constant 0 : index
    %263 = vector.load %arg1[%262, %c0_65, %c0_66] : memref<8x2x1xf32, #tpu.memory_space<vmem>>, vector<1x2x1xf32>
    %264 = vector.shape_cast %263 : vector<1x2x1xf32> to vector<2x1xf32>
    %265 = vector.broadcast %264 : vector<2x1xf32> to vector<2x512xf32>
    %266 = arith.mulf %265, %2 : vector<2x512xf32>
    %c0_67 = arith.constant 0 : index
    %c0_68 = arith.constant 0 : index
    %267 = vector.load %arg3[%c0_67, %c0_68] : memref<128x512xf32, #tpu.memory_space<vmem>>, vector<128x512xf32>
    %cst_69 = arith.constant dense<0.000000e+00> : vector<2x512xf32>
    %268 = tpu.matmul %209, %267, %cst_69 {dimension_numbers = #tpu.dot_dimension_numbers<[1], [0], [0], [1], [0, 0, 1, 1], [], []>} : vector<2x128xf32>, vector<128x512xf32>, vector<2x512xf32> -> vector<2x512xf32>
    %269 = arith.addf %266, %268 : vector<2x512xf32>
    %270 = arith.addf %269, %6 : vector<2x512xf32>
    %271 = vector.extract_strided_slice %270 {offsets = [0, 0], sizes = [2, 256], strides = [1, 1]} : vector<2x512xf32> to vector<2x256xf32>
    %272 = arith.negf %271 : vector<2x256xf32>
    %273 = math.exp %272 : vector<2x256xf32>
    %cst_70 = arith.constant 1.000000e+00 : f32
    %274 = vector.broadcast %cst_70 : f32 to vector<2x256xf32>
    %275 = arith.addf %274, %273 : vector<2x256xf32>
    %276 = arith.divf %274, %275 : vector<2x256xf32>
    %277 = vector.extract_strided_slice %276 {offsets = [0, 0], sizes = [2, 128], strides = [1, 1]} : vector<2x256xf32> to vector<2x128xf32>
    %278 = vector.extract_strided_slice %276 {offsets = [0, 128], sizes = [2, 128], strides = [1, 1]} : vector<2x256xf32> to vector<2x128xf32>
    %279 = vector.extract_strided_slice %270 {offsets = [0, 256], sizes = [2, 128], strides = [1, 1]} : vector<2x512xf32> to vector<2x128xf32>
    %280 = math.tanh %279 : vector<2x128xf32>
    %281 = vector.extract_strided_slice %270 {offsets = [0, 384], sizes = [2, 128], strides = [1, 1]} : vector<2x512xf32> to vector<2x128xf32>
    %282 = arith.negf %281 : vector<2x128xf32>
    %283 = math.exp %282 : vector<2x128xf32>
    %cst_71 = arith.constant 1.000000e+00 : f32
    %284 = vector.broadcast %cst_71 : f32 to vector<2x128xf32>
    %285 = arith.addf %284, %283 : vector<2x128xf32>
    %286 = arith.divf %284, %285 : vector<2x128xf32>
    %287 = arith.mulf %278, %207 : vector<2x128xf32>
    %288 = arith.mulf %277, %280 : vector<2x128xf32>
    %289 = arith.addf %287, %288 : vector<2x128xf32>
    %290 = math.tanh %289 : vector<2x128xf32>
    %291 = arith.mulf %286, %290 : vector<2x128xf32>
    %292 = tpu.concatenate %291, %235 in 1 : vector<2x128xf32>, vector<2x128xf32> -> vector<2x256xf32>
    %c0_72 = arith.constant 0 : index
    %c0_73 = arith.constant 0 : index
    %c0_74 = arith.constant 0 : index
    %293 = vector.load %arg4[%c0_72, %c0_73, %c0_74] : memref<2x256x512xf32, #tpu.memory_space<vmem>>, vector<1x256x512xf32>
    %294 = vector.shape_cast %293 : vector<1x256x512xf32> to vector<256x512xf32>
    %cst_75 = arith.constant dense<0.000000e+00> : vector<2x512xf32>
    %295 = tpu.matmul %292, %294, %cst_75 {dimension_numbers = #tpu.dot_dimension_numbers<[1], [0], [0], [1], [0, 0, 1, 1], [], []>} : vector<2x256xf32>, vector<256x512xf32>, vector<2x512xf32> -> vector<2x512xf32>
    %296 = arith.addf %295, %10 : vector<2x512xf32>
    %297 = vector.extract_strided_slice %296 {offsets = [0, 0], sizes = [2, 256], strides = [1, 1]} : vector<2x512xf32> to vector<2x256xf32>
    %298 = arith.negf %297 : vector<2x256xf32>
    %299 = math.exp %298 : vector<2x256xf32>
    %cst_76 = arith.constant 1.000000e+00 : f32
    %300 = vector.broadcast %cst_76 : f32 to vector<2x256xf32>
    %301 = arith.addf %300, %299 : vector<2x256xf32>
    %302 = arith.divf %300, %301 : vector<2x256xf32>
    %303 = vector.extract_strided_slice %302 {offsets = [0, 0], sizes = [2, 128], strides = [1, 1]} : vector<2x256xf32> to vector<2x128xf32>
    %304 = vector.extract_strided_slice %302 {offsets = [0, 128], sizes = [2, 128], strides = [1, 1]} : vector<2x256xf32> to vector<2x128xf32>
    %305 = vector.extract_strided_slice %296 {offsets = [0, 256], sizes = [2, 128], strides = [1, 1]} : vector<2x512xf32> to vector<2x128xf32>
    %306 = math.tanh %305 : vector<2x128xf32>
    %307 = vector.extract_strided_slice %296 {offsets = [0, 384], sizes = [2, 128], strides = [1, 1]} : vector<2x512xf32> to vector<2x128xf32>
    %308 = arith.negf %307 : vector<2x128xf32>
    %309 = math.exp %308 : vector<2x128xf32>
    %cst_77 = arith.constant 1.000000e+00 : f32
    %310 = vector.broadcast %cst_77 : f32 to vector<2x128xf32>
    %311 = arith.addf %310, %309 : vector<2x128xf32>
    %312 = arith.divf %310, %311 : vector<2x128xf32>
    %313 = arith.mulf %304, %233 : vector<2x128xf32>
    %314 = arith.mulf %303, %306 : vector<2x128xf32>
    %315 = arith.addf %313, %314 : vector<2x128xf32>
    %316 = math.tanh %315 : vector<2x128xf32>
    %317 = arith.mulf %312, %316 : vector<2x128xf32>
    %318 = tpu.concatenate %317, %261 in 1 : vector<2x128xf32>, vector<2x128xf32> -> vector<2x256xf32>
    %c1_78 = arith.constant 1 : index
    %c0_79 = arith.constant 0 : index
    %c0_80 = arith.constant 0 : index
    %319 = vector.load %arg4[%c1_78, %c0_79, %c0_80] : memref<2x256x512xf32, #tpu.memory_space<vmem>>, vector<1x256x512xf32>
    %320 = vector.shape_cast %319 : vector<1x256x512xf32> to vector<256x512xf32>
    %cst_81 = arith.constant dense<0.000000e+00> : vector<2x512xf32>
    %321 = tpu.matmul %318, %320, %cst_81 {dimension_numbers = #tpu.dot_dimension_numbers<[1], [0], [0], [1], [0, 0, 1, 1], [], []>} : vector<2x256xf32>, vector<256x512xf32>, vector<2x512xf32> -> vector<2x512xf32>
    %322 = arith.addf %321, %14 : vector<2x512xf32>
    %323 = vector.extract_strided_slice %322 {offsets = [0, 0], sizes = [2, 256], strides = [1, 1]} : vector<2x512xf32> to vector<2x256xf32>
    %324 = arith.negf %323 : vector<2x256xf32>
    %325 = math.exp %324 : vector<2x256xf32>
    %cst_82 = arith.constant 1.000000e+00 : f32
    %326 = vector.broadcast %cst_82 : f32 to vector<2x256xf32>
    %327 = arith.addf %326, %325 : vector<2x256xf32>
    %328 = arith.divf %326, %327 : vector<2x256xf32>
    %329 = vector.extract_strided_slice %328 {offsets = [0, 0], sizes = [2, 128], strides = [1, 1]} : vector<2x256xf32> to vector<2x128xf32>
    %330 = vector.extract_strided_slice %328 {offsets = [0, 128], sizes = [2, 128], strides = [1, 1]} : vector<2x256xf32> to vector<2x128xf32>
    %331 = vector.extract_strided_slice %322 {offsets = [0, 256], sizes = [2, 128], strides = [1, 1]} : vector<2x512xf32> to vector<2x128xf32>
    %332 = math.tanh %331 : vector<2x128xf32>
    %333 = vector.extract_strided_slice %322 {offsets = [0, 384], sizes = [2, 128], strides = [1, 1]} : vector<2x512xf32> to vector<2x128xf32>
    %334 = arith.negf %333 : vector<2x128xf32>
    %335 = math.exp %334 : vector<2x128xf32>
    %cst_83 = arith.constant 1.000000e+00 : f32
    %336 = vector.broadcast %cst_83 : f32 to vector<2x128xf32>
    %337 = arith.addf %336, %335 : vector<2x128xf32>
    %338 = arith.divf %336, %337 : vector<2x128xf32>
    %339 = arith.mulf %330, %259 : vector<2x128xf32>
    %340 = arith.mulf %329, %332 : vector<2x128xf32>
    %341 = arith.addf %339, %340 : vector<2x128xf32>
    %342 = math.tanh %341 : vector<2x128xf32>
    %343 = arith.mulf %338, %342 : vector<2x128xf32>
    %c4_i32 = arith.constant 4 : i32
    %344 = arith.index_cast %c4_i32 : i32 to index
    %c0_84 = arith.constant 0 : index
    %c0_85 = arith.constant 0 : index
    %345 = vector.load %arg1[%344, %c0_84, %c0_85] : memref<8x2x1xf32, #tpu.memory_space<vmem>>, vector<1x2x1xf32>
    %346 = vector.shape_cast %345 : vector<1x2x1xf32> to vector<2x1xf32>
    %347 = vector.broadcast %346 : vector<2x1xf32> to vector<2x512xf32>
    %348 = arith.mulf %347, %2 : vector<2x512xf32>
    %c0_86 = arith.constant 0 : index
    %c0_87 = arith.constant 0 : index
    %349 = vector.load %arg3[%c0_86, %c0_87] : memref<128x512xf32, #tpu.memory_space<vmem>>, vector<128x512xf32>
    %cst_88 = arith.constant dense<0.000000e+00> : vector<2x512xf32>
    %350 = tpu.matmul %291, %349, %cst_88 {dimension_numbers = #tpu.dot_dimension_numbers<[1], [0], [0], [1], [0, 0, 1, 1], [], []>} : vector<2x128xf32>, vector<128x512xf32>, vector<2x512xf32> -> vector<2x512xf32>
    %351 = arith.addf %348, %350 : vector<2x512xf32>
    %352 = arith.addf %351, %6 : vector<2x512xf32>
    %353 = vector.extract_strided_slice %352 {offsets = [0, 0], sizes = [2, 256], strides = [1, 1]} : vector<2x512xf32> to vector<2x256xf32>
    %354 = arith.negf %353 : vector<2x256xf32>
    %355 = math.exp %354 : vector<2x256xf32>
    %cst_89 = arith.constant 1.000000e+00 : f32
    %356 = vector.broadcast %cst_89 : f32 to vector<2x256xf32>
    %357 = arith.addf %356, %355 : vector<2x256xf32>
    %358 = arith.divf %356, %357 : vector<2x256xf32>
    %359 = vector.extract_strided_slice %358 {offsets = [0, 0], sizes = [2, 128], strides = [1, 1]} : vector<2x256xf32> to vector<2x128xf32>
    %360 = vector.extract_strided_slice %358 {offsets = [0, 128], sizes = [2, 128], strides = [1, 1]} : vector<2x256xf32> to vector<2x128xf32>
    %361 = vector.extract_strided_slice %352 {offsets = [0, 256], sizes = [2, 128], strides = [1, 1]} : vector<2x512xf32> to vector<2x128xf32>
    %362 = math.tanh %361 : vector<2x128xf32>
    %363 = vector.extract_strided_slice %352 {offsets = [0, 384], sizes = [2, 128], strides = [1, 1]} : vector<2x512xf32> to vector<2x128xf32>
    %364 = arith.negf %363 : vector<2x128xf32>
    %365 = math.exp %364 : vector<2x128xf32>
    %cst_90 = arith.constant 1.000000e+00 : f32
    %366 = vector.broadcast %cst_90 : f32 to vector<2x128xf32>
    %367 = arith.addf %366, %365 : vector<2x128xf32>
    %368 = arith.divf %366, %367 : vector<2x128xf32>
    %369 = arith.mulf %360, %289 : vector<2x128xf32>
    %370 = arith.mulf %359, %362 : vector<2x128xf32>
    %371 = arith.addf %369, %370 : vector<2x128xf32>
    %372 = math.tanh %371 : vector<2x128xf32>
    %373 = arith.mulf %368, %372 : vector<2x128xf32>
    %374 = tpu.concatenate %373, %317 in 1 : vector<2x128xf32>, vector<2x128xf32> -> vector<2x256xf32>
    %c0_91 = arith.constant 0 : index
    %c0_92 = arith.constant 0 : index
    %c0_93 = arith.constant 0 : index
    %375 = vector.load %arg4[%c0_91, %c0_92, %c0_93] : memref<2x256x512xf32, #tpu.memory_space<vmem>>, vector<1x256x512xf32>
    %376 = vector.shape_cast %375 : vector<1x256x512xf32> to vector<256x512xf32>
    %cst_94 = arith.constant dense<0.000000e+00> : vector<2x512xf32>
    %377 = tpu.matmul %374, %376, %cst_94 {dimension_numbers = #tpu.dot_dimension_numbers<[1], [0], [0], [1], [0, 0, 1, 1], [], []>} : vector<2x256xf32>, vector<256x512xf32>, vector<2x512xf32> -> vector<2x512xf32>
    %378 = arith.addf %377, %10 : vector<2x512xf32>
    %379 = vector.extract_strided_slice %378 {offsets = [0, 0], sizes = [2, 256], strides = [1, 1]} : vector<2x512xf32> to vector<2x256xf32>
    %380 = arith.negf %379 : vector<2x256xf32>
    %381 = math.exp %380 : vector<2x256xf32>
    %cst_95 = arith.constant 1.000000e+00 : f32
    %382 = vector.broadcast %cst_95 : f32 to vector<2x256xf32>
    %383 = arith.addf %382, %381 : vector<2x256xf32>
    %384 = arith.divf %382, %383 : vector<2x256xf32>
    %385 = vector.extract_strided_slice %384 {offsets = [0, 0], sizes = [2, 128], strides = [1, 1]} : vector<2x256xf32> to vector<2x128xf32>
    %386 = vector.extract_strided_slice %384 {offsets = [0, 128], sizes = [2, 128], strides = [1, 1]} : vector<2x256xf32> to vector<2x128xf32>
    %387 = vector.extract_strided_slice %378 {offsets = [0, 256], sizes = [2, 128], strides = [1, 1]} : vector<2x512xf32> to vector<2x128xf32>
    %388 = math.tanh %387 : vector<2x128xf32>
    %389 = vector.extract_strided_slice %378 {offsets = [0, 384], sizes = [2, 128], strides = [1, 1]} : vector<2x512xf32> to vector<2x128xf32>
    %390 = arith.negf %389 : vector<2x128xf32>
    %391 = math.exp %390 : vector<2x128xf32>
    %cst_96 = arith.constant 1.000000e+00 : f32
    %392 = vector.broadcast %cst_96 : f32 to vector<2x128xf32>
    %393 = arith.addf %392, %391 : vector<2x128xf32>
    %394 = arith.divf %392, %393 : vector<2x128xf32>
    %395 = arith.mulf %386, %315 : vector<2x128xf32>
    %396 = arith.mulf %385, %388 : vector<2x128xf32>
    %397 = arith.addf %395, %396 : vector<2x128xf32>
    %398 = math.tanh %397 : vector<2x128xf32>
    %399 = arith.mulf %394, %398 : vector<2x128xf32>
    %400 = tpu.concatenate %399, %343 in 1 : vector<2x128xf32>, vector<2x128xf32> -> vector<2x256xf32>
    %c1_97 = arith.constant 1 : index
    %c0_98 = arith.constant 0 : index
    %c0_99 = arith.constant 0 : index
    %401 = vector.load %arg4[%c1_97, %c0_98, %c0_99] : memref<2x256x512xf32, #tpu.memory_space<vmem>>, vector<1x256x512xf32>
    %402 = vector.shape_cast %401 : vector<1x256x512xf32> to vector<256x512xf32>
    %cst_100 = arith.constant dense<0.000000e+00> : vector<2x512xf32>
    %403 = tpu.matmul %400, %402, %cst_100 {dimension_numbers = #tpu.dot_dimension_numbers<[1], [0], [0], [1], [0, 0, 1, 1], [], []>} : vector<2x256xf32>, vector<256x512xf32>, vector<2x512xf32> -> vector<2x512xf32>
    %404 = arith.addf %403, %14 : vector<2x512xf32>
    %405 = vector.extract_strided_slice %404 {offsets = [0, 0], sizes = [2, 256], strides = [1, 1]} : vector<2x512xf32> to vector<2x256xf32>
    %406 = arith.negf %405 : vector<2x256xf32>
    %407 = math.exp %406 : vector<2x256xf32>
    %cst_101 = arith.constant 1.000000e+00 : f32
    %408 = vector.broadcast %cst_101 : f32 to vector<2x256xf32>
    %409 = arith.addf %408, %407 : vector<2x256xf32>
    %410 = arith.divf %408, %409 : vector<2x256xf32>
    %411 = vector.extract_strided_slice %410 {offsets = [0, 0], sizes = [2, 128], strides = [1, 1]} : vector<2x256xf32> to vector<2x128xf32>
    %412 = vector.extract_strided_slice %410 {offsets = [0, 128], sizes = [2, 128], strides = [1, 1]} : vector<2x256xf32> to vector<2x128xf32>
    %413 = vector.extract_strided_slice %404 {offsets = [0, 256], sizes = [2, 128], strides = [1, 1]} : vector<2x512xf32> to vector<2x128xf32>
    %414 = math.tanh %413 : vector<2x128xf32>
    %415 = vector.extract_strided_slice %404 {offsets = [0, 384], sizes = [2, 128], strides = [1, 1]} : vector<2x512xf32> to vector<2x128xf32>
    %416 = arith.negf %415 : vector<2x128xf32>
    %417 = math.exp %416 : vector<2x128xf32>
    %cst_102 = arith.constant 1.000000e+00 : f32
    %418 = vector.broadcast %cst_102 : f32 to vector<2x128xf32>
    %419 = arith.addf %418, %417 : vector<2x128xf32>
    %420 = arith.divf %418, %419 : vector<2x128xf32>
    %421 = arith.mulf %412, %341 : vector<2x128xf32>
    %422 = arith.mulf %411, %414 : vector<2x128xf32>
    %423 = arith.addf %421, %422 : vector<2x128xf32>
    %424 = math.tanh %423 : vector<2x128xf32>
    %425 = arith.mulf %420, %424 : vector<2x128xf32>
    %c5_i32 = arith.constant 5 : i32
    %426 = arith.index_cast %c5_i32 : i32 to index
    %c0_103 = arith.constant 0 : index
    %c0_104 = arith.constant 0 : index
    %427 = vector.load %arg1[%426, %c0_103, %c0_104] : memref<8x2x1xf32, #tpu.memory_space<vmem>>, vector<1x2x1xf32>
    %428 = vector.shape_cast %427 : vector<1x2x1xf32> to vector<2x1xf32>
    %429 = vector.broadcast %428 : vector<2x1xf32> to vector<2x512xf32>
    %430 = arith.mulf %429, %2 : vector<2x512xf32>
    %c0_105 = arith.constant 0 : index
    %c0_106 = arith.constant 0 : index
    %431 = vector.load %arg3[%c0_105, %c0_106] : memref<128x512xf32, #tpu.memory_space<vmem>>, vector<128x512xf32>
    %cst_107 = arith.constant dense<0.000000e+00> : vector<2x512xf32>
    %432 = tpu.matmul %373, %431, %cst_107 {dimension_numbers = #tpu.dot_dimension_numbers<[1], [0], [0], [1], [0, 0, 1, 1], [], []>} : vector<2x128xf32>, vector<128x512xf32>, vector<2x512xf32> -> vector<2x512xf32>
    %433 = arith.addf %430, %432 : vector<2x512xf32>
    %434 = arith.addf %433, %6 : vector<2x512xf32>
    %435 = vector.extract_strided_slice %434 {offsets = [0, 0], sizes = [2, 256], strides = [1, 1]} : vector<2x512xf32> to vector<2x256xf32>
    %436 = arith.negf %435 : vector<2x256xf32>
    %437 = math.exp %436 : vector<2x256xf32>
    %cst_108 = arith.constant 1.000000e+00 : f32
    %438 = vector.broadcast %cst_108 : f32 to vector<2x256xf32>
    %439 = arith.addf %438, %437 : vector<2x256xf32>
    %440 = arith.divf %438, %439 : vector<2x256xf32>
    %441 = vector.extract_strided_slice %440 {offsets = [0, 0], sizes = [2, 128], strides = [1, 1]} : vector<2x256xf32> to vector<2x128xf32>
    %442 = vector.extract_strided_slice %440 {offsets = [0, 128], sizes = [2, 128], strides = [1, 1]} : vector<2x256xf32> to vector<2x128xf32>
    %443 = vector.extract_strided_slice %434 {offsets = [0, 256], sizes = [2, 128], strides = [1, 1]} : vector<2x512xf32> to vector<2x128xf32>
    %444 = math.tanh %443 : vector<2x128xf32>
    %445 = vector.extract_strided_slice %434 {offsets = [0, 384], sizes = [2, 128], strides = [1, 1]} : vector<2x512xf32> to vector<2x128xf32>
    %446 = arith.negf %445 : vector<2x128xf32>
    %447 = math.exp %446 : vector<2x128xf32>
    %cst_109 = arith.constant 1.000000e+00 : f32
    %448 = vector.broadcast %cst_109 : f32 to vector<2x128xf32>
    %449 = arith.addf %448, %447 : vector<2x128xf32>
    %450 = arith.divf %448, %449 : vector<2x128xf32>
    %451 = arith.mulf %442, %371 : vector<2x128xf32>
    %452 = arith.mulf %441, %444 : vector<2x128xf32>
    %453 = arith.addf %451, %452 : vector<2x128xf32>
    %454 = math.tanh %453 : vector<2x128xf32>
    %455 = arith.mulf %450, %454 : vector<2x128xf32>
    %456 = tpu.concatenate %455, %399 in 1 : vector<2x128xf32>, vector<2x128xf32> -> vector<2x256xf32>
    %c0_110 = arith.constant 0 : index
    %c0_111 = arith.constant 0 : index
    %c0_112 = arith.constant 0 : index
    %457 = vector.load %arg4[%c0_110, %c0_111, %c0_112] : memref<2x256x512xf32, #tpu.memory_space<vmem>>, vector<1x256x512xf32>
    %458 = vector.shape_cast %457 : vector<1x256x512xf32> to vector<256x512xf32>
    %cst_113 = arith.constant dense<0.000000e+00> : vector<2x512xf32>
    %459 = tpu.matmul %456, %458, %cst_113 {dimension_numbers = #tpu.dot_dimension_numbers<[1], [0], [0], [1], [0, 0, 1, 1], [], []>} : vector<2x256xf32>, vector<256x512xf32>, vector<2x512xf32> -> vector<2x512xf32>
    %460 = arith.addf %459, %10 : vector<2x512xf32>
    %461 = vector.extract_strided_slice %460 {offsets = [0, 0], sizes = [2, 256], strides = [1, 1]} : vector<2x512xf32> to vector<2x256xf32>
    %462 = arith.negf %461 : vector<2x256xf32>
    %463 = math.exp %462 : vector<2x256xf32>
    %cst_114 = arith.constant 1.000000e+00 : f32
    %464 = vector.broadcast %cst_114 : f32 to vector<2x256xf32>
    %465 = arith.addf %464, %463 : vector<2x256xf32>
    %466 = arith.divf %464, %465 : vector<2x256xf32>
    %467 = vector.extract_strided_slice %466 {offsets = [0, 0], sizes = [2, 128], strides = [1, 1]} : vector<2x256xf32> to vector<2x128xf32>
    %468 = vector.extract_strided_slice %466 {offsets = [0, 128], sizes = [2, 128], strides = [1, 1]} : vector<2x256xf32> to vector<2x128xf32>
    %469 = vector.extract_strided_slice %460 {offsets = [0, 256], sizes = [2, 128], strides = [1, 1]} : vector<2x512xf32> to vector<2x128xf32>
    %470 = math.tanh %469 : vector<2x128xf32>
    %471 = vector.extract_strided_slice %460 {offsets = [0, 384], sizes = [2, 128], strides = [1, 1]} : vector<2x512xf32> to vector<2x128xf32>
    %472 = arith.negf %471 : vector<2x128xf32>
    %473 = math.exp %472 : vector<2x128xf32>
    %cst_115 = arith.constant 1.000000e+00 : f32
    %474 = vector.broadcast %cst_115 : f32 to vector<2x128xf32>
    %475 = arith.addf %474, %473 : vector<2x128xf32>
    %476 = arith.divf %474, %475 : vector<2x128xf32>
    %477 = arith.mulf %468, %397 : vector<2x128xf32>
    %478 = arith.mulf %467, %470 : vector<2x128xf32>
    %479 = arith.addf %477, %478 : vector<2x128xf32>
    %480 = math.tanh %479 : vector<2x128xf32>
    %481 = arith.mulf %476, %480 : vector<2x128xf32>
    %482 = tpu.concatenate %481, %425 in 1 : vector<2x128xf32>, vector<2x128xf32> -> vector<2x256xf32>
    %c1_116 = arith.constant 1 : index
    %c0_117 = arith.constant 0 : index
    %c0_118 = arith.constant 0 : index
    %483 = vector.load %arg4[%c1_116, %c0_117, %c0_118] : memref<2x256x512xf32, #tpu.memory_space<vmem>>, vector<1x256x512xf32>
    %484 = vector.shape_cast %483 : vector<1x256x512xf32> to vector<256x512xf32>
    %cst_119 = arith.constant dense<0.000000e+00> : vector<2x512xf32>
    %485 = tpu.matmul %482, %484, %cst_119 {dimension_numbers = #tpu.dot_dimension_numbers<[1], [0], [0], [1], [0, 0, 1, 1], [], []>} : vector<2x256xf32>, vector<256x512xf32>, vector<2x512xf32> -> vector<2x512xf32>
    %486 = arith.addf %485, %14 : vector<2x512xf32>
    %487 = vector.extract_strided_slice %486 {offsets = [0, 0], sizes = [2, 256], strides = [1, 1]} : vector<2x512xf32> to vector<2x256xf32>
    %488 = arith.negf %487 : vector<2x256xf32>
    %489 = math.exp %488 : vector<2x256xf32>
    %cst_120 = arith.constant 1.000000e+00 : f32
    %490 = vector.broadcast %cst_120 : f32 to vector<2x256xf32>
    %491 = arith.addf %490, %489 : vector<2x256xf32>
    %492 = arith.divf %490, %491 : vector<2x256xf32>
    %493 = vector.extract_strided_slice %492 {offsets = [0, 0], sizes = [2, 128], strides = [1, 1]} : vector<2x256xf32> to vector<2x128xf32>
    %494 = vector.extract_strided_slice %492 {offsets = [0, 128], sizes = [2, 128], strides = [1, 1]} : vector<2x256xf32> to vector<2x128xf32>
    %495 = vector.extract_strided_slice %486 {offsets = [0, 256], sizes = [2, 128], strides = [1, 1]} : vector<2x512xf32> to vector<2x128xf32>
    %496 = math.tanh %495 : vector<2x128xf32>
    %497 = vector.extract_strided_slice %486 {offsets = [0, 384], sizes = [2, 128], strides = [1, 1]} : vector<2x512xf32> to vector<2x128xf32>
    %498 = arith.negf %497 : vector<2x128xf32>
    %499 = math.exp %498 : vector<2x128xf32>
    %cst_121 = arith.constant 1.000000e+00 : f32
    %500 = vector.broadcast %cst_121 : f32 to vector<2x128xf32>
    %501 = arith.addf %500, %499 : vector<2x128xf32>
    %502 = arith.divf %500, %501 : vector<2x128xf32>
    %503 = arith.mulf %494, %423 : vector<2x128xf32>
    %504 = arith.mulf %493, %496 : vector<2x128xf32>
    %505 = arith.addf %503, %504 : vector<2x128xf32>
    %506 = math.tanh %505 : vector<2x128xf32>
    %507 = arith.mulf %502, %506 : vector<2x128xf32>
    %c6_i32 = arith.constant 6 : i32
    %508 = arith.index_cast %c6_i32 : i32 to index
    %c0_122 = arith.constant 0 : index
    %c0_123 = arith.constant 0 : index
    %509 = vector.load %arg1[%508, %c0_122, %c0_123] : memref<8x2x1xf32, #tpu.memory_space<vmem>>, vector<1x2x1xf32>
    %510 = vector.shape_cast %509 : vector<1x2x1xf32> to vector<2x1xf32>
    %511 = vector.broadcast %510 : vector<2x1xf32> to vector<2x512xf32>
    %512 = arith.mulf %511, %2 : vector<2x512xf32>
    %c0_124 = arith.constant 0 : index
    %c0_125 = arith.constant 0 : index
    %513 = vector.load %arg3[%c0_124, %c0_125] : memref<128x512xf32, #tpu.memory_space<vmem>>, vector<128x512xf32>
    %cst_126 = arith.constant dense<0.000000e+00> : vector<2x512xf32>
    %514 = tpu.matmul %455, %513, %cst_126 {dimension_numbers = #tpu.dot_dimension_numbers<[1], [0], [0], [1], [0, 0, 1, 1], [], []>} : vector<2x128xf32>, vector<128x512xf32>, vector<2x512xf32> -> vector<2x512xf32>
    %515 = arith.addf %512, %514 : vector<2x512xf32>
    %516 = arith.addf %515, %6 : vector<2x512xf32>
    %517 = vector.extract_strided_slice %516 {offsets = [0, 0], sizes = [2, 256], strides = [1, 1]} : vector<2x512xf32> to vector<2x256xf32>
    %518 = arith.negf %517 : vector<2x256xf32>
    %519 = math.exp %518 : vector<2x256xf32>
    %cst_127 = arith.constant 1.000000e+00 : f32
    %520 = vector.broadcast %cst_127 : f32 to vector<2x256xf32>
    %521 = arith.addf %520, %519 : vector<2x256xf32>
    %522 = arith.divf %520, %521 : vector<2x256xf32>
    %523 = vector.extract_strided_slice %522 {offsets = [0, 0], sizes = [2, 128], strides = [1, 1]} : vector<2x256xf32> to vector<2x128xf32>
    %524 = vector.extract_strided_slice %522 {offsets = [0, 128], sizes = [2, 128], strides = [1, 1]} : vector<2x256xf32> to vector<2x128xf32>
    %525 = vector.extract_strided_slice %516 {offsets = [0, 256], sizes = [2, 128], strides = [1, 1]} : vector<2x512xf32> to vector<2x128xf32>
    %526 = math.tanh %525 : vector<2x128xf32>
    %527 = vector.extract_strided_slice %516 {offsets = [0, 384], sizes = [2, 128], strides = [1, 1]} : vector<2x512xf32> to vector<2x128xf32>
    %528 = arith.negf %527 : vector<2x128xf32>
    %529 = math.exp %528 : vector<2x128xf32>
    %cst_128 = arith.constant 1.000000e+00 : f32
    %530 = vector.broadcast %cst_128 : f32 to vector<2x128xf32>
    %531 = arith.addf %530, %529 : vector<2x128xf32>
    %532 = arith.divf %530, %531 : vector<2x128xf32>
    %533 = arith.mulf %524, %453 : vector<2x128xf32>
    %534 = arith.mulf %523, %526 : vector<2x128xf32>
    %535 = arith.addf %533, %534 : vector<2x128xf32>
    %536 = math.tanh %535 : vector<2x128xf32>
    %537 = arith.mulf %532, %536 : vector<2x128xf32>
    %538 = tpu.concatenate %537, %481 in 1 : vector<2x128xf32>, vector<2x128xf32> -> vector<2x256xf32>
    %c0_129 = arith.constant 0 : index
    %c0_130 = arith.constant 0 : index
    %c0_131 = arith.constant 0 : index
    %539 = vector.load %arg4[%c0_129, %c0_130, %c0_131] : memref<2x256x512xf32, #tpu.memory_space<vmem>>, vector<1x256x512xf32>
    %540 = vector.shape_cast %539 : vector<1x256x512xf32> to vector<256x512xf32>
    %cst_132 = arith.constant dense<0.000000e+00> : vector<2x512xf32>
    %541 = tpu.matmul %538, %540, %cst_132 {dimension_numbers = #tpu.dot_dimension_numbers<[1], [0], [0], [1], [0, 0, 1, 1], [], []>} : vector<2x256xf32>, vector<256x512xf32>, vector<2x512xf32> -> vector<2x512xf32>
    %542 = arith.addf %541, %10 : vector<2x512xf32>
    %543 = vector.extract_strided_slice %542 {offsets = [0, 0], sizes = [2, 256], strides = [1, 1]} : vector<2x512xf32> to vector<2x256xf32>
    %544 = arith.negf %543 : vector<2x256xf32>
    %545 = math.exp %544 : vector<2x256xf32>
    %cst_133 = arith.constant 1.000000e+00 : f32
    %546 = vector.broadcast %cst_133 : f32 to vector<2x256xf32>
    %547 = arith.addf %546, %545 : vector<2x256xf32>
    %548 = arith.divf %546, %547 : vector<2x256xf32>
    %549 = vector.extract_strided_slice %548 {offsets = [0, 0], sizes = [2, 128], strides = [1, 1]} : vector<2x256xf32> to vector<2x128xf32>
    %550 = vector.extract_strided_slice %548 {offsets = [0, 128], sizes = [2, 128], strides = [1, 1]} : vector<2x256xf32> to vector<2x128xf32>
    %551 = vector.extract_strided_slice %542 {offsets = [0, 256], sizes = [2, 128], strides = [1, 1]} : vector<2x512xf32> to vector<2x128xf32>
    %552 = math.tanh %551 : vector<2x128xf32>
    %553 = vector.extract_strided_slice %542 {offsets = [0, 384], sizes = [2, 128], strides = [1, 1]} : vector<2x512xf32> to vector<2x128xf32>
    %554 = arith.negf %553 : vector<2x128xf32>
    %555 = math.exp %554 : vector<2x128xf32>
    %cst_134 = arith.constant 1.000000e+00 : f32
    %556 = vector.broadcast %cst_134 : f32 to vector<2x128xf32>
    %557 = arith.addf %556, %555 : vector<2x128xf32>
    %558 = arith.divf %556, %557 : vector<2x128xf32>
    %559 = arith.mulf %550, %479 : vector<2x128xf32>
    %560 = arith.mulf %549, %552 : vector<2x128xf32>
    %561 = arith.addf %559, %560 : vector<2x128xf32>
    %562 = math.tanh %561 : vector<2x128xf32>
    %563 = arith.mulf %558, %562 : vector<2x128xf32>
    %564 = tpu.concatenate %563, %507 in 1 : vector<2x128xf32>, vector<2x128xf32> -> vector<2x256xf32>
    %c1_135 = arith.constant 1 : index
    %c0_136 = arith.constant 0 : index
    %c0_137 = arith.constant 0 : index
    %565 = vector.load %arg4[%c1_135, %c0_136, %c0_137] : memref<2x256x512xf32, #tpu.memory_space<vmem>>, vector<1x256x512xf32>
    %566 = vector.shape_cast %565 : vector<1x256x512xf32> to vector<256x512xf32>
    %cst_138 = arith.constant dense<0.000000e+00> : vector<2x512xf32>
    %567 = tpu.matmul %564, %566, %cst_138 {dimension_numbers = #tpu.dot_dimension_numbers<[1], [0], [0], [1], [0, 0, 1, 1], [], []>} : vector<2x256xf32>, vector<256x512xf32>, vector<2x512xf32> -> vector<2x512xf32>
    %568 = arith.addf %567, %14 : vector<2x512xf32>
    %569 = vector.extract_strided_slice %568 {offsets = [0, 0], sizes = [2, 256], strides = [1, 1]} : vector<2x512xf32> to vector<2x256xf32>
    %570 = arith.negf %569 : vector<2x256xf32>
    %571 = math.exp %570 : vector<2x256xf32>
    %cst_139 = arith.constant 1.000000e+00 : f32
    %572 = vector.broadcast %cst_139 : f32 to vector<2x256xf32>
    %573 = arith.addf %572, %571 : vector<2x256xf32>
    %574 = arith.divf %572, %573 : vector<2x256xf32>
    %575 = vector.extract_strided_slice %574 {offsets = [0, 0], sizes = [2, 128], strides = [1, 1]} : vector<2x256xf32> to vector<2x128xf32>
    %576 = vector.extract_strided_slice %574 {offsets = [0, 128], sizes = [2, 128], strides = [1, 1]} : vector<2x256xf32> to vector<2x128xf32>
    %577 = vector.extract_strided_slice %568 {offsets = [0, 256], sizes = [2, 128], strides = [1, 1]} : vector<2x512xf32> to vector<2x128xf32>
    %578 = math.tanh %577 : vector<2x128xf32>
    %579 = vector.extract_strided_slice %568 {offsets = [0, 384], sizes = [2, 128], strides = [1, 1]} : vector<2x512xf32> to vector<2x128xf32>
    %580 = arith.negf %579 : vector<2x128xf32>
    %581 = math.exp %580 : vector<2x128xf32>
    %cst_140 = arith.constant 1.000000e+00 : f32
    %582 = vector.broadcast %cst_140 : f32 to vector<2x128xf32>
    %583 = arith.addf %582, %581 : vector<2x128xf32>
    %584 = arith.divf %582, %583 : vector<2x128xf32>
    %585 = arith.mulf %576, %505 : vector<2x128xf32>
    %586 = arith.mulf %575, %578 : vector<2x128xf32>
    %587 = arith.addf %585, %586 : vector<2x128xf32>
    %588 = math.tanh %587 : vector<2x128xf32>
    %589 = arith.mulf %584, %588 : vector<2x128xf32>
    %c7_i32 = arith.constant 7 : i32
    %590 = arith.index_cast %c7_i32 : i32 to index
    %c0_141 = arith.constant 0 : index
    %c0_142 = arith.constant 0 : index
    %591 = vector.load %arg1[%590, %c0_141, %c0_142] : memref<8x2x1xf32, #tpu.memory_space<vmem>>, vector<1x2x1xf32>
    %592 = vector.shape_cast %591 : vector<1x2x1xf32> to vector<2x1xf32>
    %593 = vector.broadcast %592 : vector<2x1xf32> to vector<2x512xf32>
    %594 = arith.mulf %593, %2 : vector<2x512xf32>
    %c0_143 = arith.constant 0 : index
    %c0_144 = arith.constant 0 : index
    %595 = vector.load %arg3[%c0_143, %c0_144] : memref<128x512xf32, #tpu.memory_space<vmem>>, vector<128x512xf32>
    %cst_145 = arith.constant dense<0.000000e+00> : vector<2x512xf32>
    %596 = tpu.matmul %537, %595, %cst_145 {dimension_numbers = #tpu.dot_dimension_numbers<[1], [0], [0], [1], [0, 0, 1, 1], [], []>} : vector<2x128xf32>, vector<128x512xf32>, vector<2x512xf32> -> vector<2x512xf32>
    %597 = arith.addf %594, %596 : vector<2x512xf32>
    %598 = arith.addf %597, %6 : vector<2x512xf32>
    %599 = vector.extract_strided_slice %598 {offsets = [0, 0], sizes = [2, 256], strides = [1, 1]} : vector<2x512xf32> to vector<2x256xf32>
    %600 = arith.negf %599 : vector<2x256xf32>
    %601 = math.exp %600 : vector<2x256xf32>
    %cst_146 = arith.constant 1.000000e+00 : f32
    %602 = vector.broadcast %cst_146 : f32 to vector<2x256xf32>
    %603 = arith.addf %602, %601 : vector<2x256xf32>
    %604 = arith.divf %602, %603 : vector<2x256xf32>
    %605 = vector.extract_strided_slice %604 {offsets = [0, 0], sizes = [2, 128], strides = [1, 1]} : vector<2x256xf32> to vector<2x128xf32>
    %606 = vector.extract_strided_slice %604 {offsets = [0, 128], sizes = [2, 128], strides = [1, 1]} : vector<2x256xf32> to vector<2x128xf32>
    %607 = vector.extract_strided_slice %598 {offsets = [0, 256], sizes = [2, 128], strides = [1, 1]} : vector<2x512xf32> to vector<2x128xf32>
    %608 = math.tanh %607 : vector<2x128xf32>
    %609 = vector.extract_strided_slice %598 {offsets = [0, 384], sizes = [2, 128], strides = [1, 1]} : vector<2x512xf32> to vector<2x128xf32>
    %610 = arith.negf %609 : vector<2x128xf32>
    %611 = math.exp %610 : vector<2x128xf32>
    %cst_147 = arith.constant 1.000000e+00 : f32
    %612 = vector.broadcast %cst_147 : f32 to vector<2x128xf32>
    %613 = arith.addf %612, %611 : vector<2x128xf32>
    %614 = arith.divf %612, %613 : vector<2x128xf32>
    %615 = arith.mulf %606, %535 : vector<2x128xf32>
    %616 = arith.mulf %605, %608 : vector<2x128xf32>
    %617 = arith.addf %615, %616 : vector<2x128xf32>
    %618 = math.tanh %617 : vector<2x128xf32>
    %619 = arith.mulf %614, %618 : vector<2x128xf32>
    %620 = tpu.concatenate %619, %563 in 1 : vector<2x128xf32>, vector<2x128xf32> -> vector<2x256xf32>
    %c0_148 = arith.constant 0 : index
    %c0_149 = arith.constant 0 : index
    %c0_150 = arith.constant 0 : index
    %621 = vector.load %arg4[%c0_148, %c0_149, %c0_150] : memref<2x256x512xf32, #tpu.memory_space<vmem>>, vector<1x256x512xf32>
    %622 = vector.shape_cast %621 : vector<1x256x512xf32> to vector<256x512xf32>
    %cst_151 = arith.constant dense<0.000000e+00> : vector<2x512xf32>
    %623 = tpu.matmul %620, %622, %cst_151 {dimension_numbers = #tpu.dot_dimension_numbers<[1], [0], [0], [1], [0, 0, 1, 1], [], []>} : vector<2x256xf32>, vector<256x512xf32>, vector<2x512xf32> -> vector<2x512xf32>
    %624 = arith.addf %623, %10 : vector<2x512xf32>
    %625 = vector.extract_strided_slice %624 {offsets = [0, 0], sizes = [2, 256], strides = [1, 1]} : vector<2x512xf32> to vector<2x256xf32>
    %626 = arith.negf %625 : vector<2x256xf32>
    %627 = math.exp %626 : vector<2x256xf32>
    %cst_152 = arith.constant 1.000000e+00 : f32
    %628 = vector.broadcast %cst_152 : f32 to vector<2x256xf32>
    %629 = arith.addf %628, %627 : vector<2x256xf32>
    %630 = arith.divf %628, %629 : vector<2x256xf32>
    %631 = vector.extract_strided_slice %630 {offsets = [0, 0], sizes = [2, 128], strides = [1, 1]} : vector<2x256xf32> to vector<2x128xf32>
    %632 = vector.extract_strided_slice %630 {offsets = [0, 128], sizes = [2, 128], strides = [1, 1]} : vector<2x256xf32> to vector<2x128xf32>
    %633 = vector.extract_strided_slice %624 {offsets = [0, 256], sizes = [2, 128], strides = [1, 1]} : vector<2x512xf32> to vector<2x128xf32>
    %634 = math.tanh %633 : vector<2x128xf32>
    %635 = vector.extract_strided_slice %624 {offsets = [0, 384], sizes = [2, 128], strides = [1, 1]} : vector<2x512xf32> to vector<2x128xf32>
    %636 = arith.negf %635 : vector<2x128xf32>
    %637 = math.exp %636 : vector<2x128xf32>
    %cst_153 = arith.constant 1.000000e+00 : f32
    %638 = vector.broadcast %cst_153 : f32 to vector<2x128xf32>
    %639 = arith.addf %638, %637 : vector<2x128xf32>
    %640 = arith.divf %638, %639 : vector<2x128xf32>
    %641 = arith.mulf %632, %561 : vector<2x128xf32>
    %642 = arith.mulf %631, %634 : vector<2x128xf32>
    %643 = arith.addf %641, %642 : vector<2x128xf32>
    %644 = math.tanh %643 : vector<2x128xf32>
    %645 = arith.mulf %640, %644 : vector<2x128xf32>
    %646 = tpu.concatenate %645, %589 in 1 : vector<2x128xf32>, vector<2x128xf32> -> vector<2x256xf32>
    %c1_154 = arith.constant 1 : index
    %c0_155 = arith.constant 0 : index
    %c0_156 = arith.constant 0 : index
    %647 = vector.load %arg4[%c1_154, %c0_155, %c0_156] : memref<2x256x512xf32, #tpu.memory_space<vmem>>, vector<1x256x512xf32>
    %648 = vector.shape_cast %647 : vector<1x256x512xf32> to vector<256x512xf32>
    %cst_157 = arith.constant dense<0.000000e+00> : vector<2x512xf32>
    %649 = tpu.matmul %646, %648, %cst_157 {dimension_numbers = #tpu.dot_dimension_numbers<[1], [0], [0], [1], [0, 0, 1, 1], [], []>} : vector<2x256xf32>, vector<256x512xf32>, vector<2x512xf32> -> vector<2x512xf32>
    %650 = arith.addf %649, %14 : vector<2x512xf32>
    %651 = vector.extract_strided_slice %650 {offsets = [0, 0], sizes = [2, 256], strides = [1, 1]} : vector<2x512xf32> to vector<2x256xf32>
    %652 = arith.negf %651 : vector<2x256xf32>
    %653 = math.exp %652 : vector<2x256xf32>
    %cst_158 = arith.constant 1.000000e+00 : f32
    %654 = vector.broadcast %cst_158 : f32 to vector<2x256xf32>
    %655 = arith.addf %654, %653 : vector<2x256xf32>
    %656 = arith.divf %654, %655 : vector<2x256xf32>
    %657 = vector.extract_strided_slice %656 {offsets = [0, 0], sizes = [2, 128], strides = [1, 1]} : vector<2x256xf32> to vector<2x128xf32>
    %658 = vector.extract_strided_slice %656 {offsets = [0, 128], sizes = [2, 128], strides = [1, 1]} : vector<2x256xf32> to vector<2x128xf32>
    %659 = vector.extract_strided_slice %650 {offsets = [0, 256], sizes = [2, 128], strides = [1, 1]} : vector<2x512xf32> to vector<2x128xf32>
    %660 = math.tanh %659 : vector<2x128xf32>
    %661 = vector.extract_strided_slice %650 {offsets = [0, 384], sizes = [2, 128], strides = [1, 1]} : vector<2x512xf32> to vector<2x128xf32>
    %662 = arith.negf %661 : vector<2x128xf32>
    %663 = math.exp %662 : vector<2x128xf32>
    %cst_159 = arith.constant 1.000000e+00 : f32
    %664 = vector.broadcast %cst_159 : f32 to vector<2x128xf32>
    %665 = arith.addf %664, %663 : vector<2x128xf32>
    %666 = arith.divf %664, %665 : vector<2x128xf32>
    %667 = arith.mulf %658, %587 : vector<2x128xf32>
    %668 = arith.mulf %657, %660 : vector<2x128xf32>
    %669 = arith.addf %667, %668 : vector<2x128xf32>
    %670 = math.tanh %669 : vector<2x128xf32>
    %671 = arith.mulf %666, %670 : vector<2x128xf32>
    %c8_i32 = arith.constant 8 : i32
    %c0_160 = arith.constant 0 : index
    %c0_161 = arith.constant 0 : index
    %672 = vector.load %arg6[%c0_160, %c0_161] : memref<128x1xf32, #tpu.memory_space<vmem>>, vector<128x1xf32>
    %cst_162 = arith.constant dense<0.000000e+00> : vector<2x1xf32>
    %673 = tpu.matmul %671, %672, %cst_162 {dimension_numbers = #tpu.dot_dimension_numbers<[1], [0], [0], [1], [0, 0, 1, 1], [], []>} : vector<2x128xf32>, vector<128x1xf32>, vector<2x1xf32> -> vector<2x1xf32>
    %c0_163 = arith.constant 0 : index
    %c0_164 = arith.constant 0 : index
    %674 = vector.load %arg7[%c0_163, %c0_164] : memref<1x1xf32, #tpu.memory_space<vmem>>, vector<1x1xf32>
    %675 = vector.broadcast %674 : vector<1x1xf32> to vector<2x1xf32>
    %676 = arith.addf %673, %675 : vector<2x1xf32>
    %c0_165 = arith.constant 0 : index
    %c0_166 = arith.constant 0 : index
    %677 = vector.load %arg8[%c0_165, %c0_166] : memref<2x1xf32, #tpu.memory_space<vmem>>, vector<2x1xf32>
    tpu.vector_store %arg8[%c0_165, %c0_166], %676 {strides = array<i32>} : memref<2x1xf32, #tpu.memory_space<vmem>>, vector<2x1xf32>,
    return
  }
  func.func @transform_0(%arg0: i32) -> (i32, i32, i32) {
    %c0_i32 = arith.constant 0 : i32
    %c0_i32_0 = arith.constant 0 : i32
    %c0_i32_1 = arith.constant 0 : i32
    %c0_i32_2 = arith.constant 0 : i32
    return %c0_i32, %c0_i32_0, %c0_i32_1 : i32, i32, i32
  }
  func.func @transform_1(%arg0: i32) -> (i32, i32) {
    %c0_i32 = arith.constant 0 : i32
    %c0_i32_0 = arith.constant 0 : i32
    %c0_i32_1 = arith.constant 0 : i32
    return %c0_i32, %c0_i32_0 : i32, i32
  }
  func.func @transform_2(%arg0: i32) -> (i32, i32) {
    %c0_i32 = arith.constant 0 : i32
    %c0_i32_0 = arith.constant 0 : i32
    %c0_i32_1 = arith.constant 0 : i32
    return %c0_i32, %c0_i32_0 : i32, i32
  }
  func.func @transform_3(%arg0: i32) -> (i32, i32, i32) {
    %c0_i32 = arith.constant 0 : i32
    %c0_i32_0 = arith.constant 0 : i32
    %c0_i32_1 = arith.constant 0 : i32
    %c0_i32_2 = arith.constant 0 : i32
    return %c0_i32, %c0_i32_0, %c0_i32_1 : i32, i32, i32
  }
  func.func @transform_4(%arg0: i32) -> (i32, i32, i32) {
    %c0_i32 = arith.constant 0 : i32
    %c0_i32_0 = arith.constant 0 : i32
    %c0_i32_1 = arith.constant 0 : i32
    %c0_i32_2 = arith.constant 0 : i32
    return %c0_i32, %c0_i32_0, %c0_i32_1 : i32, i32, i32
  }
  func.func @transform_5(%arg0: i32) -> (i32, i32) {
    %c0_i32 = arith.constant 0 : i32
    %c0_i32_0 = arith.constant 0 : i32
    %c0_i32_1 = arith.constant 0 : i32
    return %c0_i32, %c0_i32_0 : i32, i32
  }
  func.func @transform_6(%arg0: i32) -> (i32, i32) {
    %c0_i32 = arith.constant 0 : i32
    %c0_i32_0 = arith.constant 0 : i32
    %c0_i32_1 = arith.constant 0 : i32
    return %c0_i32, %c0_i32_0 : i32, i32
  }
  func.func @transform_7(%arg0: i32) -> (i32, i32) {
    %c0_i32 = arith.constant 0 : i32
    %c0_i32_0 = arith.constant 0 : i32
    %c0_i32_1 = arith.constant 0 : i32
    return %c0_i32, %c0_i32_0 : i32, i32
  }
}

</mosaic_0001>

<bundles_post_ra>
// kernel: tpu_custom_call.1
= control target key start
LH: loop header
LB: loop body
LE: loop exit
PB: predicated region body
PF: predicated region fallthrough
CT: control target
= control target key end

     0   :  { %s9958_s0 = inlined_call_operand.vmem [shape: f32[8,2,1], index: 0, kind: input, shape index: {}]   ;;  %s9959_s1 = inlined_call_operand.vmem [shape: f32[1,512], index: 1, kind: input, shape index: {}]   ;;  %s9960_s2 = inlined_call_operand.hbm [shape: f32[128,512], index: 2, kind: input, shape index: {}]   ;;  %s9961_s3 = inlined_call_operand.hbm [shape: f32[2,256,512], index: 3, kind: input, shape index: {}]   ;;  %s9962_s4 = inlined_call_operand.vmem [shape: f32[3,1,512], index: 4, kind: input, shape index: {}]   ;;  %s9963_s5 = inlined_call_operand.vmem [shape: f32[128,1], index: 5, kind: input, shape index: {}]   ;;  %s9964_s6 = inlined_call_operand.<no memory space> [shape: f32[1,1], index: 6, kind: input, shape index: {}]   ;;  %s9965_s7 = inlined_call_operand.vmem [shape: f32[2,1], index: 7, kind: output, shape index: {}]  }
   0x1   :  { %v12_v0 = vstv %s9964_s6 }
   0x2   :  { %13 = vst [vmem:[#allocation2] sm:$0x1] %v12_v0 }
   0x3   :  { %14 = vsyncpa [#allocation4], 0 }
   0x4   :  { %15 = vsyncpa [#allocation6], 0  ;;  %s7863_s26 = smov [#allocation3]   ;;  %s7815_s30 = scalar_lea.hbm %s9960_s2, 8192 }
   0x5   :  { %s25_s27 = sshll.u32 %s7863_s26, 4  ;;  %p7816_p0 = scmp.ne.s32.totalorder %s9960_s2, %s7815_s30  ;;  %s26_s27 = int_to_ptr.vmem [resolvable:$true] %s25_s27 }
   0x6   :  { %p7819_p1 = scmp.lt.u32.totalorder %s7815_s30, %s9960_s2 }
   0x8   :  { %p7821_p2 = pnand %p7819_p1, %p7816_p0 }
   0xa   :  { %7824 = shalt.err (!%p7821_p2)
}
   0xb   :  { %s7825_s6 = scalar_lea.vmem %s26_s27, 8192  ;;  %p7830_p4 = scmp.lt.s32.totalorder %s26_s27, %s26_s27 }
   0xc   :  { %p7826_p3 = scmp.ne.s32.totalorder %s26_s27, %s7825_s6  ;;  %p7831_p5 = scmp.lt.s32.totalorder %s7825_s6, %s7825_s6 }
   0xe   :  { %p7832_p6 = por %p7831_p5, %p7830_p4 }
  0x10   :  { %p7833_p7 = pnand %p7832_p6, %p7826_p3 }
  0x12   :  { %7836 = shalt.err (!%p7833_p7)
}
  0x13   :  { %s7864_s12 = smov 512   ;;  %s7865_s13 = smov 32  }
  0x14   :  { %31 = dma.hbm_to_vmem [thread:$0]  %s9960_s2, 8192, %s26_s27, [#allocation4], %s7864_s12, %s7864_s12, %s7865_s13  }
  0x15   :  { %s7866_s16 = smov [#allocation5]   ;;  %s7837_s20 = scalar_lea.hbm %s9961_s3, 32768 }
  0x16   :  { %s37_s17 = sshll.u32 %s7866_s16, 4  ;;  %p7838_p8 = scmp.ne.s32.totalorder %s9961_s3, %s7837_s20  ;;  %s38_s17 = int_to_ptr.vmem [resolvable:$true] %s37_s17 }
  0x17   :  { %p7841_p9 = scmp.lt.u32.totalorder %s7837_s20, %s9961_s3 }
  0x19   :  { %p7843_p10 = pnand %p7841_p9, %p7838_p8 }
  0x1b   :  { %7846 = shalt.err (!%p7843_p10)
}
  0x1c   :  { %s7847_s25 = scalar_lea.vmem %s38_s17, 32768  ;;  %p7852_p12 = scmp.lt.s32.totalorder %s38_s17, %s38_s17 }
  0x1d   :  { %p7848_p11 = scmp.ne.s32.totalorder %s38_s17, %s7847_s25  ;;  %p7853_p13 = scmp.lt.s32.totalorder %s7847_s25, %s7847_s25 }
  0x1f   :  { %p7854_p0 = por %p7853_p13, %p7852_p12 }
  0x21   :  { %p7855_p1 = pnand %p7854_p0, %p7848_p11 }
  0x23   :  { %7858 = shalt.err (!%p7855_p1)
}
  0x24   :  { %43 = dma.hbm_to_vmem [thread:$0]  %s9961_s3, 32768, %s38_s17, [#allocation6], %s7864_s12, %s7864_s12, %s7865_s13  }
  0x25   :  { %7859 = dma.done.wait [#allocation4], 8192  }
  0x26   :  { %7860 = vsyncadd [#allocation4], 4294959104 }
  0x27   :  { %7861 = dma.done.wait [#allocation6], 32768  }
  0x28   :  { %7862 = vsyncadd [#allocation6], 4294934528  ;;  %v9966_v1 = vmov 0.0   ;;  %v7868_v2 = vmov 0   ;;  %v157_v3 = vld [vmem:[#allocation3 + $0x8] sm:$0xff]  ;;  %v159_v5 = vld [vmem:[#allocation3 + $0x18] sm:$0xff] }
  0x29   :  { %284 = vmatprep.mubr.f32.mxu0 %v9966_v1  ;;  %355 = vmatprep.mubr.f32.mxu1 %v9966_v1  ;;  %v161_v4 = vld [vmem:[#allocation3 + $0x28] sm:$0xff]  ;;  %v163_v7 = vld [vmem:[#allocation3 + $0x38] sm:$0xff]  ;;  %v156_v8 = vld [vmem:[#allocation3] sm:$0xff]  ;;  %vm7870_vm0 = vmmov 0   ;;  %vm4695_vm1 = vcmask 1024  }
  0x2a   :  { %7429 = vset.pattern.permute.xlu0 %v7868_v2  ;;  %7430 = vset.pattern.permute.xlu1 %v7868_v2  ;;  %v7940_v6 = vpack.c.bf16 %v161_v4, %v157_v3  ;;  %v160_v9 = vld [vmem:[#allocation3 + $0x20] sm:$0xff]  ;;  %v7942_v10 = vpack.c.bf16 %v163_v7, %v159_v5  ;;  %v158_v12 = vld [vmem:[#allocation3 + $0x10] sm:$0xff]  ;;  %v165_v14 = vld [vmem:[#allocation3 + $0x48] sm:$0xff] }
  0x2b   :  { %v7944_v11 = vpack.c.bf16 %v160_v9, %v156_v8  ;;  %v162_v13 = vld [vmem:[#allocation3 + $0x30] sm:$0xff]  ;;  %v169_v16 = vld [vmem:[#allocation3 + $0x68] sm:$0xff]  ;;  %v167_v17 = vld [vmem:[#allocation3 + $0x58] sm:$0xff] }
  0x2c   :  { %10291 = vst [vmem:[#allocation9_spill] sm:$0xff] %v7940_v6  ;;  %10292 = vst [vmem:[#allocation10_spill] sm:$0xff] %v7942_v10  ;;  %4838 = vmatprep.subr.bf16.mxu0 %v7940_v6  ;;  %v7947_v15 = vpack.c.bf16 %v162_v13, %v158_v12  ;;  %v171_v18 = vld [vmem:[#allocation3 + $0x78] sm:$0xff]  ;;  %4870 = vmatprep.subr.bf16.mxu1 %v7942_v10  ;;  %v7951_v19 = vpack.c.bf16 %v169_v16, %v165_v14  ;;  %v164_v21 = vld [vmem:[#allocation3 + $0x40] sm:$0xff] }
  0x2d   :  { %4840 = vmatpush1.bf16.msra.mxu0 %v7944_v11  ;;  %v7953_v20 = vpack.c.bf16 %v171_v18, %v167_v17  ;;  %v168_v22 = vld [vmem:[#allocation3 + $0x60] sm:$0xff]  ;;  %v166_v23 = vld [vmem:[#allocation3 + $0x50] sm:$0xff]  ;;  %v173_v26 = vld [vmem:[#allocation3 + $0x88] sm:$0xff] }
  0x2e   :  { %4872 = vmatpush1.bf16.msra.mxu1 %v7947_v15  ;;  %v7956_v24 = vpack.c.bf16 %v168_v22, %v164_v21  ;;  %v170_v25 = vld [vmem:[#allocation3 + $0x70] sm:$0xff]  ;;  %v177_v27 = vld [vmem:[#allocation3 + $0xa8] sm:$0xff]  ;;  %4842 = vmatprep.subr.bf16.mxu0 %v7951_v19  ;;  %v175_v30 = vld [vmem:[#allocation3 + $0x98] sm:$0xff] }
  0x2f   :  { %4874 = vmatprep.subr.bf16.mxu1 %v7953_v20  ;;  %v7960_v28 = vpack.c.bf16 %v170_v25, %v166_v23  ;;  %v7962_v29 = vpack.c.bf16 %v177_v27, %v173_v26  ;;  %v179_v31 = vld [vmem:[#allocation3 + $0xb8] sm:$0xff]  ;;  %v172_v32 = vld [vmem:[#allocation3 + $0x80] sm:$0xff]  ;;  %v174_v35 = vld [vmem:[#allocation3 + $0x90] sm:$0xff] }
  0x30   :  { %v7964_v33 = vpack.c.bf16 %v179_v31, %v175_v30  ;;  %v176_v34 = vld [vmem:[#allocation3 + $0xa0] sm:$0xff]  ;;  %v178_v36 = vld [vmem:[#allocation3 + $0xb0] sm:$0xff]  ;;  %v181_v38 = vld [vmem:[#allocation3 + $0xc8] sm:$0xff] }
  0x31   :  { %4844 = vmatpush1.bf16.msra.mxu0 %v7956_v24  ;;  %v7967_v37 = vpack.c.bf16 %v176_v34, %v172_v32  ;;  %v185_v39 = vld [vmem:[#allocation3 + $0xe8] sm:$0xff]  ;;  %v183_v40 = vld [vmem:[#allocation3 + $0xd8] sm:$0xff]  ;;  %v7971_v41 = vpack.c.bf16 %v178_v36, %v174_v35  ;;  %v180_v44 = vld [vmem:[#allocation3 + $0xc0] sm:$0xff] }
  0x32   :  { %4876 = vmatpush1.bf16.msra.mxu1 %v7960_v28  ;;  %4846 = vmatprep.subr.bf16.mxu0 %v7962_v29  ;;  %v7973_v42 = vpack.c.bf16 %v185_v39, %v181_v38  ;;  %v187_v43 = vld [vmem:[#allocation3 + $0xf8] sm:$0xff]  ;;  %v184_v45 = vld [vmem:[#allocation3 + $0xe0] sm:$0xff]  ;;  %v182_v47 = vld [vmem:[#allocation3 + $0xd0] sm:$0xff] }
  0x33   :  { %4878 = vmatprep.subr.bf16.mxu1 %v7964_v33  ;;  %v7976_v46 = vpack.c.bf16 %v187_v43, %v183_v40  ;;  %v186_v48 = vld [vmem:[#allocation3 + $0xf0] sm:$0xff]  ;;  %v189_v49 = vld [vmem:[#allocation3 + $0x108] sm:$0xff]  ;;  %v191_v51 = vld [vmem:[#allocation3 + $0x118] sm:$0xff]  ;;  %v7979_v53 = vpack.c.bf16 %v184_v45, %v180_v44 }
  0x34   :  { %v193_v50 = vld [vmem:[#allocation3 + $0x128] sm:$0xff]  ;;  %v195_v52 = vld [vmem:[#allocation3 + $0x138] sm:$0xff]  ;;  %v7983_v54 = vpack.c.bf16 %v186_v48, %v182_v47  ;;  %v188_v56 = vld [vmem:[#allocation3 + $0x100] sm:$0xff] }
  0x35   :  { %10293 = vst [vmem:[#allocation11_spill] sm:$0xff] %v7976_v46  ;;  %4848 = vmatpush1.bf16.msra.mxu0 %v7967_v37  ;;  %10294 = vst [vmem:[#allocation12_spill] sm:$0xff] %v7979_v53  ;;  %v7985_v55 = vpack.c.bf16 %v193_v50, %v189_v49  ;;  %v192_v57 = vld [vmem:[#allocation3 + $0x120] sm:$0xff]  ;;  %v190_v58 = vld [vmem:[#allocation3 + $0x110] sm:$0xff]  ;;  %v7988_v59 = vpack.c.bf16 %v195_v52, %v191_v51 }
  0x36   :  { %4880 = vmatpush1.bf16.msra.mxu1 %v7971_v41  ;;  %4850 = vmatprep.subr.bf16.mxu0 %v7973_v42  ;;  %10295 = vst [vmem:[#allocation13_spill] sm:$0xff] %v7983_v54  ;;  %v194_v60 = vld [vmem:[#allocation3 + $0x130] sm:$0xff]  ;;  %v197_v61 = vld [vmem:[#allocation3 + $0x148] sm:$0xff]  ;;  %v199_v63 = vld [vmem:[#allocation3 + $0x158] sm:$0xff]  ;;  %v7991_v2 = vpack.c.bf16 %v192_v57, %v188_v56 }
  0x37   :  { %10296 = vst [vmem:[#allocation14_spill] sm:$0xff] %v7985_v55  ;;  %4882 = vmatprep.subr.bf16.mxu1 %v7976_v46  ;;  %10297 = vst [vmem:[#allocation15_spill] sm:$0xff] %v7988_v59  ;;  %v201_v62 = vld [vmem:[#allocation3 + $0x168] sm:$0xff]  ;;  %v203_v0 = vld [vmem:[#allocation3 + $0x178] sm:$0xff]  ;;  %v7995_v3 = vpack.c.bf16 %v194_v60, %v190_v58 }
  0x38   :  { %10298 = vst [vmem:[#allocation16_spill] sm:$0xff] %v7991_v2  ;;  %v7997_v4 = vpack.c.bf16 %v201_v62, %v197_v61  ;;  %v196_v5 = vld [vmem:[#allocation3 + $0x140] sm:$0xff]  ;;  %v198_v8 = vld [vmem:[#allocation3 + $0x150] sm:$0xff]  ;;  %v8000_v9 = vpack.c.bf16 %v203_v0, %v199_v63  ;;  %v205_v13 = vld [vmem:[#allocation3 + $0x188] sm:$0xff] }
  0x39   :  { %4852 = vmatpush1.bf16.msra.mxu0 %v7979_v53  ;;  %10299 = vst [vmem:[#allocation17_spill] sm:$0xff] %v7995_v3  ;;  %v200_v7 = vld [vmem:[#allocation3 + $0x160] sm:$0xff]  ;;  %v202_v12 = vld [vmem:[#allocation3 + $0x170] sm:$0xff]  ;;  %v209_v14 = vld [vmem:[#allocation3 + $0x1a8] sm:$0xff] }
  0x3a   :  { %4884 = vmatpush1.bf16.msra.mxu1 %v7983_v54  ;;  %4854 = vmatprep.subr.bf16.mxu0 %v7985_v55  ;;  %10300 = vst [vmem:[#allocation18_spill] sm:$0xff] %v7997_v4  ;;  %10301 = vst [vmem:[#allocation19_spill] sm:$0xff] %v8000_v9  ;;  %v207_v16 = vld [vmem:[#allocation3 + $0x198] sm:$0xff]  ;;  %v8003_v18 = vpack.c.bf16 %v200_v7, %v196_v5  ;;  %v204_v21 = vld [vmem:[#allocation3 + $0x180] sm:$0xff]  ;;  %v8007_v22 = vpack.c.bf16 %v202_v12, %v198_v8 }
  0x3b   :  { %4886 = vmatprep.subr.bf16.mxu1 %v7988_v59  ;;  %v211_v17 = vld [vmem:[#allocation3 + $0x1b8] sm:$0xff]  ;;  %v8009_v23 = vpack.c.bf16 %v209_v14, %v205_v13  ;;  %v208_v25 = vld [vmem:[#allocation3 + $0x1a0] sm:$0xff]  ;;  %v206_v26 = vld [vmem:[#allocation3 + $0x190] sm:$0xff] }
  0x3c   :  { %10302 = vst [vmem:[#allocation20_spill] sm:$0xff] %v8003_v18  ;;  %10303 = vst [vmem:[#allocation21_spill] sm:$0xff] %v8007_v22  ;;  %v146_v27 = vld [vmem:[%s9958_s0] sm:$0x3]  ;;  %v8015_v30 = vpack.c.bf16 %v211_v17, %v207_v16  ;;  %v210_v31 = vld [vmem:[#allocation3 + $0x1b0] sm:$0xff]  ;;  %v8021_v39 = vpack.c.bf16 %v208_v25, %v204_v21 }
  0x3d   :  { %4856 = vmatpush1.bf16.msra.mxu0 %v7991_v2  ;;  %10304 = vst [vmem:[#allocation22_spill] sm:$0xff] %v8009_v23  ;;  %v213_v32 = vld [vmem:[#allocation3 + $0x1c8] sm:$0xff]  ;;  %149 = vperm.xlu0 %7429, %v146_v27   ;;  %v215_v35 = vld [vmem:[#allocation3 + $0x1d8] sm:$0xff]  ;;  %v4714_v38 = vld [vmem:[%s9958_s0 + $0x2] sm:$0x3]  ;;  %v8025_v40 = vpack.c.bf16 %v210_v31, %v206_v26 }
  0x3e   :  { %4888 = vmatpush1.bf16.msra.mxu1 %v7995_v3  ;;  %4858 = vmatprep.subr.bf16.mxu0 %v7997_v4  ;;  %10305 = vst [vmem:[#allocation23_spill] sm:$0xff] %v8015_v30  ;;  %v217_v34 = vld [vmem:[#allocation3 + $0x1e8] sm:$0xff]  ;;  %v219_v36 = vld [vmem:[#allocation3 + $0x1f8] sm:$0xff]  ;;  %10306 = vst [vmem:[#allocation24_spill] sm:$0xff] %v8021_v39 }
  0x3f   :  { %4890 = vmatprep.subr.bf16.mxu1 %v8000_v9  ;;  %10307 = vst [vmem:[#allocation25_spill] sm:$0xff] %v8025_v40  ;;  %v8027_v43 = vpack.c.bf16 %v217_v34, %v213_v32  ;;  %v212_v44 = vld [vmem:[#allocation3 + $0x1c0] sm:$0xff]  ;;  %v214_v47 = vld [vmem:[#allocation3 + $0x1d0] sm:$0xff]  ;;  %v8030_v48 = vpack.c.bf16 %v219_v36, %v215_v35  ;;  %v395_v50 = vld [vmem:[#allocation5 + $0x8] sm:$0xff] }
  0x40   :  { %v216_v45 = vld [vmem:[#allocation3 + $0x1e0] sm:$0xff]  ;;  %v218_v49 = vld [vmem:[#allocation3 + $0x1f0] sm:$0xff]  ;;  %v399_v51 = vld [vmem:[#allocation5 + $0x28] sm:$0xff] }
  0x41   :  { %4860 = vmatpush1.bf16.msra.mxu0 %v8003_v18  ;;  %10308 = vst [vmem:[#allocation26_spill] sm:$0xff] %v8027_v43  ;;  %10309 = vst [vmem:[#allocation27_spill] sm:$0xff] %v8030_v48  ;;  %987 = vperm.xlu0 %7429, %v4714_v38   ;;  %v4744_v52 = vld [vmem:[%s9958_s0 + $0x8] sm:$0x3]  ;;  %v397_v56 = vld [vmem:[#allocation5 + $0x18] sm:$0xff]  ;;  %v8036_v58 = vpack.c.bf16 %v216_v45, %v212_v44  ;;  %v8040_v60 = vpack.c.bf16 %v218_v49, %v214_v47 }
  0x42   :  { %4892 = vmatpush1.bf16.msra.mxu1 %v8007_v22  ;;  %4862 = vmatprep.subr.bf16.mxu0 %v8009_v23  ;;  %v401_v57 = vld [vmem:[#allocation5 + $0x38] sm:$0xff]  ;;  %v8042_v61 = vpack.c.bf16 %v399_v51, %v395_v50  ;;  %v394_v62 = vld [vmem:[#allocation5] sm:$0xff]  ;;  %v396_v0 = vld [vmem:[#allocation5 + $0x10] sm:$0xff] }
  0x43   :  { %4894 = vmatprep.subr.bf16.mxu1 %v8015_v30  ;;  %10310 = vst [vmem:[#allocation28_spill] sm:$0xff] %v8036_v58  ;;  %10311 = vst [vmem:[#allocation29_spill] sm:$0xff] %v8040_v60  ;;  %v398_v63 = vld [vmem:[#allocation5 + $0x20] sm:$0xff]  ;;  %v8045_v5 = vpack.c.bf16 %v401_v57, %v397_v56  ;;  %v400_v7 = vld [vmem:[#allocation5 + $0x30] sm:$0xff] }
  0x44   :  { %10312 = vst [vmem:[#allocation30_spill] sm:$0xff] %v8042_v61  ;;  %v403_v8 = vld [vmem:[#allocation5 + $0x48] sm:$0xff]  ;;  %v405_v14 = vld [vmem:[#allocation5 + $0x58] sm:$0xff]  ;;  %v8051_v17 = vpack.c.bf16 %v398_v63, %v394_v62  ;;  %v8055_v21 = vpack.c.bf16 %v400_v7, %v396_v0  ;;  %v402_v26 = vld [vmem:[#allocation5 + $0x40] sm:$0xff] }
  0x45   :  { %4864 = vmatpush1.bf16.msra.mxu0 %v8021_v39  ;;  %2538 = vperm.xlu0 %7429, %v4744_v52   ;;  %10313 = vst [vmem:[#allocation31_spill] sm:$0xff] %v8045_v5  ;;  %v407_v12 = vld [vmem:[#allocation5 + $0x68] sm:$0xff]  ;;  %v409_v16 = vld [vmem:[#allocation5 + $0x78] sm:$0xff]  ;;  %v406_v27 = vld [vmem:[#allocation5 + $0x60] sm:$0xff] }
  0x46   :  { %4896 = vmatpush1.bf16.msra.mxu1 %v8025_v40  ;;  %4866 = vmatprep.subr.bf16.mxu0 %v8027_v43  ;;  %v4764_v13 = vld [vmem:[%s9958_s0 + $0xc] sm:$0x3]  ;;  %10314 = vst [vmem:[#allocation32_spill] sm:$0xff] %v8051_v17  ;;  %10315 = vst [vmem:[#allocation33_spill] sm:$0xff] %v8055_v21  ;;  %v8057_v25 = vpack.c.bf16 %v407_v12, %v403_v8  ;;  %v404_v31 = vld [vmem:[#allocation5 + $0x50] sm:$0xff]  ;;  %v8060_v32 = vpack.c.bf16 %v409_v16, %v405_v14 }
  0x47   :  { %4898 = vmatprep.subr.bf16.mxu1 %v8030_v48  ;;  %v408_v34 = vld [vmem:[#allocation5 + $0x70] sm:$0xff]  ;;  %v411_v35 = vld [vmem:[#allocation5 + $0x88] sm:$0xff]  ;;  %v413_v38 = vld [vmem:[#allocation5 + $0x98] sm:$0xff]  ;;  %v8065_v45 = vpack.c.bf16 %v406_v27, %v402_v26 }
  0x48   :  { %10316 = vst [vmem:[#allocation34_spill] sm:$0xff] %v8057_v25  ;;  %10317 = vst [vmem:[#allocation35_spill] sm:$0xff] %v8060_v32  ;;  %v415_v36 = vld [vmem:[#allocation5 + $0xa8] sm:$0xff]  ;;  %v417_v44 = vld [vmem:[#allocation5 + $0xb8] sm:$0xff]  ;;  %v8069_v47 = vpack.c.bf16 %v408_v34, %v404_v31 }
  0x49   :  { %4868 = vmatpush1.bf16.msra.mxu0 %v8036_v58  ;;  %3572 = vperm.xlu0 %7429, %v4764_v13   ;;  %10318 = vst [vmem:[#allocation36_spill] sm:$0xff] %v8065_v45  ;;  %v8071_v49 = vpack.c.bf16 %v415_v36, %v411_v35  ;;  %v410_v50 = vld [vmem:[#allocation5 + $0x80] sm:$0xff]  ;;  %v412_v52 = vld [vmem:[#allocation5 + $0x90] sm:$0xff]  ;;  %v8074_v56 = vpack.c.bf16 %v417_v44, %v413_v38  ;;  %v419_v62 = vld [vmem:[#allocation5 + $0xc8] sm:$0xff] }
  0x4a   :  { %4900 = vmatpush1.bf16.msra.mxu1 %v8040_v60  ;;  %4902 = vmatprep.subr.bf16.mxu0 %v8042_v61  ;;  %10319 = vst [vmem:[#allocation37_spill] sm:$0xff] %v8069_v47  ;;  %v414_v51 = vld [vmem:[#allocation5 + $0xa0] sm:$0xff]  ;;  %v416_v57 = vld [vmem:[#allocation5 + $0xb0] sm:$0xff]  ;;  %v423_v63 = vld [vmem:[#allocation5 + $0xe8] sm:$0xff] }
  0x4b   :  { %4966 = vmatprep.subr.bf16.mxu1 %v8045_v5  ;;  %10320 = vst [vmem:[#allocation38_spill] sm:$0xff] %v8071_v49  ;;  %10321 = vst [vmem:[#allocation39_spill] sm:$0xff] %v8074_v56  ;;  %v421_v0 = vld [vmem:[#allocation5 + $0xd8] sm:$0xff]  ;;  %v8079_v8 = vpack.c.bf16 %v414_v51, %v410_v50  ;;  %v8083_v12 = vpack.c.bf16 %v416_v57, %v412_v52  ;;  %v8085_v13 = vpack.c.bf16 %v423_v63, %v419_v62  ;;  %v418_v14 = vld [vmem:[#allocation5 + $0xc0] sm:$0xff] }
  0x4c   :  { %285 = vmatmul.mubr.f32.vlgmr.msra.gmra.mrb[0].mxu0 %v9966_v1  ;;  %v425_v7 = vld [vmem:[#allocation5 + $0xf8] sm:$0xff]  ;;  %v422_v16 = vld [vmem:[#allocation5 + $0xe0] sm:$0xff]  ;;  %v420_v27 = vld [vmem:[#allocation5 + $0xd0] sm:$0xff] }
  0x4d   :  { %356 = vmatmul.mubr.f32.vlgmr.msra.gmra.mrb[0].mxu1 %v9966_v1  ;;  %4904 = vmatpush1.bf16.msra.mxu0 %v8051_v17  ;;  %10322 = vst [vmem:[#allocation40_spill] sm:$0xff] %v8079_v8  ;;  %10323 = vst [vmem:[#allocation41_spill] sm:$0xff] %v8083_v12  ;;  %v8088_v26 = vpack.c.bf16 %v425_v7, %v421_v0  ;;  %v424_v31 = vld [vmem:[#allocation5 + $0xf0] sm:$0xff]  ;;  %v8091_v34 = vpack.c.bf16 %v422_v16, %v418_v14  ;;  %v427_v36 = vld [vmem:[#allocation5 + $0x108] sm:$0xff] }
  0x4e   :  { %4968 = vmatpush1.bf16.msra.mxu1 %v8055_v21  ;;  %4906 = vmatprep.subr.bf16.mxu0 %v8057_v25  ;;  %10324 = vst [vmem:[#allocation42_spill] sm:$0xff] %v8085_v13  ;;  %v8095_v35 = vpack.c.bf16 %v424_v31, %v420_v27  ;;  %v431_v38 = vld [vmem:[#allocation5 + $0x128] sm:$0xff]  ;;  %v429_v44 = vld [vmem:[#allocation5 + $0x118] sm:$0xff]  ;;  %v426_v52 = vld [vmem:[#allocation5 + $0x100] sm:$0xff] }
  0x4f   :  { %4970 = vmatprep.subr.bf16.mxu1 %v8060_v32  ;;  %586 = vmatprep.mubr.f32.mxu0 %v9966_v1  ;;  %10325 = vst [vmem:[#allocation43_spill] sm:$0xff] %v8088_v26  ;;  %10326 = vst [vmem:[#allocation44_spill] sm:$0xff] %v8091_v34  ;;  %v8100_v50 = vpack.c.bf16 %v431_v38, %v427_v36  ;;  %v433_v51 = vld [vmem:[#allocation5 + $0x138] sm:$0xff]  ;;  %v430_v57 = vld [vmem:[#allocation5 + $0x120] sm:$0xff] }
  0x50   :  { %657 = vmatprep.mubr.f32.mxu1 %v9966_v1  ;;  %10327 = vst [vmem:[#allocation45_spill] sm:$0xff] %v8095_v35  ;;  %v8102_v62 = vpack.c.bf16 %v433_v51, %v429_v44  ;;  %v8104_v63 = vpack.c.bf16 %v430_v57, %v426_v52  ;;  %v428_v0 = vld [vmem:[#allocation5 + $0x110] sm:$0xff]  ;;  %v435_v16 = vld [vmem:[#allocation5 + $0x148] sm:$0xff]  ;;  %v437_v31 = vld [vmem:[#allocation5 + $0x158] sm:$0xff] }
  0x51   :  { %4908 = vmatpush1.bf16.msra.mxu0 %v8065_v45  ;;  %10328 = vst [vmem:[#allocation46_spill] sm:$0xff] %v8100_v50  ;;  %v432_v7 = vld [vmem:[#allocation5 + $0x130] sm:$0xff]  ;;  %v439_v27 = vld [vmem:[#allocation5 + $0x168] sm:$0xff]  ;;  %v441_v38 = vld [vmem:[#allocation5 + $0x178] sm:$0xff] }
  0x52   :  { %4972 = vmatpush1.bf16.msra.mxu1 %v8069_v47  ;;  %4910 = vmatprep.subr.bf16.mxu0 %v8071_v49  ;;  %10329 = vst [vmem:[#allocation47_spill] sm:$0xff] %v8102_v62  ;;  %10330 = vst [vmem:[#allocation48_spill] sm:$0xff] %v8104_v63  ;;  %v8107_v14 = vpack.c.bf16 %v432_v7, %v428_v0  ;;  %v8112_v36 = vpack.c.bf16 %v439_v27, %v435_v16  ;;  %v434_v44 = vld [vmem:[#allocation5 + $0x140] sm:$0xff]  ;;  %v436_v0 = vld [vmem:[#allocation5 + $0x150] sm:$0xff] }
  0x53   :  { %4974 = vmatprep.subr.bf16.mxu1 %v8074_v56  ;;  %v438_v51 = vld [vmem:[#allocation5 + $0x160] sm:$0xff]  ;;  %v8114_v52 = vpack.c.bf16 %v441_v38, %v437_v31  ;;  %v440_v7 = vld [vmem:[#allocation5 + $0x170] sm:$0xff]  ;;  %v447_v16 = vld [vmem:[#allocation5 + $0x1a8] sm:$0xff] }
  0x54   :  { %10331 = vst [vmem:[#allocation49_spill] sm:$0xff] %v8107_v14  ;;  %10332 = vst [vmem:[#allocation50_spill] sm:$0xff] %v8112_v36  ;;  %v8116_v57 = vpack.c.bf16 %v438_v51, %v434_v44  ;;  %v8119_v1 = vpack.c.bf16 %v440_v7, %v436_v0  ;;  %v445_v27 = vld [vmem:[#allocation5 + $0x198] sm:$0xff]  ;;  %v442_v38 = vld [vmem:[#allocation5 + $0x180] sm:$0xff] }
  0x55   :  { %4912 = vmatpush1.bf16.msra.mxu0 %v8079_v8  ;;  %10333 = vst [vmem:[#allocation51_spill] sm:$0xff] %v8114_v52  ;;  %v449_v31 = vld [vmem:[#allocation5 + $0x1b8] sm:$0xff]  ;;  %v446_v44 = vld [vmem:[#allocation5 + $0x1a0] sm:$0xff]  ;;  %v444_v0 = vld [vmem:[#allocation5 + $0x190] sm:$0xff] }
  0x56   :  { %4976 = vmatpush1.bf16.msra.mxu1 %v8083_v12  ;;  %4914 = vmatprep.subr.bf16.mxu0 %v8085_v13  ;;  %10334 = vst [vmem:[#allocation52_spill] sm:$0xff] %v8116_v57  ;;  %10335 = vst [vmem:[#allocation53_spill] sm:$0xff] %v8119_v1  ;;  %v8126_v51 = vpack.c.bf16 %v449_v31, %v445_v27  ;;  %v448_v7 = vld [vmem:[#allocation5 + $0x1b0] sm:$0xff]  ;;  %v457_v27 = vld [vmem:[#allocation5 + $0x1f8] sm:$0xff] }
  0x57   :  { %4978 = vmatprep.subr.bf16.mxu1 %v8088_v26  ;;  %v450_v31 = vld [vmem:[#allocation5 + $0x1c0] sm:$0xff]  ;;  %v712_v32 = vld [vmem:[#allocation5 + $0x4b8] sm:$0xff] }
  0x58   :  { %10337 = vst [vmem:[#allocation55_spill] sm:$0xff] %v8126_v51  ;;  %v724_v25 = vld [vmem:[#allocation5 + $0x518] sm:$0xff] }
  0x59   :  { %4916 = vmatpush1.bf16.msra.mxu0 %v8091_v34 }
  0x5a   :  { %4980 = vmatpush1.bf16.msra.mxu1 %v8095_v35  ;;  %4918 = vmatprep.subr.bf16.mxu0 %v8100_v50  ;;  %v511_v50 = vld [vmem:[#allocation5 + $0x3a8] sm:$0xff]  ;;  %v513_v35 = vld [vmem:[#allocation5 + $0x3b8] sm:$0xff] }
  0x5b   :  { %4982 = vmatprep.subr.bf16.mxu1 %v8102_v62  ;;  %v8128_v62 = vpack.c.bf16 %v446_v44, %v442_v38  ;;  %v454_v38 = vld [vmem:[#allocation5 + $0x1e0] sm:$0xff] }
  0x5d   :  { %4920 = vmatpush1.bf16.msra.mxu0 %v8104_v63  ;;  %10338 = vst [vmem:[#allocation56_spill] sm:$0xff] %v8128_v62 }
  0x5e   :  { %4984 = vmatpush1.bf16.msra.mxu1 %v8107_v14  ;;  %4922 = vmatprep.subr.bf16.mxu0 %v8112_v36  ;;  %v443_v14 = vld [vmem:[#allocation5 + $0x188] sm:$0xff]  ;;  %v8140_v36 = vpack.c.bf16 %v454_v38, %v450_v31  ;;  %v462_v31 = vld [vmem:[#allocation5 + $0x220] sm:$0xff] }
  0x5f   :  { %4986 = vmatprep.subr.bf16.mxu1 %v8114_v52  ;;  %v8124_v63 = vpack.c.bf16 %v447_v16, %v443_v14  ;;  %v8131_v52 = vpack.c.bf16 %v448_v7, %v444_v0  ;;  %v455_v14 = vld [vmem:[#allocation5 + $0x1e8] sm:$0xff]  ;;  %v453_v16 = vld [vmem:[#allocation5 + $0x1d8] sm:$0xff]  ;;  %v452_v0 = vld [vmem:[#allocation5 + $0x1d0] sm:$0xff] }
  0x60   :  { %v8138_v44 = vpack.c.bf16 %v457_v27, %v453_v16  ;;  %10342 = vst [vmem:[#allocation60_spill] sm:$0xff] %v8140_v36  ;;  %v456_v7 = vld [vmem:[#allocation5 + $0x1f0] sm:$0xff]  ;;  %v465_v16 = vld [vmem:[#allocation5 + $0x238] sm:$0xff]  ;;  %v458_v27 = vld [vmem:[#allocation5 + $0x200] sm:$0xff] }
  0x61   :  { %4924 = vmatpush1.bf16.msra.mxu0 %v8116_v57  ;;  %10336 = vst [vmem:[#allocation54_spill] sm:$0xff] %v8124_v63  ;;  %10339 = vst [vmem:[#allocation57_spill] sm:$0xff] %v8131_v52 }
  0x62   :  { %4988 = vmatpush1.bf16.msra.mxu1 %v8119_v1  ;;  %4926 = vmatprep.subr.bf16.mxu0 %v8124_v63  ;;  %v451_v1 = vld [vmem:[#allocation5 + $0x1c8] sm:$0xff]  ;;  %10341 = vst [vmem:[#allocation59_spill] sm:$0xff] %v8138_v44  ;;  %v8152_v63 = vpack.c.bf16 %v462_v31, %v458_v27  ;;  %v470_v27 = vld [vmem:[#allocation5 + $0x260] sm:$0xff] }
  0x63   :  { %4990 = vmatprep.subr.bf16.mxu1 %v8126_v51  ;;  %v8136_v57 = vpack.c.bf16 %v455_v14, %v451_v1  ;;  %v8143_v51 = vpack.c.bf16 %v456_v7, %v452_v0  ;;  %v463_v1 = vld [vmem:[#allocation5 + $0x228] sm:$0xff]  ;;  %v461_v14 = vld [vmem:[#allocation5 + $0x218] sm:$0xff]  ;;  %v460_v0 = vld [vmem:[#allocation5 + $0x210] sm:$0xff] }
  0x64   :  { %v8150_v38 = vpack.c.bf16 %v465_v16, %v461_v14  ;;  %10346 = vst [vmem:[#allocation64_spill] sm:$0xff] %v8152_v63  ;;  %v464_v7 = vld [vmem:[#allocation5 + $0x230] sm:$0xff]  ;;  %v473_v14 = vld [vmem:[#allocation5 + $0x278] sm:$0xff]  ;;  %v466_v16 = vld [vmem:[#allocation5 + $0x240] sm:$0xff] }
  0x65   :  { %4928 = vmatpush1.bf16.msra.mxu0 %v8128_v62  ;;  %10340 = vst [vmem:[#allocation58_spill] sm:$0xff] %v8136_v57  ;;  %10343 = vst [vmem:[#allocation61_spill] sm:$0xff] %v8143_v51 }
  0x66   :  { %4992 = vmatpush1.bf16.msra.mxu1 %v8131_v52  ;;  %4930 = vmatprep.subr.bf16.mxu0 %v8136_v57  ;;  %v459_v52 = vld [vmem:[#allocation5 + $0x208] sm:$0xff]  ;;  %10345 = vst [vmem:[#allocation63_spill] sm:$0xff] %v8150_v38  ;;  %v8164_v57 = vpack.c.bf16 %v470_v27, %v466_v16  ;;  %v478_v16 = vld [vmem:[#allocation5 + $0x2a0] sm:$0xff] }
  0x67   :  { %4994 = vmatprep.subr.bf16.mxu1 %v8138_v44  ;;  %v8148_v62 = vpack.c.bf16 %v463_v1, %v459_v52  ;;  %v8155_v44 = vpack.c.bf16 %v464_v7, %v460_v0  ;;  %v471_v52 = vld [vmem:[#allocation5 + $0x268] sm:$0xff]  ;;  %v469_v1 = vld [vmem:[#allocation5 + $0x258] sm:$0xff]  ;;  %v468_v0 = vld [vmem:[#allocation5 + $0x250] sm:$0xff] }
  0x68   :  { %v8162_v31 = vpack.c.bf16 %v473_v14, %v469_v1  ;;  %10350 = vst [vmem:[#allocation68_spill] sm:$0xff] %v8164_v57  ;;  %v472_v7 = vld [vmem:[#allocation5 + $0x270] sm:$0xff]  ;;  %v481_v1 = vld [vmem:[#allocation5 + $0x2b8] sm:$0xff]  ;;  %v474_v14 = vld [vmem:[#allocation5 + $0x280] sm:$0xff] }
  0x69   :  { %4932 = vmatpush1.bf16.msra.mxu0 %v8140_v36  ;;  %10344 = vst [vmem:[#allocation62_spill] sm:$0xff] %v8148_v62  ;;  %10347 = vst [vmem:[#allocation65_spill] sm:$0xff] %v8155_v44 }
  0x6a   :  { %4996 = vmatpush1.bf16.msra.mxu1 %v8143_v51  ;;  %4934 = vmatprep.subr.bf16.mxu0 %v8148_v62  ;;  %v467_v51 = vld [vmem:[#allocation5 + $0x248] sm:$0xff]  ;;  %10349 = vst [vmem:[#allocation67_spill] sm:$0xff] %v8162_v31  ;;  %v8176_v62 = vpack.c.bf16 %v478_v16, %v474_v14  ;;  %v486_v14 = vld [vmem:[#allocation5 + $0x2e0] sm:$0xff] }
  0x6b   :  { %4998 = vmatprep.subr.bf16.mxu1 %v8150_v38  ;;  %v8160_v36 = vpack.c.bf16 %v471_v52, %v467_v51  ;;  %v8167_v38 = vpack.c.bf16 %v472_v7, %v468_v0  ;;  %v479_v51 = vld [vmem:[#allocation5 + $0x2a8] sm:$0xff]  ;;  %v477_v52 = vld [vmem:[#allocation5 + $0x298] sm:$0xff]  ;;  %v476_v0 = vld [vmem:[#allocation5 + $0x290] sm:$0xff] }
  0x6c   :  { %v8174_v27 = vpack.c.bf16 %v481_v1, %v477_v52  ;;  %10354 = vst [vmem:[#allocation72_spill] sm:$0xff] %v8176_v62  ;;  %v480_v7 = vld [vmem:[#allocation5 + $0x2b0] sm:$0xff]  ;;  %v489_v52 = vld [vmem:[#allocation5 + $0x2f8] sm:$0xff]  ;;  %v482_v1 = vld [vmem:[#allocation5 + $0x2c0] sm:$0xff] }
  0x6d   :  { %4936 = vmatpush1.bf16.msra.mxu0 %v8152_v63  ;;  %10348 = vst [vmem:[#allocation66_spill] sm:$0xff] %v8160_v36  ;;  %10351 = vst [vmem:[#allocation69_spill] sm:$0xff] %v8167_v38 }
  0x6e   :  { %5000 = vmatpush1.bf16.msra.mxu1 %v8155_v44  ;;  %4938 = vmatprep.subr.bf16.mxu0 %v8160_v36  ;;  %v475_v44 = vld [vmem:[#allocation5 + $0x288] sm:$0xff]  ;;  %10353 = vst [vmem:[#allocation71_spill] sm:$0xff] %v8174_v27  ;;  %v8188_v36 = vpack.c.bf16 %v486_v14, %v482_v1 }
  0x6f   :  { %5002 = vmatprep.subr.bf16.mxu1 %v8162_v31  ;;  %v8172_v63 = vpack.c.bf16 %v479_v51, %v475_v44  ;;  %v8179_v31 = vpack.c.bf16 %v480_v7, %v476_v0  ;;  %v487_v44 = vld [vmem:[#allocation5 + $0x2e8] sm:$0xff]  ;;  %v485_v51 = vld [vmem:[#allocation5 + $0x2d8] sm:$0xff]  ;;  %v484_v0 = vld [vmem:[#allocation5 + $0x2d0] sm:$0xff] }
  0x70   :  { %v8186_v16 = vpack.c.bf16 %v489_v52, %v485_v51  ;;  %10358 = vst [vmem:[#allocation76_spill] sm:$0xff] %v8188_v36  ;;  %v488_v7 = vld [vmem:[#allocation5 + $0x2f0] sm:$0xff]  ;;  %v490_v51 = vld [vmem:[#allocation5 + $0x300] sm:$0xff] }
  0x71   :  { %4940 = vmatpush1.bf16.msra.mxu0 %v8164_v57  ;;  %10352 = vst [vmem:[#allocation70_spill] sm:$0xff] %v8172_v63  ;;  %10355 = vst [vmem:[#allocation73_spill] sm:$0xff] %v8179_v31  ;;  %v494_v52 = vld [vmem:[#allocation5 + $0x320] sm:$0xff] }
  0x72   :  { %5004 = vmatpush1.bf16.msra.mxu1 %v8167_v38  ;;  %4942 = vmatprep.subr.bf16.mxu0 %v8172_v63  ;;  %v483_v38 = vld [vmem:[#allocation5 + $0x2c8] sm:$0xff]  ;;  %10357 = vst [vmem:[#allocation75_spill] sm:$0xff] %v8186_v16  ;;  %v8200_v63 = vpack.c.bf16 %v494_v52, %v490_v51 }
  0x73   :  { %5006 = vmatprep.subr.bf16.mxu1 %v8174_v27  ;;  %v8184_v57 = vpack.c.bf16 %v487_v44, %v483_v38  ;;  %v8191_v27 = vpack.c.bf16 %v488_v7, %v484_v0  ;;  %v495_v38 = vld [vmem:[#allocation5 + $0x328] sm:$0xff]  ;;  %v493_v44 = vld [vmem:[#allocation5 + $0x318] sm:$0xff]  ;;  %v492_v0 = vld [vmem:[#allocation5 + $0x310] sm:$0xff] }
  0x74   :  { %10362 = vst [vmem:[#allocation80_spill] sm:$0xff] %v8200_v63  ;;  %v496_v7 = vld [vmem:[#allocation5 + $0x330] sm:$0xff] }
  0x75   :  { %4944 = vmatpush1.bf16.msra.mxu0 %v8176_v62  ;;  %10356 = vst [vmem:[#allocation74_spill] sm:$0xff] %v8184_v57  ;;  %10359 = vst [vmem:[#allocation77_spill] sm:$0xff] %v8191_v27  ;;  %v497_v62 = vld [vmem:[#allocation5 + $0x338] sm:$0xff] }
  0x76   :  { %5008 = vmatpush1.bf16.msra.mxu1 %v8179_v31  ;;  %4946 = vmatprep.subr.bf16.mxu0 %v8184_v57  ;;  %v491_v31 = vld [vmem:[#allocation5 + $0x308] sm:$0xff]  ;;  %v8198_v14 = vpack.c.bf16 %v497_v62, %v493_v44  ;;  %v8202_v57 = vpack.c.bf16 %v496_v7, %v492_v0  ;;  %v505_v62 = vld [vmem:[#allocation5 + $0x378] sm:$0xff]  ;;  %v502_v44 = vld [vmem:[#allocation5 + $0x360] sm:$0xff] }
  0x77   :  { %5010 = vmatprep.subr.bf16.mxu1 %v8186_v16  ;;  %v8196_v1 = vpack.c.bf16 %v495_v38, %v491_v31  ;;  %v503_v16 = vld [vmem:[#allocation5 + $0x368] sm:$0xff]  ;;  %v498_v38 = vld [vmem:[#allocation5 + $0x340] sm:$0xff]  ;;  %v500_v0 = vld [vmem:[#allocation5 + $0x350] sm:$0xff] }
  0x78   :  { %10361 = vst [vmem:[#allocation79_spill] sm:$0xff] %v8198_v14  ;;  %10363 = vst [vmem:[#allocation81_spill] sm:$0xff] %v8202_v57  ;;  %v8212_v52 = vpack.c.bf16 %v502_v44, %v498_v38  ;;  %v504_v7 = vld [vmem:[#allocation5 + $0x370] sm:$0xff] }
  0x79   :  { %4948 = vmatpush1.bf16.msra.mxu0 %v8188_v36  ;;  %10360 = vst [vmem:[#allocation78_spill] sm:$0xff] %v8196_v1  ;;  %v499_v36 = vld [vmem:[#allocation5 + $0x348] sm:$0xff]  ;;  %v508_v38 = vld [vmem:[#allocation5 + $0x390] sm:$0xff] }
  0x7a   :  { %5012 = vmatpush1.bf16.msra.mxu1 %v8191_v27  ;;  %4950 = vmatprep.subr.bf16.mxu0 %v8196_v1  ;;  %v501_v27 = vld [vmem:[#allocation5 + $0x358] sm:$0xff]  ;;  %v8208_v31 = vpack.c.bf16 %v503_v16, %v499_v36  ;;  %10366 = vst [vmem:[#allocation84_spill] sm:$0xff] %v8212_v52  ;;  %v507_v1 = vld [vmem:[#allocation5 + $0x388] sm:$0xff] }
  0x7b   :  { %5014 = vmatprep.subr.bf16.mxu1 %v8198_v14  ;;  %v8210_v51 = vpack.c.bf16 %v505_v62, %v501_v27  ;;  %v8215_v14 = vpack.c.bf16 %v504_v7, %v500_v0  ;;  %v8218_v36 = vpack.c.bf16 %v511_v50, %v507_v1  ;;  %v506_v27 = vld [vmem:[#allocation5 + $0x380] sm:$0xff]  ;;  %v512_v0 = vld [vmem:[#allocation5 + $0x3b0] sm:$0xff]  ;;  %v515_v7 = vld [vmem:[#allocation5 + $0x3c8] sm:$0xff] }
  0x7c   :  { %10364 = vst [vmem:[#allocation82_spill] sm:$0xff] %v8208_v31  ;;  %v510_v62 = vld [vmem:[#allocation5 + $0x3a0] sm:$0xff]  ;;  %v8228_v50 = vpack.c.bf16 %v512_v0, %v508_v38  ;;  %v521_v1 = vld [vmem:[#allocation5 + $0x3f8] sm:$0xff]  ;;  %v694_v38 = vld [vmem:[#allocation5 + $0x428] sm:$0xff] }
  0x7d   :  { %4952 = vmatpush1.bf16.msra.mxu0 %v8200_v63  ;;  %10365 = vst [vmem:[#allocation83_spill] sm:$0xff] %v8210_v51  ;;  %10367 = vst [vmem:[#allocation85_spill] sm:$0xff] %v8215_v14  ;;  %v509_v63 = vld [vmem:[#allocation5 + $0x398] sm:$0xff]  ;;  %v8224_v44 = vpack.c.bf16 %v510_v62, %v506_v27  ;;  %v520_v27 = vld [vmem:[#allocation5 + $0x3f0] sm:$0xff] }
  0x7e   :  { %5016 = vmatpush1.bf16.msra.mxu1 %v8202_v57  ;;  %4954 = vmatprep.subr.bf16.mxu0 %v8208_v31  ;;  %10368 = vst [vmem:[#allocation86_spill] sm:$0xff] %v8218_v36  ;;  %v8220_v16 = vpack.c.bf16 %v513_v35, %v509_v63  ;;  %v519_v31 = vld [vmem:[#allocation5 + $0x3e8] sm:$0xff]  ;;  %10371 = vst [vmem:[#allocation89_spill] sm:$0xff] %v8228_v50  ;;  %v517_v63 = vld [vmem:[#allocation5 + $0x3d8] sm:$0xff] }
  0x7f   :  { %5018 = vmatprep.subr.bf16.mxu1 %v8210_v51  ;;  %10370 = vst [vmem:[#allocation88_spill] sm:$0xff] %v8224_v44  ;;  %v8230_v35 = vpack.c.bf16 %v519_v31, %v515_v7  ;;  %v514_v51 = vld [vmem:[#allocation5 + $0x3c0] sm:$0xff]  ;;  %v8232_v57 = vpack.c.bf16 %v521_v1, %v517_v63  ;;  %v690_v31 = vld [vmem:[#allocation5 + $0x408] sm:$0xff]  ;;  %v692_v0 = vld [vmem:[#allocation5 + $0x418] sm:$0xff] }
  0x80   :  { %10369 = vst [vmem:[#allocation87_spill] sm:$0xff] %v8220_v16  ;;  %v8244_v7 = vpack.c.bf16 %v694_v38, %v690_v31  ;;  %v696_v63 = vld [vmem:[#allocation5 + $0x438] sm:$0xff] }
  0x81   :  { %4956 = vmatpush1.bf16.msra.mxu0 %v8212_v52  ;;  %10372 = vst [vmem:[#allocation90_spill] sm:$0xff] %v8230_v35  ;;  %10373 = vst [vmem:[#allocation91_spill] sm:$0xff] %v8232_v57  ;;  %v518_v52 = vld [vmem:[#allocation5 + $0x3e0] sm:$0xff]  ;;  %v8246_v1 = vpack.c.bf16 %v696_v63, %v692_v0 }
  0x82   :  { %5020 = vmatpush1.bf16.msra.mxu1 %v8215_v14  ;;  %4958 = vmatprep.subr.bf16.mxu0 %v8218_v36  ;;  %v516_v14 = vld [vmem:[#allocation5 + $0x3d0] sm:$0xff]  ;;  %v8236_v62 = vpack.c.bf16 %v518_v52, %v514_v51  ;;  %10376 = vst [vmem:[#allocation94_spill] sm:$0xff] %v8244_v7 }
  0x83   :  { %5022 = vmatprep.subr.bf16.mxu1 %v8220_v16  ;;  %v8238_v36 = vpack.c.bf16 %v520_v27, %v516_v14  ;;  %10377 = vst [vmem:[#allocation95_spill] sm:$0xff] %v8246_v1  ;;  %v58_v14 = vlaneseq  ;;  %v56_v27 = vld [vmem:[%s9959_s1] sm:$0xf] }
  0x84   :  { %10374 = vst [vmem:[#allocation92_spill] sm:$0xff] %v8236_v62 }
  0x85   :  { %4960 = vmatpush1.bf16.msra.mxu0 %v8224_v44  ;;  %10375 = vst [vmem:[#allocation93_spill] sm:$0xff] %v8238_v36  ;;  %v59_v51 = vshrl.u32 %v58_v14, 7  ;;  %v78_v14 = vld [vmem:[%s9962_s4] sm:$0xf] }
  0x86   :  { %5024 = vmatpush1.bf16.msra.mxu1 %v8228_v50  ;;  %4962 = vmatprep.subr.bf16.mxu0 %v8230_v35 }
  0x87   :  { %5026 = vmatprep.subr.bf16.mxu1 %v8232_v57  ;;  %v8250_v52 = vsub.s32 0, %v59_v51  ;;  %v8263_v0 = vsub.s32 3, %v59_v51  ;;  %v8276_v35 = vsub.s32 2, %v59_v51 }
  0x89   :  { %4964 = vmatpush1.bf16.msra.mxu0 %v8236_v62  ;;  %v8258_v31 = vrot.slane %v56_v27, %v8250_v52  ;;  %v8271_v62 = vrot.slane %v56_v27, %v8263_v0  ;;  %v8274_v57 = vrot.slane %v78_v14, %v8250_v52  ;;  %v8284_v8 = vrot.slane %v56_v27, %v8276_v35 }
  0x8a   :  { %5028 = vmatpush1.bf16.msra.mxu1 %v8238_v36  ;;  %5030 = vmatprep.subr.bf16.mxu0 %v8244_v7  ;;  %v8255_v36 = vsub.s32 1, %v59_v51  ;;  %v8288_v47 = vrot.slane %v78_v14, %v8263_v0 }
  0x8b   :  { %5094 = vmatprep.subr.bf16.mxu1 %v8246_v1  ;;  %10378 = vst [vmem:[#allocation96_spill] sm:$0xff] %v8258_v31  ;;  %10380 = vst [vmem:[#allocation98_spill] sm:$0xff] %v8271_v62 }
  0x8c   :  { %v8261_v38 = vrot.slane %v56_v27, %v8255_v36  ;;  %10381 = vst [vmem:[#allocation99_spill] sm:$0xff] %v8274_v57  ;;  %v8279_v44 = vrot.slane %v78_v14, %v8255_v36  ;;  %10383 = vst [vmem:[#allocation101_spill] sm:$0xff] %v8284_v8 }
  0x8d   :  { %10384 = vst [vmem:[#allocation102_spill] sm:$0xff] %v8288_v47 }
  0x8e   :  { %10379 = vst [vmem:[#allocation97_spill] sm:$0xff] %v8261_v38  ;;  %10382 = vst [vmem:[#allocation100_spill] sm:$0xff] %v8279_v44 }
  0xbc   :  { %v150_v63 = vpop.permute.xlu0 %149 }
  0xbd   :  { %v152_v1 = vmul.f32 %v150_v63, %v8258_v31  ;;  %v153_v7 = vmul.f32 %v150_v63, %v8261_v38  ;;  %v155_v31 = vmul.f32 %v150_v63, %v8271_v62 }
 0x11f   :  { %v286_v50 = vpop.f32.mrb[0].mxu0 }
 0x120   :  { %v362_v16 = vadd.f32 %v286_v50, %v152_v1  ;;  %v357_v34 = vpop.f32.mrb[0].mxu1  ;;  %v288_v26 = vpop.f32.mrb[1].mxu0  ;;  %v154_v50 = vmul.f32 %v150_v63, %v8284_v8  ;;  %v706_v8 = vld [vmem:[#allocation5 + $0x488] sm:$0xff] }
 0x121   :  { %v363_v13 = vadd.f32 %v288_v26, %v153_v7  ;;  %v359_v12 = vpop.f32.mrb[1].mxu1  ;;  %v8293_v7 = vrot.slane %v78_v14, %v8276_v35 }
 0x122   :  { %v366_v38 = vadd.f32 %v362_v16, %v8274_v57  ;;  %v365_v45 = vadd.f32 %v359_v12, %v155_v31  ;;  %v364_v16 = vadd.f32 %v357_v34, %v154_v50  ;;  %v689_v34 = vld [vmem:[#allocation5 + $0x400] sm:$0xff]  ;;  %v708_v57 = vld [vmem:[#allocation5 + $0x498] sm:$0xff] }
 0x123   :  { %v367_v56 = vadd.f32 %v363_v13, %v8279_v44  ;;  %10385 = vst [vmem:[#allocation103_spill] sm:$0xff] %v8293_v7  ;;  %v693_v50 = vld [vmem:[#allocation5 + $0x420] sm:$0xff]  ;;  %v710_v44 = vld [vmem:[#allocation5 + $0x4a8] sm:$0xff] }
 0x124   :  { %v4705_v51 = vmul.f32 -1.442695, %v366_v38  ;;  %v369_v26 = vadd.f32 %v365_v45, %v8288_v47  ;;  %v368_v27 = vadd.f32 %v364_v16, %v8293_v7  ;;  %v695_v16 = vld [vmem:[#allocation5 + $0x430] sm:$0xff]  ;;  %v8299_v7 = vpack.c.bf16 %v693_v50, %v689_v34 }
 0x125   :  { %v4706_v49 = vmul.f32 -1.442695, %v367_v56 }
 0x126   :  { %7431 = vpow2.f32 %v4705_v51  ;;  %v4707_v1 = vmul.f32 -1.442695, %v369_v26  ;;  %v691_v26 = vld [vmem:[#allocation5 + $0x410] sm:$0xff]  ;;  %10387 = vst [vmem:[#allocation105_spill] sm:$0xff] %v8299_v7 }
 0x127   :  { %7433 = vpow2.f32 %v4706_v49 }
 0x128   :  { %7435 = vpow2.f32 %v4707_v1  ;;  %v698_v1 = vld [vmem:[#allocation5 + $0x448] sm:$0xff] }
 0x129   :  { %7437 = vtanh.f32 %v368_v27  ;;  %v702_v27 = vld [vmem:[#allocation5 + $0x468] sm:$0xff] }
 0x130   :  { %v7432_v13 = vpop.eup %7431 }
 0x131   :  { %v7434_v38 = vpop.eup %7433  ;;  %v376_v56 = vadd.f32 1.0, %v7432_v13  ;;  %v700_v13 = vld [vmem:[#allocation5 + $0x458] sm:$0xff] }
 0x132   :  { %v377_v62 = vadd.f32 1.0, %v7434_v38  ;;  %v7436_v12 = vpop.eup %7435 }
 0x133   :  { %7439 = vrcp.f32 %v376_v56  ;;  %v7438_v31 = vpop.eup %7437  ;;  %v386_v51 = vadd.f32 1.0, %v7436_v12  ;;  %v697_v12 = vld [vmem:[#allocation5 + $0x440] sm:$0xff] }
 0x134   :  { %7441 = vrcp.f32 %v377_v62  ;;  %v704_v62 = vld [vmem:[#allocation5 + $0x478] sm:$0xff] }
 0x135   :  { %7443 = vrcp.f32 %v386_v51  ;;  %v8307_v51 = vpack.c.bf16 %v704_v62, %v700_v13  ;;  %v707_v13 = vld [vmem:[#allocation5 + $0x490] sm:$0xff] }
 0x136   :  { %v711_v62 = vld [vmem:[#allocation5 + $0x4b0] sm:$0xff] }
 0x137   :  { %10390 = vst [vmem:[#allocation108_spill] sm:$0xff] %v8307_v51 }
 0x13d   :  { %v7440_v49 = vpop.eup %7439 }
 0x13e   :  { %v7442_v63 = vpop.eup %7441  ;;  %v390_v45 = vmul.f32 %v7440_v49, %v7438_v31  ;;  %v8301_v31 = vpack.c.bf16 %v695_v16, %v691_v26  ;;  %v701_v49 = vld [vmem:[#allocation5 + $0x460] sm:$0xff] }
 0x13f   :  { %v389_v14 = vmul.f32 0.0, %v7442_v63  ;;  %v7444_v38 = vpop.eup %7443  ;;  %v8313_v34 = vpack.c.bf16 %v701_v49, %v697_v12  ;;  %v705_v26 = vld [vmem:[#allocation5 + $0x480] sm:$0xff]  ;;  %v10394_v12 = vmov 0.0  }
 0x140   :  { %10388 = vst [vmem:[#allocation106_spill] sm:$0xff] %v8301_v31  ;;  %v709_v16 = vld [vmem:[#allocation5 + $0x4a0] sm:$0xff] }
 0x141   :  { %v8296_v47 = vadd.f32 %v390_v45, %v389_v14  ;;  %v8305_v45 = vpack.c.bf16 %v702_v27, %v698_v1  ;;  %v699_v14 = vld [vmem:[#allocation5 + $0x450] sm:$0xff]  ;;  %10391 = vst [vmem:[#allocation109_spill] sm:$0xff] %v8313_v34  ;;  %v8319_v1 = vpack.c.bf16 %v710_v44, %v706_v8  ;;  %v8321_v27 = vpack.c.bf16 %v712_v32, %v708_v57  ;;  %v713_v32 = vld [vmem:[#allocation5 + $0x4c0] sm:$0xff] }
 0x142   :  { %v8329_v8 = vpack.c.bf16 %v711_v62, %v707_v13  ;;  %v717_v57 = vld [vmem:[#allocation5 + $0x4e0] sm:$0xff] }
 0x143   :  { %10386 = vst [vmem:[#allocation104_spill] sm:$0xff] %v8296_v47  ;;  %7445 = vtanh.f32 %v8296_v47  ;;  %10389 = vst [vmem:[#allocation107_spill] sm:$0xff] %v8305_v45  ;;  %v703_v47 = vld [vmem:[#allocation5 + $0x470] sm:$0xff]  ;;  %v721_v13 = vld [vmem:[#allocation5 + $0x500] sm:$0xff] }
 0x144   :  { %v8315_v50 = vpack.c.bf16 %v703_v47, %v699_v14  ;;  %10393 = vst [vmem:[#allocation111_spill] sm:$0xff] %v8321_v27  ;;  %v8327_v47 = vpack.c.bf16 %v709_v16, %v705_v26  ;;  %10396 = vst [vmem:[#allocation113_spill] sm:$0xff] %v8329_v8  ;;  %v715_v14 = vld [vmem:[#allocation5 + $0x4d0] sm:$0xff]  ;;  %v8339_v26 = vpack.c.bf16 %v717_v57, %v713_v32  ;;  %v725_v62 = vld [vmem:[#allocation5 + $0x520] sm:$0xff] }
 0x145   :  { %v8351_v32 = vpack.c.bf16 %v725_v62, %v721_v13  ;;  %v736_v57 = vld [vmem:[#allocation5 + $0x578] sm:$0xff] }
 0x146   :  { %10392 = vst [vmem:[#allocation110_spill] sm:$0xff] %v8315_v50  ;;  %10395 = vst [vmem:[#allocation112_spill] sm:$0xff] %v8327_v47 }
 0x147   :  { %10399 = vst [vmem:[#allocation116_spill] sm:$0xff] %v8339_v26  ;;  %10403 = vst [vmem:[#allocation120_spill] sm:$0xff] %v8351_v32 }
 0x14d   :  { %v7446_v56 = vpop.eup %7445 }
 0x14e   :  { %v8303_v63 = vmul.f32 %v7446_v56, %v7444_v38  ;;  %v714_v38 = vld [vmem:[#allocation5 + $0x4c8] sm:$0xff] }
 0x14f   :  { %v718_v56 = vld [vmem:[#allocation5 + $0x4e8] sm:$0xff] }
 0x150   :  { %587 = vmatmul.mubr.f32.vlgmr.msra.gmra.mrb[2].mxu0 %v8303_v63  ;;  %658 = vmatmul.mubr.f32.vlgmr.msra.gmra.mrb[2].mxu1 %v8303_v63  ;;  %v8333_v44 = vpack.c.bf16 %v718_v56, %v714_v38  ;;  %v723_v38 = vld [vmem:[#allocation5 + $0x510] sm:$0xff] }
 0x151   :  { %5032 = vmatpush1.bf16.msra.mxu0 %v8299_v7  ;;  %5096 = vmatpush1.bf16.msra.mxu1 %v8301_v31  ;;  %v716_v7 = vld [vmem:[#allocation5 + $0x4d8] sm:$0xff]  ;;  %v727_v56 = vld [vmem:[#allocation5 + $0x530] sm:$0xff] }
 0x152   :  { %5034 = vmatprep.subr.bf16.mxu0 %v8305_v45  ;;  %5098 = vmatprep.subr.bf16.mxu1 %v8307_v51  ;;  %v720_v31 = vld [vmem:[#allocation5 + $0x4f8] sm:$0xff]  ;;  %10397 = vst [vmem:[#allocation114_spill] sm:$0xff] %v8333_v44  ;;  %v719_v51 = vld [vmem:[#allocation5 + $0x4f0] sm:$0xff]  ;;  %v722_v45 = vld [vmem:[#allocation5 + $0x508] sm:$0xff] }
 0x153   :  { %881 = vmatprep.mubr.f32.mxu0 %v10394_v12  ;;  %952 = vmatprep.mubr.f32.mxu1 %v10394_v12  ;;  %v8335_v49 = vpack.c.bf16 %v720_v31, %v716_v7  ;;  %v8341_v16 = vpack.c.bf16 %v719_v51, %v715_v14  ;;  %v8353_v51 = vpack.c.bf16 %v727_v56, %v723_v38  ;;  %v729_v14 = vld [vmem:[#allocation5 + $0x540] sm:$0xff]  ;;  %v731_v38 = vld [vmem:[#allocation5 + $0x550] sm:$0xff] }
 0x154   :  { %v735_v56 = vld [vmem:[#allocation5 + $0x570] sm:$0xff] }
 0x155   :  { %5036 = vmatpush1.bf16.msra.mxu0 %v8313_v34  ;;  %5100 = vmatpush1.bf16.msra.mxu1 %v8315_v50  ;;  %10398 = vst [vmem:[#allocation115_spill] sm:$0xff] %v8335_v49  ;;  %v726_v34 = vld [vmem:[#allocation5 + $0x528] sm:$0xff]  ;;  %v728_v50 = vld [vmem:[#allocation5 + $0x538] sm:$0xff]  ;;  %10400 = vst [vmem:[#allocation117_spill] sm:$0xff] %v8341_v16 }
 0x156   :  { %5038 = vmatprep.subr.bf16.mxu0 %v8319_v1  ;;  %5102 = vmatprep.subr.bf16.mxu1 %v8321_v27  ;;  %v8345_v7 = vpack.c.bf16 %v726_v34, %v722_v45  ;;  %v8347_v31 = vpack.c.bf16 %v728_v50, %v724_v25  ;;  %10404 = vst [vmem:[#allocation121_spill] sm:$0xff] %v8353_v51  ;;  %v730_v25 = vld [vmem:[#allocation5 + $0x548] sm:$0xff]  ;;  %v732_v34 = vld [vmem:[#allocation5 + $0x558] sm:$0xff] }
 0x157   :  { %v734_v45 = vld [vmem:[#allocation5 + $0x568] sm:$0xff]  ;;  %v8361_v13 = vpack.c.bf16 %v736_v57, %v732_v34  ;;  %v744_v34 = vld [vmem:[#allocation5 + $0x5b8] sm:$0xff]  ;;  %v741_v57 = vld [vmem:[#allocation5 + $0x5a0] sm:$0xff] }
 0x158   :  { %10401 = vst [vmem:[#allocation118_spill] sm:$0xff] %v8345_v7  ;;  %10402 = vst [vmem:[#allocation119_spill] sm:$0xff] %v8347_v31  ;;  %v8359_v50 = vpack.c.bf16 %v734_v45, %v730_v25  ;;  %v742_v25 = vld [vmem:[#allocation5 + $0x5a8] sm:$0xff]  ;;  %v740_v45 = vld [vmem:[#allocation5 + $0x598] sm:$0xff] }
 0x159   :  { %5040 = vmatpush1.bf16.msra.mxu0 %v8327_v47  ;;  %5104 = vmatpush1.bf16.msra.mxu1 %v8329_v8  ;;  %10406 = vst [vmem:[#allocation123_spill] sm:$0xff] %v8361_v13 }
 0x15a   :  { %5042 = vmatprep.subr.bf16.mxu0 %v8333_v44  ;;  %5106 = vmatprep.subr.bf16.mxu1 %v8335_v49  ;;  %10405 = vst [vmem:[#allocation122_spill] sm:$0xff] %v8359_v50  ;;  %v808_v49 = vld [vmem:[#allocation5 + $0x7b8] sm:$0xff] }
 0x15d   :  { %5044 = vmatpush1.bf16.msra.mxu0 %v8339_v26  ;;  %5108 = vmatpush1.bf16.msra.mxu1 %v8341_v16  ;;  %v733_v16 = vld [vmem:[#allocation5 + $0x560] sm:$0xff]  ;;  %v804_v26 = vld [vmem:[#allocation5 + $0x798] sm:$0xff] }
 0x15e   :  { %5046 = vmatprep.subr.bf16.mxu0 %v8345_v7  ;;  %5110 = vmatprep.subr.bf16.mxu1 %v8347_v31  ;;  %v8363_v62 = vpack.c.bf16 %v733_v16, %v729_v14  ;;  %v8366_v31 = vpack.c.bf16 %v735_v56, %v731_v38  ;;  %v737_v16 = vld [vmem:[#allocation5 + $0x580] sm:$0xff]  ;;  %v8373_v14 = vpack.c.bf16 %v744_v34, %v740_v45  ;;  %v739_v38 = vld [vmem:[#allocation5 + $0x590] sm:$0xff]  ;;  %v752_v45 = vld [vmem:[#allocation5 + $0x5f8] sm:$0xff] }
 0x15f   :  { %v8375_v7 = vpack.c.bf16 %v741_v57, %v737_v16  ;;  %v743_v56 = vld [vmem:[#allocation5 + $0x5b0] sm:$0xff]  ;;  %v745_v34 = vld [vmem:[#allocation5 + $0x5c0] sm:$0xff] }
 0x160   :  { %10407 = vst [vmem:[#allocation124_spill] sm:$0xff] %v8363_v62  ;;  %10408 = vst [vmem:[#allocation125_spill] sm:$0xff] %v8366_v31  ;;  %v749_v16 = vld [vmem:[#allocation5 + $0x5e0] sm:$0xff] }
 0x161   :  { %5048 = vmatpush1.bf16.msra.mxu0 %v8351_v32  ;;  %5112 = vmatpush1.bf16.msra.mxu1 %v8353_v51  ;;  %v738_v51 = vld [vmem:[#allocation5 + $0x588] sm:$0xff]  ;;  %10410 = vst [vmem:[#allocation127_spill] sm:$0xff] %v8373_v14  ;;  %10411 = vst [vmem:[#allocation128_spill] sm:$0xff] %v8375_v7 }
 0x162   :  { %5050 = vmatprep.subr.bf16.mxu0 %v8359_v50  ;;  %5114 = vmatprep.subr.bf16.mxu1 %v8361_v13  ;;  %v8371_v32 = vpack.c.bf16 %v742_v25, %v738_v51  ;;  %v8378_v13 = vpack.c.bf16 %v743_v56, %v739_v38  ;;  %v750_v51 = vld [vmem:[#allocation5 + $0x5e8] sm:$0xff]  ;;  %v748_v25 = vld [vmem:[#allocation5 + $0x5d8] sm:$0xff]  ;;  %v8387_v50 = vpack.c.bf16 %v749_v16, %v745_v34  ;;  %v747_v38 = vld [vmem:[#allocation5 + $0x5d0] sm:$0xff] }
 0x163   :  { %v8385_v57 = vpack.c.bf16 %v752_v45, %v748_v25  ;;  %v751_v56 = vld [vmem:[#allocation5 + $0x5f0] sm:$0xff]  ;;  %v760_v25 = vld [vmem:[#allocation5 + $0x638] sm:$0xff]  ;;  %v753_v45 = vld [vmem:[#allocation5 + $0x600] sm:$0xff] }
 0x164   :  { %10409 = vst [vmem:[#allocation126_spill] sm:$0xff] %v8371_v32  ;;  %10412 = vst [vmem:[#allocation129_spill] sm:$0xff] %v8378_v13  ;;  %v757_v34 = vld [vmem:[#allocation5 + $0x620] sm:$0xff] }
 0x165   :  { %5052 = vmatpush1.bf16.msra.mxu0 %v8363_v62  ;;  %5116 = vmatpush1.bf16.msra.mxu1 %v8366_v31  ;;  %v746_v31 = vld [vmem:[#allocation5 + $0x5c8] sm:$0xff]  ;;  %10414 = vst [vmem:[#allocation131_spill] sm:$0xff] %v8385_v57  ;;  %10415 = vst [vmem:[#allocation132_spill] sm:$0xff] %v8387_v50 }
 0x166   :  { %5054 = vmatprep.subr.bf16.mxu0 %v8371_v32  ;;  %5118 = vmatprep.subr.bf16.mxu1 %v8373_v14  ;;  %v8383_v62 = vpack.c.bf16 %v750_v51, %v746_v31  ;;  %v8390_v14 = vpack.c.bf16 %v751_v56, %v747_v38  ;;  %v758_v31 = vld [vmem:[#allocation5 + $0x628] sm:$0xff]  ;;  %v756_v51 = vld [vmem:[#allocation5 + $0x618] sm:$0xff]  ;;  %v8399_v32 = vpack.c.bf16 %v757_v34, %v753_v45  ;;  %v755_v38 = vld [vmem:[#allocation5 + $0x610] sm:$0xff] }
 0x167   :  { %v8397_v16 = vpack.c.bf16 %v760_v25, %v756_v51  ;;  %v759_v56 = vld [vmem:[#allocation5 + $0x630] sm:$0xff]  ;;  %v768_v51 = vld [vmem:[#allocation5 + $0x678] sm:$0xff]  ;;  %v761_v25 = vld [vmem:[#allocation5 + $0x640] sm:$0xff] }
 0x168   :  { %10413 = vst [vmem:[#allocation130_spill] sm:$0xff] %v8383_v62  ;;  %10416 = vst [vmem:[#allocation133_spill] sm:$0xff] %v8390_v14  ;;  %v765_v45 = vld [vmem:[#allocation5 + $0x660] sm:$0xff] }
 0x169   :  { %5056 = vmatpush1.bf16.msra.mxu0 %v8375_v7  ;;  %5120 = vmatpush1.bf16.msra.mxu1 %v8378_v13  ;;  %v754_v13 = vld [vmem:[#allocation5 + $0x608] sm:$0xff]  ;;  %10418 = vst [vmem:[#allocation135_spill] sm:$0xff] %v8397_v16  ;;  %10419 = vst [vmem:[#allocation136_spill] sm:$0xff] %v8399_v32 }
 0x16a   :  { %5058 = vmatprep.subr.bf16.mxu0 %v8383_v62  ;;  %5122 = vmatprep.subr.bf16.mxu1 %v8385_v57  ;;  %v8395_v7 = vpack.c.bf16 %v758_v31, %v754_v13  ;;  %v8402_v57 = vpack.c.bf16 %v759_v56, %v755_v38  ;;  %v766_v13 = vld [vmem:[#allocation5 + $0x668] sm:$0xff]  ;;  %v764_v31 = vld [vmem:[#allocation5 + $0x658] sm:$0xff]  ;;  %v8411_v62 = vpack.c.bf16 %v765_v45, %v761_v25  ;;  %v763_v38 = vld [vmem:[#allocation5 + $0x650] sm:$0xff] }
 0x16b   :  { %v8409_v34 = vpack.c.bf16 %v768_v51, %v764_v31  ;;  %v767_v56 = vld [vmem:[#allocation5 + $0x670] sm:$0xff]  ;;  %v776_v31 = vld [vmem:[#allocation5 + $0x6b8] sm:$0xff]  ;;  %v769_v51 = vld [vmem:[#allocation5 + $0x680] sm:$0xff] }
 0x16c   :  { %10417 = vst [vmem:[#allocation134_spill] sm:$0xff] %v8395_v7  ;;  %10420 = vst [vmem:[#allocation137_spill] sm:$0xff] %v8402_v57  ;;  %v773_v25 = vld [vmem:[#allocation5 + $0x6a0] sm:$0xff] }
 0x16d   :  { %5060 = vmatpush1.bf16.msra.mxu0 %v8387_v50  ;;  %5124 = vmatpush1.bf16.msra.mxu1 %v8390_v14  ;;  %v762_v14 = vld [vmem:[#allocation5 + $0x648] sm:$0xff]  ;;  %10422 = vst [vmem:[#allocation139_spill] sm:$0xff] %v8409_v34  ;;  %10423 = vst [vmem:[#allocation140_spill] sm:$0xff] %v8411_v62 }
 0x16e   :  { %5062 = vmatprep.subr.bf16.mxu0 %v8395_v7  ;;  %5126 = vmatprep.subr.bf16.mxu1 %v8397_v16  ;;  %v8407_v50 = vpack.c.bf16 %v766_v13, %v762_v14  ;;  %v8414_v16 = vpack.c.bf16 %v767_v56, %v763_v38  ;;  %v774_v14 = vld [vmem:[#allocation5 + $0x6a8] sm:$0xff]  ;;  %v772_v13 = vld [vmem:[#allocation5 + $0x698] sm:$0xff]  ;;  %v8423_v7 = vpack.c.bf16 %v773_v25, %v769_v51  ;;  %v771_v38 = vld [vmem:[#allocation5 + $0x690] sm:$0xff] }
 0x16f   :  { %v8421_v45 = vpack.c.bf16 %v776_v31, %v772_v13  ;;  %v775_v56 = vld [vmem:[#allocation5 + $0x6b0] sm:$0xff]  ;;  %v784_v13 = vld [vmem:[#allocation5 + $0x6f8] sm:$0xff]  ;;  %v777_v31 = vld [vmem:[#allocation5 + $0x6c0] sm:$0xff] }
 0x170   :  { %10421 = vst [vmem:[#allocation138_spill] sm:$0xff] %v8407_v50  ;;  %10424 = vst [vmem:[#allocation141_spill] sm:$0xff] %v8414_v16  ;;  %v781_v51 = vld [vmem:[#allocation5 + $0x6e0] sm:$0xff] }
 0x171   :  { %5064 = vmatpush1.bf16.msra.mxu0 %v8399_v32  ;;  %5128 = vmatpush1.bf16.msra.mxu1 %v8402_v57  ;;  %v770_v57 = vld [vmem:[#allocation5 + $0x688] sm:$0xff]  ;;  %10426 = vst [vmem:[#allocation143_spill] sm:$0xff] %v8421_v45  ;;  %10427 = vst [vmem:[#allocation144_spill] sm:$0xff] %v8423_v7 }
 0x172   :  { %5066 = vmatprep.subr.bf16.mxu0 %v8407_v50  ;;  %5130 = vmatprep.subr.bf16.mxu1 %v8409_v34  ;;  %v8419_v32 = vpack.c.bf16 %v774_v14, %v770_v57  ;;  %v8426_v34 = vpack.c.bf16 %v775_v56, %v771_v38  ;;  %v782_v57 = vld [vmem:[#allocation5 + $0x6e8] sm:$0xff]  ;;  %v780_v14 = vld [vmem:[#allocation5 + $0x6d8] sm:$0xff]  ;;  %v8435_v50 = vpack.c.bf16 %v781_v51, %v777_v31  ;;  %v779_v38 = vld [vmem:[#allocation5 + $0x6d0] sm:$0xff] }
 0x173   :  { %v8433_v25 = vpack.c.bf16 %v784_v13, %v780_v14  ;;  %v783_v56 = vld [vmem:[#allocation5 + $0x6f0] sm:$0xff]  ;;  %v792_v14 = vld [vmem:[#allocation5 + $0x738] sm:$0xff]  ;;  %v785_v13 = vld [vmem:[#allocation5 + $0x700] sm:$0xff] }
 0x174   :  { %10425 = vst [vmem:[#allocation142_spill] sm:$0xff] %v8419_v32  ;;  %10428 = vst [vmem:[#allocation145_spill] sm:$0xff] %v8426_v34  ;;  %v789_v31 = vld [vmem:[#allocation5 + $0x720] sm:$0xff] }
 0x175   :  { %5068 = vmatpush1.bf16.msra.mxu0 %v8411_v62  ;;  %5132 = vmatpush1.bf16.msra.mxu1 %v8414_v16  ;;  %v778_v16 = vld [vmem:[#allocation5 + $0x6c8] sm:$0xff]  ;;  %10430 = vst [vmem:[#allocation147_spill] sm:$0xff] %v8433_v25  ;;  %10431 = vst [vmem:[#allocation148_spill] sm:$0xff] %v8435_v50 }
 0x176   :  { %5070 = vmatprep.subr.bf16.mxu0 %v8419_v32  ;;  %5134 = vmatprep.subr.bf16.mxu1 %v8421_v45  ;;  %v8431_v62 = vpack.c.bf16 %v782_v57, %v778_v16  ;;  %v8438_v45 = vpack.c.bf16 %v783_v56, %v779_v38  ;;  %v790_v16 = vld [vmem:[#allocation5 + $0x728] sm:$0xff]  ;;  %v788_v57 = vld [vmem:[#allocation5 + $0x718] sm:$0xff]  ;;  %v8447_v32 = vpack.c.bf16 %v789_v31, %v785_v13  ;;  %v787_v38 = vld [vmem:[#allocation5 + $0x710] sm:$0xff] }
 0x177   :  { %v8445_v51 = vpack.c.bf16 %v792_v14, %v788_v57  ;;  %v791_v56 = vld [vmem:[#allocation5 + $0x730] sm:$0xff]  ;;  %v800_v57 = vld [vmem:[#allocation5 + $0x778] sm:$0xff]  ;;  %v793_v14 = vld [vmem:[#allocation5 + $0x740] sm:$0xff] }
 0x178   :  { %10429 = vst [vmem:[#allocation146_spill] sm:$0xff] %v8431_v62  ;;  %10432 = vst [vmem:[#allocation149_spill] sm:$0xff] %v8438_v45  ;;  %v797_v13 = vld [vmem:[#allocation5 + $0x760] sm:$0xff] }
 0x179   :  { %5072 = vmatpush1.bf16.msra.mxu0 %v8423_v7  ;;  %5136 = vmatpush1.bf16.msra.mxu1 %v8426_v34  ;;  %v786_v34 = vld [vmem:[#allocation5 + $0x708] sm:$0xff]  ;;  %10434 = vst [vmem:[#allocation151_spill] sm:$0xff] %v8445_v51  ;;  %10435 = vst [vmem:[#allocation152_spill] sm:$0xff] %v8447_v32 }
 0x17a   :  { %5074 = vmatprep.subr.bf16.mxu0 %v8431_v62  ;;  %5138 = vmatprep.subr.bf16.mxu1 %v8433_v25  ;;  %v8443_v7 = vpack.c.bf16 %v790_v16, %v786_v34  ;;  %v8450_v25 = vpack.c.bf16 %v791_v56, %v787_v38  ;;  %v798_v34 = vld [vmem:[#allocation5 + $0x768] sm:$0xff]  ;;  %v796_v16 = vld [vmem:[#allocation5 + $0x758] sm:$0xff]  ;;  %v8459_v62 = vpack.c.bf16 %v797_v13, %v793_v14  ;;  %v795_v38 = vld [vmem:[#allocation5 + $0x750] sm:$0xff] }
 0x17b   :  { %v8457_v31 = vpack.c.bf16 %v800_v57, %v796_v16  ;;  %v799_v56 = vld [vmem:[#allocation5 + $0x770] sm:$0xff]  ;;  %v801_v16 = vld [vmem:[#allocation5 + $0x780] sm:$0xff] }
 0x17c   :  { %10433 = vst [vmem:[#allocation150_spill] sm:$0xff] %v8443_v7  ;;  %10436 = vst [vmem:[#allocation153_spill] sm:$0xff] %v8450_v25  ;;  %v805_v57 = vld [vmem:[#allocation5 + $0x7a0] sm:$0xff]  ;;  %v803_v14 = vld [vmem:[#allocation5 + $0x790] sm:$0xff] }
 0x17d   :  { %5076 = vmatpush1.bf16.msra.mxu0 %v8435_v50  ;;  %5140 = vmatpush1.bf16.msra.mxu1 %v8438_v45  ;;  %v794_v45 = vld [vmem:[#allocation5 + $0x748] sm:$0xff]  ;;  %10438 = vst [vmem:[#allocation155_spill] sm:$0xff] %v8457_v31  ;;  %10439 = vst [vmem:[#allocation156_spill] sm:$0xff] %v8459_v62  ;;  %v8471_v13 = vpack.c.bf16 %v805_v57, %v801_v16  ;;  %v815_v16 = vld [vmem:[#allocation5 + $0x7f0] sm:$0xff] }
 0x17e   :  { %5078 = vmatprep.subr.bf16.mxu0 %v8443_v7  ;;  %5142 = vmatprep.subr.bf16.mxu1 %v8445_v51  ;;  %v8455_v50 = vpack.c.bf16 %v798_v34, %v794_v45  ;;  %v802_v7 = vld [vmem:[#allocation5 + $0x788] sm:$0xff]  ;;  %v8468_v34 = vpack.c.bf16 %v808_v49, %v804_v26  ;;  %v812_v49 = vld [vmem:[#allocation5 + $0x7d8] sm:$0xff] }
 0x17f   :  { %v806_v51 = vld [vmem:[#allocation5 + $0x7a8] sm:$0xff]  ;;  %10443 = vst [vmem:[#allocation160_spill] sm:$0xff] %v8471_v13  ;;  %v816_v26 = vld [vmem:[#allocation5 + $0x7f8] sm:$0xff] }
 0x180   :  { %10437 = vst [vmem:[#allocation154_spill] sm:$0xff] %v8455_v50  ;;  %v8466_v45 = vpack.c.bf16 %v806_v51, %v802_v7  ;;  %10442 = vst [vmem:[#allocation159_spill] sm:$0xff] %v8468_v34  ;;  %v809_v51 = vld [vmem:[#allocation5 + $0x7c0] sm:$0xff] }
 0x181   :  { %5080 = vmatpush1.bf16.msra.mxu0 %v8447_v32  ;;  %5144 = vmatpush1.bf16.msra.mxu1 %v8450_v25  ;;  %v8462_v32 = vpack.c.bf16 %v799_v56, %v795_v38  ;;  %v807_v38 = vld [vmem:[#allocation5 + $0x7b0] sm:$0xff]  ;;  %v810_v56 = vld [vmem:[#allocation5 + $0x7c8] sm:$0xff]  ;;  %v813_v25 = vld [vmem:[#allocation5 + $0x7e0] sm:$0xff] }
 0x182   :  { %5082 = vmatprep.subr.bf16.mxu0 %v8455_v50  ;;  %5146 = vmatprep.subr.bf16.mxu1 %v8457_v31  ;;  %10441 = vst [vmem:[#allocation158_spill] sm:$0xff] %v8466_v45  ;;  %v814_v50 = vld [vmem:[#allocation5 + $0x7e8] sm:$0xff]  ;;  %v8475_v31 = vpack.c.bf16 %v807_v38, %v803_v14  ;;  %v8482_v57 = vpack.c.bf16 %v813_v25, %v809_v51 }
 0x183   :  { %10440 = vst [vmem:[#allocation157_spill] sm:$0xff] %v8462_v32  ;;  %v8477_v7 = vpack.c.bf16 %v814_v50, %v810_v56  ;;  %v4703_v50 = vld [vmem:[%s9962_s4 + $0x4] sm:$0xf] }
 0x184   :  { %10444 = vst [vmem:[#allocation161_spill] sm:$0xff] %v8475_v31  ;;  %10447 = vst [vmem:[#allocation164_spill] sm:$0xff] %v8482_v57  ;;  %v8497_v25 = vrot.slane %v4703_v50, %v8250_v52 }
 0x185   :  { %5084 = vmatpush1.bf16.msra.mxu0 %v8459_v62  ;;  %5148 = vmatpush1.bf16.msra.mxu1 %v8462_v32  ;;  %10445 = vst [vmem:[#allocation162_spill] sm:$0xff] %v8477_v7  ;;  %v8479_v62 = vpack.c.bf16 %v816_v26, %v812_v49  ;;  %v811_v32 = vld [vmem:[#allocation5 + $0x7d0] sm:$0xff] }
 0x186   :  { %5086 = vmatprep.subr.bf16.mxu0 %v8466_v45  ;;  %5150 = vmatprep.subr.bf16.mxu1 %v8468_v34  ;;  %v8486_v14 = vpack.c.bf16 %v815_v16, %v811_v32  ;;  %10449 = vst [vmem:[#allocation166_spill] sm:$0xff] %v8497_v25  ;;  %v8500_v32 = vrot.slane %v4703_v50, %v8255_v36 }
 0x187   :  { %10446 = vst [vmem:[#allocation163_spill] sm:$0xff] %v8479_v62 }
 0x188   :  { %10448 = vst [vmem:[#allocation165_spill] sm:$0xff] %v8486_v14  ;;  %10450 = vst [vmem:[#allocation167_spill] sm:$0xff] %v8500_v32 }
 0x189   :  { %5088 = vmatpush1.bf16.msra.mxu0 %v8471_v13  ;;  %5152 = vmatpush1.bf16.msra.mxu1 %v8475_v31 }
 0x18a   :  { %5090 = vmatprep.subr.bf16.mxu0 %v8477_v7  ;;  %5154 = vmatprep.subr.bf16.mxu1 %v8479_v62  ;;  %v8509_v62 = vrot.slane %v4703_v50, %v8276_v35 }
 0x18d   :  { %5092 = vmatpush1.bf16.msra.mxu0 %v8482_v57  ;;  %5156 = vmatpush1.bf16.msra.mxu1 %v8486_v14  ;;  %v8505_v14 = vrot.slane %v4703_v50, %v8263_v0 }
 0x18e   :  { %5158 = vmatprep.subr.bf16.mxu0 %v7940_v6  ;;  %5190 = vmatprep.subr.bf16.mxu1 %v7942_v10 }
 0x18f   :  { %10451 = vst [vmem:[#allocation168_spill] sm:$0xff] %v8505_v14 }
 0x223   :  { %v588_v38 = vpop.f32.mrb[2].mxu0  ;;  %v659_v56 = vpop.f32.mrb[2].mxu1 }
 0x224   :  { %v589_v49 = vadd.f32 %v588_v38, %v8497_v25  ;;  %v590_v26 = vpop.f32.mrb[3].mxu0  ;;  %v661_v51 = vpop.f32.mrb[3].mxu1  ;;  %v660_v31 = vadd.f32 %v659_v56, %v8509_v62 }
 0x225   :  { %v591_v16 = vadd.f32 %v590_v26, %v8500_v32  ;;  %v662_v57 = vadd.f32 %v661_v51, %v8505_v14 }
 0x226   :  { %v4708_v6 = vmul.f32 -1.442695, %v589_v49 }
 0x227   :  { %v4709_v10 = vmul.f32 -1.442695, %v591_v16  ;;  %v4710_v7 = vmul.f32 -1.442695, %v662_v57 }
 0x228   :  { %7447 = vpow2.f32 %v4708_v6 }
 0x229   :  { %7449 = vpow2.f32 %v4709_v10 }
 0x22a   :  { %7451 = vpow2.f32 %v4710_v7  ;;  %v10454_v7 = vld [vmem:[#allocation36_spill] sm:$0xff] }
 0x22b   :  { %7453 = vtanh.f32 %v660_v31  ;;  %v10452_v31 = vld [vmem:[#allocation34_spill] sm:$0xff] }
 0x232   :  { %v7448_v38 = vpop.eup %7447 }
 0x233   :  { %v7450_v25 = vpop.eup %7449  ;;  %v670_v13 = vadd.f32 1.0, %v7448_v38 }
 0x234   :  { %v671_v49 = vadd.f32 1.0, %v7450_v25  ;;  %v7452_v26 = vpop.eup %7451  ;;  %v10456_v25 = vld [vmem:[#allocation38_spill] sm:$0xff] }
 0x235   :  { %7455 = vrcp.f32 %v670_v13  ;;  %v7454_v16 = vpop.eup %7453  ;;  %v680_v51 = vadd.f32 1.0, %v7452_v26  ;;  %v10453_v13 = vld [vmem:[#allocation35_spill] sm:$0xff]  ;;  %v10460_v26 = vld [vmem:[#allocation42_spill] sm:$0xff] }
 0x236   :  { %7457 = vrcp.f32 %v671_v49  ;;  %v10458_v49 = vld [vmem:[#allocation40_spill] sm:$0xff] }
 0x237   :  { %7459 = vrcp.f32 %v680_v51  ;;  %v10464_v51 = vld [vmem:[#allocation46_spill] sm:$0xff] }
 0x23f   :  { %v7456_v6 = vpop.eup %7455 }
 0x240   :  { %v7458_v10 = vpop.eup %7457  ;;  %v684_v32 = vmul.f32 %v7456_v6, %v7454_v16  ;;  %v10461_v16 = vld [vmem:[#allocation43_spill] sm:$0xff]  ;;  %v10462_v6 = vld [vmem:[#allocation44_spill] sm:$0xff] }
 0x241   :  { %v683_v14 = vmul.f32 0.0, %v7458_v10  ;;  %v7460_v57 = vpop.eup %7459  ;;  %v10463_v10 = vld [vmem:[#allocation45_spill] sm:$0xff] }
 0x243   :  { %v8512_v50 = vadd.f32 %v684_v32, %v683_v14  ;;  %v10455_v14 = vld [vmem:[#allocation37_spill] sm:$0xff]  ;;  %v10457_v32 = vld [vmem:[#allocation39_spill] sm:$0xff] }
 0x245   :  { %7461 = vtanh.f32 %v8512_v50 }
 0x24f   :  { %v7462_v56 = vpop.eup %7461 }
 0x250   :  { %v687_v38 = vmul.f32 %v7462_v56, %v7460_v57  ;;  %v10465_v57 = vld [vmem:[#allocation47_spill] sm:$0xff]  ;;  %v10466_v56 = vld [vmem:[#allocation48_spill] sm:$0xff] }
 0x252   :  { %882 = vmatmul.mubr.f32.vlgmr.msra.gmra.mrb[4].mxu0 %v687_v38  ;;  %953 = vmatmul.mubr.f32.vlgmr.msra.gmra.mrb[4].mxu1 %v687_v38 }
 0x253   :  { %5160 = vmatpush1.bf16.msra.mxu0 %v7944_v11  ;;  %5192 = vmatpush1.bf16.msra.mxu1 %v7947_v15 }
 0x254   :  { %5162 = vmatprep.subr.bf16.mxu0 %v7951_v19  ;;  %5194 = vmatprep.subr.bf16.mxu1 %v7953_v20 }
 0x255   :  { %1058 = vmatprep.mubr.f32.mxu0 %v10394_v12  ;;  %1129 = vmatprep.mubr.f32.mxu1 %v10394_v12 }
 0x257   :  { %5164 = vmatpush1.bf16.msra.mxu0 %v7956_v24  ;;  %5196 = vmatpush1.bf16.msra.mxu1 %v7960_v28 }
 0x258   :  { %5166 = vmatprep.subr.bf16.mxu0 %v7962_v29  ;;  %5198 = vmatprep.subr.bf16.mxu1 %v7964_v33 }
 0x25b   :  { %5168 = vmatpush1.bf16.msra.mxu0 %v7967_v37  ;;  %5200 = vmatpush1.bf16.msra.mxu1 %v7971_v41 }
 0x25c   :  { %5170 = vmatprep.subr.bf16.mxu0 %v7973_v42  ;;  %5202 = vmatprep.subr.bf16.mxu1 %v7976_v46 }
 0x25f   :  { %5172 = vmatpush1.bf16.msra.mxu0 %v7979_v53  ;;  %5204 = vmatpush1.bf16.msra.mxu1 %v7983_v54 }
 0x260   :  { %5174 = vmatprep.subr.bf16.mxu0 %v7985_v55  ;;  %5206 = vmatprep.subr.bf16.mxu1 %v7988_v59 }
 0x263   :  { %5176 = vmatpush1.bf16.msra.mxu0 %v7991_v2  ;;  %5208 = vmatpush1.bf16.msra.mxu1 %v7995_v3 }
 0x264   :  { %5178 = vmatprep.subr.bf16.mxu0 %v7997_v4  ;;  %5210 = vmatprep.subr.bf16.mxu1 %v8000_v9 }
 0x267   :  { %5180 = vmatpush1.bf16.msra.mxu0 %v8003_v18  ;;  %5212 = vmatpush1.bf16.msra.mxu1 %v8007_v22 }
 0x268   :  { %5182 = vmatprep.subr.bf16.mxu0 %v8009_v23  ;;  %5214 = vmatprep.subr.bf16.mxu1 %v8015_v30 }
 0x26b   :  { %5184 = vmatpush1.bf16.msra.mxu0 %v8021_v39  ;;  %5216 = vmatpush1.bf16.msra.mxu1 %v8025_v40 }
 0x26c   :  { %5186 = vmatprep.subr.bf16.mxu0 %v8027_v43  ;;  %5218 = vmatprep.subr.bf16.mxu1 %v8030_v48 }
 0x26f   :  { %5188 = vmatpush1.bf16.msra.mxu0 %v8036_v58  ;;  %5220 = vmatpush1.bf16.msra.mxu1 %v8040_v60  ;;  %v10521_v60 = vld [vmem:[#allocation98_spill] sm:$0xff] }
 0x270   :  { %5222 = vmatprep.subr.bf16.mxu0 %v8042_v61  ;;  %5286 = vmatprep.subr.bf16.mxu1 %v8045_v5  ;;  %v10520_v5 = vld [vmem:[#allocation100_spill] sm:$0xff] }
 0x272   :  { %1059 = vmatmul.mubr.f32.vlgmr.msra.gmra.mrb[6].mxu0 %v8303_v63  ;;  %1130 = vmatmul.mubr.f32.vlgmr.msra.gmra.mrb[6].mxu1 %v8303_v63  ;;  %v10459_v63 = vld [vmem:[#allocation41_spill] sm:$0xff] }
 0x273   :  { %1232 = vmatprep.mubr.f32.mxu0 %v687_v38  ;;  %1303 = vmatprep.mubr.f32.mxu1 %v687_v38  ;;  %v10467_v38 = vld [vmem:[#allocation49_spill] sm:$0xff] }
 0x274   :  { %5224 = vmatpush1.bf16.msra.mxu0 %v8051_v17  ;;  %5288 = vmatpush1.bf16.msra.mxu1 %v8055_v21 }
 0x275   :  { %5226 = vmatprep.subr.bf16.mxu0 %v10452_v31  ;;  %5290 = vmatprep.subr.bf16.mxu1 %v10453_v13 }
 0x278   :  { %5228 = vmatpush1.bf16.msra.mxu0 %v10454_v7  ;;  %5292 = vmatpush1.bf16.msra.mxu1 %v10455_v14 }
 0x279   :  { %5230 = vmatprep.subr.bf16.mxu0 %v10456_v25  ;;  %5294 = vmatprep.subr.bf16.mxu1 %v10457_v32  ;;  %v10468_v32 = vld [vmem:[#allocation50_spill] sm:$0xff] }
 0x27c   :  { %5232 = vmatpush1.bf16.msra.mxu0 %v10458_v49  ;;  %5296 = vmatpush1.bf16.msra.mxu1 %v10459_v63  ;;  %v10469_v49 = vld [vmem:[#allocation51_spill] sm:$0xff]  ;;  %v10470_v63 = vld [vmem:[#allocation52_spill] sm:$0xff] }
 0x27d   :  { %5234 = vmatprep.subr.bf16.mxu0 %v10460_v26  ;;  %5298 = vmatprep.subr.bf16.mxu1 %v10461_v16  ;;  %v10471_v26 = vld [vmem:[#allocation53_spill] sm:$0xff]  ;;  %v10472_v16 = vld [vmem:[#allocation54_spill] sm:$0xff] }
 0x280   :  { %5236 = vmatpush1.bf16.msra.mxu0 %v10462_v6  ;;  %5300 = vmatpush1.bf16.msra.mxu1 %v10463_v10  ;;  %v10473_v6 = vld [vmem:[#allocation55_spill] sm:$0xff]  ;;  %v10474_v10 = vld [vmem:[#allocation56_spill] sm:$0xff] }
 0x281   :  { %5238 = vmatprep.subr.bf16.mxu0 %v10464_v51  ;;  %5302 = vmatprep.subr.bf16.mxu1 %v10465_v57  ;;  %v10475_v51 = vld [vmem:[#allocation57_spill] sm:$0xff]  ;;  %v10476_v57 = vld [vmem:[#allocation58_spill] sm:$0xff] }
 0x284   :  { %5240 = vmatpush1.bf16.msra.mxu0 %v10466_v56  ;;  %5304 = vmatpush1.bf16.msra.mxu1 %v10467_v38  ;;  %v10477_v56 = vld [vmem:[#allocation59_spill] sm:$0xff]  ;;  %v10478_v38 = vld [vmem:[#allocation60_spill] sm:$0xff] }
 0x285   :  { %5242 = vmatprep.subr.bf16.mxu0 %v10468_v32  ;;  %5306 = vmatprep.subr.bf16.mxu1 %v10469_v49  ;;  %v10479_v32 = vld [vmem:[#allocation61_spill] sm:$0xff]  ;;  %v10480_v49 = vld [vmem:[#allocation62_spill] sm:$0xff] }
 0x288   :  { %5244 = vmatpush1.bf16.msra.mxu0 %v10470_v63  ;;  %5308 = vmatpush1.bf16.msra.mxu1 %v10471_v26  ;;  %v10481_v63 = vld [vmem:[#allocation63_spill] sm:$0xff]  ;;  %v10482_v26 = vld [vmem:[#allocation64_spill] sm:$0xff] }
 0x289   :  { %5246 = vmatprep.subr.bf16.mxu0 %v10472_v16  ;;  %5310 = vmatprep.subr.bf16.mxu1 %v10473_v6  ;;  %v10483_v16 = vld [vmem:[#allocation65_spill] sm:$0xff]  ;;  %v10484_v6 = vld [vmem:[#allocation66_spill] sm:$0xff] }
 0x28c   :  { %5248 = vmatpush1.bf16.msra.mxu0 %v10474_v10  ;;  %5312 = vmatpush1.bf16.msra.mxu1 %v10475_v51  ;;  %v10485_v10 = vld [vmem:[#allocation67_spill] sm:$0xff]  ;;  %v10486_v51 = vld [vmem:[#allocation68_spill] sm:$0xff] }
 0x28d   :  { %5250 = vmatprep.subr.bf16.mxu0 %v10476_v57  ;;  %5314 = vmatprep.subr.bf16.mxu1 %v10477_v56  ;;  %v10487_v57 = vld [vmem:[#allocation69_spill] sm:$0xff]  ;;  %v10488_v56 = vld [vmem:[#allocation70_spill] sm:$0xff] }
 0x290   :  { %5252 = vmatpush1.bf16.msra.mxu0 %v10478_v38  ;;  %5316 = vmatpush1.bf16.msra.mxu1 %v10479_v32  ;;  %v10489_v38 = vld [vmem:[#allocation71_spill] sm:$0xff]  ;;  %v10490_v32 = vld [vmem:[#allocation72_spill] sm:$0xff] }
 0x291   :  { %5254 = vmatprep.subr.bf16.mxu0 %v10480_v49  ;;  %5318 = vmatprep.subr.bf16.mxu1 %v10481_v63  ;;  %v10491_v49 = vld [vmem:[#allocation73_spill] sm:$0xff]  ;;  %v10492_v63 = vld [vmem:[#allocation74_spill] sm:$0xff] }
 0x294   :  { %5256 = vmatpush1.bf16.msra.mxu0 %v10482_v26  ;;  %5320 = vmatpush1.bf16.msra.mxu1 %v10483_v16  ;;  %v10493_v26 = vld [vmem:[#allocation75_spill] sm:$0xff]  ;;  %v10494_v16 = vld [vmem:[#allocation76_spill] sm:$0xff] }
 0x295   :  { %5258 = vmatprep.subr.bf16.mxu0 %v10484_v6  ;;  %5322 = vmatprep.subr.bf16.mxu1 %v10485_v10  ;;  %v10495_v6 = vld [vmem:[#allocation77_spill] sm:$0xff]  ;;  %v10496_v10 = vld [vmem:[#allocation78_spill] sm:$0xff] }
 0x298   :  { %5260 = vmatpush1.bf16.msra.mxu0 %v10486_v51  ;;  %5324 = vmatpush1.bf16.msra.mxu1 %v10487_v57  ;;  %v10497_v51 = vld [vmem:[#allocation79_spill] sm:$0xff]  ;;  %v10498_v57 = vld [vmem:[#allocation80_spill] sm:$0xff] }
 0x299   :  { %5262 = vmatprep.subr.bf16.mxu0 %v10488_v56  ;;  %5326 = vmatprep.subr.bf16.mxu1 %v10489_v38  ;;  %v10499_v56 = vld [vmem:[#allocation81_spill] sm:$0xff]  ;;  %v10500_v38 = vld [vmem:[#allocation82_spill] sm:$0xff] }
 0x29c   :  { %5264 = vmatpush1.bf16.msra.mxu0 %v10490_v32  ;;  %5328 = vmatpush1.bf16.msra.mxu1 %v10491_v49  ;;  %v10501_v32 = vld [vmem:[#allocation83_spill] sm:$0xff]  ;;  %v10502_v49 = vld [vmem:[#allocation84_spill] sm:$0xff] }
 0x29d   :  { %5266 = vmatprep.subr.bf16.mxu0 %v10492_v63  ;;  %5330 = vmatprep.subr.bf16.mxu1 %v10493_v26  ;;  %v10503_v63 = vld [vmem:[#allocation85_spill] sm:$0xff]  ;;  %v10504_v26 = vld [vmem:[#allocation86_spill] sm:$0xff] }
 0x2a0   :  { %5268 = vmatpush1.bf16.msra.mxu0 %v10494_v16  ;;  %5332 = vmatpush1.bf16.msra.mxu1 %v10495_v6  ;;  %v10505_v16 = vld [vmem:[#allocation87_spill] sm:$0xff]  ;;  %v10506_v6 = vld [vmem:[#allocation88_spill] sm:$0xff] }
 0x2a1   :  { %5270 = vmatprep.subr.bf16.mxu0 %v10496_v10  ;;  %5334 = vmatprep.subr.bf16.mxu1 %v10497_v51  ;;  %v10507_v10 = vld [vmem:[#allocation89_spill] sm:$0xff]  ;;  %v10508_v51 = vld [vmem:[#allocation90_spill] sm:$0xff] }
 0x2a4   :  { %5272 = vmatpush1.bf16.msra.mxu0 %v10498_v57  ;;  %5336 = vmatpush1.bf16.msra.mxu1 %v10499_v56  ;;  %v10509_v57 = vld [vmem:[#allocation91_spill] sm:$0xff]  ;;  %v10510_v56 = vld [vmem:[#allocation92_spill] sm:$0xff] }
 0x2a5   :  { %5274 = vmatprep.subr.bf16.mxu0 %v10500_v38  ;;  %5338 = vmatprep.subr.bf16.mxu1 %v10501_v32  ;;  %v10511_v38 = vld [vmem:[#allocation93_spill] sm:$0xff]  ;;  %v10512_v32 = vld [vmem:[#allocation94_spill] sm:$0xff] }
 0x2a8   :  { %5276 = vmatpush1.bf16.msra.mxu0 %v10502_v49  ;;  %5340 = vmatpush1.bf16.msra.mxu1 %v10503_v63  ;;  %v10513_v49 = vld [vmem:[#allocation95_spill] sm:$0xff] }
 0x2a9   :  { %5278 = vmatprep.subr.bf16.mxu0 %v10504_v26  ;;  %5342 = vmatprep.subr.bf16.mxu1 %v10505_v16  ;;  %v4704_v16 = vld [vmem:[%s9962_s4 + $0x8] sm:$0xf] }
 0x2aa   :  { %v8627_v25 = vrot.slane %v4704_v16, %v8276_v35 }
 0x2ac   :  { %5280 = vmatpush1.bf16.msra.mxu0 %v10506_v6  ;;  %5344 = vmatpush1.bf16.msra.mxu1 %v10507_v10  ;;  %v8619_v6 = vrot.slane %v4704_v16, %v8250_v52  ;;  %v8622_v10 = vrot.slane %v4704_v16, %v8255_v36  ;;  %10516 = vst [vmem:[#allocation171_spill] sm:$0xff] %v8627_v25 }
 0x2ad   :  { %5282 = vmatprep.subr.bf16.mxu0 %v10508_v51  ;;  %5346 = vmatprep.subr.bf16.mxu1 %v10509_v57 }
 0x2ae   :  { %10514 = vst [vmem:[#allocation169_spill] sm:$0xff] %v8619_v6  ;;  %10515 = vst [vmem:[#allocation170_spill] sm:$0xff] %v8622_v10 }
 0x2b0   :  { %5284 = vmatpush1.bf16.msra.mxu0 %v10510_v56  ;;  %5348 = vmatpush1.bf16.msra.mxu1 %v10511_v38 }
 0x2b1   :  { %5350 = vmatprep.subr.bf16.mxu0 %v10512_v32  ;;  %5414 = vmatprep.subr.bf16.mxu1 %v10513_v49 }
 0x325   :  { %v883_v51 = vpop.f32.mrb[4].mxu0  ;;  %v954_v57 = vpop.f32.mrb[4].mxu1 }
 0x326   :  { %v884_v56 = vadd.f32 %v883_v51, %v8619_v6  ;;  %v885_v26 = vpop.f32.mrb[5].mxu0  ;;  %v956_v38 = vpop.f32.mrb[5].mxu1  ;;  %v955_v52 = vadd.f32 %v954_v57, %v8627_v25  ;;  %v10518_v57 = vld [vmem:[#allocation97_spill] sm:$0xff] }
 0x327   :  { %v886_v32 = vadd.f32 %v885_v26, %v8622_v10 }
 0x328   :  { %v4711_v63 = vmul.f32 -1.442695, %v884_v56  ;;  %v988_v56 = vpop.permute.xlu0 %987 }
 0x329   :  { %v4712_v49 = vmul.f32 -1.442695, %v886_v32  ;;  %v991_v25 = vmul.f32 %v988_v56, %v10518_v57 }
 0x32a   :  { %7463 = vpow2.f32 %v4711_v63  ;;  %v10517_v63 = vld [vmem:[#allocation96_spill] sm:$0xff] }
 0x32b   :  { %7465 = vpow2.f32 %v4712_v49  ;;  %v990_v49 = vmul.f32 %v988_v56, %v10517_v63  ;;  %v10523_v63 = vld [vmem:[#allocation102_spill] sm:$0xff] }
 0x32c   :  { %7467 = vtanh.f32 %v955_v52 }
 0x334   :  { %v7464_v14 = vpop.eup %7463 }
 0x335   :  { %v7466_v36 = vpop.eup %7465  ;;  %v965_v7 = vadd.f32 1.0, %v7464_v14 }
 0x336   :  { %v966_v13 = vadd.f32 1.0, %v7466_v36  ;;  %v7468_v51 = vpop.eup %7467 }
 0x337   :  { %7469 = vrcp.f32 %v965_v7  ;;  %v10519_v7 = vld [vmem:[#allocation99_spill] sm:$0xff] }
 0x338   :  { %7471 = vrcp.f32 %v966_v13 }
 0x341   :  { %v7470_v6 = vpop.eup %7469 }
 0x342   :  { %v7472_v31 = vpop.eup %7471  ;;  %v979_v26 = vmul.f32 %v7470_v6, %v7468_v51  ;;  %v993_v6 = vmul.f32 %v988_v56, %v10521_v60 }
 0x343   :  { %v978_v32 = vmul.f32 0.0, %v7472_v31  ;;  %v8638_v31 = vrot.slane %v4704_v16, %v8263_v0 }
 0x345   :  { %v8631_v10 = vadd.f32 %v979_v26, %v978_v32  ;;  %v1060_v35 = vpop.f32.mrb[6].mxu0  ;;  %v1131_v21 = vpop.f32.mrb[6].mxu1  ;;  %v957_v57 = vadd.f32 %v956_v38, %v8638_v31 }
 0x346   :  { %v1136_v17 = vadd.f32 %v1060_v35, %v990_v49  ;;  %v1062_v14 = vpop.f32.mrb[7].mxu0  ;;  %v1133_v52 = vpop.f32.mrb[7].mxu1  ;;  %v10522_v49 = vld [vmem:[#allocation101_spill] sm:$0xff] }
 0x347   :  { %v1137_v36 = vadd.f32 %v1062_v14, %v991_v25  ;;  %v1139_v32 = vadd.f32 %v1133_v52, %v993_v6  ;;  %v992_v35 = vmul.f32 %v988_v56, %v10522_v49 }
 0x348   :  { %v1140_v13 = vadd.f32 %v1136_v17, %v10519_v7  ;;  %v4713_v17 = vmul.f32 -1.442695, %v957_v57  ;;  %v10525_v57 = vld [vmem:[#allocation104_spill] sm:$0xff] }
 0x349   :  { %v1141_v61 = vadd.f32 %v1137_v36, %v10520_v5  ;;  %v1143_v25 = vadd.f32 %v1139_v32, %v10523_v63  ;;  %v1138_v14 = vadd.f32 %v1131_v21, %v992_v35  ;;  %v10524_v36 = vld [vmem:[#allocation103_spill] sm:$0xff] }
 0x34a   :  { %v4715_v51 = vmul.f32 -1.442695, %v1140_v13 }
 0x34b   :  { %v4716_v26 = vmul.f32 -1.442695, %v1141_v61  ;;  %v4717_v7 = vmul.f32 -1.442695, %v1143_v25  ;;  %v1142_v5 = vadd.f32 %v1138_v14, %v10524_v36 }
 0x34c   :  { %7473 = vpow2.f32 %v4715_v51 }
 0x34d   :  { %7475 = vpow2.f32 %v4716_v26 }
 0x34e   :  { %7477 = vpow2.f32 %v4713_v17 }
 0x34f   :  { %7479 = vpow2.f32 %v4717_v7 }
 0x350   :  { %7481 = vtanh.f32 %v1142_v5 }
 0x356   :  { %v7474_v60 = vpop.eup %7473 }
 0x357   :  { %v7476_v0 = vpop.eup %7475  ;;  %v1150_v16 = vadd.f32 1.0, %v7474_v60 }
 0x358   :  { %v1151_v61 = vadd.f32 1.0, %v7476_v0  ;;  %v7478_v52 = vpop.eup %7477  ;;  %v10526_v0 = vld [vmem:[#allocation105_spill] sm:$0xff] }
 0x359   :  { %7483 = vrcp.f32 %v1150_v16  ;;  %v7480_v38 = vpop.eup %7479  ;;  %v975_v32 = vadd.f32 1.0, %v7478_v52  ;;  %v10527_v16 = vld [vmem:[#allocation106_spill] sm:$0xff]  ;;  %v10529_v52 = vld [vmem:[#allocation108_spill] sm:$0xff] }
 0x35a   :  { %7485 = vrcp.f32 %v1151_v61  ;;  %v7482_v13 = vpop.eup %7481  ;;  %v1160_v21 = vadd.f32 1.0, %v7480_v38  ;;  %v10528_v61 = vld [vmem:[#allocation107_spill] sm:$0xff]  ;;  %v10530_v38 = vld [vmem:[#allocation109_spill] sm:$0xff] }
 0x35b   :  { %7487 = vtanh.f32 %v8631_v10 }
 0x35c   :  { %7489 = vrcp.f32 %v1160_v21  ;;  %v10535_v21 = vld [vmem:[#allocation118_spill] sm:$0xff] }
 0x363   :  { %v7484_v56 = vpop.eup %7483 }
 0x364   :  { %v7486_v6 = vpop.eup %7485  ;;  %v1164_v51 = vmul.f32 %v7484_v56, %v7482_v13  ;;  %v10531_v13 = vld [vmem:[#allocation110_spill] sm:$0xff]  ;;  %v10532_v56 = vld [vmem:[#allocation115_spill] sm:$0xff] }
 0x365   :  { %v1163_v26 = vmul.f32 %v7486_v6, %v10525_v57  ;;  %v7488_v60 = vpop.eup %7487  ;;  %v10533_v6 = vld [vmem:[#allocation116_spill] sm:$0xff]  ;;  %v10536_v57 = vld [vmem:[#allocation119_spill] sm:$0xff] }
 0x366   :  { %v7490_v5 = vpop.eup %7489 }
 0x367   :  { %v8646_v35 = vadd.f32 %v1164_v51, %v1163_v26  ;;  %v10534_v51 = vld [vmem:[#allocation117_spill] sm:$0xff]  ;;  %v10537_v26 = vld [vmem:[#allocation120_spill] sm:$0xff] }
 0x369   :  { %7491 = vtanh.f32 %v8646_v35 }
 0x36a   :  { %7493 = vrcp.f32 %v975_v32  ;;  %v10538_v32 = vld [vmem:[#allocation121_spill] sm:$0xff] }
 0x373   :  { %v7492_v7 = vpop.eup %7491 }
 0x374   :  { %v7494_v25 = vpop.eup %7493  ;;  %v8649_v14 = vmul.f32 %v7492_v7, %v7490_v5  ;;  %v10540_v5 = vld [vmem:[#allocation123_spill] sm:$0xff]  ;;  %v10541_v7 = vld [vmem:[#allocation124_spill] sm:$0xff] }
 0x375   :  { %v982_v17 = vmul.f32 %v7494_v25, %v7488_v60  ;;  %v10539_v60 = vld [vmem:[#allocation122_spill] sm:$0xff]  ;;  %v10542_v25 = vld [vmem:[#allocation125_spill] sm:$0xff] }
 0x376   :  { %1233 = vmatmul.mubr.f32.vlgmr.msra.gmra.mrb[8].mxu0 %v8649_v14  ;;  %1304 = vmatmul.mubr.f32.vlgmr.msra.gmra.mrb[8].mxu1 %v8649_v14 }
 0x377   :  { %1398 = vmatprep.mubr.f32.mxu0 %v982_v17  ;;  %1469 = vmatprep.mubr.f32.mxu1 %v982_v17  ;;  %v10543_v17 = vld [vmem:[#allocation126_spill] sm:$0xff] }
 0x378   :  { %5352 = vmatpush1.bf16.msra.mxu0 %v10526_v0  ;;  %5416 = vmatpush1.bf16.msra.mxu1 %v10527_v16 }
 0x379   :  { %5354 = vmatprep.subr.bf16.mxu0 %v10528_v61  ;;  %5418 = vmatprep.subr.bf16.mxu1 %v10529_v52 }
 0x37c   :  { %5356 = vmatpush1.bf16.msra.mxu0 %v10530_v38  ;;  %5420 = vmatpush1.bf16.msra.mxu1 %v10531_v13 }
 0x37d   :  { %5358 = vmatprep.subr.bf16.mxu0 %v8319_v1  ;;  %5422 = vmatprep.subr.bf16.mxu1 %v8321_v27 }
 0x380   :  { %5360 = vmatpush1.bf16.msra.mxu0 %v8327_v47  ;;  %5424 = vmatpush1.bf16.msra.mxu1 %v8329_v8 }
 0x381   :  { %5362 = vmatprep.subr.bf16.mxu0 %v8333_v44  ;;  %5426 = vmatprep.subr.bf16.mxu1 %v10532_v56 }
 0x384   :  { %5364 = vmatpush1.bf16.msra.mxu0 %v10533_v6  ;;  %5428 = vmatpush1.bf16.msra.mxu1 %v10534_v51  ;;  %v10544_v6 = vld [vmem:[#allocation127_spill] sm:$0xff]  ;;  %v10545_v51 = vld [vmem:[#allocation128_spill] sm:$0xff] }
 0x385   :  { %5366 = vmatprep.subr.bf16.mxu0 %v10535_v21  ;;  %5430 = vmatprep.subr.bf16.mxu1 %v10536_v57  ;;  %v10546_v21 = vld [vmem:[#allocation129_spill] sm:$0xff]  ;;  %v10547_v57 = vld [vmem:[#allocation130_spill] sm:$0xff] }
 0x388   :  { %5368 = vmatpush1.bf16.msra.mxu0 %v10537_v26  ;;  %5432 = vmatpush1.bf16.msra.mxu1 %v10538_v32  ;;  %v10548_v26 = vld [vmem:[#allocation131_spill] sm:$0xff]  ;;  %v10549_v32 = vld [vmem:[#allocation132_spill] sm:$0xff] }
 0x389   :  { %5370 = vmatprep.subr.bf16.mxu0 %v10539_v60  ;;  %5434 = vmatprep.subr.bf16.mxu1 %v10540_v5  ;;  %v10550_v60 = vld [vmem:[#allocation133_spill] sm:$0xff]  ;;  %v10551_v5 = vld [vmem:[#allocation134_spill] sm:$0xff] }
 0x38c   :  { %5372 = vmatpush1.bf16.msra.mxu0 %v10541_v7  ;;  %5436 = vmatpush1.bf16.msra.mxu1 %v10542_v25  ;;  %v10552_v7 = vld [vmem:[#allocation135_spill] sm:$0xff]  ;;  %v10553_v25 = vld [vmem:[#allocation136_spill] sm:$0xff] }
 0x38d   :  { %5374 = vmatprep.subr.bf16.mxu0 %v10543_v17  ;;  %5438 = vmatprep.subr.bf16.mxu1 %v10544_v6  ;;  %v10554_v17 = vld [vmem:[#allocation137_spill] sm:$0xff]  ;;  %v10555_v6 = vld [vmem:[#allocation138_spill] sm:$0xff] }
 0x390   :  { %5376 = vmatpush1.bf16.msra.mxu0 %v10545_v51  ;;  %5440 = vmatpush1.bf16.msra.mxu1 %v10546_v21  ;;  %v10556_v51 = vld [vmem:[#allocation139_spill] sm:$0xff]  ;;  %v10557_v21 = vld [vmem:[#allocation140_spill] sm:$0xff] }
 0x391   :  { %5378 = vmatprep.subr.bf16.mxu0 %v10547_v57  ;;  %5442 = vmatprep.subr.bf16.mxu1 %v10548_v26  ;;  %v10558_v57 = vld [vmem:[#allocation141_spill] sm:$0xff]  ;;  %v10559_v26 = vld [vmem:[#allocation142_spill] sm:$0xff] }
 0x394   :  { %5380 = vmatpush1.bf16.msra.mxu0 %v10549_v32  ;;  %5444 = vmatpush1.bf16.msra.mxu1 %v10550_v60  ;;  %v10560_v32 = vld [vmem:[#allocation143_spill] sm:$0xff]  ;;  %v10561_v60 = vld [vmem:[#allocation144_spill] sm:$0xff] }
 0x395   :  { %5382 = vmatprep.subr.bf16.mxu0 %v10551_v5  ;;  %5446 = vmatprep.subr.bf16.mxu1 %v10552_v7  ;;  %v10562_v5 = vld [vmem:[#allocation145_spill] sm:$0xff]  ;;  %v10563_v7 = vld [vmem:[#allocation146_spill] sm:$0xff] }
 0x398   :  { %5384 = vmatpush1.bf16.msra.mxu0 %v10553_v25  ;;  %5448 = vmatpush1.bf16.msra.mxu1 %v10554_v17  ;;  %v10564_v25 = vld [vmem:[#allocation147_spill] sm:$0xff]  ;;  %v10565_v17 = vld [vmem:[#allocation148_spill] sm:$0xff] }
 0x399   :  { %5386 = vmatprep.subr.bf16.mxu0 %v10555_v6  ;;  %5450 = vmatprep.subr.bf16.mxu1 %v10556_v51  ;;  %v10566_v6 = vld [vmem:[#allocation149_spill] sm:$0xff]  ;;  %v10567_v51 = vld [vmem:[#allocation150_spill] sm:$0xff] }
 0x39c   :  { %5388 = vmatpush1.bf16.msra.mxu0 %v10557_v21  ;;  %5452 = vmatpush1.bf16.msra.mxu1 %v10558_v57  ;;  %v10568_v21 = vld [vmem:[#allocation151_spill] sm:$0xff]  ;;  %v10569_v57 = vld [vmem:[#allocation152_spill] sm:$0xff] }
 0x39d   :  { %5390 = vmatprep.subr.bf16.mxu0 %v10559_v26  ;;  %5454 = vmatprep.subr.bf16.mxu1 %v10560_v32  ;;  %v10570_v26 = vld [vmem:[#allocation153_spill] sm:$0xff]  ;;  %v10571_v32 = vld [vmem:[#allocation154_spill] sm:$0xff] }
 0x3a0   :  { %5392 = vmatpush1.bf16.msra.mxu0 %v10561_v60  ;;  %5456 = vmatpush1.bf16.msra.mxu1 %v10562_v5  ;;  %v10572_v60 = vld [vmem:[#allocation155_spill] sm:$0xff]  ;;  %v10573_v5 = vld [vmem:[#allocation156_spill] sm:$0xff] }
 0x3a1   :  { %5394 = vmatprep.subr.bf16.mxu0 %v10563_v7  ;;  %5458 = vmatprep.subr.bf16.mxu1 %v10564_v25  ;;  %v10574_v7 = vld [vmem:[#allocation157_spill] sm:$0xff]  ;;  %v10585_v25 = vld [vmem:[#allocation168_spill] sm:$0xff] }
 0x3a4   :  { %5396 = vmatpush1.bf16.msra.mxu0 %v10565_v17  ;;  %5460 = vmatpush1.bf16.msra.mxu1 %v10566_v6  ;;  %v10575_v6 = vld [vmem:[#allocation160_spill] sm:$0xff] }
 0x3a5   :  { %5398 = vmatprep.subr.bf16.mxu0 %v10567_v51  ;;  %5462 = vmatprep.subr.bf16.mxu1 %v10568_v21  ;;  %v10576_v51 = vld [vmem:[#allocation161_spill] sm:$0xff]  ;;  %v10577_v21 = vld [vmem:[#allocation162_spill] sm:$0xff] }
 0x3a8   :  { %5400 = vmatpush1.bf16.msra.mxu0 %v10569_v57  ;;  %5464 = vmatpush1.bf16.msra.mxu1 %v10570_v26  ;;  %v10578_v57 = vld [vmem:[#allocation163_spill] sm:$0xff]  ;;  %v10579_v26 = vld [vmem:[#allocation164_spill] sm:$0xff] }
 0x3a9   :  { %5402 = vmatprep.subr.bf16.mxu0 %v10571_v32  ;;  %5466 = vmatprep.subr.bf16.mxu1 %v10572_v60  ;;  %v10580_v32 = vld [vmem:[#allocation165_spill] sm:$0xff] }
 0x3aa   :  { %v10581_v60 = vld [vmem:[#allocation9_spill] sm:$0xff] }
 0x3ac   :  { %5404 = vmatpush1.bf16.msra.mxu0 %v10573_v5  ;;  %5468 = vmatpush1.bf16.msra.mxu1 %v10574_v7  ;;  %v10582_v5 = vld [vmem:[#allocation10_spill] sm:$0xff] }
 0x3ad   :  { %5406 = vmatprep.subr.bf16.mxu0 %v8466_v45  ;;  %5470 = vmatprep.subr.bf16.mxu1 %v8468_v34  ;;  %v4724_v34 = vld [vmem:[%s9958_s0 + $0x4] sm:$0x3]  ;;  %v10584_v45 = vld [vmem:[#allocation167_spill] sm:$0xff] }
 0x3ae   :  { %1504 = vperm.xlu1 %7430, %v4724_v34  }
 0x3b0   :  { %5408 = vmatpush1.bf16.msra.mxu0 %v10575_v6  ;;  %5472 = vmatpush1.bf16.msra.mxu1 %v10576_v51  ;;  %v4734_v51 = vld [vmem:[%s9958_s0 + $0x6] sm:$0x3] }
 0x3b1   :  { %5410 = vmatprep.subr.bf16.mxu0 %v10577_v21  ;;  %5474 = vmatprep.subr.bf16.mxu1 %v10578_v57  ;;  %v10583_v57 = vld [vmem:[#allocation166_spill] sm:$0xff] }
 0x3b2   :  { %2021 = vperm.xlu1 %7430, %v4734_v51  }
 0x3b4   :  { %5412 = vmatpush1.bf16.msra.mxu0 %v10579_v26  ;;  %5476 = vmatpush1.bf16.msra.mxu1 %v10580_v32  ;;  %v4754_v26 = vld [vmem:[%s9958_s0 + $0xa] sm:$0x3] }
 0x3b5   :  { %5478 = vmatprep.subr.bf16.mxu0 %v10581_v60  ;;  %5510 = vmatprep.subr.bf16.mxu1 %v10582_v5  ;;  %v4774_v60 = vld [vmem:[%s9958_s0 + $0xe] sm:$0x3] }
 0x3b6   :  { %3055 = vperm.xlu1 %7430, %v4754_v26  }
 0x3ba   :  { %4089 = vperm.xlu1 %7430, %v4774_v60  }
 0x449   :  { %v1234_v5 = vpop.f32.mrb[8].mxu0  ;;  %v1305_v32 = vpop.f32.mrb[8].mxu1 }
 0x44a   :  { %v1235_v21 = vadd.f32 %v1234_v5, %v10583_v57  ;;  %v1236_v34 = vpop.f32.mrb[9].mxu0  ;;  %v1307_v6 = vpop.f32.mrb[9].mxu1  ;;  %v1306_v44 = vadd.f32 %v1305_v32, %v8509_v62 }
 0x44b   :  { %v1237_v7 = vadd.f32 %v1236_v34, %v10584_v45  ;;  %v1308_v56 = vadd.f32 %v1307_v6, %v10585_v25 }
 0x44c   :  { %v4718_v17 = vmul.f32 -1.442695, %v1235_v21 }
 0x44d   :  { %v4719_v51 = vmul.f32 -1.442695, %v1237_v7  ;;  %v4720_v26 = vmul.f32 -1.442695, %v1308_v56 }
 0x44e   :  { %7495 = vpow2.f32 %v4718_v17 }
 0x44f   :  { %7497 = vpow2.f32 %v4719_v51 }
 0x450   :  { %7499 = vpow2.f32 %v4720_v26  ;;  %v10591_v26 = vld [vmem:[#allocation34_spill] sm:$0xff] }
 0x451   :  { %7501 = vtanh.f32 %v1306_v44  ;;  %v10588_v44 = vld [vmem:[#allocation31_spill] sm:$0xff] }
 0x458   :  { %v7496_v8 = vpop.eup %7495 }
 0x459   :  { %v7498_v47 = vpop.eup %7497  ;;  %v1316_v60 = vadd.f32 1.0, %v7496_v8 }
 0x45a   :  { %v1317_v27 = vadd.f32 1.0, %v7498_v47  ;;  %v7500_v5 = vpop.eup %7499  ;;  %v10587_v47 = vld [vmem:[#allocation30_spill] sm:$0xff] }
 0x45b   :  { %7503 = vrcp.f32 %v1316_v60  ;;  %v7502_v57 = vpop.eup %7501  ;;  %v1326_v17 = vadd.f32 1.0, %v7500_v5  ;;  %v10592_v60 = vld [vmem:[#allocation35_spill] sm:$0xff]  ;;  %v10593_v5 = vld [vmem:[#allocation36_spill] sm:$0xff] }
 0x45c   :  { %7505 = vrcp.f32 %v1317_v27  ;;  %v10586_v27 = vld [vmem:[#allocation29_spill] sm:$0xff] }
 0x45d   :  { %7507 = vrcp.f32 %v1326_v17  ;;  %v10597_v17 = vld [vmem:[#allocation40_spill] sm:$0xff] }
 0x465   :  { %v7504_v34 = vpop.eup %7503 }
 0x466   :  { %v7506_v21 = vpop.eup %7505  ;;  %v1330_v7 = vmul.f32 %v7504_v34, %v7502_v57  ;;  %v10590_v57 = vld [vmem:[#allocation33_spill] sm:$0xff] }
 0x467   :  { %v1329_v51 = vmul.f32 %v7506_v21, %v8512_v50  ;;  %v7508_v56 = vpop.eup %7507  ;;  %v10589_v50 = vld [vmem:[#allocation32_spill] sm:$0xff]  ;;  %v10594_v34 = vld [vmem:[#allocation37_spill] sm:$0xff]  ;;  %v10595_v21 = vld [vmem:[#allocation38_spill] sm:$0xff] }
 0x469   :  { %v8734_v6 = vadd.f32 %v1330_v7, %v1329_v51  ;;  %v10596_v7 = vld [vmem:[#allocation39_spill] sm:$0xff]  ;;  %v10599_v51 = vld [vmem:[#allocation42_spill] sm:$0xff] }
 0x46b   :  { %7509 = vtanh.f32 %v8734_v6 }
 0x475   :  { %v7510_v8 = vpop.eup %7509 }
 0x476   :  { %v1333_v32 = vmul.f32 %v7510_v8, %v7508_v56  ;;  %v10600_v56 = vld [vmem:[#allocation43_spill] sm:$0xff]  ;;  %v10601_v8 = vld [vmem:[#allocation44_spill] sm:$0xff] }
 0x478   :  { %1399 = vmatmul.mubr.f32.vlgmr.msra.gmra.mrb[10].mxu0 %v1333_v32  ;;  %1470 = vmatmul.mubr.f32.vlgmr.msra.gmra.mrb[10].mxu1 %v1333_v32 }
 0x479   :  { %5480 = vmatpush1.bf16.msra.mxu0 %v7944_v11  ;;  %5512 = vmatpush1.bf16.msra.mxu1 %v7947_v15 }
 0x47a   :  { %5482 = vmatprep.subr.bf16.mxu0 %v7951_v19  ;;  %5514 = vmatprep.subr.bf16.mxu1 %v7953_v20 }
 0x47b   :  { %1575 = vmatprep.mubr.f32.mxu0 %v10394_v12  ;;  %1646 = vmatprep.mubr.f32.mxu1 %v10394_v12 }
 0x47d   :  { %5484 = vmatpush1.bf16.msra.mxu0 %v7956_v24  ;;  %5516 = vmatpush1.bf16.msra.mxu1 %v7960_v28 }
 0x47e   :  { %5486 = vmatprep.subr.bf16.mxu0 %v7962_v29  ;;  %5518 = vmatprep.subr.bf16.mxu1 %v7964_v33 }
 0x481   :  { %5488 = vmatpush1.bf16.msra.mxu0 %v7967_v37  ;;  %5520 = vmatpush1.bf16.msra.mxu1 %v7971_v41 }
 0x482   :  { %5490 = vmatprep.subr.bf16.mxu0 %v7973_v42  ;;  %5522 = vmatprep.subr.bf16.mxu1 %v7976_v46 }
 0x485   :  { %5492 = vmatpush1.bf16.msra.mxu0 %v7979_v53  ;;  %5524 = vmatpush1.bf16.msra.mxu1 %v7983_v54 }
 0x486   :  { %5494 = vmatprep.subr.bf16.mxu0 %v7985_v55  ;;  %5526 = vmatprep.subr.bf16.mxu1 %v7988_v59 }
 0x489   :  { %5496 = vmatpush1.bf16.msra.mxu0 %v7991_v2  ;;  %5528 = vmatpush1.bf16.msra.mxu1 %v7995_v3 }
 0x48a   :  { %5498 = vmatprep.subr.bf16.mxu0 %v7997_v4  ;;  %5530 = vmatprep.subr.bf16.mxu1 %v8000_v9 }
 0x48d   :  { %5500 = vmatpush1.bf16.msra.mxu0 %v8003_v18  ;;  %5532 = vmatpush1.bf16.msra.mxu1 %v8007_v22 }
 0x48e   :  { %5502 = vmatprep.subr.bf16.mxu0 %v8009_v23  ;;  %5534 = vmatprep.subr.bf16.mxu1 %v8015_v30  ;;  %v10660_v30 = vld [vmem:[#allocation100_spill] sm:$0xff] }
 0x491   :  { %5504 = vmatpush1.bf16.msra.mxu0 %v8021_v39  ;;  %5536 = vmatpush1.bf16.msra.mxu1 %v8025_v40  ;;  %v10659_v40 = vld [vmem:[#allocation99_spill] sm:$0xff] }
 0x492   :  { %5506 = vmatprep.subr.bf16.mxu0 %v8027_v43  ;;  %5538 = vmatprep.subr.bf16.mxu1 %v8030_v48  ;;  %v10656_v43 = vld [vmem:[#allocation96_spill] sm:$0xff] }
 0x495   :  { %5508 = vmatpush1.bf16.msra.mxu0 %v8036_v58  ;;  %5540 = vmatpush1.bf16.msra.mxu1 %v10586_v27 }
 0x496   :  { %5542 = vmatprep.subr.bf16.mxu0 %v10587_v47  ;;  %5606 = vmatprep.subr.bf16.mxu1 %v10588_v44 }
 0x498   :  { %1576 = vmatmul.mubr.f32.vlgmr.msra.gmra.mrb[12].mxu0 %v8649_v14  ;;  %1647 = vmatmul.mubr.f32.vlgmr.msra.gmra.mrb[12].mxu1 %v8649_v14  ;;  %v10598_v14 = vld [vmem:[#allocation41_spill] sm:$0xff] }
 0x499   :  { %1749 = vmatprep.mubr.f32.mxu0 %v1333_v32  ;;  %1820 = vmatprep.mubr.f32.mxu1 %v1333_v32  ;;  %v10602_v32 = vld [vmem:[#allocation45_spill] sm:$0xff] }
 0x49a   :  { %5544 = vmatpush1.bf16.msra.mxu0 %v10589_v50  ;;  %5608 = vmatpush1.bf16.msra.mxu1 %v10590_v57  ;;  %v10654_v50 = vld [vmem:[#allocation170_spill] sm:$0xff] }
 0x49b   :  { %5546 = vmatprep.subr.bf16.mxu0 %v10591_v26  ;;  %5610 = vmatprep.subr.bf16.mxu1 %v10592_v60  ;;  %v10603_v60 = vld [vmem:[#allocation46_spill] sm:$0xff]  ;;  %v10653_v26 = vld [vmem:[#allocation169_spill] sm:$0xff] }
 0x49e   :  { %5548 = vmatpush1.bf16.msra.mxu0 %v10593_v5  ;;  %5612 = vmatpush1.bf16.msra.mxu1 %v10594_v34  ;;  %v10604_v5 = vld [vmem:[#allocation47_spill] sm:$0xff]  ;;  %v10605_v34 = vld [vmem:[#allocation48_spill] sm:$0xff] }
 0x49f   :  { %5550 = vmatprep.subr.bf16.mxu0 %v10595_v21  ;;  %5614 = vmatprep.subr.bf16.mxu1 %v10596_v7  ;;  %v10606_v21 = vld [vmem:[#allocation49_spill] sm:$0xff]  ;;  %v10607_v7 = vld [vmem:[#allocation50_spill] sm:$0xff] }
 0x4a2   :  { %5552 = vmatpush1.bf16.msra.mxu0 %v10597_v17  ;;  %5616 = vmatpush1.bf16.msra.mxu1 %v10598_v14  ;;  %v10608_v17 = vld [vmem:[#allocation51_spill] sm:$0xff]  ;;  %v10609_v14 = vld [vmem:[#allocation52_spill] sm:$0xff] }
 0x4a3   :  { %5554 = vmatprep.subr.bf16.mxu0 %v10599_v51  ;;  %5618 = vmatprep.subr.bf16.mxu1 %v10600_v56  ;;  %v10610_v51 = vld [vmem:[#allocation53_spill] sm:$0xff]  ;;  %v10611_v56 = vld [vmem:[#allocation54_spill] sm:$0xff] }
 0x4a6   :  { %5556 = vmatpush1.bf16.msra.mxu0 %v10601_v8  ;;  %5620 = vmatpush1.bf16.msra.mxu1 %v10602_v32  ;;  %v10612_v8 = vld [vmem:[#allocation55_spill] sm:$0xff]  ;;  %v10613_v32 = vld [vmem:[#allocation56_spill] sm:$0xff] }
 0x4a7   :  { %5558 = vmatprep.subr.bf16.mxu0 %v10603_v60  ;;  %5622 = vmatprep.subr.bf16.mxu1 %v10604_v5  ;;  %v10614_v60 = vld [vmem:[#allocation57_spill] sm:$0xff]  ;;  %v10615_v5 = vld [vmem:[#allocation58_spill] sm:$0xff] }
 0x4aa   :  { %5560 = vmatpush1.bf16.msra.mxu0 %v10605_v34  ;;  %5624 = vmatpush1.bf16.msra.mxu1 %v10606_v21  ;;  %v10616_v34 = vld [vmem:[#allocation59_spill] sm:$0xff]  ;;  %v10617_v21 = vld [vmem:[#allocation60_spill] sm:$0xff] }
 0x4ab   :  { %5562 = vmatprep.subr.bf16.mxu0 %v10607_v7  ;;  %5626 = vmatprep.subr.bf16.mxu1 %v10608_v17  ;;  %v10618_v7 = vld [vmem:[#allocation61_spill] sm:$0xff]  ;;  %v10619_v17 = vld [vmem:[#allocation62_spill] sm:$0xff] }
 0x4ae   :  { %5564 = vmatpush1.bf16.msra.mxu0 %v10609_v14  ;;  %5628 = vmatpush1.bf16.msra.mxu1 %v10610_v51  ;;  %v10620_v14 = vld [vmem:[#allocation63_spill] sm:$0xff]  ;;  %v10621_v51 = vld [vmem:[#allocation64_spill] sm:$0xff] }
 0x4af   :  { %5566 = vmatprep.subr.bf16.mxu0 %v10611_v56  ;;  %5630 = vmatprep.subr.bf16.mxu1 %v10612_v8  ;;  %v10622_v56 = vld [vmem:[#allocation65_spill] sm:$0xff]  ;;  %v10623_v8 = vld [vmem:[#allocation66_spill] sm:$0xff] }
 0x4b2   :  { %5568 = vmatpush1.bf16.msra.mxu0 %v10613_v32  ;;  %5632 = vmatpush1.bf16.msra.mxu1 %v10614_v60  ;;  %v10624_v32 = vld [vmem:[#allocation67_spill] sm:$0xff]  ;;  %v10625_v60 = vld [vmem:[#allocation68_spill] sm:$0xff] }
 0x4b3   :  { %5570 = vmatprep.subr.bf16.mxu0 %v10615_v5  ;;  %5634 = vmatprep.subr.bf16.mxu1 %v10616_v34  ;;  %v10626_v5 = vld [vmem:[#allocation69_spill] sm:$0xff]  ;;  %v10627_v34 = vld [vmem:[#allocation70_spill] sm:$0xff] }
 0x4b6   :  { %5572 = vmatpush1.bf16.msra.mxu0 %v10617_v21  ;;  %5636 = vmatpush1.bf16.msra.mxu1 %v10618_v7  ;;  %v10628_v21 = vld [vmem:[#allocation71_spill] sm:$0xff]  ;;  %v10629_v7 = vld [vmem:[#allocation72_spill] sm:$0xff] }
 0x4b7   :  { %5574 = vmatprep.subr.bf16.mxu0 %v10619_v17  ;;  %5638 = vmatprep.subr.bf16.mxu1 %v10620_v14  ;;  %v10630_v17 = vld [vmem:[#allocation73_spill] sm:$0xff]  ;;  %v10631_v14 = vld [vmem:[#allocation74_spill] sm:$0xff] }
 0x4ba   :  { %5576 = vmatpush1.bf16.msra.mxu0 %v10621_v51  ;;  %5640 = vmatpush1.bf16.msra.mxu1 %v10622_v56  ;;  %v10632_v51 = vld [vmem:[#allocation75_spill] sm:$0xff]  ;;  %v10633_v56 = vld [vmem:[#allocation76_spill] sm:$0xff] }
 0x4bb   :  { %5578 = vmatprep.subr.bf16.mxu0 %v10623_v8  ;;  %5642 = vmatprep.subr.bf16.mxu1 %v10624_v32  ;;  %v10634_v8 = vld [vmem:[#allocation77_spill] sm:$0xff]  ;;  %v10635_v32 = vld [vmem:[#allocation78_spill] sm:$0xff] }
 0x4be   :  { %5580 = vmatpush1.bf16.msra.mxu0 %v10625_v60  ;;  %5644 = vmatpush1.bf16.msra.mxu1 %v10626_v5  ;;  %v10636_v60 = vld [vmem:[#allocation79_spill] sm:$0xff]  ;;  %v10637_v5 = vld [vmem:[#allocation80_spill] sm:$0xff] }
 0x4bf   :  { %5582 = vmatprep.subr.bf16.mxu0 %v10627_v34  ;;  %5646 = vmatprep.subr.bf16.mxu1 %v10628_v21  ;;  %v10638_v34 = vld [vmem:[#allocation81_spill] sm:$0xff]  ;;  %v10639_v21 = vld [vmem:[#allocation82_spill] sm:$0xff] }
 0x4c2   :  { %5584 = vmatpush1.bf16.msra.mxu0 %v10629_v7  ;;  %5648 = vmatpush1.bf16.msra.mxu1 %v10630_v17  ;;  %v10640_v7 = vld [vmem:[#allocation83_spill] sm:$0xff]  ;;  %v10641_v17 = vld [vmem:[#allocation84_spill] sm:$0xff] }
 0x4c3   :  { %5586 = vmatprep.subr.bf16.mxu0 %v10631_v14  ;;  %5650 = vmatprep.subr.bf16.mxu1 %v10632_v51  ;;  %v10642_v14 = vld [vmem:[#allocation85_spill] sm:$0xff]  ;;  %v10643_v51 = vld [vmem:[#allocation86_spill] sm:$0xff] }
 0x4c6   :  { %5588 = vmatpush1.bf16.msra.mxu0 %v10633_v56  ;;  %5652 = vmatpush1.bf16.msra.mxu1 %v10634_v8  ;;  %v10644_v56 = vld [vmem:[#allocation87_spill] sm:$0xff]  ;;  %v10645_v8 = vld [vmem:[#allocation88_spill] sm:$0xff] }
 0x4c7   :  { %5590 = vmatprep.subr.bf16.mxu0 %v10635_v32  ;;  %5654 = vmatprep.subr.bf16.mxu1 %v10636_v60  ;;  %v10646_v32 = vld [vmem:[#allocation89_spill] sm:$0xff]  ;;  %v10647_v60 = vld [vmem:[#allocation90_spill] sm:$0xff] }
 0x4ca   :  { %5592 = vmatpush1.bf16.msra.mxu0 %v10637_v5  ;;  %5656 = vmatpush1.bf16.msra.mxu1 %v10638_v34  ;;  %v10648_v5 = vld [vmem:[#allocation91_spill] sm:$0xff]  ;;  %v10649_v34 = vld [vmem:[#allocation92_spill] sm:$0xff] }
 0x4cb   :  { %5594 = vmatprep.subr.bf16.mxu0 %v10639_v21  ;;  %5658 = vmatprep.subr.bf16.mxu1 %v10640_v7  ;;  %v10650_v21 = vld [vmem:[#allocation93_spill] sm:$0xff]  ;;  %v10651_v7 = vld [vmem:[#allocation94_spill] sm:$0xff] }
 0x4ce   :  { %5596 = vmatpush1.bf16.msra.mxu0 %v10641_v17  ;;  %5660 = vmatpush1.bf16.msra.mxu1 %v10642_v14  ;;  %v10652_v17 = vld [vmem:[#allocation95_spill] sm:$0xff] }
 0x4cf   :  { %5598 = vmatprep.subr.bf16.mxu0 %v10643_v51  ;;  %5662 = vmatprep.subr.bf16.mxu1 %v10644_v56 }
 0x4d2   :  { %5600 = vmatpush1.bf16.msra.mxu0 %v10645_v8  ;;  %5664 = vmatpush1.bf16.msra.mxu1 %v10646_v32 }
 0x4d3   :  { %5602 = vmatprep.subr.bf16.mxu0 %v10647_v60  ;;  %5666 = vmatprep.subr.bf16.mxu1 %v10648_v5  ;;  %v10655_v5 = vld [vmem:[#allocation171_spill] sm:$0xff] }
 0x4d6   :  { %5604 = vmatpush1.bf16.msra.mxu0 %v10649_v34  ;;  %5668 = vmatpush1.bf16.msra.mxu1 %v10650_v21 }
 0x4d7   :  { %5670 = vmatprep.subr.bf16.mxu0 %v10651_v7  ;;  %5734 = vmatprep.subr.bf16.mxu1 %v10652_v17 }
 0x54b   :  { %v1400_v14 = vpop.f32.mrb[10].mxu0  ;;  %v1471_v51 = vpop.f32.mrb[10].mxu1 }
 0x54c   :  { %v1401_v56 = vadd.f32 %v1400_v14, %v10653_v26  ;;  %v1402_v57 = vpop.f32.mrb[11].mxu0  ;;  %v1473_v8 = vpop.f32.mrb[11].mxu1  ;;  %v1472_v34 = vadd.f32 %v1471_v51, %v10655_v5 }
 0x54d   :  { %v1403_v32 = vadd.f32 %v1402_v57, %v10654_v50  ;;  %v1505_v14 = vpop.permute.xlu1 %1504 }
 0x54e   :  { %v4721_v44 = vmul.f32 -1.442695, %v1401_v56  ;;  %v1507_v57 = vmul.f32 %v1505_v14, %v10656_v43 }
 0x54f   :  { %v4722_v60 = vmul.f32 -1.442695, %v1403_v32 }
 0x550   :  { %7511 = vpow2.f32 %v4721_v44  ;;  %v10657_v44 = vld [vmem:[#allocation97_spill] sm:$0xff] }
 0x551   :  { %7513 = vpow2.f32 %v4722_v60  ;;  %v1508_v60 = vmul.f32 %v1505_v14, %v10657_v44 }
 0x552   :  { %7515 = vtanh.f32 %v1472_v34 }
 0x55a   :  { %v7512_v47 = vpop.eup %7511 }
 0x55b   :  { %v7514_v21 = vpop.eup %7513  ;;  %v1482_v27 = vadd.f32 1.0, %v7512_v47 }
 0x55c   :  { %v1483_v7 = vadd.f32 1.0, %v7514_v21  ;;  %v7516_v17 = vpop.eup %7515 }
 0x55d   :  { %7517 = vrcp.f32 %v1482_v27 }
 0x55e   :  { %7519 = vrcp.f32 %v1483_v7  ;;  %v10658_v7 = vld [vmem:[#allocation98_spill] sm:$0xff] }
 0x55f   :  { %v1510_v50 = vmul.f32 %v1505_v14, %v10658_v7 }
 0x567   :  { %v7518_v58 = vpop.eup %7517 }
 0x568   :  { %v7520_v26 = vpop.eup %7519  ;;  %v1496_v48 = vmul.f32 %v7518_v58, %v7516_v17 }
 0x569   :  { %v1495_v56 = vmul.f32 %v7520_v26, %v8631_v10  ;;  %v1509_v10 = vmul.f32 %v1505_v14, %v10522_v49 }
 0x56b   :  { %v1577_v32 = vpop.f32.mrb[12].mxu0  ;;  %v1648_v51 = vpop.f32.mrb[12].mxu1  ;;  %v8843_v5 = vadd.f32 %v1496_v48, %v1495_v56  ;;  %v1474_v48 = vadd.f32 %v1473_v8, %v8638_v31 }
 0x56c   :  { %v1653_v47 = vadd.f32 %v1577_v32, %v1507_v57  ;;  %v1579_v34 = vpop.f32.mrb[13].mxu0  ;;  %v1650_v21 = vpop.f32.mrb[13].mxu1  ;;  %v1655_v57 = vadd.f32 %v1648_v51, %v1509_v10 }
 0x56d   :  { %v1654_v27 = vadd.f32 %v1579_v34, %v1508_v60  ;;  %v1656_v23 = vadd.f32 %v1650_v21, %v1510_v50  ;;  %v4723_v56 = vmul.f32 -1.442695, %v1474_v48 }
 0x56e   :  { %v1657_v39 = vadd.f32 %v1653_v47, %v10659_v40  ;;  %v1659_v32 = vadd.f32 %v1655_v57, %v10524_v36 }
 0x56f   :  { %v1658_v58 = vadd.f32 %v1654_v27, %v10660_v30  ;;  %v1660_v26 = vadd.f32 %v1656_v23, %v10523_v63 }
 0x570   :  { %v4725_v17 = vmul.f32 -1.442695, %v1657_v39 }
 0x571   :  { %v4726_v43 = vmul.f32 -1.442695, %v1658_v58  ;;  %v4727_v60 = vmul.f32 -1.442695, %v1660_v26 }
 0x572   :  { %7521 = vpow2.f32 %v4725_v17 }
 0x573   :  { %7523 = vpow2.f32 %v4726_v43 }
 0x574   :  { %7525 = vpow2.f32 %v4723_v56 }
 0x575   :  { %7527 = vpow2.f32 %v4727_v60 }
 0x576   :  { %7529 = vtanh.f32 %v1659_v32 }
 0x57c   :  { %v7522_v34 = vpop.eup %7521 }
 0x57d   :  { %v7524_v47 = vpop.eup %7523  ;;  %v1667_v27 = vadd.f32 1.0, %v7522_v34  ;;  %v10662_v34 = vld [vmem:[#allocation112_spill] sm:$0xff] }
 0x57e   :  { %v1668_v39 = vadd.f32 1.0, %v7524_v47  ;;  %v7526_v50 = vpop.eup %7525  ;;  %v10663_v47 = vld [vmem:[#allocation113_spill] sm:$0xff] }
 0x57f   :  { %7531 = vrcp.f32 %v1667_v27  ;;  %v7528_v43 = vpop.eup %7527  ;;  %v1492_v17 = vadd.f32 1.0, %v7526_v50  ;;  %v10664_v27 = vld [vmem:[#allocation114_spill] sm:$0xff]  ;;  %v10666_v50 = vld [vmem:[#allocation116_spill] sm:$0xff] }
 0x580   :  { %7533 = vrcp.f32 %v1668_v39  ;;  %v7530_v14 = vpop.eup %7529  ;;  %v1677_v51 = vadd.f32 1.0, %v7528_v43  ;;  %v10665_v39 = vld [vmem:[#allocation115_spill] sm:$0xff]  ;;  %v10667_v43 = vld [vmem:[#allocation117_spill] sm:$0xff] }
 0x581   :  { %7535 = vtanh.f32 %v8843_v5 }
 0x582   :  { %7537 = vrcp.f32 %v1677_v51  ;;  %v10672_v51 = vld [vmem:[#allocation122_spill] sm:$0xff] }
 0x589   :  { %v7532_v8 = vpop.eup %7531 }
 0x58a   :  { %v7534_v21 = vpop.eup %7533  ;;  %v1681_v23 = vmul.f32 %v7532_v8, %v7530_v14  ;;  %v10668_v14 = vld [vmem:[#allocation118_spill] sm:$0xff]  ;;  %v10669_v8 = vld [vmem:[#allocation119_spill] sm:$0xff] }
 0x58b   :  { %v1680_v58 = vmul.f32 %v7534_v21, %v8646_v35  ;;  %v7536_v48 = vpop.eup %7535  ;;  %v10661_v35 = vld [vmem:[#allocation111_spill] sm:$0xff]  ;;  %v10670_v21 = vld [vmem:[#allocation120_spill] sm:$0xff] }
 0x58c   :  { %v7538_v26 = vpop.eup %7537 }
 0x58d   :  { %v8853_v10 = vadd.f32 %v1681_v23, %v1680_v58  ;;  %v10671_v23 = vld [vmem:[#allocation121_spill] sm:$0xff]  ;;  %v10673_v58 = vld [vmem:[#allocation123_spill] sm:$0xff] }
 0x58f   :  { %7539 = vtanh.f32 %v8853_v10 }
 0x590   :  { %7541 = vrcp.f32 %v1492_v17  ;;  %v10674_v17 = vld [vmem:[#allocation124_spill] sm:$0xff] }
 0x599   :  { %v7540_v57 = vpop.eup %7539 }
 0x59a   :  { %v7542_v56 = vpop.eup %7541  ;;  %v8857_v60 = vmul.f32 %v7540_v57, %v7538_v26  ;;  %v10676_v26 = vld [vmem:[#allocation126_spill] sm:$0xff]  ;;  %v10677_v57 = vld [vmem:[#allocation127_spill] sm:$0xff] }
 0x59b   :  { %v1499_v32 = vmul.f32 %v7542_v56, %v7536_v48  ;;  %v10675_v48 = vld [vmem:[#allocation125_spill] sm:$0xff]  ;;  %v10678_v56 = vld [vmem:[#allocation128_spill] sm:$0xff] }
 0x59c   :  { %1750 = vmatmul.mubr.f32.vlgmr.msra.gmra.mrb[14].mxu0 %v8857_v60  ;;  %1821 = vmatmul.mubr.f32.vlgmr.msra.gmra.mrb[14].mxu1 %v8857_v60 }
 0x59d   :  { %1915 = vmatprep.mubr.f32.mxu0 %v1499_v32  ;;  %1986 = vmatprep.mubr.f32.mxu1 %v1499_v32  ;;  %v10679_v32 = vld [vmem:[#allocation129_spill] sm:$0xff] }
 0x59e   :  { %5672 = vmatpush1.bf16.msra.mxu0 %v10526_v0  ;;  %5736 = vmatpush1.bf16.msra.mxu1 %v10527_v16 }
 0x59f   :  { %5674 = vmatprep.subr.bf16.mxu0 %v10528_v61  ;;  %5738 = vmatprep.subr.bf16.mxu1 %v10529_v52 }
 0x5a2   :  { %5676 = vmatpush1.bf16.msra.mxu0 %v10530_v38  ;;  %5740 = vmatpush1.bf16.msra.mxu1 %v10531_v13 }
 0x5a3   :  { %5678 = vmatprep.subr.bf16.mxu0 %v8319_v1  ;;  %5742 = vmatprep.subr.bf16.mxu1 %v10661_v35 }
 0x5a6   :  { %5680 = vmatpush1.bf16.msra.mxu0 %v10662_v34  ;;  %5744 = vmatpush1.bf16.msra.mxu1 %v10663_v47 }
 0x5a7   :  { %5682 = vmatprep.subr.bf16.mxu0 %v10664_v27  ;;  %5746 = vmatprep.subr.bf16.mxu1 %v10665_v39 }
 0x5aa   :  { %5684 = vmatpush1.bf16.msra.mxu0 %v10666_v50  ;;  %5748 = vmatpush1.bf16.msra.mxu1 %v10667_v43 }
 0x5ab   :  { %5686 = vmatprep.subr.bf16.mxu0 %v10668_v14  ;;  %5750 = vmatprep.subr.bf16.mxu1 %v10669_v8  ;;  %v10680_v8 = vld [vmem:[#allocation130_spill] sm:$0xff] }
 0x5ac   :  { %v10718_v14 = vld [vmem:[#allocation166_spill] sm:$0xff] }
 0x5ae   :  { %5688 = vmatpush1.bf16.msra.mxu0 %v10670_v21  ;;  %5752 = vmatpush1.bf16.msra.mxu1 %v10671_v23  ;;  %v10681_v21 = vld [vmem:[#allocation131_spill] sm:$0xff]  ;;  %v10682_v23 = vld [vmem:[#allocation132_spill] sm:$0xff] }
 0x5af   :  { %5690 = vmatprep.subr.bf16.mxu0 %v10672_v51  ;;  %5754 = vmatprep.subr.bf16.mxu1 %v10673_v58  ;;  %v10683_v51 = vld [vmem:[#allocation133_spill] sm:$0xff]  ;;  %v10684_v58 = vld [vmem:[#allocation134_spill] sm:$0xff] }
 0x5b2   :  { %5692 = vmatpush1.bf16.msra.mxu0 %v10674_v17  ;;  %5756 = vmatpush1.bf16.msra.mxu1 %v10675_v48  ;;  %v10685_v17 = vld [vmem:[#allocation135_spill] sm:$0xff]  ;;  %v10686_v48 = vld [vmem:[#allocation136_spill] sm:$0xff] }
 0x5b3   :  { %5694 = vmatprep.subr.bf16.mxu0 %v10676_v26  ;;  %5758 = vmatprep.subr.bf16.mxu1 %v10677_v57  ;;  %v10687_v26 = vld [vmem:[#allocation137_spill] sm:$0xff]  ;;  %v10688_v57 = vld [vmem:[#allocation138_spill] sm:$0xff] }
 0x5b6   :  { %5696 = vmatpush1.bf16.msra.mxu0 %v10678_v56  ;;  %5760 = vmatpush1.bf16.msra.mxu1 %v10679_v32  ;;  %v10689_v56 = vld [vmem:[#allocation139_spill] sm:$0xff]  ;;  %v10690_v32 = vld [vmem:[#allocation140_spill] sm:$0xff] }
 0x5b7   :  { %5698 = vmatprep.subr.bf16.mxu0 %v10680_v8  ;;  %5762 = vmatprep.subr.bf16.mxu1 %v10681_v21  ;;  %v10691_v8 = vld [vmem:[#allocation141_spill] sm:$0xff]  ;;  %v10692_v21 = vld [vmem:[#allocation142_spill] sm:$0xff] }
 0x5ba   :  { %5700 = vmatpush1.bf16.msra.mxu0 %v10682_v23  ;;  %5764 = vmatpush1.bf16.msra.mxu1 %v10683_v51  ;;  %v10693_v23 = vld [vmem:[#allocation143_spill] sm:$0xff]  ;;  %v10694_v51 = vld [vmem:[#allocation144_spill] sm:$0xff] }
 0x5bb   :  { %5702 = vmatprep.subr.bf16.mxu0 %v10684_v58  ;;  %5766 = vmatprep.subr.bf16.mxu1 %v10685_v17  ;;  %v10695_v58 = vld [vmem:[#allocation145_spill] sm:$0xff]  ;;  %v10696_v17 = vld [vmem:[#allocation146_spill] sm:$0xff] }
 0x5be   :  { %5704 = vmatpush1.bf16.msra.mxu0 %v10686_v48  ;;  %5768 = vmatpush1.bf16.msra.mxu1 %v10687_v26  ;;  %v10697_v48 = vld [vmem:[#allocation147_spill] sm:$0xff]  ;;  %v10698_v26 = vld [vmem:[#allocation148_spill] sm:$0xff] }
 0x5bf   :  { %5706 = vmatprep.subr.bf16.mxu0 %v10688_v57  ;;  %5770 = vmatprep.subr.bf16.mxu1 %v10689_v56  ;;  %v10699_v57 = vld [vmem:[#allocation149_spill] sm:$0xff]  ;;  %v10700_v56 = vld [vmem:[#allocation150_spill] sm:$0xff] }
 0x5c2   :  { %5708 = vmatpush1.bf16.msra.mxu0 %v10690_v32  ;;  %5772 = vmatpush1.bf16.msra.mxu1 %v10691_v8  ;;  %v10701_v32 = vld [vmem:[#allocation151_spill] sm:$0xff]  ;;  %v10702_v8 = vld [vmem:[#allocation152_spill] sm:$0xff] }
 0x5c3   :  { %5710 = vmatprep.subr.bf16.mxu0 %v10692_v21  ;;  %5774 = vmatprep.subr.bf16.mxu1 %v10693_v23  ;;  %v10703_v21 = vld [vmem:[#allocation153_spill] sm:$0xff]  ;;  %v10704_v23 = vld [vmem:[#allocation154_spill] sm:$0xff] }
 0x5c6   :  { %5712 = vmatpush1.bf16.msra.mxu0 %v10694_v51  ;;  %5776 = vmatpush1.bf16.msra.mxu1 %v10695_v58  ;;  %v10705_v51 = vld [vmem:[#allocation155_spill] sm:$0xff]  ;;  %v10706_v58 = vld [vmem:[#allocation156_spill] sm:$0xff] }
 0x5c7   :  { %5714 = vmatprep.subr.bf16.mxu0 %v10696_v17  ;;  %5778 = vmatprep.subr.bf16.mxu1 %v10697_v48  ;;  %v10707_v17 = vld [vmem:[#allocation157_spill] sm:$0xff]  ;;  %v10708_v48 = vld [vmem:[#allocation158_spill] sm:$0xff] }
 0x5ca   :  { %5716 = vmatpush1.bf16.msra.mxu0 %v10698_v26  ;;  %5780 = vmatpush1.bf16.msra.mxu1 %v10699_v57  ;;  %v10709_v26 = vld [vmem:[#allocation159_spill] sm:$0xff]  ;;  %v10710_v57 = vld [vmem:[#allocation160_spill] sm:$0xff] }
 0x5cb   :  { %5718 = vmatprep.subr.bf16.mxu0 %v10700_v56  ;;  %5782 = vmatprep.subr.bf16.mxu1 %v10701_v32  ;;  %v10711_v56 = vld [vmem:[#allocation161_spill] sm:$0xff]  ;;  %v10712_v32 = vld [vmem:[#allocation162_spill] sm:$0xff] }
 0x5ce   :  { %5720 = vmatpush1.bf16.msra.mxu0 %v10702_v8  ;;  %5784 = vmatpush1.bf16.msra.mxu1 %v10703_v21  ;;  %v10713_v8 = vld [vmem:[#allocation163_spill] sm:$0xff]  ;;  %v10714_v21 = vld [vmem:[#allocation164_spill] sm:$0xff] }
 0x5cf   :  { %5722 = vmatprep.subr.bf16.mxu0 %v10704_v23  ;;  %5786 = vmatprep.subr.bf16.mxu1 %v10705_v51  ;;  %v10715_v23 = vld [vmem:[#allocation165_spill] sm:$0xff] }
 0x5d0   :  { %v10716_v51 = vld [vmem:[#allocation9_spill] sm:$0xff] }
 0x5d2   :  { %5724 = vmatpush1.bf16.msra.mxu0 %v10706_v58  ;;  %5788 = vmatpush1.bf16.msra.mxu1 %v10707_v17  ;;  %v10717_v58 = vld [vmem:[#allocation10_spill] sm:$0xff] }
 0x5d3   :  { %5726 = vmatprep.subr.bf16.mxu0 %v10708_v48  ;;  %5790 = vmatprep.subr.bf16.mxu1 %v10709_v26 }
 0x5d6   :  { %5728 = vmatpush1.bf16.msra.mxu0 %v10710_v57  ;;  %5792 = vmatpush1.bf16.msra.mxu1 %v10711_v56 }
 0x5d7   :  { %5730 = vmatprep.subr.bf16.mxu0 %v10712_v32  ;;  %5794 = vmatprep.subr.bf16.mxu1 %v10713_v8 }
 0x5da   :  { %5732 = vmatpush1.bf16.msra.mxu0 %v10714_v21  ;;  %5796 = vmatpush1.bf16.msra.mxu1 %v10715_v23 }
 0x5db   :  { %5798 = vmatprep.subr.bf16.mxu0 %v10716_v51  ;;  %5830 = vmatprep.subr.bf16.mxu1 %v10717_v58 }
 0x66f   :  { %v1751_v17 = vpop.f32.mrb[14].mxu0  ;;  %v1822_v48 = vpop.f32.mrb[14].mxu1 }
 0x670   :  { %v1752_v26 = vadd.f32 %v1751_v17, %v10718_v14  ;;  %v1753_v43 = vpop.f32.mrb[15].mxu0  ;;  %v1824_v57 = vpop.f32.mrb[15].mxu1  ;;  %v1823_v23 = vadd.f32 %v1822_v48, %v8509_v62  ;;  %v10725_v48 = vld [vmem:[#allocation28_spill] sm:$0xff] }
 0x671   :  { %v1754_v56 = vadd.f32 %v1753_v43, %v10584_v45  ;;  %v1825_v21 = vadd.f32 %v1824_v57, %v10585_v25 }
 0x672   :  { %v4728_v50 = vmul.f32 -1.442695, %v1752_v26 }
 0x673   :  { %v4729_v32 = vmul.f32 -1.442695, %v1754_v56  ;;  %v4730_v8 = vmul.f32 -1.442695, %v1825_v21 }
 0x674   :  { %7543 = vpow2.f32 %v4728_v50 }
 0x675   :  { %7545 = vpow2.f32 %v4729_v32 }
 0x676   :  { %7547 = vpow2.f32 %v4730_v8 }
 0x677   :  { %7549 = vtanh.f32 %v1823_v23  ;;  %v10723_v23 = vld [vmem:[#allocation26_spill] sm:$0xff] }
 0x67e   :  { %v7544_v51 = vpop.eup %7543 }
 0x67f   :  { %v7546_v39 = vpop.eup %7545  ;;  %v1833_v58 = vadd.f32 1.0, %v7544_v51 }
 0x680   :  { %v1834_v27 = vadd.f32 1.0, %v7546_v39  ;;  %v7548_v17 = vpop.eup %7547  ;;  %v10721_v39 = vld [vmem:[#allocation24_spill] sm:$0xff] }
 0x681   :  { %7551 = vrcp.f32 %v1833_v58  ;;  %v7550_v14 = vpop.eup %7549  ;;  %v1843_v50 = vadd.f32 1.0, %v7548_v17  ;;  %v10724_v58 = vld [vmem:[#allocation27_spill] sm:$0xff]  ;;  %v10726_v17 = vld [vmem:[#allocation29_spill] sm:$0xff] }
 0x682   :  { %7553 = vrcp.f32 %v1834_v27  ;;  %v10720_v27 = vld [vmem:[#allocation23_spill] sm:$0xff] }
 0x683   :  { %7555 = vrcp.f32 %v1843_v50  ;;  %v10730_v50 = vld [vmem:[#allocation33_spill] sm:$0xff] }
 0x68b   :  { %v7552_v43 = vpop.eup %7551 }
 0x68c   :  { %v7554_v26 = vpop.eup %7553  ;;  %v1847_v56 = vmul.f32 %v7552_v43, %v7550_v14  ;;  %v10722_v14 = vld [vmem:[#allocation25_spill] sm:$0xff]  ;;  %v10727_v43 = vld [vmem:[#allocation30_spill] sm:$0xff] }
 0x68d   :  { %v1846_v32 = vmul.f32 %v7554_v26, %v8734_v6  ;;  %v7556_v21 = vpop.eup %7555  ;;  %v10719_v6 = vld [vmem:[#allocation22_spill] sm:$0xff]  ;;  %v10728_v26 = vld [vmem:[#allocation31_spill] sm:$0xff] }
 0x68f   :  { %v8930_v57 = vadd.f32 %v1847_v56, %v1846_v32  ;;  %v10729_v56 = vld [vmem:[#allocation32_spill] sm:$0xff]  ;;  %v10731_v32 = vld [vmem:[#allocation34_spill] sm:$0xff] }
 0x691   :  { %7557 = vtanh.f32 %v8930_v57 }
 0x69b   :  { %v7558_v51 = vpop.eup %7557 }
 0x69c   :  { %v1850_v8 = vmul.f32 %v7558_v51, %v7556_v21  ;;  %v10732_v21 = vld [vmem:[#allocation35_spill] sm:$0xff]  ;;  %v10733_v51 = vld [vmem:[#allocation36_spill] sm:$0xff] }
 0x69e   :  { %1916 = vmatmul.mubr.f32.vlgmr.msra.gmra.mrb[16].mxu0 %v1850_v8  ;;  %1987 = vmatmul.mubr.f32.vlgmr.msra.gmra.mrb[16].mxu1 %v1850_v8 }
 0x69f   :  { %5800 = vmatpush1.bf16.msra.mxu0 %v7944_v11  ;;  %5832 = vmatpush1.bf16.msra.mxu1 %v7947_v15 }
 0x6a0   :  { %5802 = vmatprep.subr.bf16.mxu0 %v7951_v19  ;;  %5834 = vmatprep.subr.bf16.mxu1 %v7953_v20 }
 0x6a1   :  { %2092 = vmatprep.mubr.f32.mxu0 %v10394_v12  ;;  %2163 = vmatprep.mubr.f32.mxu1 %v10394_v12 }
 0x6a3   :  { %5804 = vmatpush1.bf16.msra.mxu0 %v7956_v24  ;;  %5836 = vmatpush1.bf16.msra.mxu1 %v7960_v28 }
 0x6a4   :  { %5806 = vmatprep.subr.bf16.mxu0 %v7962_v29  ;;  %5838 = vmatprep.subr.bf16.mxu1 %v7964_v33 }
 0x6a7   :  { %5808 = vmatpush1.bf16.msra.mxu0 %v7967_v37  ;;  %5840 = vmatpush1.bf16.msra.mxu1 %v7971_v41 }
 0x6a8   :  { %5810 = vmatprep.subr.bf16.mxu0 %v7973_v42  ;;  %5842 = vmatprep.subr.bf16.mxu1 %v7976_v46 }
 0x6ab   :  { %5812 = vmatpush1.bf16.msra.mxu0 %v7979_v53  ;;  %5844 = vmatpush1.bf16.msra.mxu1 %v7983_v54 }
 0x6ac   :  { %5814 = vmatprep.subr.bf16.mxu0 %v7985_v55  ;;  %5846 = vmatprep.subr.bf16.mxu1 %v7988_v59 }
 0x6af   :  { %5816 = vmatpush1.bf16.msra.mxu0 %v7991_v2  ;;  %5848 = vmatpush1.bf16.msra.mxu1 %v7995_v3 }
 0x6b0   :  { %5818 = vmatprep.subr.bf16.mxu0 %v7997_v4  ;;  %5850 = vmatprep.subr.bf16.mxu1 %v8000_v9 }
 0x6b3   :  { %5820 = vmatpush1.bf16.msra.mxu0 %v8003_v18  ;;  %5852 = vmatpush1.bf16.msra.mxu1 %v8007_v22  ;;  %v2022_v18 = vpop.permute.xlu1 %2021 }
 0x6b4   :  { %5822 = vmatprep.subr.bf16.mxu0 %v10719_v6  ;;  %5854 = vmatprep.subr.bf16.mxu1 %v10720_v27 }
 0x6b7   :  { %5824 = vmatpush1.bf16.msra.mxu0 %v10721_v39  ;;  %5856 = vmatpush1.bf16.msra.mxu1 %v10722_v14  ;;  %v10794_v14 = vld [vmem:[#allocation170_spill] sm:$0xff] }
 0x6b8   :  { %5826 = vmatprep.subr.bf16.mxu0 %v10723_v23  ;;  %5858 = vmatprep.subr.bf16.mxu1 %v10724_v58  ;;  %v10793_v58 = vld [vmem:[#allocation169_spill] sm:$0xff] }
 0x6bb   :  { %5828 = vmatpush1.bf16.msra.mxu0 %v10725_v48  ;;  %5860 = vmatpush1.bf16.msra.mxu1 %v10726_v17  ;;  %v10734_v17 = vld [vmem:[#allocation37_spill] sm:$0xff]  ;;  %v10737_v48 = vld [vmem:[#allocation40_spill] sm:$0xff] }
 0x6bc   :  { %5862 = vmatprep.subr.bf16.mxu0 %v10727_v43  ;;  %5926 = vmatprep.subr.bf16.mxu1 %v10728_v26  ;;  %v10735_v43 = vld [vmem:[#allocation38_spill] sm:$0xff]  ;;  %v10736_v26 = vld [vmem:[#allocation39_spill] sm:$0xff] }
 0x6be   :  { %2093 = vmatmul.mubr.f32.vlgmr.msra.gmra.mrb[18].mxu0 %v8857_v60  ;;  %2164 = vmatmul.mubr.f32.vlgmr.msra.gmra.mrb[18].mxu1 %v8857_v60  ;;  %v10738_v60 = vld [vmem:[#allocation41_spill] sm:$0xff] }
 0x6bf   :  { %2266 = vmatprep.mubr.f32.mxu0 %v1850_v8  ;;  %2337 = vmatprep.mubr.f32.mxu1 %v1850_v8  ;;  %v10739_v8 = vld [vmem:[#allocation42_spill] sm:$0xff] }
 0x6c0   :  { %5864 = vmatpush1.bf16.msra.mxu0 %v10729_v56  ;;  %5928 = vmatpush1.bf16.msra.mxu1 %v10730_v50  ;;  %v10740_v56 = vld [vmem:[#allocation43_spill] sm:$0xff]  ;;  %v10741_v50 = vld [vmem:[#allocation44_spill] sm:$0xff] }
 0x6c1   :  { %5866 = vmatprep.subr.bf16.mxu0 %v10731_v32  ;;  %5930 = vmatprep.subr.bf16.mxu1 %v10732_v21  ;;  %v10742_v32 = vld [vmem:[#allocation45_spill] sm:$0xff]  ;;  %v10743_v21 = vld [vmem:[#allocation46_spill] sm:$0xff] }
 0x6c4   :  { %5868 = vmatpush1.bf16.msra.mxu0 %v10733_v51  ;;  %5932 = vmatpush1.bf16.msra.mxu1 %v10734_v17  ;;  %v10744_v51 = vld [vmem:[#allocation47_spill] sm:$0xff]  ;;  %v10745_v17 = vld [vmem:[#allocation48_spill] sm:$0xff] }
 0x6c5   :  { %5870 = vmatprep.subr.bf16.mxu0 %v10735_v43  ;;  %5934 = vmatprep.subr.bf16.mxu1 %v10736_v26  ;;  %v10746_v43 = vld [vmem:[#allocation49_spill] sm:$0xff]  ;;  %v10747_v26 = vld [vmem:[#allocation50_spill] sm:$0xff] }
 0x6c8   :  { %5872 = vmatpush1.bf16.msra.mxu0 %v10737_v48  ;;  %5936 = vmatpush1.bf16.msra.mxu1 %v10738_v60  ;;  %v10748_v48 = vld [vmem:[#allocation51_spill] sm:$0xff]  ;;  %v10749_v60 = vld [vmem:[#allocation52_spill] sm:$0xff] }
 0x6c9   :  { %5874 = vmatprep.subr.bf16.mxu0 %v10739_v8  ;;  %5938 = vmatprep.subr.bf16.mxu1 %v10740_v56  ;;  %v10750_v8 = vld [vmem:[#allocation53_spill] sm:$0xff]  ;;  %v10751_v56 = vld [vmem:[#allocation54_spill] sm:$0xff] }
 0x6cc   :  { %5876 = vmatpush1.bf16.msra.mxu0 %v10741_v50  ;;  %5940 = vmatpush1.bf16.msra.mxu1 %v10742_v32  ;;  %v10752_v50 = vld [vmem:[#allocation55_spill] sm:$0xff]  ;;  %v10753_v32 = vld [vmem:[#allocation56_spill] sm:$0xff] }
 0x6cd   :  { %5878 = vmatprep.subr.bf16.mxu0 %v10743_v21  ;;  %5942 = vmatprep.subr.bf16.mxu1 %v10744_v51  ;;  %v10754_v21 = vld [vmem:[#allocation57_spill] sm:$0xff]  ;;  %v10755_v51 = vld [vmem:[#allocation58_spill] sm:$0xff] }
 0x6d0   :  { %5880 = vmatpush1.bf16.msra.mxu0 %v10745_v17  ;;  %5944 = vmatpush1.bf16.msra.mxu1 %v10746_v43  ;;  %v10756_v17 = vld [vmem:[#allocation59_spill] sm:$0xff]  ;;  %v10757_v43 = vld [vmem:[#allocation60_spill] sm:$0xff] }
 0x6d1   :  { %5882 = vmatprep.subr.bf16.mxu0 %v10747_v26  ;;  %5946 = vmatprep.subr.bf16.mxu1 %v10748_v48  ;;  %v10758_v26 = vld [vmem:[#allocation61_spill] sm:$0xff]  ;;  %v10759_v48 = vld [vmem:[#allocation62_spill] sm:$0xff] }
 0x6d4   :  { %5884 = vmatpush1.bf16.msra.mxu0 %v10749_v60  ;;  %5948 = vmatpush1.bf16.msra.mxu1 %v10750_v8  ;;  %v10760_v60 = vld [vmem:[#allocation63_spill] sm:$0xff]  ;;  %v10761_v8 = vld [vmem:[#allocation64_spill] sm:$0xff] }
 0x6d5   :  { %5886 = vmatprep.subr.bf16.mxu0 %v10751_v56  ;;  %5950 = vmatprep.subr.bf16.mxu1 %v10752_v50  ;;  %v10762_v56 = vld [vmem:[#allocation65_spill] sm:$0xff]  ;;  %v10763_v50 = vld [vmem:[#allocation66_spill] sm:$0xff] }
 0x6d8   :  { %5888 = vmatpush1.bf16.msra.mxu0 %v10753_v32  ;;  %5952 = vmatpush1.bf16.msra.mxu1 %v10754_v21  ;;  %v10764_v32 = vld [vmem:[#allocation67_spill] sm:$0xff]  ;;  %v10765_v21 = vld [vmem:[#allocation68_spill] sm:$0xff] }
 0x6d9   :  { %5890 = vmatprep.subr.bf16.mxu0 %v10755_v51  ;;  %5954 = vmatprep.subr.bf16.mxu1 %v10756_v17  ;;  %v10766_v51 = vld [vmem:[#allocation69_spill] sm:$0xff]  ;;  %v10767_v17 = vld [vmem:[#allocation70_spill] sm:$0xff] }
 0x6dc   :  { %5892 = vmatpush1.bf16.msra.mxu0 %v10757_v43  ;;  %5956 = vmatpush1.bf16.msra.mxu1 %v10758_v26  ;;  %v10768_v43 = vld [vmem:[#allocation71_spill] sm:$0xff]  ;;  %v10769_v26 = vld [vmem:[#allocation72_spill] sm:$0xff] }
 0x6dd   :  { %5894 = vmatprep.subr.bf16.mxu0 %v10759_v48  ;;  %5958 = vmatprep.subr.bf16.mxu1 %v10760_v60  ;;  %v10770_v48 = vld [vmem:[#allocation73_spill] sm:$0xff]  ;;  %v10771_v60 = vld [vmem:[#allocation74_spill] sm:$0xff] }
 0x6e0   :  { %5896 = vmatpush1.bf16.msra.mxu0 %v10761_v8  ;;  %5960 = vmatpush1.bf16.msra.mxu1 %v10762_v56  ;;  %v10772_v8 = vld [vmem:[#allocation75_spill] sm:$0xff]  ;;  %v10773_v56 = vld [vmem:[#allocation76_spill] sm:$0xff] }
 0x6e1   :  { %5898 = vmatprep.subr.bf16.mxu0 %v10763_v50  ;;  %5962 = vmatprep.subr.bf16.mxu1 %v10764_v32  ;;  %v10774_v50 = vld [vmem:[#allocation77_spill] sm:$0xff]  ;;  %v10775_v32 = vld [vmem:[#allocation78_spill] sm:$0xff] }
 0x6e4   :  { %5900 = vmatpush1.bf16.msra.mxu0 %v10765_v21  ;;  %5964 = vmatpush1.bf16.msra.mxu1 %v10766_v51  ;;  %v10776_v21 = vld [vmem:[#allocation79_spill] sm:$0xff]  ;;  %v10777_v51 = vld [vmem:[#allocation80_spill] sm:$0xff] }
 0x6e5   :  { %5902 = vmatprep.subr.bf16.mxu0 %v10767_v17  ;;  %5966 = vmatprep.subr.bf16.mxu1 %v10768_v43  ;;  %v10778_v17 = vld [vmem:[#allocation81_spill] sm:$0xff]  ;;  %v10779_v43 = vld [vmem:[#allocation82_spill] sm:$0xff] }
 0x6e8   :  { %5904 = vmatpush1.bf16.msra.mxu0 %v10769_v26  ;;  %5968 = vmatpush1.bf16.msra.mxu1 %v10770_v48  ;;  %v10780_v26 = vld [vmem:[#allocation83_spill] sm:$0xff]  ;;  %v10781_v48 = vld [vmem:[#allocation84_spill] sm:$0xff] }
 0x6e9   :  { %5906 = vmatprep.subr.bf16.mxu0 %v10771_v60  ;;  %5970 = vmatprep.subr.bf16.mxu1 %v10772_v8  ;;  %v10782_v60 = vld [vmem:[#allocation85_spill] sm:$0xff]  ;;  %v10783_v8 = vld [vmem:[#allocation86_spill] sm:$0xff] }
 0x6ec   :  { %5908 = vmatpush1.bf16.msra.mxu0 %v10773_v56  ;;  %5972 = vmatpush1.bf16.msra.mxu1 %v10774_v50  ;;  %v10784_v56 = vld [vmem:[#allocation87_spill] sm:$0xff]  ;;  %v10785_v50 = vld [vmem:[#allocation88_spill] sm:$0xff] }
 0x6ed   :  { %5910 = vmatprep.subr.bf16.mxu0 %v10775_v32  ;;  %5974 = vmatprep.subr.bf16.mxu1 %v10776_v21  ;;  %v10786_v32 = vld [vmem:[#allocation89_spill] sm:$0xff]  ;;  %v10787_v21 = vld [vmem:[#allocation90_spill] sm:$0xff] }
 0x6f0   :  { %5912 = vmatpush1.bf16.msra.mxu0 %v10777_v51  ;;  %5976 = vmatpush1.bf16.msra.mxu1 %v10778_v17  ;;  %v10788_v51 = vld [vmem:[#allocation91_spill] sm:$0xff]  ;;  %v10789_v17 = vld [vmem:[#allocation92_spill] sm:$0xff] }
 0x6f1   :  { %5914 = vmatprep.subr.bf16.mxu0 %v10779_v43  ;;  %5978 = vmatprep.subr.bf16.mxu1 %v10780_v26  ;;  %v10790_v43 = vld [vmem:[#allocation93_spill] sm:$0xff]  ;;  %v10791_v26 = vld [vmem:[#allocation94_spill] sm:$0xff] }
 0x6f4   :  { %5916 = vmatpush1.bf16.msra.mxu0 %v10781_v48  ;;  %5980 = vmatpush1.bf16.msra.mxu1 %v10782_v60  ;;  %v10792_v48 = vld [vmem:[#allocation95_spill] sm:$0xff] }
 0x6f5   :  { %5918 = vmatprep.subr.bf16.mxu0 %v10783_v8  ;;  %5982 = vmatprep.subr.bf16.mxu1 %v10784_v56 }
 0x6f8   :  { %5920 = vmatpush1.bf16.msra.mxu0 %v10785_v50  ;;  %5984 = vmatpush1.bf16.msra.mxu1 %v10786_v32 }
 0x6f9   :  { %5922 = vmatprep.subr.bf16.mxu0 %v10787_v21  ;;  %5986 = vmatprep.subr.bf16.mxu1 %v10788_v51  ;;  %v10795_v51 = vld [vmem:[#allocation171_spill] sm:$0xff] }
 0x6fc   :  { %5924 = vmatpush1.bf16.msra.mxu0 %v10789_v17  ;;  %5988 = vmatpush1.bf16.msra.mxu1 %v10790_v43 }
 0x6fd   :  { %5990 = vmatprep.subr.bf16.mxu0 %v10791_v26  ;;  %6054 = vmatprep.subr.bf16.mxu1 %v10792_v48 }
 0x771   :  { %v1917_v60 = vpop.f32.mrb[16].mxu0  ;;  %v1988_v8 = vpop.f32.mrb[16].mxu1 }
 0x772   :  { %v1918_v56 = vadd.f32 %v1917_v60, %v10793_v58  ;;  %v1919_v23 = vpop.f32.mrb[17].mxu0  ;;  %v1990_v50 = vpop.f32.mrb[17].mxu1  ;;  %v1989_v17 = vadd.f32 %v1988_v8, %v10795_v51  ;;  %v2025_v8 = vmul.f32 %v2022_v18, %v10657_v44 }
 0x773   :  { %v1920_v32 = vadd.f32 %v1919_v23, %v10794_v14 }
 0x774   :  { %v4731_v39 = vmul.f32 -1.442695, %v1918_v56  ;;  %v10796_v56 = vld [vmem:[#allocation96_spill] sm:$0xff] }
 0x775   :  { %v4732_v21 = vmul.f32 -1.442695, %v1920_v32  ;;  %v2024_v32 = vmul.f32 %v2022_v18, %v10796_v56  ;;  %v1991_v56 = vadd.f32 %v1990_v50, %v8638_v31 }
 0x776   :  { %7559 = vpow2.f32 %v4731_v39 }
 0x777   :  { %7561 = vpow2.f32 %v4732_v21 }
 0x778   :  { %7563 = vtanh.f32 %v1989_v17 }
 0x780   :  { %v7560_v27 = vpop.eup %7559 }
 0x781   :  { %v7562_v43 = vpop.eup %7561  ;;  %v1999_v6 = vadd.f32 1.0, %v7560_v27 }
 0x782   :  { %v2000_v26 = vadd.f32 1.0, %v7562_v43  ;;  %v7564_v48 = vpop.eup %7563 }
 0x783   :  { %7565 = vrcp.f32 %v1999_v6 }
 0x784   :  { %7567 = vrcp.f32 %v2000_v26 }
 0x78d   :  { %v7566_v22 = vpop.eup %7565 }
 0x78e   :  { %v7568_v60 = vpop.eup %7567  ;;  %v2013_v58 = vmul.f32 %v7566_v22, %v7564_v48  ;;  %v2027_v22 = vmul.f32 %v2022_v18, %v10658_v7 }
 0x78f   :  { %v2012_v23 = vmul.f32 %v7568_v60, %v8843_v5 }
 0x791   :  { %v2094_v39 = vpop.f32.mrb[18].mxu0  ;;  %v2165_v21 = vpop.f32.mrb[18].mxu1  ;;  %v9039_v51 = vadd.f32 %v2013_v58, %v2012_v23  ;;  %v2026_v58 = vmul.f32 %v2022_v18, %v10522_v49 }
 0x792   :  { %v2170_v27 = vadd.f32 %v2094_v39, %v2024_v32  ;;  %v2096_v17 = vpop.f32.mrb[19].mxu0  ;;  %v2167_v43 = vpop.f32.mrb[19].mxu1  ;;  %v4733_v39 = vmul.f32 -1.442695, %v1991_v56 }
 0x793   :  { %v2171_v6 = vadd.f32 %v2096_v17, %v2025_v8  ;;  %v2173_v60 = vadd.f32 %v2167_v43, %v2027_v22  ;;  %v2172_v32 = vadd.f32 %v2165_v21, %v2026_v58 }
 0x794   :  { %v2174_v26 = vadd.f32 %v2170_v27, %v10659_v40 }
 0x795   :  { %v2175_v14 = vadd.f32 %v2171_v6, %v10660_v30  ;;  %v2177_v23 = vadd.f32 %v2173_v60, %v10523_v63  ;;  %v2176_v27 = vadd.f32 %v2172_v32, %v10524_v36 }
 0x796   :  { %v4735_v48 = vmul.f32 -1.442695, %v2174_v26 }
 0x797   :  { %v4736_v5 = vmul.f32 -1.442695, %v2175_v14  ;;  %v4737_v8 = vmul.f32 -1.442695, %v2177_v23 }
 0x798   :  { %7569 = vpow2.f32 %v4735_v48 }
 0x799   :  { %7571 = vpow2.f32 %v4736_v5 }
 0x79a   :  { %7573 = vpow2.f32 %v4733_v39 }
 0x79b   :  { %7575 = vpow2.f32 %v4737_v8 }
 0x79c   :  { %7577 = vtanh.f32 %v2176_v27  ;;  %v10798_v27 = vld [vmem:[#allocation115_spill] sm:$0xff] }
 0x7a2   :  { %v7570_v17 = vpop.eup %7569 }
 0x7a3   :  { %v7572_v6 = vpop.eup %7571  ;;  %v2184_v7 = vadd.f32 1.0, %v7570_v17  ;;  %v10799_v17 = vld [vmem:[#allocation116_spill] sm:$0xff] }
 0x7a4   :  { %v2185_v14 = vadd.f32 1.0, %v7572_v6  ;;  %v7574_v43 = vpop.eup %7573  ;;  %v10800_v6 = vld [vmem:[#allocation117_spill] sm:$0xff] }
 0x7a5   :  { %7579 = vrcp.f32 %v2184_v7  ;;  %v7576_v50 = vpop.eup %7575  ;;  %v2009_v5 = vadd.f32 1.0, %v7574_v43  ;;  %v10802_v43 = vld [vmem:[#allocation119_spill] sm:$0xff] }
 0x7a6   :  { %7581 = vrcp.f32 %v2185_v14  ;;  %v7578_v26 = vpop.eup %7577  ;;  %v2194_v21 = vadd.f32 1.0, %v7576_v50  ;;  %v10801_v14 = vld [vmem:[#allocation118_spill] sm:$0xff]  ;;  %v10803_v50 = vld [vmem:[#allocation120_spill] sm:$0xff] }
 0x7a7   :  { %7583 = vtanh.f32 %v9039_v51 }
 0x7a8   :  { %7585 = vrcp.f32 %v2194_v21  ;;  %v10808_v21 = vld [vmem:[#allocation125_spill] sm:$0xff] }
 0x7af   :  { %v7580_v18 = vpop.eup %7579 }
 0x7b0   :  { %v7582_v22 = vpop.eup %7581  ;;  %v2198_v48 = vmul.f32 %v7580_v18, %v7578_v26  ;;  %v10804_v26 = vld [vmem:[#allocation121_spill] sm:$0xff]  ;;  %v10805_v18 = vld [vmem:[#allocation122_spill] sm:$0xff] }
 0x7b1   :  { %v2197_v56 = vmul.f32 %v7582_v22, %v8853_v10  ;;  %v7584_v7 = vpop.eup %7583  ;;  %v10797_v10 = vld [vmem:[#allocation114_spill] sm:$0xff]  ;;  %v10806_v22 = vld [vmem:[#allocation123_spill] sm:$0xff] }
 0x7b2   :  { %v7586_v58 = vpop.eup %7585 }
 0x7b3   :  { %v9049_v60 = vadd.f32 %v2198_v48, %v2197_v56  ;;  %v10807_v48 = vld [vmem:[#allocation124_spill] sm:$0xff]  ;;  %v10809_v56 = vld [vmem:[#allocation126_spill] sm:$0xff] }
 0x7b5   :  { %7587 = vtanh.f32 %v9049_v60 }
 0x7b6   :  { %7589 = vrcp.f32 %v2009_v5  ;;  %v10810_v5 = vld [vmem:[#allocation127_spill] sm:$0xff] }
 0x7bf   :  { %v7588_v23 = vpop.eup %7587 }
 0x7c0   :  { %v7590_v32 = vpop.eup %7589  ;;  %v9053_v39 = vmul.f32 %v7588_v23, %v7586_v58  ;;  %v10812_v58 = vld [vmem:[#allocation129_spill] sm:$0xff]  ;;  %v10813_v23 = vld [vmem:[#allocation130_spill] sm:$0xff] }
 0x7c1   :  { %v2016_v8 = vmul.f32 %v7590_v32, %v7584_v7  ;;  %v10811_v7 = vld [vmem:[#allocation128_spill] sm:$0xff]  ;;  %v10814_v32 = vld [vmem:[#allocation131_spill] sm:$0xff] }
 0x7c2   :  { %2267 = vmatmul.mubr.f32.vlgmr.msra.gmra.mrb[20].mxu0 %v9053_v39  ;;  %2338 = vmatmul.mubr.f32.vlgmr.msra.gmra.mrb[20].mxu1 %v9053_v39 }
 0x7c3   :  { %2432 = vmatprep.mubr.f32.mxu0 %v2016_v8  ;;  %2503 = vmatprep.mubr.f32.mxu1 %v2016_v8  ;;  %v10815_v8 = vld [vmem:[#allocation132_spill] sm:$0xff] }
 0x7c4   :  { %5992 = vmatpush1.bf16.msra.mxu0 %v10526_v0  ;;  %6056 = vmatpush1.bf16.msra.mxu1 %v10527_v16 }
 0x7c5   :  { %5994 = vmatprep.subr.bf16.mxu0 %v10528_v61  ;;  %6058 = vmatprep.subr.bf16.mxu1 %v10529_v52 }
 0x7c8   :  { %5996 = vmatpush1.bf16.msra.mxu0 %v10530_v38  ;;  %6060 = vmatpush1.bf16.msra.mxu1 %v10531_v13 }
 0x7c9   :  { %5998 = vmatprep.subr.bf16.mxu0 %v8319_v1  ;;  %6062 = vmatprep.subr.bf16.mxu1 %v10661_v35 }
 0x7cc   :  { %6000 = vmatpush1.bf16.msra.mxu0 %v10662_v34  ;;  %6064 = vmatpush1.bf16.msra.mxu1 %v10663_v47 }
 0x7cd   :  { %6002 = vmatprep.subr.bf16.mxu0 %v10797_v10  ;;  %6066 = vmatprep.subr.bf16.mxu1 %v10798_v27 }
 0x7d0   :  { %6004 = vmatpush1.bf16.msra.mxu0 %v10799_v17  ;;  %6068 = vmatpush1.bf16.msra.mxu1 %v10800_v6 }
 0x7d1   :  { %6006 = vmatprep.subr.bf16.mxu0 %v10801_v14  ;;  %6070 = vmatprep.subr.bf16.mxu1 %v10802_v43 }
 0x7d4   :  { %6008 = vmatpush1.bf16.msra.mxu0 %v10803_v50  ;;  %6072 = vmatpush1.bf16.msra.mxu1 %v10804_v26  ;;  %v10851_v26 = vld [vmem:[#allocation166_spill] sm:$0xff] }
 0x7d5   :  { %6010 = vmatprep.subr.bf16.mxu0 %v10805_v18  ;;  %6074 = vmatprep.subr.bf16.mxu1 %v10806_v22  ;;  %v10816_v18 = vld [vmem:[#allocation133_spill] sm:$0xff]  ;;  %v10817_v22 = vld [vmem:[#allocation134_spill] sm:$0xff] }
 0x7d8   :  { %6012 = vmatpush1.bf16.msra.mxu0 %v10807_v48  ;;  %6076 = vmatpush1.bf16.msra.mxu1 %v10808_v21  ;;  %v10818_v48 = vld [vmem:[#allocation135_spill] sm:$0xff]  ;;  %v10819_v21 = vld [vmem:[#allocation136_spill] sm:$0xff] }
 0x7d9   :  { %6014 = vmatprep.subr.bf16.mxu0 %v10809_v56  ;;  %6078 = vmatprep.subr.bf16.mxu1 %v10810_v5  ;;  %v10820_v56 = vld [vmem:[#allocation137_spill] sm:$0xff]  ;;  %v10821_v5 = vld [vmem:[#allocation138_spill] sm:$0xff] }
 0x7dc   :  { %6016 = vmatpush1.bf16.msra.mxu0 %v10811_v7  ;;  %6080 = vmatpush1.bf16.msra.mxu1 %v10812_v58  ;;  %v10822_v7 = vld [vmem:[#allocation139_spill] sm:$0xff]  ;;  %v10823_v58 = vld [vmem:[#allocation140_spill] sm:$0xff] }
 0x7dd   :  { %6018 = vmatprep.subr.bf16.mxu0 %v10813_v23  ;;  %6082 = vmatprep.subr.bf16.mxu1 %v10814_v32  ;;  %v10824_v23 = vld [vmem:[#allocation141_spill] sm:$0xff]  ;;  %v10825_v32 = vld [vmem:[#allocation142_spill] sm:$0xff] }
 0x7e0   :  { %6020 = vmatpush1.bf16.msra.mxu0 %v10815_v8  ;;  %6084 = vmatpush1.bf16.msra.mxu1 %v10816_v18  ;;  %v10826_v8 = vld [vmem:[#allocation143_spill] sm:$0xff]  ;;  %v10827_v18 = vld [vmem:[#allocation144_spill] sm:$0xff] }
 0x7e1   :  { %6022 = vmatprep.subr.bf16.mxu0 %v10817_v22  ;;  %6086 = vmatprep.subr.bf16.mxu1 %v10818_v48  ;;  %v10828_v22 = vld [vmem:[#allocation145_spill] sm:$0xff]  ;;  %v10829_v48 = vld [vmem:[#allocation146_spill] sm:$0xff] }
 0x7e4   :  { %6024 = vmatpush1.bf16.msra.mxu0 %v10819_v21  ;;  %6088 = vmatpush1.bf16.msra.mxu1 %v10820_v56  ;;  %v10830_v21 = vld [vmem:[#allocation147_spill] sm:$0xff]  ;;  %v10831_v56 = vld [vmem:[#allocation148_spill] sm:$0xff] }
 0x7e5   :  { %6026 = vmatprep.subr.bf16.mxu0 %v10821_v5  ;;  %6090 = vmatprep.subr.bf16.mxu1 %v10822_v7  ;;  %v10832_v5 = vld [vmem:[#allocation149_spill] sm:$0xff]  ;;  %v10833_v7 = vld [vmem:[#allocation150_spill] sm:$0xff] }
 0x7e8   :  { %6028 = vmatpush1.bf16.msra.mxu0 %v10823_v58  ;;  %6092 = vmatpush1.bf16.msra.mxu1 %v10824_v23  ;;  %v10834_v58 = vld [vmem:[#allocation151_spill] sm:$0xff]  ;;  %v10835_v23 = vld [vmem:[#allocation152_spill] sm:$0xff] }
 0x7e9   :  { %6030 = vmatprep.subr.bf16.mxu0 %v10825_v32  ;;  %6094 = vmatprep.subr.bf16.mxu1 %v10826_v8  ;;  %v10836_v32 = vld [vmem:[#allocation153_spill] sm:$0xff]  ;;  %v10837_v8 = vld [vmem:[#allocation154_spill] sm:$0xff] }
 0x7ec   :  { %6032 = vmatpush1.bf16.msra.mxu0 %v10827_v18  ;;  %6096 = vmatpush1.bf16.msra.mxu1 %v10828_v22  ;;  %v10838_v18 = vld [vmem:[#allocation155_spill] sm:$0xff]  ;;  %v10839_v22 = vld [vmem:[#allocation156_spill] sm:$0xff] }
 0x7ed   :  { %6034 = vmatprep.subr.bf16.mxu0 %v10829_v48  ;;  %6098 = vmatprep.subr.bf16.mxu1 %v10830_v21  ;;  %v10840_v48 = vld [vmem:[#allocation157_spill] sm:$0xff]  ;;  %v10841_v21 = vld [vmem:[#allocation158_spill] sm:$0xff] }
 0x7f0   :  { %6036 = vmatpush1.bf16.msra.mxu0 %v10831_v56  ;;  %6100 = vmatpush1.bf16.msra.mxu1 %v10832_v5  ;;  %v10842_v56 = vld [vmem:[#allocation159_spill] sm:$0xff]  ;;  %v10843_v5 = vld [vmem:[#allocation160_spill] sm:$0xff] }
 0x7f1   :  { %6038 = vmatprep.subr.bf16.mxu0 %v10833_v7  ;;  %6102 = vmatprep.subr.bf16.mxu1 %v10834_v58  ;;  %v10844_v7 = vld [vmem:[#allocation161_spill] sm:$0xff]  ;;  %v10845_v58 = vld [vmem:[#allocation162_spill] sm:$0xff] }
 0x7f4   :  { %6040 = vmatpush1.bf16.msra.mxu0 %v10835_v23  ;;  %6104 = vmatpush1.bf16.msra.mxu1 %v10836_v32  ;;  %v10846_v23 = vld [vmem:[#allocation163_spill] sm:$0xff]  ;;  %v10847_v32 = vld [vmem:[#allocation164_spill] sm:$0xff] }
 0x7f5   :  { %6042 = vmatprep.subr.bf16.mxu0 %v10837_v8  ;;  %6106 = vmatprep.subr.bf16.mxu1 %v10838_v18  ;;  %v10848_v8 = vld [vmem:[#allocation165_spill] sm:$0xff] }
 0x7f6   :  { %v10849_v18 = vld [vmem:[#allocation9_spill] sm:$0xff] }
 0x7f8   :  { %6044 = vmatpush1.bf16.msra.mxu0 %v10839_v22  ;;  %6108 = vmatpush1.bf16.msra.mxu1 %v10840_v48  ;;  %v10850_v22 = vld [vmem:[#allocation10_spill] sm:$0xff] }
 0x7f9   :  { %6046 = vmatprep.subr.bf16.mxu0 %v10841_v21  ;;  %6110 = vmatprep.subr.bf16.mxu1 %v10842_v56 }
 0x7fc   :  { %6048 = vmatpush1.bf16.msra.mxu0 %v10843_v5  ;;  %6112 = vmatpush1.bf16.msra.mxu1 %v10844_v7 }
 0x7fd   :  { %6050 = vmatprep.subr.bf16.mxu0 %v10845_v58  ;;  %6114 = vmatprep.subr.bf16.mxu1 %v10846_v23 }
 0x800   :  { %6052 = vmatpush1.bf16.msra.mxu0 %v10847_v32  ;;  %6116 = vmatpush1.bf16.msra.mxu1 %v10848_v8 }
 0x801   :  { %6118 = vmatprep.subr.bf16.mxu0 %v10849_v18  ;;  %6150 = vmatprep.subr.bf16.mxu1 %v10850_v22 }
 0x895   :  { %v2268_v48 = vpop.f32.mrb[20].mxu0  ;;  %v2339_v21 = vpop.f32.mrb[20].mxu1 }
 0x896   :  { %v2269_v56 = vadd.f32 %v2268_v48, %v10851_v26  ;;  %v2270_v50 = vpop.f32.mrb[21].mxu0  ;;  %v2341_v5 = vpop.f32.mrb[21].mxu1  ;;  %v2340_v8 = vadd.f32 %v2339_v21, %v8509_v62 }
 0x897   :  { %v2271_v7 = vadd.f32 %v2270_v50, %v10584_v45  ;;  %v2342_v32 = vadd.f32 %v2341_v5, %v10585_v25 }
 0x898   :  { %v4738_v43 = vmul.f32 -1.442695, %v2269_v56 }
 0x899   :  { %v4739_v58 = vmul.f32 -1.442695, %v2271_v7  ;;  %v4740_v23 = vmul.f32 -1.442695, %v2342_v32  ;;  %v10857_v32 = vld [vmem:[#allocation25_spill] sm:$0xff] }
 0x89a   :  { %7591 = vpow2.f32 %v4738_v43 }
 0x89b   :  { %7593 = vpow2.f32 %v4739_v58 }
 0x89c   :  { %7595 = vpow2.f32 %v4740_v23 }
 0x89d   :  { %7597 = vtanh.f32 %v2340_v8  ;;  %v10858_v8 = vld [vmem:[#allocation26_spill] sm:$0xff] }
 0x8a4   :  { %v7592_v18 = vpop.eup %7591 }
 0x8a5   :  { %v7594_v14 = vpop.eup %7593  ;;  %v2350_v22 = vadd.f32 1.0, %v7592_v18 }
 0x8a6   :  { %v2351_v6 = vadd.f32 1.0, %v7594_v14  ;;  %v7596_v48 = vpop.eup %7595  ;;  %v10854_v14 = vld [vmem:[#allocation22_spill] sm:$0xff] }
 0x8a7   :  { %7599 = vrcp.f32 %v2350_v22  ;;  %v7598_v26 = vpop.eup %7597  ;;  %v2360_v43 = vadd.f32 1.0, %v7596_v48  ;;  %v10856_v22 = vld [vmem:[#allocation24_spill] sm:$0xff]  ;;  %v10859_v48 = vld [vmem:[#allocation27_spill] sm:$0xff] }
 0x8a8   :  { %7601 = vrcp.f32 %v2351_v6  ;;  %v10853_v6 = vld [vmem:[#allocation21_spill] sm:$0xff] }
 0x8a9   :  { %7603 = vrcp.f32 %v2360_v43  ;;  %v10863_v43 = vld [vmem:[#allocation31_spill] sm:$0xff] }
 0x8b1   :  { %v7600_v50 = vpop.eup %7599 }
 0x8b2   :  { %v7602_v56 = vpop.eup %7601  ;;  %v2364_v7 = vmul.f32 %v7600_v50, %v7598_v26  ;;  %v10855_v26 = vld [vmem:[#allocation23_spill] sm:$0xff]  ;;  %v10860_v50 = vld [vmem:[#allocation28_spill] sm:$0xff] }
 0x8b3   :  { %v2363_v58 = vmul.f32 %v7602_v56, %v8930_v57  ;;  %v7604_v21 = vpop.eup %7603  ;;  %v10852_v57 = vld [vmem:[#allocation20_spill] sm:$0xff]  ;;  %v10861_v56 = vld [vmem:[#allocation29_spill] sm:$0xff] }
 0x8b5   :  { %v9126_v5 = vadd.f32 %v2364_v7, %v2363_v58  ;;  %v10862_v7 = vld [vmem:[#allocation30_spill] sm:$0xff]  ;;  %v10864_v58 = vld [vmem:[#allocation32_spill] sm:$0xff] }
 0x8b7   :  { %7605 = vtanh.f32 %v9126_v5 }
 0x8c1   :  { %v7606_v18 = vpop.eup %7605 }
 0x8c2   :  { %v2367_v23 = vmul.f32 %v7606_v18, %v7604_v21  ;;  %v10865_v21 = vld [vmem:[#allocation33_spill] sm:$0xff]  ;;  %v10866_v18 = vld [vmem:[#allocation34_spill] sm:$0xff] }
 0x8c4   :  { %2433 = vmatmul.mubr.f32.vlgmr.msra.gmra.mrb[22].mxu0 %v2367_v23  ;;  %2504 = vmatmul.mubr.f32.vlgmr.msra.gmra.mrb[22].mxu1 %v2367_v23 }
 0x8c5   :  { %6120 = vmatpush1.bf16.msra.mxu0 %v7944_v11  ;;  %6152 = vmatpush1.bf16.msra.mxu1 %v7947_v15 }
 0x8c6   :  { %6122 = vmatprep.subr.bf16.mxu0 %v7951_v19  ;;  %6154 = vmatprep.subr.bf16.mxu1 %v7953_v20 }
 0x8c7   :  { %2609 = vmatprep.mubr.f32.mxu0 %v10394_v12  ;;  %2680 = vmatprep.mubr.f32.mxu1 %v10394_v12 }
 0x8c9   :  { %6124 = vmatpush1.bf16.msra.mxu0 %v7956_v24  ;;  %6156 = vmatpush1.bf16.msra.mxu1 %v7960_v28 }
 0x8ca   :  { %6126 = vmatprep.subr.bf16.mxu0 %v7962_v29  ;;  %6158 = vmatprep.subr.bf16.mxu1 %v7964_v33 }
 0x8cd   :  { %6128 = vmatpush1.bf16.msra.mxu0 %v7967_v37  ;;  %6160 = vmatpush1.bf16.msra.mxu1 %v7971_v41 }
 0x8ce   :  { %6130 = vmatprep.subr.bf16.mxu0 %v7973_v42  ;;  %6162 = vmatprep.subr.bf16.mxu1 %v7976_v46 }
 0x8d1   :  { %6132 = vmatpush1.bf16.msra.mxu0 %v7979_v53  ;;  %6164 = vmatpush1.bf16.msra.mxu1 %v7983_v54 }
 0x8d2   :  { %6134 = vmatprep.subr.bf16.mxu0 %v7985_v55  ;;  %6166 = vmatprep.subr.bf16.mxu1 %v7988_v59 }
 0x8d5   :  { %6136 = vmatpush1.bf16.msra.mxu0 %v7991_v2  ;;  %6168 = vmatpush1.bf16.msra.mxu1 %v7995_v3 }
 0x8d6   :  { %6138 = vmatprep.subr.bf16.mxu0 %v7997_v4  ;;  %6170 = vmatprep.subr.bf16.mxu1 %v8000_v9  ;;  %v2539_v4 = vpop.permute.xlu0 %2538 }
 0x8d9   :  { %6140 = vmatpush1.bf16.msra.mxu0 %v10852_v57  ;;  %6172 = vmatpush1.bf16.msra.mxu1 %v10853_v6 }
 0x8da   :  { %6142 = vmatprep.subr.bf16.mxu0 %v10854_v14  ;;  %6174 = vmatprep.subr.bf16.mxu1 %v10855_v26  ;;  %v10929_v26 = vld [vmem:[#allocation170_spill] sm:$0xff] }
 0x8dd   :  { %6144 = vmatpush1.bf16.msra.mxu0 %v10856_v22  ;;  %6176 = vmatpush1.bf16.msra.mxu1 %v10857_v32  ;;  %v10928_v32 = vld [vmem:[#allocation169_spill] sm:$0xff] }
 0x8de   :  { %6146 = vmatprep.subr.bf16.mxu0 %v10858_v8  ;;  %6178 = vmatprep.subr.bf16.mxu1 %v10859_v48  ;;  %v10867_v48 = vld [vmem:[#allocation35_spill] sm:$0xff]  ;;  %v10872_v8 = vld [vmem:[#allocation40_spill] sm:$0xff] }
 0x8e1   :  { %6148 = vmatpush1.bf16.msra.mxu0 %v10860_v50  ;;  %6180 = vmatpush1.bf16.msra.mxu1 %v10861_v56  ;;  %v10868_v50 = vld [vmem:[#allocation36_spill] sm:$0xff]  ;;  %v10869_v56 = vld [vmem:[#allocation37_spill] sm:$0xff] }
 0x8e2   :  { %6182 = vmatprep.subr.bf16.mxu0 %v10862_v7  ;;  %6246 = vmatprep.subr.bf16.mxu1 %v10863_v43  ;;  %v10870_v7 = vld [vmem:[#allocation38_spill] sm:$0xff]  ;;  %v10871_v43 = vld [vmem:[#allocation39_spill] sm:$0xff] }
 0x8e4   :  { %2610 = vmatmul.mubr.f32.vlgmr.msra.gmra.mrb[24].mxu0 %v9053_v39  ;;  %2681 = vmatmul.mubr.f32.vlgmr.msra.gmra.mrb[24].mxu1 %v9053_v39  ;;  %v10873_v39 = vld [vmem:[#allocation41_spill] sm:$0xff] }
 0x8e5   :  { %2783 = vmatprep.mubr.f32.mxu0 %v2367_v23  ;;  %2854 = vmatprep.mubr.f32.mxu1 %v2367_v23  ;;  %v10874_v23 = vld [vmem:[#allocation42_spill] sm:$0xff] }
 0x8e6   :  { %6184 = vmatpush1.bf16.msra.mxu0 %v10864_v58  ;;  %6248 = vmatpush1.bf16.msra.mxu1 %v10865_v21  ;;  %v10875_v58 = vld [vmem:[#allocation43_spill] sm:$0xff]  ;;  %v10876_v21 = vld [vmem:[#allocation44_spill] sm:$0xff] }
 0x8e7   :  { %6186 = vmatprep.subr.bf16.mxu0 %v10866_v18  ;;  %6250 = vmatprep.subr.bf16.mxu1 %v10867_v48  ;;  %v10877_v18 = vld [vmem:[#allocation45_spill] sm:$0xff]  ;;  %v10878_v48 = vld [vmem:[#allocation46_spill] sm:$0xff] }
 0x8ea   :  { %6188 = vmatpush1.bf16.msra.mxu0 %v10868_v50  ;;  %6252 = vmatpush1.bf16.msra.mxu1 %v10869_v56  ;;  %v10879_v50 = vld [vmem:[#allocation47_spill] sm:$0xff]  ;;  %v10880_v56 = vld [vmem:[#allocation48_spill] sm:$0xff] }
 0x8eb   :  { %6190 = vmatprep.subr.bf16.mxu0 %v10870_v7  ;;  %6254 = vmatprep.subr.bf16.mxu1 %v10871_v43  ;;  %v10881_v7 = vld [vmem:[#allocation49_spill] sm:$0xff]  ;;  %v10882_v43 = vld [vmem:[#allocation50_spill] sm:$0xff] }
 0x8ee   :  { %6192 = vmatpush1.bf16.msra.mxu0 %v10872_v8  ;;  %6256 = vmatpush1.bf16.msra.mxu1 %v10873_v39  ;;  %v10883_v8 = vld [vmem:[#allocation51_spill] sm:$0xff]  ;;  %v10884_v39 = vld [vmem:[#allocation52_spill] sm:$0xff] }
 0x8ef   :  { %6194 = vmatprep.subr.bf16.mxu0 %v10874_v23  ;;  %6258 = vmatprep.subr.bf16.mxu1 %v10875_v58  ;;  %v10885_v23 = vld [vmem:[#allocation53_spill] sm:$0xff]  ;;  %v10886_v58 = vld [vmem:[#allocation54_spill] sm:$0xff] }
 0x8f2   :  { %6196 = vmatpush1.bf16.msra.mxu0 %v10876_v21  ;;  %6260 = vmatpush1.bf16.msra.mxu1 %v10877_v18  ;;  %v10887_v21 = vld [vmem:[#allocation55_spill] sm:$0xff]  ;;  %v10888_v18 = vld [vmem:[#allocation56_spill] sm:$0xff] }
 0x8f3   :  { %6198 = vmatprep.subr.bf16.mxu0 %v10878_v48  ;;  %6262 = vmatprep.subr.bf16.mxu1 %v10879_v50  ;;  %v10889_v48 = vld [vmem:[#allocation57_spill] sm:$0xff]  ;;  %v10890_v50 = vld [vmem:[#allocation58_spill] sm:$0xff] }
 0x8f6   :  { %6200 = vmatpush1.bf16.msra.mxu0 %v10880_v56  ;;  %6264 = vmatpush1.bf16.msra.mxu1 %v10881_v7  ;;  %v10891_v56 = vld [vmem:[#allocation59_spill] sm:$0xff]  ;;  %v10892_v7 = vld [vmem:[#allocation60_spill] sm:$0xff] }
 0x8f7   :  { %6202 = vmatprep.subr.bf16.mxu0 %v10882_v43  ;;  %6266 = vmatprep.subr.bf16.mxu1 %v10883_v8  ;;  %v10893_v43 = vld [vmem:[#allocation61_spill] sm:$0xff]  ;;  %v10894_v8 = vld [vmem:[#allocation62_spill] sm:$0xff] }
 0x8fa   :  { %6204 = vmatpush1.bf16.msra.mxu0 %v10884_v39  ;;  %6268 = vmatpush1.bf16.msra.mxu1 %v10885_v23  ;;  %v10895_v39 = vld [vmem:[#allocation63_spill] sm:$0xff]  ;;  %v10896_v23 = vld [vmem:[#allocation64_spill] sm:$0xff] }
 0x8fb   :  { %6206 = vmatprep.subr.bf16.mxu0 %v10886_v58  ;;  %6270 = vmatprep.subr.bf16.mxu1 %v10887_v21  ;;  %v10897_v58 = vld [vmem:[#allocation65_spill] sm:$0xff]  ;;  %v10898_v21 = vld [vmem:[#allocation66_spill] sm:$0xff] }
 0x8fe   :  { %6208 = vmatpush1.bf16.msra.mxu0 %v10888_v18  ;;  %6272 = vmatpush1.bf16.msra.mxu1 %v10889_v48  ;;  %v10899_v18 = vld [vmem:[#allocation67_spill] sm:$0xff]  ;;  %v10900_v48 = vld [vmem:[#allocation68_spill] sm:$0xff] }
 0x8ff   :  { %6210 = vmatprep.subr.bf16.mxu0 %v10890_v50  ;;  %6274 = vmatprep.subr.bf16.mxu1 %v10891_v56  ;;  %v10901_v50 = vld [vmem:[#allocation69_spill] sm:$0xff]  ;;  %v10902_v56 = vld [vmem:[#allocation70_spill] sm:$0xff] }
 0x902   :  { %6212 = vmatpush1.bf16.msra.mxu0 %v10892_v7  ;;  %6276 = vmatpush1.bf16.msra.mxu1 %v10893_v43  ;;  %v10903_v7 = vld [vmem:[#allocation71_spill] sm:$0xff]  ;;  %v10904_v43 = vld [vmem:[#allocation72_spill] sm:$0xff] }
 0x903   :  { %6214 = vmatprep.subr.bf16.mxu0 %v10894_v8  ;;  %6278 = vmatprep.subr.bf16.mxu1 %v10895_v39  ;;  %v10905_v8 = vld [vmem:[#allocation73_spill] sm:$0xff]  ;;  %v10906_v39 = vld [vmem:[#allocation74_spill] sm:$0xff] }
 0x906   :  { %6216 = vmatpush1.bf16.msra.mxu0 %v10896_v23  ;;  %6280 = vmatpush1.bf16.msra.mxu1 %v10897_v58  ;;  %v10907_v23 = vld [vmem:[#allocation75_spill] sm:$0xff]  ;;  %v10908_v58 = vld [vmem:[#allocation76_spill] sm:$0xff] }
 0x907   :  { %6218 = vmatprep.subr.bf16.mxu0 %v10898_v21  ;;  %6282 = vmatprep.subr.bf16.mxu1 %v10899_v18  ;;  %v10909_v21 = vld [vmem:[#allocation77_spill] sm:$0xff]  ;;  %v10910_v18 = vld [vmem:[#allocation78_spill] sm:$0xff] }
 0x90a   :  { %6220 = vmatpush1.bf16.msra.mxu0 %v10900_v48  ;;  %6284 = vmatpush1.bf16.msra.mxu1 %v10901_v50  ;;  %v10911_v48 = vld [vmem:[#allocation79_spill] sm:$0xff]  ;;  %v10912_v50 = vld [vmem:[#allocation80_spill] sm:$0xff] }
 0x90b   :  { %6222 = vmatprep.subr.bf16.mxu0 %v10902_v56  ;;  %6286 = vmatprep.subr.bf16.mxu1 %v10903_v7  ;;  %v10913_v56 = vld [vmem:[#allocation81_spill] sm:$0xff]  ;;  %v10914_v7 = vld [vmem:[#allocation82_spill] sm:$0xff] }
 0x90e   :  { %6224 = vmatpush1.bf16.msra.mxu0 %v10904_v43  ;;  %6288 = vmatpush1.bf16.msra.mxu1 %v10905_v8  ;;  %v10915_v43 = vld [vmem:[#allocation83_spill] sm:$0xff]  ;;  %v10916_v8 = vld [vmem:[#allocation84_spill] sm:$0xff] }
 0x90f   :  { %6226 = vmatprep.subr.bf16.mxu0 %v10906_v39  ;;  %6290 = vmatprep.subr.bf16.mxu1 %v10907_v23  ;;  %v10917_v39 = vld [vmem:[#allocation85_spill] sm:$0xff]  ;;  %v10918_v23 = vld [vmem:[#allocation86_spill] sm:$0xff] }
 0x912   :  { %6228 = vmatpush1.bf16.msra.mxu0 %v10908_v58  ;;  %6292 = vmatpush1.bf16.msra.mxu1 %v10909_v21  ;;  %v10919_v58 = vld [vmem:[#allocation87_spill] sm:$0xff]  ;;  %v10920_v21 = vld [vmem:[#allocation88_spill] sm:$0xff] }
 0x913   :  { %6230 = vmatprep.subr.bf16.mxu0 %v10910_v18  ;;  %6294 = vmatprep.subr.bf16.mxu1 %v10911_v48  ;;  %v10921_v18 = vld [vmem:[#allocation89_spill] sm:$0xff]  ;;  %v10922_v48 = vld [vmem:[#allocation90_spill] sm:$0xff] }
 0x916   :  { %6232 = vmatpush1.bf16.msra.mxu0 %v10912_v50  ;;  %6296 = vmatpush1.bf16.msra.mxu1 %v10913_v56  ;;  %v10923_v50 = vld [vmem:[#allocation91_spill] sm:$0xff]  ;;  %v10924_v56 = vld [vmem:[#allocation92_spill] sm:$0xff] }
 0x917   :  { %6234 = vmatprep.subr.bf16.mxu0 %v10914_v7  ;;  %6298 = vmatprep.subr.bf16.mxu1 %v10915_v43  ;;  %v10925_v7 = vld [vmem:[#allocation93_spill] sm:$0xff]  ;;  %v10926_v43 = vld [vmem:[#allocation94_spill] sm:$0xff] }
 0x91a   :  { %6236 = vmatpush1.bf16.msra.mxu0 %v10916_v8  ;;  %6300 = vmatpush1.bf16.msra.mxu1 %v10917_v39  ;;  %v10927_v8 = vld [vmem:[#allocation95_spill] sm:$0xff] }
 0x91b   :  { %6238 = vmatprep.subr.bf16.mxu0 %v10918_v23  ;;  %6302 = vmatprep.subr.bf16.mxu1 %v10919_v58 }
 0x91e   :  { %6240 = vmatpush1.bf16.msra.mxu0 %v10920_v21  ;;  %6304 = vmatpush1.bf16.msra.mxu1 %v10921_v18 }
 0x91f   :  { %6242 = vmatprep.subr.bf16.mxu0 %v10922_v48  ;;  %6306 = vmatprep.subr.bf16.mxu1 %v10923_v50  ;;  %v10930_v50 = vld [vmem:[#allocation171_spill] sm:$0xff] }
 0x922   :  { %6244 = vmatpush1.bf16.msra.mxu0 %v10924_v56  ;;  %6308 = vmatpush1.bf16.msra.mxu1 %v10925_v7 }
 0x923   :  { %6310 = vmatprep.subr.bf16.mxu0 %v10926_v43  ;;  %6374 = vmatprep.subr.bf16.mxu1 %v10927_v8 }
 0x997   :  { %v2434_v39 = vpop.f32.mrb[22].mxu0  ;;  %v2505_v23 = vpop.f32.mrb[22].mxu1 }
 0x998   :  { %v2435_v58 = vadd.f32 %v2434_v39, %v10928_v32  ;;  %v2436_v22 = vpop.f32.mrb[23].mxu0  ;;  %v2507_v21 = vpop.f32.mrb[23].mxu1  ;;  %v2506_v56 = vadd.f32 %v2505_v23, %v10930_v50  ;;  %v2542_v23 = vmul.f32 %v2539_v4, %v10657_v44 }
 0x999   :  { %v2437_v18 = vadd.f32 %v2436_v22, %v10929_v26 }
 0x99a   :  { %v4741_v14 = vmul.f32 -1.442695, %v2435_v58  ;;  %v10931_v58 = vld [vmem:[#allocation96_spill] sm:$0xff] }
 0x99b   :  { %v4742_v48 = vmul.f32 -1.442695, %v2437_v18  ;;  %v2541_v18 = vmul.f32 %v2539_v4, %v10931_v58  ;;  %v2508_v58 = vadd.f32 %v2507_v21, %v8638_v31 }
 0x99c   :  { %7607 = vpow2.f32 %v4741_v14 }
 0x99d   :  { %7609 = vpow2.f32 %v4742_v48 }
 0x99e   :  { %7611 = vtanh.f32 %v2506_v56 }
 0x9a6   :  { %v7608_v6 = vpop.eup %7607 }
 0x9a7   :  { %v7610_v7 = vpop.eup %7609  ;;  %v2516_v57 = vadd.f32 1.0, %v7608_v6 }
 0x9a8   :  { %v2517_v43 = vadd.f32 1.0, %v7610_v7  ;;  %v7612_v8 = vpop.eup %7611 }
 0x9a9   :  { %7613 = vrcp.f32 %v2516_v57 }
 0x9aa   :  { %7615 = vrcp.f32 %v2517_v43 }
 0x9b3   :  { %v7614_v9 = vpop.eup %7613 }
 0x9b4   :  { %v7616_v39 = vpop.eup %7615  ;;  %v2530_v32 = vmul.f32 %v7614_v9, %v7612_v8  ;;  %v10932_v9 = vld [vmem:[#allocation98_spill] sm:$0xff] }
 0x9b5   :  { %v2529_v22 = vmul.f32 %v7616_v39, %v9039_v51  ;;  %v2544_v8 = vmul.f32 %v2539_v4, %v10932_v9 }
 0x9b7   :  { %v2611_v14 = vpop.f32.mrb[24].mxu0  ;;  %v2682_v48 = vpop.f32.mrb[24].mxu1  ;;  %v9235_v50 = vadd.f32 %v2530_v32, %v2529_v22  ;;  %v2543_v32 = vmul.f32 %v2539_v4, %v10522_v49 }
 0x9b8   :  { %v2687_v6 = vadd.f32 %v2611_v14, %v2541_v18  ;;  %v2613_v56 = vpop.f32.mrb[25].mxu0  ;;  %v2684_v7 = vpop.f32.mrb[25].mxu1  ;;  %v4743_v14 = vmul.f32 -1.442695, %v2508_v58 }
 0x9b9   :  { %v2688_v57 = vadd.f32 %v2613_v56, %v2542_v23  ;;  %v2690_v39 = vadd.f32 %v2684_v7, %v2544_v8  ;;  %v2689_v18 = vadd.f32 %v2682_v48, %v2543_v32 }
 0x9ba   :  { %v2691_v43 = vadd.f32 %v2687_v6, %v10659_v40 }
 0x9bb   :  { %v2692_v26 = vadd.f32 %v2688_v57, %v10660_v30  ;;  %v2694_v22 = vadd.f32 %v2690_v39, %v10523_v63  ;;  %v2693_v6 = vadd.f32 %v2689_v18, %v10524_v36 }
 0x9bc   :  { %v4745_v3 = vmul.f32 -1.442695, %v2691_v43 }
 0x9bd   :  { %v4746_v51 = vmul.f32 -1.442695, %v2692_v26  ;;  %v4747_v23 = vmul.f32 -1.442695, %v2694_v22 }
 0x9be   :  { %7617 = vpow2.f32 %v4745_v3 }
 0x9bf   :  { %7619 = vpow2.f32 %v4746_v51 }
 0x9c0   :  { %7621 = vpow2.f32 %v4743_v14 }
 0x9c1   :  { %7623 = vpow2.f32 %v4747_v23 }
 0x9c2   :  { %7625 = vtanh.f32 %v2693_v6  ;;  %v10934_v6 = vld [vmem:[#allocation118_spill] sm:$0xff] }
 0x9c8   :  { %v7618_v56 = vpop.eup %7617 }
 0x9c9   :  { %v7620_v57 = vpop.eup %7619  ;;  %v2701_v9 = vadd.f32 1.0, %v7618_v56  ;;  %v10935_v56 = vld [vmem:[#allocation119_spill] sm:$0xff] }
 0x9ca   :  { %v2702_v26 = vadd.f32 1.0, %v7620_v57  ;;  %v7622_v3 = vpop.eup %7621  ;;  %v10936_v57 = vld [vmem:[#allocation120_spill] sm:$0xff] }
 0x9cb   :  { %7627 = vrcp.f32 %v2701_v9  ;;  %v7624_v21 = vpop.eup %7623  ;;  %v2526_v51 = vadd.f32 1.0, %v7622_v3  ;;  %v10938_v3 = vld [vmem:[#allocation122_spill] sm:$0xff] }
 0x9cc   :  { %7629 = vrcp.f32 %v2702_v26  ;;  %v7626_v7 = vpop.eup %7625  ;;  %v2711_v48 = vadd.f32 1.0, %v7624_v21  ;;  %v10937_v26 = vld [vmem:[#allocation121_spill] sm:$0xff]  ;;  %v10939_v21 = vld [vmem:[#allocation123_spill] sm:$0xff] }
 0x9cd   :  { %7631 = vtanh.f32 %v9235_v50 }
 0x9ce   :  { %7633 = vrcp.f32 %v2711_v48  ;;  %v10944_v48 = vld [vmem:[#allocation128_spill] sm:$0xff] }
 0x9d5   :  { %v7628_v4 = vpop.eup %7627 }
 0x9d6   :  { %v7630_v43 = vpop.eup %7629  ;;  %v2715_v8 = vmul.f32 %v7628_v4, %v7626_v7  ;;  %v10940_v7 = vld [vmem:[#allocation124_spill] sm:$0xff]  ;;  %v10941_v4 = vld [vmem:[#allocation125_spill] sm:$0xff] }
 0x9d7   :  { %v2714_v58 = vmul.f32 %v7630_v43, %v9049_v60  ;;  %v7632_v9 = vpop.eup %7631  ;;  %v10933_v60 = vld [vmem:[#allocation117_spill] sm:$0xff]  ;;  %v10942_v43 = vld [vmem:[#allocation126_spill] sm:$0xff] }
 0x9d8   :  { %v7634_v32 = vpop.eup %7633 }
 0x9d9   :  { %v9245_v39 = vadd.f32 %v2715_v8, %v2714_v58  ;;  %v10943_v8 = vld [vmem:[#allocation127_spill] sm:$0xff]  ;;  %v10945_v58 = vld [vmem:[#allocation129_spill] sm:$0xff] }
 0x9db   :  { %7635 = vtanh.f32 %v9245_v39 }
 0x9dc   :  { %7637 = vrcp.f32 %v2526_v51  ;;  %v10946_v51 = vld [vmem:[#allocation130_spill] sm:$0xff] }
 0x9e5   :  { %v7636_v22 = vpop.eup %7635 }
 0x9e6   :  { %v7638_v18 = vpop.eup %7637  ;;  %v9249_v14 = vmul.f32 %v7636_v22, %v7634_v32  ;;  %v10948_v32 = vld [vmem:[#allocation132_spill] sm:$0xff]  ;;  %v10949_v22 = vld [vmem:[#allocation133_spill] sm:$0xff] }
 0x9e7   :  { %v2533_v23 = vmul.f32 %v7638_v18, %v7632_v9  ;;  %v10947_v9 = vld [vmem:[#allocation131_spill] sm:$0xff]  ;;  %v10950_v18 = vld [vmem:[#allocation134_spill] sm:$0xff] }
 0x9e8   :  { %2784 = vmatmul.mubr.f32.vlgmr.msra.gmra.mrb[26].mxu0 %v9249_v14  ;;  %2855 = vmatmul.mubr.f32.vlgmr.msra.gmra.mrb[26].mxu1 %v9249_v14 }
 0x9e9   :  { %2949 = vmatprep.mubr.f32.mxu0 %v2533_v23  ;;  %3020 = vmatprep.mubr.f32.mxu1 %v2533_v23  ;;  %v10951_v23 = vld [vmem:[#allocation135_spill] sm:$0xff] }
 0x9ea   :  { %6312 = vmatpush1.bf16.msra.mxu0 %v10526_v0  ;;  %6376 = vmatpush1.bf16.msra.mxu1 %v10527_v16 }
 0x9eb   :  { %6314 = vmatprep.subr.bf16.mxu0 %v10528_v61  ;;  %6378 = vmatprep.subr.bf16.mxu1 %v10529_v52 }
 0x9ee   :  { %6316 = vmatpush1.bf16.msra.mxu0 %v10530_v38  ;;  %6380 = vmatpush1.bf16.msra.mxu1 %v10531_v13 }
 0x9ef   :  { %6318 = vmatprep.subr.bf16.mxu0 %v8319_v1  ;;  %6382 = vmatprep.subr.bf16.mxu1 %v10661_v35 }
 0x9f2   :  { %6320 = vmatpush1.bf16.msra.mxu0 %v10662_v34  ;;  %6384 = vmatpush1.bf16.msra.mxu1 %v10663_v47 }
 0x9f3   :  { %6322 = vmatprep.subr.bf16.mxu0 %v10797_v10  ;;  %6386 = vmatprep.subr.bf16.mxu1 %v10798_v27 }
 0x9f6   :  { %6324 = vmatpush1.bf16.msra.mxu0 %v10799_v17  ;;  %6388 = vmatpush1.bf16.msra.mxu1 %v10933_v60 }
 0x9f7   :  { %6326 = vmatprep.subr.bf16.mxu0 %v10934_v6  ;;  %6390 = vmatprep.subr.bf16.mxu1 %v10935_v56 }
 0x9fa   :  { %6328 = vmatpush1.bf16.msra.mxu0 %v10936_v57  ;;  %6392 = vmatpush1.bf16.msra.mxu1 %v10937_v26 }
 0x9fb   :  { %6330 = vmatprep.subr.bf16.mxu0 %v10938_v3  ;;  %6394 = vmatprep.subr.bf16.mxu1 %v10939_v21 }
 0x9fe   :  { %6332 = vmatpush1.bf16.msra.mxu0 %v10940_v7  ;;  %6396 = vmatpush1.bf16.msra.mxu1 %v10941_v4  ;;  %v10952_v4 = vld [vmem:[#allocation136_spill] sm:$0xff]  ;;  %v10984_v7 = vld [vmem:[#allocation166_spill] sm:$0xff] }
 0x9ff   :  { %6334 = vmatprep.subr.bf16.mxu0 %v10942_v43  ;;  %6398 = vmatprep.subr.bf16.mxu1 %v10943_v8  ;;  %v10953_v43 = vld [vmem:[#allocation137_spill] sm:$0xff]  ;;  %v10954_v8 = vld [vmem:[#allocation138_spill] sm:$0xff] }
 0xa02   :  { %6336 = vmatpush1.bf16.msra.mxu0 %v10944_v48  ;;  %6400 = vmatpush1.bf16.msra.mxu1 %v10945_v58  ;;  %v10955_v48 = vld [vmem:[#allocation139_spill] sm:$0xff]  ;;  %v10956_v58 = vld [vmem:[#allocation140_spill] sm:$0xff] }
 0xa03   :  { %6338 = vmatprep.subr.bf16.mxu0 %v10946_v51  ;;  %6402 = vmatprep.subr.bf16.mxu1 %v10947_v9  ;;  %v10957_v51 = vld [vmem:[#allocation141_spill] sm:$0xff]  ;;  %v10958_v9 = vld [vmem:[#allocation142_spill] sm:$0xff] }
 0xa06   :  { %6340 = vmatpush1.bf16.msra.mxu0 %v10948_v32  ;;  %6404 = vmatpush1.bf16.msra.mxu1 %v10949_v22  ;;  %v10959_v32 = vld [vmem:[#allocation143_spill] sm:$0xff]  ;;  %v10960_v22 = vld [vmem:[#allocation144_spill] sm:$0xff] }
 0xa07   :  { %6342 = vmatprep.subr.bf16.mxu0 %v10950_v18  ;;  %6406 = vmatprep.subr.bf16.mxu1 %v10951_v23  ;;  %v10961_v18 = vld [vmem:[#allocation145_spill] sm:$0xff]  ;;  %v10962_v23 = vld [vmem:[#allocation146_spill] sm:$0xff] }
 0xa0a   :  { %6344 = vmatpush1.bf16.msra.mxu0 %v10952_v4  ;;  %6408 = vmatpush1.bf16.msra.mxu1 %v10953_v43  ;;  %v10963_v4 = vld [vmem:[#allocation147_spill] sm:$0xff]  ;;  %v10964_v43 = vld [vmem:[#allocation148_spill] sm:$0xff] }
 0xa0b   :  { %6346 = vmatprep.subr.bf16.mxu0 %v10954_v8  ;;  %6410 = vmatprep.subr.bf16.mxu1 %v10955_v48  ;;  %v10965_v8 = vld [vmem:[#allocation149_spill] sm:$0xff]  ;;  %v10966_v48 = vld [vmem:[#allocation150_spill] sm:$0xff] }
 0xa0e   :  { %6348 = vmatpush1.bf16.msra.mxu0 %v10956_v58  ;;  %6412 = vmatpush1.bf16.msra.mxu1 %v10957_v51  ;;  %v10967_v58 = vld [vmem:[#allocation151_spill] sm:$0xff]  ;;  %v10968_v51 = vld [vmem:[#allocation152_spill] sm:$0xff] }
 0xa0f   :  { %6350 = vmatprep.subr.bf16.mxu0 %v10958_v9  ;;  %6414 = vmatprep.subr.bf16.mxu1 %v10959_v32  ;;  %v10969_v9 = vld [vmem:[#allocation153_spill] sm:$0xff]  ;;  %v10970_v32 = vld [vmem:[#allocation154_spill] sm:$0xff] }
 0xa12   :  { %6352 = vmatpush1.bf16.msra.mxu0 %v10960_v22  ;;  %6416 = vmatpush1.bf16.msra.mxu1 %v10961_v18  ;;  %v10971_v22 = vld [vmem:[#allocation155_spill] sm:$0xff]  ;;  %v10972_v18 = vld [vmem:[#allocation156_spill] sm:$0xff] }
 0xa13   :  { %6354 = vmatprep.subr.bf16.mxu0 %v10962_v23  ;;  %6418 = vmatprep.subr.bf16.mxu1 %v10963_v4  ;;  %v10973_v23 = vld [vmem:[#allocation157_spill] sm:$0xff]  ;;  %v10974_v4 = vld [vmem:[#allocation158_spill] sm:$0xff] }
 0xa16   :  { %6356 = vmatpush1.bf16.msra.mxu0 %v10964_v43  ;;  %6420 = vmatpush1.bf16.msra.mxu1 %v10965_v8  ;;  %v10975_v43 = vld [vmem:[#allocation159_spill] sm:$0xff]  ;;  %v10976_v8 = vld [vmem:[#allocation160_spill] sm:$0xff] }
 0xa17   :  { %6358 = vmatprep.subr.bf16.mxu0 %v10966_v48  ;;  %6422 = vmatprep.subr.bf16.mxu1 %v10967_v58  ;;  %v10977_v48 = vld [vmem:[#allocation161_spill] sm:$0xff]  ;;  %v10978_v58 = vld [vmem:[#allocation162_spill] sm:$0xff] }
 0xa1a   :  { %6360 = vmatpush1.bf16.msra.mxu0 %v10968_v51  ;;  %6424 = vmatpush1.bf16.msra.mxu1 %v10969_v9  ;;  %v10979_v51 = vld [vmem:[#allocation163_spill] sm:$0xff]  ;;  %v10980_v9 = vld [vmem:[#allocation164_spill] sm:$0xff] }
 0xa1b   :  { %6362 = vmatprep.subr.bf16.mxu0 %v10970_v32  ;;  %6426 = vmatprep.subr.bf16.mxu1 %v10971_v22  ;;  %v10981_v32 = vld [vmem:[#allocation165_spill] sm:$0xff] }
 0xa1c   :  { %v10982_v22 = vld [vmem:[#allocation9_spill] sm:$0xff] }
 0xa1e   :  { %6364 = vmatpush1.bf16.msra.mxu0 %v10972_v18  ;;  %6428 = vmatpush1.bf16.msra.mxu1 %v10973_v23  ;;  %v10983_v18 = vld [vmem:[#allocation10_spill] sm:$0xff] }
 0xa1f   :  { %6366 = vmatprep.subr.bf16.mxu0 %v10974_v4  ;;  %6430 = vmatprep.subr.bf16.mxu1 %v10975_v43 }
 0xa22   :  { %6368 = vmatpush1.bf16.msra.mxu0 %v10976_v8  ;;  %6432 = vmatpush1.bf16.msra.mxu1 %v10977_v48 }
 0xa23   :  { %6370 = vmatprep.subr.bf16.mxu0 %v10978_v58  ;;  %6434 = vmatprep.subr.bf16.mxu1 %v10979_v51 }
 0xa26   :  { %6372 = vmatpush1.bf16.msra.mxu0 %v10980_v9  ;;  %6436 = vmatpush1.bf16.msra.mxu1 %v10981_v32 }
 0xa27   :  { %6438 = vmatprep.subr.bf16.mxu0 %v10982_v22  ;;  %6470 = vmatprep.subr.bf16.mxu1 %v10983_v18 }
 0xabb   :  { %v2785_v23 = vpop.f32.mrb[26].mxu0  ;;  %v2856_v4 = vpop.f32.mrb[26].mxu1 }
 0xabc   :  { %v2786_v43 = vadd.f32 %v2785_v23, %v10984_v7  ;;  %v2787_v21 = vpop.f32.mrb[27].mxu0  ;;  %v2858_v8 = vpop.f32.mrb[27].mxu1  ;;  %v2857_v32 = vadd.f32 %v2856_v4, %v8509_v62 }
 0xabd   :  { %v2788_v48 = vadd.f32 %v2787_v21, %v10584_v45  ;;  %v2859_v9 = vadd.f32 %v2858_v8, %v10585_v25 }
 0xabe   :  { %v4748_v3 = vmul.f32 -1.442695, %v2786_v43 }
 0xabf   :  { %v4749_v58 = vmul.f32 -1.442695, %v2788_v48  ;;  %v4750_v51 = vmul.f32 -1.442695, %v2859_v9 }
 0xac0   :  { %7639 = vpow2.f32 %v4748_v3 }
 0xac1   :  { %7641 = vpow2.f32 %v4749_v58 }
 0xac2   :  { %7643 = vpow2.f32 %v4750_v51 }
 0xac3   :  { %7645 = vtanh.f32 %v2857_v32  ;;  %v10989_v32 = vld [vmem:[#allocation21_spill] sm:$0xff] }
 0xaca   :  { %v7640_v22 = vpop.eup %7639 }
 0xacb   :  { %v7642_v26 = vpop.eup %7641  ;;  %v2867_v18 = vadd.f32 1.0, %v7640_v22  ;;  %v10990_v22 = vld [vmem:[#allocation22_spill] sm:$0xff] }
 0xacc   :  { %v2868_v57 = vadd.f32 1.0, %v7642_v26  ;;  %v7644_v23 = vpop.eup %7643  ;;  %v10987_v26 = vld [vmem:[#allocation19_spill] sm:$0xff] }
 0xacd   :  { %7647 = vrcp.f32 %v2867_v18  ;;  %v7646_v7 = vpop.eup %7645  ;;  %v2877_v3 = vadd.f32 1.0, %v7644_v23  ;;  %v10991_v18 = vld [vmem:[#allocation23_spill] sm:$0xff]  ;;  %v10992_v23 = vld [vmem:[#allocation24_spill] sm:$0xff] }
 0xace   :  { %7649 = vrcp.f32 %v2868_v57  ;;  %v10986_v57 = vld [vmem:[#allocation18_spill] sm:$0xff] }
 0xacf   :  { %7651 = vrcp.f32 %v2877_v3  ;;  %v10996_v3 = vld [vmem:[#allocation28_spill] sm:$0xff] }
 0xad7   :  { %v7648_v21 = vpop.eup %7647 }
 0xad8   :  { %v7650_v43 = vpop.eup %7649  ;;  %v2881_v48 = vmul.f32 %v7648_v21, %v7646_v7  ;;  %v10988_v7 = vld [vmem:[#allocation20_spill] sm:$0xff]  ;;  %v10993_v21 = vld [vmem:[#allocation25_spill] sm:$0xff] }
 0xad9   :  { %v2880_v58 = vmul.f32 %v7650_v43, %v9126_v5  ;;  %v7652_v4 = vpop.eup %7651  ;;  %v10985_v5 = vld [vmem:[#allocation17_spill] sm:$0xff]  ;;  %v10994_v43 = vld [vmem:[#allocation26_spill] sm:$0xff] }
 0xadb   :  { %v9322_v8 = vadd.f32 %v2881_v48, %v2880_v58  ;;  %v10995_v48 = vld [vmem:[#allocation27_spill] sm:$0xff]  ;;  %v10997_v58 = vld [vmem:[#allocation29_spill] sm:$0xff] }
 0xadd   :  { %7653 = vtanh.f32 %v9322_v8 }
 0xae7   :  { %v7654_v9 = vpop.eup %7653 }
 0xae8   :  { %v2884_v51 = vmul.f32 %v7654_v9, %v7652_v4  ;;  %v10998_v4 = vld [vmem:[#allocation30_spill] sm:$0xff]  ;;  %v10999_v9 = vld [vmem:[#allocation31_spill] sm:$0xff] }
 0xaea   :  { %2950 = vmatmul.mubr.f32.vlgmr.msra.gmra.mrb[28].mxu0 %v2884_v51  ;;  %3021 = vmatmul.mubr.f32.vlgmr.msra.gmra.mrb[28].mxu1 %v2884_v51 }
 0xaeb   :  { %6440 = vmatpush1.bf16.msra.mxu0 %v7944_v11  ;;  %6472 = vmatpush1.bf16.msra.mxu1 %v7947_v15 }
 0xaec   :  { %6442 = vmatprep.subr.bf16.mxu0 %v7951_v19  ;;  %6474 = vmatprep.subr.bf16.mxu1 %v7953_v20 }
 0xaed   :  { %3126 = vmatprep.mubr.f32.mxu0 %v10394_v12  ;;  %3197 = vmatprep.mubr.f32.mxu1 %v10394_v12 }
 0xaef   :  { %6444 = vmatpush1.bf16.msra.mxu0 %v7956_v24  ;;  %6476 = vmatpush1.bf16.msra.mxu1 %v7960_v28 }
 0xaf0   :  { %6446 = vmatprep.subr.bf16.mxu0 %v7962_v29  ;;  %6478 = vmatprep.subr.bf16.mxu1 %v7964_v33 }
 0xaf3   :  { %6448 = vmatpush1.bf16.msra.mxu0 %v7967_v37  ;;  %6480 = vmatpush1.bf16.msra.mxu1 %v7971_v41 }
 0xaf4   :  { %6450 = vmatprep.subr.bf16.mxu0 %v7973_v42  ;;  %6482 = vmatprep.subr.bf16.mxu1 %v7976_v46 }
 0xaf7   :  { %6452 = vmatpush1.bf16.msra.mxu0 %v7979_v53  ;;  %6484 = vmatpush1.bf16.msra.mxu1 %v7983_v54 }
 0xaf8   :  { %6454 = vmatprep.subr.bf16.mxu0 %v7985_v55  ;;  %6486 = vmatprep.subr.bf16.mxu1 %v7988_v59  ;;  %v3056_v59 = vpop.permute.xlu1 %3055 }
 0xafb   :  { %6456 = vmatpush1.bf16.msra.mxu0 %v7991_v2  ;;  %6488 = vmatpush1.bf16.msra.mxu1 %v10985_v5 }
 0xafc   :  { %6458 = vmatprep.subr.bf16.mxu0 %v10986_v57  ;;  %6490 = vmatprep.subr.bf16.mxu1 %v10987_v26 }
 0xaff   :  { %6460 = vmatpush1.bf16.msra.mxu0 %v10988_v7  ;;  %6492 = vmatpush1.bf16.msra.mxu1 %v10989_v32  ;;  %v11065_v7 = vld [vmem:[#allocation170_spill] sm:$0xff] }
 0xb00   :  { %6462 = vmatprep.subr.bf16.mxu0 %v10990_v22  ;;  %6494 = vmatprep.subr.bf16.mxu1 %v10991_v18  ;;  %v11008_v18 = vld [vmem:[#allocation40_spill] sm:$0xff]  ;;  %v11064_v22 = vld [vmem:[#allocation169_spill] sm:$0xff] }
 0xb03   :  { %6464 = vmatpush1.bf16.msra.mxu0 %v10992_v23  ;;  %6496 = vmatpush1.bf16.msra.mxu1 %v10993_v21  ;;  %v11000_v23 = vld [vmem:[#allocation32_spill] sm:$0xff]  ;;  %v11001_v21 = vld [vmem:[#allocation33_spill] sm:$0xff] }
 0xb04   :  { %6466 = vmatprep.subr.bf16.mxu0 %v10994_v43  ;;  %6498 = vmatprep.subr.bf16.mxu1 %v10995_v48  ;;  %v11002_v43 = vld [vmem:[#allocation34_spill] sm:$0xff]  ;;  %v11003_v48 = vld [vmem:[#allocation35_spill] sm:$0xff] }
 0xb07   :  { %6468 = vmatpush1.bf16.msra.mxu0 %v10996_v3  ;;  %6500 = vmatpush1.bf16.msra.mxu1 %v10997_v58  ;;  %v11004_v3 = vld [vmem:[#allocation36_spill] sm:$0xff]  ;;  %v11005_v58 = vld [vmem:[#allocation37_spill] sm:$0xff] }
 0xb08   :  { %6502 = vmatprep.subr.bf16.mxu0 %v10998_v4  ;;  %6566 = vmatprep.subr.bf16.mxu1 %v10999_v9  ;;  %v11006_v4 = vld [vmem:[#allocation38_spill] sm:$0xff]  ;;  %v11007_v9 = vld [vmem:[#allocation39_spill] sm:$0xff] }
 0xb0a   :  { %3127 = vmatmul.mubr.f32.vlgmr.msra.gmra.mrb[30].mxu0 %v9249_v14  ;;  %3198 = vmatmul.mubr.f32.vlgmr.msra.gmra.mrb[30].mxu1 %v9249_v14  ;;  %v11009_v14 = vld [vmem:[#allocation41_spill] sm:$0xff] }
 0xb0b   :  { %3300 = vmatprep.mubr.f32.mxu0 %v2884_v51  ;;  %3371 = vmatprep.mubr.f32.mxu1 %v2884_v51  ;;  %v11010_v51 = vld [vmem:[#allocation42_spill] sm:$0xff] }
 0xb0c   :  { %6504 = vmatpush1.bf16.msra.mxu0 %v11000_v23  ;;  %6568 = vmatpush1.bf16.msra.mxu1 %v11001_v21  ;;  %v11011_v23 = vld [vmem:[#allocation43_spill] sm:$0xff]  ;;  %v11012_v21 = vld [vmem:[#allocation44_spill] sm:$0xff] }
 0xb0d   :  { %6506 = vmatprep.subr.bf16.mxu0 %v11002_v43  ;;  %6570 = vmatprep.subr.bf16.mxu1 %v11003_v48  ;;  %v11013_v43 = vld [vmem:[#allocation45_spill] sm:$0xff]  ;;  %v11014_v48 = vld [vmem:[#allocation46_spill] sm:$0xff] }
 0xb10   :  { %6508 = vmatpush1.bf16.msra.mxu0 %v11004_v3  ;;  %6572 = vmatpush1.bf16.msra.mxu1 %v11005_v58  ;;  %v11015_v3 = vld [vmem:[#allocation47_spill] sm:$0xff]  ;;  %v11016_v58 = vld [vmem:[#allocation48_spill] sm:$0xff] }
 0xb11   :  { %6510 = vmatprep.subr.bf16.mxu0 %v11006_v4  ;;  %6574 = vmatprep.subr.bf16.mxu1 %v11007_v9  ;;  %v11017_v4 = vld [vmem:[#allocation49_spill] sm:$0xff]  ;;  %v11018_v9 = vld [vmem:[#allocation50_spill] sm:$0xff] }
 0xb14   :  { %6512 = vmatpush1.bf16.msra.mxu0 %v11008_v18  ;;  %6576 = vmatpush1.bf16.msra.mxu1 %v11009_v14  ;;  %v11019_v18 = vld [vmem:[#allocation51_spill] sm:$0xff]  ;;  %v11020_v14 = vld [vmem:[#allocation52_spill] sm:$0xff] }
 0xb15   :  { %6514 = vmatprep.subr.bf16.mxu0 %v11010_v51  ;;  %6578 = vmatprep.subr.bf16.mxu1 %v11011_v23  ;;  %v11021_v51 = vld [vmem:[#allocation53_spill] sm:$0xff]  ;;  %v11022_v23 = vld [vmem:[#allocation54_spill] sm:$0xff] }
 0xb18   :  { %6516 = vmatpush1.bf16.msra.mxu0 %v11012_v21  ;;  %6580 = vmatpush1.bf16.msra.mxu1 %v11013_v43  ;;  %v11023_v21 = vld [vmem:[#allocation55_spill] sm:$0xff]  ;;  %v11024_v43 = vld [vmem:[#allocation56_spill] sm:$0xff] }
 0xb19   :  { %6518 = vmatprep.subr.bf16.mxu0 %v11014_v48  ;;  %6582 = vmatprep.subr.bf16.mxu1 %v11015_v3  ;;  %v11025_v48 = vld [vmem:[#allocation57_spill] sm:$0xff]  ;;  %v11026_v3 = vld [vmem:[#allocation58_spill] sm:$0xff] }
 0xb1c   :  { %6520 = vmatpush1.bf16.msra.mxu0 %v11016_v58  ;;  %6584 = vmatpush1.bf16.msra.mxu1 %v11017_v4  ;;  %v11027_v58 = vld [vmem:[#allocation59_spill] sm:$0xff]  ;;  %v11028_v4 = vld [vmem:[#allocation60_spill] sm:$0xff] }
 0xb1d   :  { %6522 = vmatprep.subr.bf16.mxu0 %v11018_v9  ;;  %6586 = vmatprep.subr.bf16.mxu1 %v11019_v18  ;;  %v11029_v9 = vld [vmem:[#allocation61_spill] sm:$0xff]  ;;  %v11030_v18 = vld [vmem:[#allocation62_spill] sm:$0xff] }
 0xb20   :  { %6524 = vmatpush1.bf16.msra.mxu0 %v11020_v14  ;;  %6588 = vmatpush1.bf16.msra.mxu1 %v11021_v51  ;;  %v11031_v14 = vld [vmem:[#allocation63_spill] sm:$0xff]  ;;  %v11032_v51 = vld [vmem:[#allocation64_spill] sm:$0xff] }
 0xb21   :  { %6526 = vmatprep.subr.bf16.mxu0 %v11022_v23  ;;  %6590 = vmatprep.subr.bf16.mxu1 %v11023_v21  ;;  %v11033_v23 = vld [vmem:[#allocation65_spill] sm:$0xff]  ;;  %v11034_v21 = vld [vmem:[#allocation66_spill] sm:$0xff] }
 0xb24   :  { %6528 = vmatpush1.bf16.msra.mxu0 %v11024_v43  ;;  %6592 = vmatpush1.bf16.msra.mxu1 %v11025_v48  ;;  %v11035_v43 = vld [vmem:[#allocation67_spill] sm:$0xff]  ;;  %v11036_v48 = vld [vmem:[#allocation68_spill] sm:$0xff] }
 0xb25   :  { %6530 = vmatprep.subr.bf16.mxu0 %v11026_v3  ;;  %6594 = vmatprep.subr.bf16.mxu1 %v11027_v58  ;;  %v11037_v3 = vld [vmem:[#allocation69_spill] sm:$0xff]  ;;  %v11038_v58 = vld [vmem:[#allocation70_spill] sm:$0xff] }
 0xb28   :  { %6532 = vmatpush1.bf16.msra.mxu0 %v11028_v4  ;;  %6596 = vmatpush1.bf16.msra.mxu1 %v11029_v9  ;;  %v11039_v4 = vld [vmem:[#allocation71_spill] sm:$0xff]  ;;  %v11040_v9 = vld [vmem:[#allocation72_spill] sm:$0xff] }
 0xb29   :  { %6534 = vmatprep.subr.bf16.mxu0 %v11030_v18  ;;  %6598 = vmatprep.subr.bf16.mxu1 %v11031_v14  ;;  %v11041_v18 = vld [vmem:[#allocation73_spill] sm:$0xff]  ;;  %v11042_v14 = vld [vmem:[#allocation74_spill] sm:$0xff] }
 0xb2c   :  { %6536 = vmatpush1.bf16.msra.mxu0 %v11032_v51  ;;  %6600 = vmatpush1.bf16.msra.mxu1 %v11033_v23  ;;  %v11043_v51 = vld [vmem:[#allocation75_spill] sm:$0xff]  ;;  %v11044_v23 = vld [vmem:[#allocation76_spill] sm:$0xff] }
 0xb2d   :  { %6538 = vmatprep.subr.bf16.mxu0 %v11034_v21  ;;  %6602 = vmatprep.subr.bf16.mxu1 %v11035_v43  ;;  %v11045_v21 = vld [vmem:[#allocation77_spill] sm:$0xff]  ;;  %v11046_v43 = vld [vmem:[#allocation78_spill] sm:$0xff] }
 0xb30   :  { %6540 = vmatpush1.bf16.msra.mxu0 %v11036_v48  ;;  %6604 = vmatpush1.bf16.msra.mxu1 %v11037_v3  ;;  %v11047_v48 = vld [vmem:[#allocation79_spill] sm:$0xff]  ;;  %v11048_v3 = vld [vmem:[#allocation80_spill] sm:$0xff] }
 0xb31   :  { %6542 = vmatprep.subr.bf16.mxu0 %v11038_v58  ;;  %6606 = vmatprep.subr.bf16.mxu1 %v11039_v4  ;;  %v11049_v58 = vld [vmem:[#allocation81_spill] sm:$0xff]  ;;  %v11050_v4 = vld [vmem:[#allocation82_spill] sm:$0xff] }
 0xb34   :  { %6544 = vmatpush1.bf16.msra.mxu0 %v11040_v9  ;;  %6608 = vmatpush1.bf16.msra.mxu1 %v11041_v18  ;;  %v11051_v9 = vld [vmem:[#allocation83_spill] sm:$0xff]  ;;  %v11052_v18 = vld [vmem:[#allocation84_spill] sm:$0xff] }
 0xb35   :  { %6546 = vmatprep.subr.bf16.mxu0 %v11042_v14  ;;  %6610 = vmatprep.subr.bf16.mxu1 %v11043_v51  ;;  %v11053_v14 = vld [vmem:[#allocation85_spill] sm:$0xff]  ;;  %v11054_v51 = vld [vmem:[#allocation86_spill] sm:$0xff] }
 0xb38   :  { %6548 = vmatpush1.bf16.msra.mxu0 %v11044_v23  ;;  %6612 = vmatpush1.bf16.msra.mxu1 %v11045_v21  ;;  %v11055_v23 = vld [vmem:[#allocation87_spill] sm:$0xff]  ;;  %v11056_v21 = vld [vmem:[#allocation88_spill] sm:$0xff] }
 0xb39   :  { %6550 = vmatprep.subr.bf16.mxu0 %v11046_v43  ;;  %6614 = vmatprep.subr.bf16.mxu1 %v11047_v48  ;;  %v11057_v43 = vld [vmem:[#allocation89_spill] sm:$0xff]  ;;  %v11058_v48 = vld [vmem:[#allocation90_spill] sm:$0xff] }
 0xb3c   :  { %6552 = vmatpush1.bf16.msra.mxu0 %v11048_v3  ;;  %6616 = vmatpush1.bf16.msra.mxu1 %v11049_v58  ;;  %v11059_v3 = vld [vmem:[#allocation91_spill] sm:$0xff]  ;;  %v11060_v58 = vld [vmem:[#allocation92_spill] sm:$0xff] }
 0xb3d   :  { %6554 = vmatprep.subr.bf16.mxu0 %v11050_v4  ;;  %6618 = vmatprep.subr.bf16.mxu1 %v11051_v9  ;;  %v11061_v4 = vld [vmem:[#allocation93_spill] sm:$0xff]  ;;  %v11062_v9 = vld [vmem:[#allocation94_spill] sm:$0xff] }
 0xb40   :  { %6556 = vmatpush1.bf16.msra.mxu0 %v11052_v18  ;;  %6620 = vmatpush1.bf16.msra.mxu1 %v11053_v14  ;;  %v11063_v18 = vld [vmem:[#allocation95_spill] sm:$0xff] }
 0xb41   :  { %6558 = vmatprep.subr.bf16.mxu0 %v11054_v51  ;;  %6622 = vmatprep.subr.bf16.mxu1 %v11055_v23 }
 0xb44   :  { %6560 = vmatpush1.bf16.msra.mxu0 %v11056_v21  ;;  %6624 = vmatpush1.bf16.msra.mxu1 %v11057_v43 }
 0xb45   :  { %6562 = vmatprep.subr.bf16.mxu0 %v11058_v48  ;;  %6626 = vmatprep.subr.bf16.mxu1 %v11059_v3  ;;  %v11066_v3 = vld [vmem:[#allocation171_spill] sm:$0xff] }
 0xb48   :  { %6564 = vmatpush1.bf16.msra.mxu0 %v11060_v58  ;;  %6628 = vmatpush1.bf16.msra.mxu1 %v11061_v4 }
 0xb49   :  { %6630 = vmatprep.subr.bf16.mxu0 %v11062_v9  ;;  %6694 = vmatprep.subr.bf16.mxu1 %v11063_v18 }
 0xbbd   :  { %v2951_v14 = vpop.f32.mrb[28].mxu0  ;;  %v3022_v51 = vpop.f32.mrb[28].mxu1 }
 0xbbe   :  { %v2952_v23 = vadd.f32 %v2951_v14, %v11064_v22  ;;  %v2953_v32 = vpop.f32.mrb[29].mxu0  ;;  %v3024_v21 = vpop.f32.mrb[29].mxu1  ;;  %v3023_v58 = vadd.f32 %v3022_v51, %v11066_v3  ;;  %v3059_v51 = vmul.f32 %v3056_v59, %v10657_v44 }
 0xbbf   :  { %v2954_v43 = vadd.f32 %v2953_v32, %v11065_v7 }
 0xbc0   :  { %v4751_v26 = vmul.f32 -1.442695, %v2952_v23  ;;  %v11067_v23 = vld [vmem:[#allocation96_spill] sm:$0xff] }
 0xbc1   :  { %v4752_v48 = vmul.f32 -1.442695, %v2954_v43  ;;  %v3058_v43 = vmul.f32 %v3056_v59, %v11067_v23  ;;  %v3025_v23 = vadd.f32 %v3024_v21, %v8638_v31 }
 0xbc2   :  { %7655 = vpow2.f32 %v4751_v26 }
 0xbc3   :  { %7657 = vpow2.f32 %v4752_v48 }
 0xbc4   :  { %7659 = vtanh.f32 %v3023_v58 }
 0xbcc   :  { %v7656_v57 = vpop.eup %7655 }
 0xbcd   :  { %v7658_v4 = vpop.eup %7657  ;;  %v3033_v5 = vadd.f32 1.0, %v7656_v57 }
 0xbce   :  { %v3034_v9 = vadd.f32 1.0, %v7658_v4  ;;  %v7660_v18 = vpop.eup %7659 }
 0xbcf   :  { %7661 = vrcp.f32 %v3033_v5 }
 0xbd0   :  { %7663 = vrcp.f32 %v3034_v9 }
 0xbd9   :  { %v7662_v2 = vpop.eup %7661 }
 0xbda   :  { %v7664_v14 = vpop.eup %7663  ;;  %v3047_v22 = vmul.f32 %v7662_v2, %v7660_v18  ;;  %v11068_v2 = vld [vmem:[#allocation98_spill] sm:$0xff] }
 0xbdb   :  { %v3046_v32 = vmul.f32 %v7664_v14, %v9235_v50  ;;  %v3061_v18 = vmul.f32 %v3056_v59, %v11068_v2 }
 0xbdd   :  { %v3128_v26 = vpop.f32.mrb[30].mxu0  ;;  %v3199_v48 = vpop.f32.mrb[30].mxu1  ;;  %v9431_v3 = vadd.f32 %v3047_v22, %v3046_v32  ;;  %v3060_v22 = vmul.f32 %v3056_v59, %v10522_v49 }
 0xbde   :  { %v3204_v57 = vadd.f32 %v3128_v26, %v3058_v43  ;;  %v3130_v58 = vpop.f32.mrb[31].mxu0  ;;  %v3201_v4 = vpop.f32.mrb[31].mxu1  ;;  %v4753_v26 = vmul.f32 -1.442695, %v3025_v23 }
 0xbdf   :  { %v3205_v5 = vadd.f32 %v3130_v58, %v3059_v51  ;;  %v3207_v14 = vadd.f32 %v3201_v4, %v3061_v18  ;;  %v3206_v43 = vadd.f32 %v3199_v48, %v3060_v22 }
 0xbe0   :  { %v3208_v9 = vadd.f32 %v3204_v57, %v10659_v40 }
 0xbe1   :  { %v3209_v7 = vadd.f32 %v3205_v5, %v10660_v30  ;;  %v3211_v32 = vadd.f32 %v3207_v14, %v10523_v63  ;;  %v3210_v57 = vadd.f32 %v3206_v43, %v10524_v36 }
 0xbe2   :  { %v4755_v55 = vmul.f32 -1.442695, %v3208_v9 }
 0xbe3   :  { %v4756_v50 = vmul.f32 -1.442695, %v3209_v7  ;;  %v4757_v51 = vmul.f32 -1.442695, %v3211_v32 }
 0xbe4   :  { %7665 = vpow2.f32 %v4755_v55 }
 0xbe5   :  { %7667 = vpow2.f32 %v4756_v50 }
 0xbe6   :  { %7669 = vpow2.f32 %v4753_v26 }
 0xbe7   :  { %7671 = vpow2.f32 %v4757_v51 }
 0xbe8   :  { %7673 = vtanh.f32 %v3210_v57  ;;  %v11070_v57 = vld [vmem:[#allocation121_spill] sm:$0xff] }
 0xbee   :  { %v7666_v58 = vpop.eup %7665 }
 0xbef   :  { %v7668_v5 = vpop.eup %7667  ;;  %v3218_v2 = vadd.f32 1.0, %v7666_v58  ;;  %v11071_v58 = vld [vmem:[#allocation122_spill] sm:$0xff] }
 0xbf0   :  { %v3219_v7 = vadd.f32 1.0, %v7668_v5  ;;  %v7670_v55 = vpop.eup %7669  ;;  %v11072_v5 = vld [vmem:[#allocation123_spill] sm:$0xff] }
 0xbf1   :  { %7675 = vrcp.f32 %v3218_v2  ;;  %v7672_v21 = vpop.eup %7671  ;;  %v3043_v50 = vadd.f32 1.0, %v7670_v55  ;;  %v11074_v55 = vld [vmem:[#allocation125_spill] sm:$0xff] }
 0xbf2   :  { %7677 = vrcp.f32 %v3219_v7  ;;  %v7674_v4 = vpop.eup %7673  ;;  %v3228_v48 = vadd.f32 1.0, %v7672_v21  ;;  %v11073_v7 = vld [vmem:[#allocation124_spill] sm:$0xff]  ;;  %v11075_v21 = vld [vmem:[#allocation126_spill] sm:$0xff] }
 0xbf3   :  { %7679 = vtanh.f32 %v9431_v3 }
 0xbf4   :  { %7681 = vrcp.f32 %v3228_v48  ;;  %v11080_v48 = vld [vmem:[#allocation131_spill] sm:$0xff] }
 0xbfb   :  { %v7676_v59 = vpop.eup %7675 }
 0xbfc   :  { %v7678_v9 = vpop.eup %7677  ;;  %v3232_v18 = vmul.f32 %v7676_v59, %v7674_v4  ;;  %v11076_v4 = vld [vmem:[#allocation127_spill] sm:$0xff]  ;;  %v11077_v59 = vld [vmem:[#allocation128_spill] sm:$0xff] }
 0xbfd   :  { %v3231_v23 = vmul.f32 %v7678_v9, %v9245_v39  ;;  %v7680_v2 = vpop.eup %7679  ;;  %v11069_v39 = vld [vmem:[#allocation120_spill] sm:$0xff]  ;;  %v11078_v9 = vld [vmem:[#allocation129_spill] sm:$0xff] }
 0xbfe   :  { %v7682_v22 = vpop.eup %7681 }
 0xbff   :  { %v9441_v14 = vadd.f32 %v3232_v18, %v3231_v23  ;;  %v11079_v18 = vld [vmem:[#allocation130_spill] sm:$0xff]  ;;  %v11081_v23 = vld [vmem:[#allocation132_spill] sm:$0xff] }
 0xc01   :  { %7683 = vtanh.f32 %v9441_v14 }
 0xc02   :  { %7685 = vrcp.f32 %v3043_v50  ;;  %v11082_v50 = vld [vmem:[#allocation133_spill] sm:$0xff] }
 0xc0b   :  { %v7684_v32 = vpop.eup %7683 }
 0xc0c   :  { %v7686_v43 = vpop.eup %7685  ;;  %v9445_v26 = vmul.f32 %v7684_v32, %v7682_v22  ;;  %v11084_v22 = vld [vmem:[#allocation135_spill] sm:$0xff]  ;;  %v11085_v32 = vld [vmem:[#allocation136_spill] sm:$0xff] }
 0xc0d   :  { %v3050_v51 = vmul.f32 %v7686_v43, %v7680_v2  ;;  %v11083_v2 = vld [vmem:[#allocation134_spill] sm:$0xff]  ;;  %v11086_v43 = vld [vmem:[#allocation137_spill] sm:$0xff] }
 0xc0e   :  { %3301 = vmatmul.mubr.f32.vlgmr.msra.gmra.mrb[32].mxu0 %v9445_v26  ;;  %3372 = vmatmul.mubr.f32.vlgmr.msra.gmra.mrb[32].mxu1 %v9445_v26 }
 0xc0f   :  { %3466 = vmatprep.mubr.f32.mxu0 %v3050_v51  ;;  %3537 = vmatprep.mubr.f32.mxu1 %v3050_v51  ;;  %v11087_v51 = vld [vmem:[#allocation138_spill] sm:$0xff] }
 0xc10   :  { %6632 = vmatpush1.bf16.msra.mxu0 %v10526_v0  ;;  %6696 = vmatpush1.bf16.msra.mxu1 %v10527_v16 }
 0xc11   :  { %6634 = vmatprep.subr.bf16.mxu0 %v10528_v61  ;;  %6698 = vmatprep.subr.bf16.mxu1 %v10529_v52 }
 0xc14   :  { %6636 = vmatpush1.bf16.msra.mxu0 %v10530_v38  ;;  %6700 = vmatpush1.bf16.msra.mxu1 %v10531_v13 }
 0xc15   :  { %6638 = vmatprep.subr.bf16.mxu0 %v8319_v1  ;;  %6702 = vmatprep.subr.bf16.mxu1 %v10661_v35 }
 0xc18   :  { %6640 = vmatpush1.bf16.msra.mxu0 %v10662_v34  ;;  %6704 = vmatpush1.bf16.msra.mxu1 %v10663_v47 }
 0xc19   :  { %6642 = vmatprep.subr.bf16.mxu0 %v10797_v10  ;;  %6706 = vmatprep.subr.bf16.mxu1 %v10798_v27 }
 0xc1c   :  { %6644 = vmatpush1.bf16.msra.mxu0 %v10799_v17  ;;  %6708 = vmatpush1.bf16.msra.mxu1 %v10933_v60 }
 0xc1d   :  { %6646 = vmatprep.subr.bf16.mxu0 %v10934_v6  ;;  %6710 = vmatprep.subr.bf16.mxu1 %v10935_v56 }
 0xc20   :  { %6648 = vmatpush1.bf16.msra.mxu0 %v11069_v39  ;;  %6712 = vmatpush1.bf16.msra.mxu1 %v11070_v57 }
 0xc21   :  { %6650 = vmatprep.subr.bf16.mxu0 %v11071_v58  ;;  %6714 = vmatprep.subr.bf16.mxu1 %v11072_v5 }
 0xc24   :  { %6652 = vmatpush1.bf16.msra.mxu0 %v11073_v7  ;;  %6716 = vmatpush1.bf16.msra.mxu1 %v11074_v55 }
 0xc25   :  { %6654 = vmatprep.subr.bf16.mxu0 %v11075_v21  ;;  %6718 = vmatprep.subr.bf16.mxu1 %v11076_v4  ;;  %v11117_v4 = vld [vmem:[#allocation166_spill] sm:$0xff] }
 0xc28   :  { %6656 = vmatpush1.bf16.msra.mxu0 %v11077_v59  ;;  %6720 = vmatpush1.bf16.msra.mxu1 %v11078_v9  ;;  %v11088_v59 = vld [vmem:[#allocation139_spill] sm:$0xff]  ;;  %v11089_v9 = vld [vmem:[#allocation140_spill] sm:$0xff] }
 0xc29   :  { %6658 = vmatprep.subr.bf16.mxu0 %v11079_v18  ;;  %6722 = vmatprep.subr.bf16.mxu1 %v11080_v48  ;;  %v11090_v18 = vld [vmem:[#allocation141_spill] sm:$0xff]  ;;  %v11091_v48 = vld [vmem:[#allocation142_spill] sm:$0xff] }
 0xc2c   :  { %6660 = vmatpush1.bf16.msra.mxu0 %v11081_v23  ;;  %6724 = vmatpush1.bf16.msra.mxu1 %v11082_v50  ;;  %v11092_v23 = vld [vmem:[#allocation143_spill] sm:$0xff]  ;;  %v11093_v50 = vld [vmem:[#allocation144_spill] sm:$0xff] }
 0xc2d   :  { %6662 = vmatprep.subr.bf16.mxu0 %v11083_v2  ;;  %6726 = vmatprep.subr.bf16.mxu1 %v11084_v22  ;;  %v11094_v2 = vld [vmem:[#allocation145_spill] sm:$0xff]  ;;  %v11095_v22 = vld [vmem:[#allocation146_spill] sm:$0xff] }
 0xc30   :  { %6664 = vmatpush1.bf16.msra.mxu0 %v11085_v32  ;;  %6728 = vmatpush1.bf16.msra.mxu1 %v11086_v43  ;;  %v11096_v32 = vld [vmem:[#allocation147_spill] sm:$0xff]  ;;  %v11097_v43 = vld [vmem:[#allocation148_spill] sm:$0xff] }
 0xc31   :  { %6666 = vmatprep.subr.bf16.mxu0 %v11087_v51  ;;  %6730 = vmatprep.subr.bf16.mxu1 %v11088_v59  ;;  %v11098_v51 = vld [vmem:[#allocation149_spill] sm:$0xff]  ;;  %v11099_v59 = vld [vmem:[#allocation150_spill] sm:$0xff] }
 0xc34   :  { %6668 = vmatpush1.bf16.msra.mxu0 %v11089_v9  ;;  %6732 = vmatpush1.bf16.msra.mxu1 %v11090_v18  ;;  %v11100_v9 = vld [vmem:[#allocation151_spill] sm:$0xff]  ;;  %v11101_v18 = vld [vmem:[#allocation152_spill] sm:$0xff] }
 0xc35   :  { %6670 = vmatprep.subr.bf16.mxu0 %v11091_v48  ;;  %6734 = vmatprep.subr.bf16.mxu1 %v11092_v23  ;;  %v11102_v48 = vld [vmem:[#allocation153_spill] sm:$0xff]  ;;  %v11103_v23 = vld [vmem:[#allocation154_spill] sm:$0xff] }
 0xc38   :  { %6672 = vmatpush1.bf16.msra.mxu0 %v11093_v50  ;;  %6736 = vmatpush1.bf16.msra.mxu1 %v11094_v2  ;;  %v11104_v50 = vld [vmem:[#allocation155_spill] sm:$0xff]  ;;  %v11105_v2 = vld [vmem:[#allocation156_spill] sm:$0xff] }
 0xc39   :  { %6674 = vmatprep.subr.bf16.mxu0 %v11095_v22  ;;  %6738 = vmatprep.subr.bf16.mxu1 %v11096_v32  ;;  %v11106_v22 = vld [vmem:[#allocation157_spill] sm:$0xff]  ;;  %v11107_v32 = vld [vmem:[#allocation158_spill] sm:$0xff] }
 0xc3c   :  { %6676 = vmatpush1.bf16.msra.mxu0 %v11097_v43  ;;  %6740 = vmatpush1.bf16.msra.mxu1 %v11098_v51  ;;  %v11108_v43 = vld [vmem:[#allocation159_spill] sm:$0xff]  ;;  %v11109_v51 = vld [vmem:[#allocation160_spill] sm:$0xff] }
 0xc3d   :  { %6678 = vmatprep.subr.bf16.mxu0 %v11099_v59  ;;  %6742 = vmatprep.subr.bf16.mxu1 %v11100_v9  ;;  %v11110_v59 = vld [vmem:[#allocation161_spill] sm:$0xff]  ;;  %v11111_v9 = vld [vmem:[#allocation162_spill] sm:$0xff] }
 0xc40   :  { %6680 = vmatpush1.bf16.msra.mxu0 %v11101_v18  ;;  %6744 = vmatpush1.bf16.msra.mxu1 %v11102_v48  ;;  %v11112_v18 = vld [vmem:[#allocation163_spill] sm:$0xff]  ;;  %v11113_v48 = vld [vmem:[#allocation164_spill] sm:$0xff] }
 0xc41   :  { %6682 = vmatprep.subr.bf16.mxu0 %v11103_v23  ;;  %6746 = vmatprep.subr.bf16.mxu1 %v11104_v50  ;;  %v11114_v23 = vld [vmem:[#allocation165_spill] sm:$0xff] }
 0xc42   :  { %v11115_v50 = vld [vmem:[#allocation9_spill] sm:$0xff] }
 0xc44   :  { %6684 = vmatpush1.bf16.msra.mxu0 %v11105_v2  ;;  %6748 = vmatpush1.bf16.msra.mxu1 %v11106_v22  ;;  %v11116_v2 = vld [vmem:[#allocation10_spill] sm:$0xff] }
 0xc45   :  { %6686 = vmatprep.subr.bf16.mxu0 %v11107_v32  ;;  %6750 = vmatprep.subr.bf16.mxu1 %v11108_v43 }
 0xc48   :  { %6688 = vmatpush1.bf16.msra.mxu0 %v11109_v51  ;;  %6752 = vmatpush1.bf16.msra.mxu1 %v11110_v59 }
 0xc49   :  { %6690 = vmatprep.subr.bf16.mxu0 %v11111_v9  ;;  %6754 = vmatprep.subr.bf16.mxu1 %v11112_v18 }
 0xc4c   :  { %6692 = vmatpush1.bf16.msra.mxu0 %v11113_v48  ;;  %6756 = vmatpush1.bf16.msra.mxu1 %v11114_v23 }
 0xc4d   :  { %6758 = vmatprep.subr.bf16.mxu0 %v11115_v50  ;;  %6790 = vmatprep.subr.bf16.mxu1 %v11116_v2 }
 0xce1   :  { %v3302_v22 = vpop.f32.mrb[32].mxu0  ;;  %v3373_v32 = vpop.f32.mrb[32].mxu1 }
 0xce2   :  { %v3303_v43 = vadd.f32 %v3302_v22, %v11117_v4  ;;  %v3304_v21 = vpop.f32.mrb[33].mxu0  ;;  %v3375_v51 = vpop.f32.mrb[33].mxu1  ;;  %v3374_v23 = vadd.f32 %v3373_v32, %v8509_v62  ;;  %v11124_v32 = vld [vmem:[#allocation20_spill] sm:$0xff] }
 0xce3   :  { %v3305_v59 = vadd.f32 %v3304_v21, %v10584_v45  ;;  %v3376_v48 = vadd.f32 %v3375_v51, %v10585_v25 }
 0xce4   :  { %v4758_v55 = vmul.f32 -1.442695, %v3303_v43 }
 0xce5   :  { %v4759_v9 = vmul.f32 -1.442695, %v3305_v59  ;;  %v4760_v18 = vmul.f32 -1.442695, %v3376_v48 }
 0xce6   :  { %7687 = vpow2.f32 %v4758_v55 }
 0xce7   :  { %7689 = vpow2.f32 %v4759_v9 }
 0xce8   :  { %7691 = vpow2.f32 %v4760_v18 }
 0xce9   :  { %7693 = vtanh.f32 %v3374_v23  ;;  %v11122_v23 = vld [vmem:[#allocation18_spill] sm:$0xff] }
 0xcf0   :  { %v7688_v50 = vpop.eup %7687 }
 0xcf1   :  { %v7690_v7 = vpop.eup %7689  ;;  %v3384_v2 = vadd.f32 1.0, %v7688_v50 }
 0xcf2   :  { %v3385_v5 = vadd.f32 1.0, %v7690_v7  ;;  %v7692_v22 = vpop.eup %7691  ;;  %v11120_v7 = vld [vmem:[#allocation16_spill] sm:$0xff] }
 0xcf3   :  { %7695 = vrcp.f32 %v3384_v2  ;;  %v7694_v4 = vpop.eup %7693  ;;  %v3394_v55 = vadd.f32 1.0, %v7692_v22  ;;  %v11123_v2 = vld [vmem:[#allocation19_spill] sm:$0xff]  ;;  %v11125_v22 = vld [vmem:[#allocation21_spill] sm:$0xff] }
 0xcf4   :  { %7697 = vrcp.f32 %v3385_v5  ;;  %v11119_v5 = vld [vmem:[#allocation15_spill] sm:$0xff] }
 0xcf5   :  { %7699 = vrcp.f32 %v3394_v55  ;;  %v11129_v55 = vld [vmem:[#allocation25_spill] sm:$0xff] }
 0xcfd   :  { %v7696_v21 = vpop.eup %7695 }
 0xcfe   :  { %v7698_v43 = vpop.eup %7697  ;;  %v3398_v59 = vmul.f32 %v7696_v21, %v7694_v4  ;;  %v11121_v4 = vld [vmem:[#allocation17_spill] sm:$0xff]  ;;  %v11126_v21 = vld [vmem:[#allocation22_spill] sm:$0xff] }
 0xcff   :  { %v3397_v9 = vmul.f32 %v7698_v43, %v9322_v8  ;;  %v7700_v48 = vpop.eup %7699  ;;  %v11118_v8 = vld [vmem:[#allocation14_spill] sm:$0xff]  ;;  %v11127_v43 = vld [vmem:[#allocation23_spill] sm:$0xff] }
 0xd01   :  { %v9518_v51 = vadd.f32 %v3398_v59, %v3397_v9  ;;  %v11128_v59 = vld [vmem:[#allocation24_spill] sm:$0xff]  ;;  %v11130_v9 = vld [vmem:[#allocation26_spill] sm:$0xff] }
 0xd03   :  { %7701 = vtanh.f32 %v9518_v51 }
 0xd0d   :  { %v7702_v50 = vpop.eup %7701 }
 0xd0e   :  { %v3401_v18 = vmul.f32 %v7702_v50, %v7700_v48  ;;  %v11131_v48 = vld [vmem:[#allocation27_spill] sm:$0xff]  ;;  %v11132_v50 = vld [vmem:[#allocation28_spill] sm:$0xff] }
 0xd10   :  { %3467 = vmatmul.mubr.f32.vlgmr.msra.gmra.mrb[34].mxu0 %v3401_v18  ;;  %3538 = vmatmul.mubr.f32.vlgmr.msra.gmra.mrb[34].mxu1 %v3401_v18 }
 0xd11   :  { %6760 = vmatpush1.bf16.msra.mxu0 %v7944_v11  ;;  %6792 = vmatpush1.bf16.msra.mxu1 %v7947_v15 }
 0xd12   :  { %6762 = vmatprep.subr.bf16.mxu0 %v7951_v19  ;;  %6794 = vmatprep.subr.bf16.mxu1 %v7953_v20 }
 0xd13   :  { %3643 = vmatprep.mubr.f32.mxu0 %v10394_v12  ;;  %3714 = vmatprep.mubr.f32.mxu1 %v10394_v12 }
 0xd15   :  { %6764 = vmatpush1.bf16.msra.mxu0 %v7956_v24  ;;  %6796 = vmatpush1.bf16.msra.mxu1 %v7960_v28 }
 0xd16   :  { %6766 = vmatprep.subr.bf16.mxu0 %v7962_v29  ;;  %6798 = vmatprep.subr.bf16.mxu1 %v7964_v33 }
 0xd19   :  { %6768 = vmatpush1.bf16.msra.mxu0 %v7967_v37  ;;  %6800 = vmatpush1.bf16.msra.mxu1 %v7971_v41 }
 0xd1a   :  { %6770 = vmatprep.subr.bf16.mxu0 %v7973_v42  ;;  %6802 = vmatprep.subr.bf16.mxu1 %v7976_v46  ;;  %v11204_v46 = vld [vmem:[#allocation98_spill] sm:$0xff] }
 0xd1d   :  { %6772 = vmatpush1.bf16.msra.mxu0 %v7979_v53  ;;  %6804 = vmatpush1.bf16.msra.mxu1 %v7983_v54 }
 0xd1e   :  { %6774 = vmatprep.subr.bf16.mxu0 %v11118_v8  ;;  %6806 = vmatprep.subr.bf16.mxu1 %v11119_v5 }
 0xd21   :  { %6776 = vmatpush1.bf16.msra.mxu0 %v11120_v7  ;;  %6808 = vmatpush1.bf16.msra.mxu1 %v11121_v4  ;;  %v11201_v4 = vld [vmem:[#allocation170_spill] sm:$0xff] }
 0xd22   :  { %6778 = vmatprep.subr.bf16.mxu0 %v11122_v23  ;;  %6810 = vmatprep.subr.bf16.mxu1 %v11123_v2  ;;  %v11133_v23 = vld [vmem:[#allocation29_spill] sm:$0xff]  ;;  %v11134_v2 = vld [vmem:[#allocation30_spill] sm:$0xff] }
 0xd25   :  { %6780 = vmatpush1.bf16.msra.mxu0 %v11124_v32  ;;  %6812 = vmatpush1.bf16.msra.mxu1 %v11125_v22  ;;  %v11135_v32 = vld [vmem:[#allocation31_spill] sm:$0xff] }
 0xd26   :  { %6782 = vmatprep.subr.bf16.mxu0 %v11126_v21  ;;  %6814 = vmatprep.subr.bf16.mxu1 %v11127_v43  ;;  %v11144_v43 = vld [vmem:[#allocation40_spill] sm:$0xff]  ;;  %v11200_v21 = vld [vmem:[#allocation169_spill] sm:$0xff] }
 0xd29   :  { %6784 = vmatpush1.bf16.msra.mxu0 %v11128_v59  ;;  %6816 = vmatpush1.bf16.msra.mxu1 %v11129_v55  ;;  %v11136_v59 = vld [vmem:[#allocation32_spill] sm:$0xff]  ;;  %v11137_v55 = vld [vmem:[#allocation33_spill] sm:$0xff] }
 0xd2a   :  { %6786 = vmatprep.subr.bf16.mxu0 %v11130_v9  ;;  %6818 = vmatprep.subr.bf16.mxu1 %v11131_v48  ;;  %v11138_v9 = vld [vmem:[#allocation34_spill] sm:$0xff]  ;;  %v11139_v48 = vld [vmem:[#allocation35_spill] sm:$0xff] }
 0xd2d   :  { %6788 = vmatpush1.bf16.msra.mxu0 %v11132_v50  ;;  %6820 = vmatpush1.bf16.msra.mxu1 %v11133_v23  ;;  %v11140_v50 = vld [vmem:[#allocation36_spill] sm:$0xff]  ;;  %v11141_v23 = vld [vmem:[#allocation37_spill] sm:$0xff] }
 0xd2e   :  { %6822 = vmatprep.subr.bf16.mxu0 %v11134_v2  ;;  %6886 = vmatprep.subr.bf16.mxu1 %v11135_v32  ;;  %v11142_v2 = vld [vmem:[#allocation38_spill] sm:$0xff]  ;;  %v11143_v32 = vld [vmem:[#allocation39_spill] sm:$0xff] }
 0xd30   :  { %3644 = vmatmul.mubr.f32.vlgmr.msra.gmra.mrb[36].mxu0 %v9445_v26  ;;  %3715 = vmatmul.mubr.f32.vlgmr.msra.gmra.mrb[36].mxu1 %v9445_v26  ;;  %v11145_v26 = vld [vmem:[#allocation41_spill] sm:$0xff] }
 0xd31   :  { %3817 = vmatprep.mubr.f32.mxu0 %v3401_v18  ;;  %3888 = vmatprep.mubr.f32.mxu1 %v3401_v18  ;;  %v11146_v18 = vld [vmem:[#allocation42_spill] sm:$0xff] }
 0xd32   :  { %6824 = vmatpush1.bf16.msra.mxu0 %v11136_v59  ;;  %6888 = vmatpush1.bf16.msra.mxu1 %v11137_v55  ;;  %v11147_v59 = vld [vmem:[#allocation43_spill] sm:$0xff]  ;;  %v11148_v55 = vld [vmem:[#allocation44_spill] sm:$0xff] }
 0xd33   :  { %6826 = vmatprep.subr.bf16.mxu0 %v11138_v9  ;;  %6890 = vmatprep.subr.bf16.mxu1 %v11139_v48  ;;  %v11149_v9 = vld [vmem:[#allocation45_spill] sm:$0xff]  ;;  %v11150_v48 = vld [vmem:[#allocation46_spill] sm:$0xff] }
 0xd36   :  { %6828 = vmatpush1.bf16.msra.mxu0 %v11140_v50  ;;  %6892 = vmatpush1.bf16.msra.mxu1 %v11141_v23  ;;  %v11151_v50 = vld [vmem:[#allocation47_spill] sm:$0xff]  ;;  %v11152_v23 = vld [vmem:[#allocation48_spill] sm:$0xff] }
 0xd37   :  { %6830 = vmatprep.subr.bf16.mxu0 %v11142_v2  ;;  %6894 = vmatprep.subr.bf16.mxu1 %v11143_v32  ;;  %v11153_v2 = vld [vmem:[#allocation49_spill] sm:$0xff]  ;;  %v11154_v32 = vld [vmem:[#allocation50_spill] sm:$0xff] }
 0xd3a   :  { %6832 = vmatpush1.bf16.msra.mxu0 %v11144_v43  ;;  %6896 = vmatpush1.bf16.msra.mxu1 %v11145_v26  ;;  %v11155_v43 = vld [vmem:[#allocation51_spill] sm:$0xff]  ;;  %v11156_v26 = vld [vmem:[#allocation52_spill] sm:$0xff] }
 0xd3b   :  { %6834 = vmatprep.subr.bf16.mxu0 %v11146_v18  ;;  %6898 = vmatprep.subr.bf16.mxu1 %v11147_v59  ;;  %v11157_v18 = vld [vmem:[#allocation53_spill] sm:$0xff]  ;;  %v11158_v59 = vld [vmem:[#allocation54_spill] sm:$0xff] }
 0xd3e   :  { %6836 = vmatpush1.bf16.msra.mxu0 %v11148_v55  ;;  %6900 = vmatpush1.bf16.msra.mxu1 %v11149_v9  ;;  %v11159_v55 = vld [vmem:[#allocation55_spill] sm:$0xff]  ;;  %v11160_v9 = vld [vmem:[#allocation56_spill] sm:$0xff] }
 0xd3f   :  { %6838 = vmatprep.subr.bf16.mxu0 %v11150_v48  ;;  %6902 = vmatprep.subr.bf16.mxu1 %v11151_v50  ;;  %v11161_v48 = vld [vmem:[#allocation57_spill] sm:$0xff]  ;;  %v11162_v50 = vld [vmem:[#allocation58_spill] sm:$0xff] }
 0xd42   :  { %6840 = vmatpush1.bf16.msra.mxu0 %v11152_v23  ;;  %6904 = vmatpush1.bf16.msra.mxu1 %v11153_v2  ;;  %v11163_v23 = vld [vmem:[#allocation59_spill] sm:$0xff]  ;;  %v11164_v2 = vld [vmem:[#allocation60_spill] sm:$0xff] }
 0xd43   :  { %6842 = vmatprep.subr.bf16.mxu0 %v11154_v32  ;;  %6906 = vmatprep.subr.bf16.mxu1 %v11155_v43  ;;  %v11165_v32 = vld [vmem:[#allocation61_spill] sm:$0xff]  ;;  %v11166_v43 = vld [vmem:[#allocation62_spill] sm:$0xff] }
 0xd46   :  { %6844 = vmatpush1.bf16.msra.mxu0 %v11156_v26  ;;  %6908 = vmatpush1.bf16.msra.mxu1 %v11157_v18  ;;  %v11167_v26 = vld [vmem:[#allocation63_spill] sm:$0xff]  ;;  %v11168_v18 = vld [vmem:[#allocation64_spill] sm:$0xff] }
 0xd47   :  { %6846 = vmatprep.subr.bf16.mxu0 %v11158_v59  ;;  %6910 = vmatprep.subr.bf16.mxu1 %v11159_v55  ;;  %v11169_v59 = vld [vmem:[#allocation65_spill] sm:$0xff]  ;;  %v11170_v55 = vld [vmem:[#allocation66_spill] sm:$0xff] }
 0xd4a   :  { %6848 = vmatpush1.bf16.msra.mxu0 %v11160_v9  ;;  %6912 = vmatpush1.bf16.msra.mxu1 %v11161_v48  ;;  %v11171_v9 = vld [vmem:[#allocation67_spill] sm:$0xff]  ;;  %v11172_v48 = vld [vmem:[#allocation68_spill] sm:$0xff] }
 0xd4b   :  { %6850 = vmatprep.subr.bf16.mxu0 %v11162_v50  ;;  %6914 = vmatprep.subr.bf16.mxu1 %v11163_v23  ;;  %v11173_v50 = vld [vmem:[#allocation69_spill] sm:$0xff]  ;;  %v11174_v23 = vld [vmem:[#allocation70_spill] sm:$0xff] }
 0xd4e   :  { %6852 = vmatpush1.bf16.msra.mxu0 %v11164_v2  ;;  %6916 = vmatpush1.bf16.msra.mxu1 %v11165_v32  ;;  %v11175_v2 = vld [vmem:[#allocation71_spill] sm:$0xff]  ;;  %v11176_v32 = vld [vmem:[#allocation72_spill] sm:$0xff] }
 0xd4f   :  { %6854 = vmatprep.subr.bf16.mxu0 %v11166_v43  ;;  %6918 = vmatprep.subr.bf16.mxu1 %v11167_v26  ;;  %v11177_v43 = vld [vmem:[#allocation73_spill] sm:$0xff]  ;;  %v11178_v26 = vld [vmem:[#allocation74_spill] sm:$0xff] }
 0xd52   :  { %6856 = vmatpush1.bf16.msra.mxu0 %v11168_v18  ;;  %6920 = vmatpush1.bf16.msra.mxu1 %v11169_v59  ;;  %v11179_v18 = vld [vmem:[#allocation75_spill] sm:$0xff]  ;;  %v11180_v59 = vld [vmem:[#allocation76_spill] sm:$0xff] }
 0xd53   :  { %6858 = vmatprep.subr.bf16.mxu0 %v11170_v55  ;;  %6922 = vmatprep.subr.bf16.mxu1 %v11171_v9  ;;  %v11181_v55 = vld [vmem:[#allocation77_spill] sm:$0xff]  ;;  %v11182_v9 = vld [vmem:[#allocation78_spill] sm:$0xff] }
 0xd56   :  { %6860 = vmatpush1.bf16.msra.mxu0 %v11172_v48  ;;  %6924 = vmatpush1.bf16.msra.mxu1 %v11173_v50  ;;  %v11183_v48 = vld [vmem:[#allocation79_spill] sm:$0xff]  ;;  %v11184_v50 = vld [vmem:[#allocation80_spill] sm:$0xff] }
 0xd57   :  { %6862 = vmatprep.subr.bf16.mxu0 %v11174_v23  ;;  %6926 = vmatprep.subr.bf16.mxu1 %v11175_v2  ;;  %v11185_v23 = vld [vmem:[#allocation81_spill] sm:$0xff]  ;;  %v11186_v2 = vld [vmem:[#allocation82_spill] sm:$0xff] }
 0xd5a   :  { %6864 = vmatpush1.bf16.msra.mxu0 %v11176_v32  ;;  %6928 = vmatpush1.bf16.msra.mxu1 %v11177_v43  ;;  %v11187_v32 = vld [vmem:[#allocation83_spill] sm:$0xff]  ;;  %v11188_v43 = vld [vmem:[#allocation84_spill] sm:$0xff] }
 0xd5b   :  { %6866 = vmatprep.subr.bf16.mxu0 %v11178_v26  ;;  %6930 = vmatprep.subr.bf16.mxu1 %v11179_v18  ;;  %v11189_v26 = vld [vmem:[#allocation85_spill] sm:$0xff]  ;;  %v11190_v18 = vld [vmem:[#allocation86_spill] sm:$0xff] }
 0xd5e   :  { %6868 = vmatpush1.bf16.msra.mxu0 %v11180_v59  ;;  %6932 = vmatpush1.bf16.msra.mxu1 %v11181_v55  ;;  %v11191_v59 = vld [vmem:[#allocation87_spill] sm:$0xff]  ;;  %v11192_v55 = vld [vmem:[#allocation88_spill] sm:$0xff] }
 0xd5f   :  { %6870 = vmatprep.subr.bf16.mxu0 %v11182_v9  ;;  %6934 = vmatprep.subr.bf16.mxu1 %v11183_v48  ;;  %v11193_v9 = vld [vmem:[#allocation89_spill] sm:$0xff]  ;;  %v11194_v48 = vld [vmem:[#allocation90_spill] sm:$0xff] }
 0xd62   :  { %6872 = vmatpush1.bf16.msra.mxu0 %v11184_v50  ;;  %6936 = vmatpush1.bf16.msra.mxu1 %v11185_v23  ;;  %v11195_v50 = vld [vmem:[#allocation91_spill] sm:$0xff]  ;;  %v11196_v23 = vld [vmem:[#allocation92_spill] sm:$0xff] }
 0xd63   :  { %6874 = vmatprep.subr.bf16.mxu0 %v11186_v2  ;;  %6938 = vmatprep.subr.bf16.mxu1 %v11187_v32  ;;  %v11197_v2 = vld [vmem:[#allocation93_spill] sm:$0xff]  ;;  %v11198_v32 = vld [vmem:[#allocation94_spill] sm:$0xff] }
 0xd66   :  { %6876 = vmatpush1.bf16.msra.mxu0 %v11188_v43  ;;  %6940 = vmatpush1.bf16.msra.mxu1 %v11189_v26  ;;  %v11199_v43 = vld [vmem:[#allocation95_spill] sm:$0xff] }
 0xd67   :  { %6878 = vmatprep.subr.bf16.mxu0 %v11190_v18  ;;  %6942 = vmatprep.subr.bf16.mxu1 %v11191_v59 }
 0xd6a   :  { %6880 = vmatpush1.bf16.msra.mxu0 %v11192_v55  ;;  %6944 = vmatpush1.bf16.msra.mxu1 %v11193_v9 }
 0xd6b   :  { %6882 = vmatprep.subr.bf16.mxu0 %v11194_v48  ;;  %6946 = vmatprep.subr.bf16.mxu1 %v11195_v50  ;;  %v11202_v50 = vld [vmem:[#allocation171_spill] sm:$0xff] }
 0xd6e   :  { %6884 = vmatpush1.bf16.msra.mxu0 %v11196_v23  ;;  %6948 = vmatpush1.bf16.msra.mxu1 %v11197_v2 }
 0xd6f   :  { %6950 = vmatprep.subr.bf16.mxu0 %v11198_v32  ;;  %7014 = vmatprep.subr.bf16.mxu1 %v11199_v43 }
 0xde3   :  { %v3468_v26 = vpop.f32.mrb[34].mxu0  ;;  %v3539_v18 = vpop.f32.mrb[34].mxu1 }
 0xde4   :  { %v3469_v59 = vadd.f32 %v3468_v26, %v11200_v21  ;;  %v3470_v22 = vpop.f32.mrb[35].mxu0  ;;  %v3541_v55 = vpop.f32.mrb[35].mxu1  ;;  %v3540_v23 = vadd.f32 %v3539_v18, %v11202_v50 }
 0xde5   :  { %v3471_v9 = vadd.f32 %v3470_v22, %v11201_v4  ;;  %v3573_v26 = vpop.permute.xlu0 %3572 }
 0xde6   :  { %v4761_v7 = vmul.f32 -1.442695, %v3469_v59  ;;  %v11203_v59 = vld [vmem:[#allocation96_spill] sm:$0xff]  ;;  %v3576_v18 = vmul.f32 %v3573_v26, %v10657_v44 }
 0xde7   :  { %v4762_v48 = vmul.f32 -1.442695, %v3471_v9  ;;  %v3575_v9 = vmul.f32 %v3573_v26, %v11203_v59  ;;  %v3542_v59 = vadd.f32 %v3541_v55, %v8638_v31 }
 0xde8   :  { %7703 = vpow2.f32 %v4761_v7 }
 0xde9   :  { %7705 = vpow2.f32 %v4762_v48 }
 0xdea   :  { %7707 = vtanh.f32 %v3540_v23 }
 0xdf2   :  { %v7704_v5 = vpop.eup %7703 }
 0xdf3   :  { %v7706_v2 = vpop.eup %7705  ;;  %v3550_v8 = vadd.f32 1.0, %v7704_v5 }
 0xdf4   :  { %v3551_v32 = vadd.f32 1.0, %v7706_v2  ;;  %v7708_v43 = vpop.eup %7707 }
 0xdf5   :  { %7709 = vrcp.f32 %v3550_v8 }
 0xdf6   :  { %7711 = vrcp.f32 %v3551_v32 }
 0xdff   :  { %v7710_v54 = vpop.eup %7709 }
 0xe00   :  { %v7712_v21 = vpop.eup %7711  ;;  %v3564_v53 = vmul.f32 %v7710_v54, %v7708_v43  ;;  %v3578_v54 = vmul.f32 %v3573_v26, %v11204_v46 }
 0xe01   :  { %v3563_v22 = vmul.f32 %v7712_v21, %v9431_v3 }
 0xe03   :  { %v3645_v7 = vpop.f32.mrb[36].mxu0  ;;  %v3716_v48 = vpop.f32.mrb[36].mxu1  ;;  %v9627_v50 = vadd.f32 %v3564_v53, %v3563_v22  ;;  %v3577_v53 = vmul.f32 %v3573_v26, %v10522_v49 }
 0xe04   :  { %v3721_v5 = vadd.f32 %v3645_v7, %v3575_v9  ;;  %v3647_v23 = vpop.f32.mrb[37].mxu0  ;;  %v3718_v2 = vpop.f32.mrb[37].mxu1  ;;  %v4763_v7 = vmul.f32 -1.442695, %v3542_v59 }
 0xe05   :  { %v3722_v8 = vadd.f32 %v3647_v23, %v3576_v18  ;;  %v3724_v21 = vadd.f32 %v3718_v2, %v3578_v54  ;;  %v3723_v9 = vadd.f32 %v3716_v48, %v3577_v53 }
 0xe06   :  { %v3725_v32 = vadd.f32 %v3721_v5, %v10659_v40 }
 0xe07   :  { %v3726_v4 = vadd.f32 %v3722_v8, %v10660_v30  ;;  %v3728_v22 = vadd.f32 %v3724_v21, %v10523_v63  ;;  %v3727_v5 = vadd.f32 %v3723_v9, %v10524_v36 }
 0xe08   :  { %v4765_v43 = vmul.f32 -1.442695, %v3725_v32 }
 0xe09   :  { %v4766_v3 = vmul.f32 -1.442695, %v3726_v4  ;;  %v4767_v18 = vmul.f32 -1.442695, %v3728_v22 }
 0xe0a   :  { %7713 = vpow2.f32 %v4765_v43 }
 0xe0b   :  { %7715 = vpow2.f32 %v4766_v3 }
 0xe0c   :  { %7717 = vpow2.f32 %v4763_v7 }
 0xe0d   :  { %7719 = vpow2.f32 %v4767_v18 }
 0xe0e   :  { %7721 = vtanh.f32 %v3727_v5  ;;  %v11206_v5 = vld [vmem:[#allocation124_spill] sm:$0xff] }
 0xe14   :  { %v7714_v23 = vpop.eup %7713 }
 0xe15   :  { %v7716_v8 = vpop.eup %7715  ;;  %v3735_v46 = vadd.f32 1.0, %v7714_v23  ;;  %v11207_v23 = vld [vmem:[#allocation125_spill] sm:$0xff] }
 0xe16   :  { %v3736_v4 = vadd.f32 1.0, %v7716_v8  ;;  %v7718_v2 = vpop.eup %7717  ;;  %v11208_v8 = vld [vmem:[#allocation126_spill] sm:$0xff] }
 0xe17   :  { %7723 = vrcp.f32 %v3735_v46  ;;  %v7720_v55 = vpop.eup %7719  ;;  %v3560_v3 = vadd.f32 1.0, %v7718_v2  ;;  %v11210_v2 = vld [vmem:[#allocation128_spill] sm:$0xff] }
 0xe18   :  { %7725 = vrcp.f32 %v3736_v4  ;;  %v7722_v32 = vpop.eup %7721  ;;  %v3745_v48 = vadd.f32 1.0, %v7720_v55  ;;  %v11209_v4 = vld [vmem:[#allocation127_spill] sm:$0xff]  ;;  %v11211_v55 = vld [vmem:[#allocation129_spill] sm:$0xff] }
 0xe19   :  { %7727 = vtanh.f32 %v9627_v50 }
 0xe1a   :  { %7729 = vrcp.f32 %v3745_v48  ;;  %v11216_v48 = vld [vmem:[#allocation134_spill] sm:$0xff] }
 0xe21   :  { %v7724_v26 = vpop.eup %7723 }
 0xe22   :  { %v7726_v54 = vpop.eup %7725  ;;  %v3749_v43 = vmul.f32 %v7724_v26, %v7722_v32  ;;  %v11212_v32 = vld [vmem:[#allocation130_spill] sm:$0xff]  ;;  %v11213_v26 = vld [vmem:[#allocation131_spill] sm:$0xff] }
 0xe23   :  { %v3748_v59 = vmul.f32 %v7726_v54, %v9441_v14  ;;  %v7728_v46 = vpop.eup %7727  ;;  %v11205_v14 = vld [vmem:[#allocation123_spill] sm:$0xff]  ;;  %v11214_v54 = vld [vmem:[#allocation132_spill] sm:$0xff] }
 0xe24   :  { %v7730_v53 = vpop.eup %7729 }
 0xe25   :  { %v9637_v21 = vadd.f32 %v3749_v43, %v3748_v59  ;;  %v11215_v43 = vld [vmem:[#allocation133_spill] sm:$0xff]  ;;  %v11217_v59 = vld [vmem:[#allocation135_spill] sm:$0xff] }
 0xe27   :  { %7731 = vtanh.f32 %v9637_v21 }
 0xe28   :  { %7733 = vrcp.f32 %v3560_v3  ;;  %v11218_v3 = vld [vmem:[#allocation136_spill] sm:$0xff] }
 0xe31   :  { %v7732_v22 = vpop.eup %7731 }
 0xe32   :  { %v7734_v9 = vpop.eup %7733  ;;  %v9641_v7 = vmul.f32 %v7732_v22, %v7730_v53  ;;  %v11220_v53 = vld [vmem:[#allocation138_spill] sm:$0xff]  ;;  %v11221_v22 = vld [vmem:[#allocation139_spill] sm:$0xff] }
 0xe33   :  { %v3567_v18 = vmul.f32 %v7734_v9, %v7728_v46  ;;  %v11219_v46 = vld [vmem:[#allocation137_spill] sm:$0xff]  ;;  %v11222_v9 = vld [vmem:[#allocation140_spill] sm:$0xff] }
 0xe34   :  { %3818 = vmatmul.mubr.f32.vlgmr.msra.gmra.mrb[38].mxu0 %v9641_v7  ;;  %3889 = vmatmul.mubr.f32.vlgmr.msra.gmra.mrb[38].mxu1 %v9641_v7 }
 0xe35   :  { %3983 = vmatprep.mubr.f32.mxu0 %v3567_v18  ;;  %4054 = vmatprep.mubr.f32.mxu1 %v3567_v18  ;;  %v11223_v18 = vld [vmem:[#allocation141_spill] sm:$0xff] }
 0xe36   :  { %6952 = vmatpush1.bf16.msra.mxu0 %v10526_v0  ;;  %7016 = vmatpush1.bf16.msra.mxu1 %v10527_v16 }
 0xe37   :  { %6954 = vmatprep.subr.bf16.mxu0 %v10528_v61  ;;  %7018 = vmatprep.subr.bf16.mxu1 %v10529_v52 }
 0xe3a   :  { %6956 = vmatpush1.bf16.msra.mxu0 %v10530_v38  ;;  %7020 = vmatpush1.bf16.msra.mxu1 %v10531_v13 }
 0xe3b   :  { %6958 = vmatprep.subr.bf16.mxu0 %v8319_v1  ;;  %7022 = vmatprep.subr.bf16.mxu1 %v10661_v35 }
 0xe3e   :  { %6960 = vmatpush1.bf16.msra.mxu0 %v10662_v34  ;;  %7024 = vmatpush1.bf16.msra.mxu1 %v10663_v47 }
 0xe3f   :  { %6962 = vmatprep.subr.bf16.mxu0 %v10797_v10  ;;  %7026 = vmatprep.subr.bf16.mxu1 %v10798_v27 }
 0xe42   :  { %6964 = vmatpush1.bf16.msra.mxu0 %v10799_v17  ;;  %7028 = vmatpush1.bf16.msra.mxu1 %v10933_v60 }
 0xe43   :  { %6966 = vmatprep.subr.bf16.mxu0 %v10934_v6  ;;  %7030 = vmatprep.subr.bf16.mxu1 %v10935_v56 }
 0xe46   :  { %6968 = vmatpush1.bf16.msra.mxu0 %v11069_v39  ;;  %7032 = vmatpush1.bf16.msra.mxu1 %v11070_v57 }
 0xe47   :  { %6970 = vmatprep.subr.bf16.mxu0 %v11071_v58  ;;  %7034 = vmatprep.subr.bf16.mxu1 %v11205_v14 }
 0xe4a   :  { %6972 = vmatpush1.bf16.msra.mxu0 %v11206_v5  ;;  %7036 = vmatpush1.bf16.msra.mxu1 %v11207_v23 }
 0xe4b   :  { %6974 = vmatprep.subr.bf16.mxu0 %v11208_v8  ;;  %7038 = vmatprep.subr.bf16.mxu1 %v11209_v4 }
 0xe4e   :  { %6976 = vmatpush1.bf16.msra.mxu0 %v11210_v2  ;;  %7040 = vmatpush1.bf16.msra.mxu1 %v11211_v55 }
 0xe4f   :  { %6978 = vmatprep.subr.bf16.mxu0 %v11212_v32  ;;  %7042 = vmatprep.subr.bf16.mxu1 %v11213_v26  ;;  %v11224_v26 = vld [vmem:[#allocation142_spill] sm:$0xff] }
 0xe50   :  { %v11250_v32 = vld [vmem:[#allocation166_spill] sm:$0xff] }
 0xe52   :  { %6980 = vmatpush1.bf16.msra.mxu0 %v11214_v54  ;;  %7044 = vmatpush1.bf16.msra.mxu1 %v11215_v43  ;;  %v11225_v54 = vld [vmem:[#allocation143_spill] sm:$0xff]  ;;  %v11226_v43 = vld [vmem:[#allocation144_spill] sm:$0xff] }
 0xe53   :  { %6982 = vmatprep.subr.bf16.mxu0 %v11216_v48  ;;  %7046 = vmatprep.subr.bf16.mxu1 %v11217_v59  ;;  %v11227_v48 = vld [vmem:[#allocation145_spill] sm:$0xff]  ;;  %v11228_v59 = vld [vmem:[#allocation146_spill] sm:$0xff] }
 0xe56   :  { %6984 = vmatpush1.bf16.msra.mxu0 %v11218_v3  ;;  %7048 = vmatpush1.bf16.msra.mxu1 %v11219_v46  ;;  %v11229_v3 = vld [vmem:[#allocation147_spill] sm:$0xff]  ;;  %v11230_v46 = vld [vmem:[#allocation148_spill] sm:$0xff] }
 0xe57   :  { %6986 = vmatprep.subr.bf16.mxu0 %v11220_v53  ;;  %7050 = vmatprep.subr.bf16.mxu1 %v11221_v22  ;;  %v11231_v53 = vld [vmem:[#allocation149_spill] sm:$0xff]  ;;  %v11232_v22 = vld [vmem:[#allocation150_spill] sm:$0xff] }
 0xe5a   :  { %6988 = vmatpush1.bf16.msra.mxu0 %v11222_v9  ;;  %7052 = vmatpush1.bf16.msra.mxu1 %v11223_v18  ;;  %v11233_v9 = vld [vmem:[#allocation151_spill] sm:$0xff]  ;;  %v11234_v18 = vld [vmem:[#allocation152_spill] sm:$0xff] }
 0xe5b   :  { %6990 = vmatprep.subr.bf16.mxu0 %v11224_v26  ;;  %7054 = vmatprep.subr.bf16.mxu1 %v11225_v54  ;;  %v11235_v26 = vld [vmem:[#allocation153_spill] sm:$0xff]  ;;  %v11236_v54 = vld [vmem:[#allocation154_spill] sm:$0xff] }
 0xe5e   :  { %6992 = vmatpush1.bf16.msra.mxu0 %v11226_v43  ;;  %7056 = vmatpush1.bf16.msra.mxu1 %v11227_v48  ;;  %v11237_v43 = vld [vmem:[#allocation155_spill] sm:$0xff]  ;;  %v11238_v48 = vld [vmem:[#allocation156_spill] sm:$0xff] }
 0xe5f   :  { %6994 = vmatprep.subr.bf16.mxu0 %v11228_v59  ;;  %7058 = vmatprep.subr.bf16.mxu1 %v11229_v3  ;;  %v11239_v59 = vld [vmem:[#allocation157_spill] sm:$0xff]  ;;  %v11240_v3 = vld [vmem:[#allocation158_spill] sm:$0xff] }
 0xe62   :  { %6996 = vmatpush1.bf16.msra.mxu0 %v11230_v46  ;;  %7060 = vmatpush1.bf16.msra.mxu1 %v11231_v53  ;;  %v11241_v46 = vld [vmem:[#allocation159_spill] sm:$0xff]  ;;  %v11242_v53 = vld [vmem:[#allocation160_spill] sm:$0xff] }
 0xe63   :  { %6998 = vmatprep.subr.bf16.mxu0 %v11232_v22  ;;  %7062 = vmatprep.subr.bf16.mxu1 %v11233_v9  ;;  %v11243_v22 = vld [vmem:[#allocation161_spill] sm:$0xff]  ;;  %v11244_v9 = vld [vmem:[#allocation162_spill] sm:$0xff] }
 0xe66   :  { %7000 = vmatpush1.bf16.msra.mxu0 %v11234_v18  ;;  %7064 = vmatpush1.bf16.msra.mxu1 %v11235_v26  ;;  %v11245_v18 = vld [vmem:[#allocation163_spill] sm:$0xff]  ;;  %v11246_v26 = vld [vmem:[#allocation164_spill] sm:$0xff] }
 0xe67   :  { %7002 = vmatprep.subr.bf16.mxu0 %v11236_v54  ;;  %7066 = vmatprep.subr.bf16.mxu1 %v11237_v43  ;;  %v11247_v54 = vld [vmem:[#allocation165_spill] sm:$0xff] }
 0xe68   :  { %v11248_v43 = vld [vmem:[#allocation9_spill] sm:$0xff] }
 0xe6a   :  { %7004 = vmatpush1.bf16.msra.mxu0 %v11238_v48  ;;  %7068 = vmatpush1.bf16.msra.mxu1 %v11239_v59  ;;  %v11249_v48 = vld [vmem:[#allocation10_spill] sm:$0xff] }
 0xe6b   :  { %7006 = vmatprep.subr.bf16.mxu0 %v11240_v3  ;;  %7070 = vmatprep.subr.bf16.mxu1 %v11241_v46 }
 0xe6e   :  { %7008 = vmatpush1.bf16.msra.mxu0 %v11242_v53  ;;  %7072 = vmatpush1.bf16.msra.mxu1 %v11243_v22 }
 0xe6f   :  { %7010 = vmatprep.subr.bf16.mxu0 %v11244_v9  ;;  %7074 = vmatprep.subr.bf16.mxu1 %v11245_v18 }
 0xe72   :  { %7012 = vmatpush1.bf16.msra.mxu0 %v11246_v26  ;;  %7076 = vmatpush1.bf16.msra.mxu1 %v11247_v54 }
 0xe73   :  { %7078 = vmatprep.subr.bf16.mxu0 %v11248_v43  ;;  %7110 = vmatprep.subr.bf16.mxu1 %v11249_v48 }
 0xf07   :  { %v3819_v59 = vpop.f32.mrb[38].mxu0  ;;  %v3890_v3 = vpop.f32.mrb[38].mxu1 }
 0xf08   :  { %v3820_v46 = vadd.f32 %v3819_v59, %v11250_v32  ;;  %v3821_v55 = vpop.f32.mrb[39].mxu0  ;;  %v3892_v53 = vpop.f32.mrb[39].mxu1  ;;  %v3891_v54 = vadd.f32 %v3890_v3, %v8509_v62 }
 0xf09   :  { %v3822_v22 = vadd.f32 %v3821_v55, %v10584_v45  ;;  %v3893_v26 = vadd.f32 %v3892_v53, %v10585_v25 }
 0xf0a   :  { %v4768_v2 = vmul.f32 -1.442695, %v3820_v46 }
 0xf0b   :  { %v4769_v9 = vmul.f32 -1.442695, %v3822_v22  ;;  %v4770_v18 = vmul.f32 -1.442695, %v3893_v26 }
 0xf0c   :  { %7735 = vpow2.f32 %v4768_v2 }
 0xf0d   :  { %7737 = vpow2.f32 %v4769_v9 }
 0xf0e   :  { %7739 = vpow2.f32 %v4770_v18 }
 0xf0f   :  { %7741 = vtanh.f32 %v3891_v54  ;;  %v11266_v54 = vld [vmem:[#allocation26_spill] sm:$0xff] }
 0xf16   :  { %v7736_v43 = vpop.eup %7735 }
 0xf17   :  { %v7738_v4 = vpop.eup %7737  ;;  %v3901_v48 = vadd.f32 1.0, %v7736_v43  ;;  %v11267_v43 = vld [vmem:[#allocation27_spill] sm:$0xff] }
 0xf18   :  { %v3902_v8 = vadd.f32 1.0, %v7738_v4  ;;  %v7740_v59 = vpop.eup %7739  ;;  %v11264_v4 = vld [vmem:[#allocation24_spill] sm:$0xff] }
 0xf19   :  { %7743 = vrcp.f32 %v3901_v48  ;;  %v7742_v32 = vpop.eup %7741  ;;  %v3911_v2 = vadd.f32 1.0, %v7740_v59  ;;  %v11268_v48 = vld [vmem:[#allocation28_spill] sm:$0xff]  ;;  %v11269_v59 = vld [vmem:[#allocation29_spill] sm:$0xff] }
 0xf1a   :  { %7745 = vrcp.f32 %v3902_v8  ;;  %v11263_v8 = vld [vmem:[#allocation23_spill] sm:$0xff] }
 0xf1b   :  { %7747 = vrcp.f32 %v3911_v2  ;;  %v11273_v2 = vld [vmem:[#allocation33_spill] sm:$0xff] }
 0xf23   :  { %v7744_v55 = vpop.eup %7743 }
 0xf24   :  { %v7746_v46 = vpop.eup %7745  ;;  %v3915_v22 = vmul.f32 %v7744_v55, %v7742_v32  ;;  %v11265_v32 = vld [vmem:[#allocation25_spill] sm:$0xff]  ;;  %v11270_v55 = vld [vmem:[#allocation30_spill] sm:$0xff] }
 0xf25   :  { %v3914_v9 = vmul.f32 %v7746_v46, %v9518_v51  ;;  %v7748_v26 = vpop.eup %7747  ;;  %v11262_v51 = vld [vmem:[#allocation22_spill] sm:$0xff]  ;;  %v11271_v46 = vld [vmem:[#allocation31_spill] sm:$0xff] }
 0xf27   :  { %v9714_v53 = vadd.f32 %v3915_v22, %v3914_v9  ;;  %v11272_v22 = vld [vmem:[#allocation32_spill] sm:$0xff]  ;;  %v11274_v9 = vld [vmem:[#allocation34_spill] sm:$0xff] }
 0xf29   :  { %7749 = vtanh.f32 %v9714_v53 }
 0xf33   :  { %v7750_v3 = vpop.eup %7749 }
 0xf34   :  { %v3918_v18 = vmul.f32 %v7750_v3, %v7748_v26  ;;  %v11275_v26 = vld [vmem:[#allocation35_spill] sm:$0xff]  ;;  %v11276_v3 = vld [vmem:[#allocation36_spill] sm:$0xff] }
 0xf36   :  { %3984 = vmatmul.mubr.f32.vlgmr.msra.gmra.mrb[40].mxu0 %v3918_v18  ;;  %4055 = vmatmul.mubr.f32.vlgmr.msra.gmra.mrb[40].mxu1 %v3918_v18 }
 0xf37   :  { %7080 = vmatpush1.bf16.msra.mxu0 %v7944_v11  ;;  %7112 = vmatpush1.bf16.msra.mxu1 %v7947_v15  ;;  %v11251_v11 = vld [vmem:[#allocation11_spill] sm:$0xff]  ;;  %v11252_v15 = vld [vmem:[#allocation12_spill] sm:$0xff] }
 0xf38   :  { %7082 = vmatprep.subr.bf16.mxu0 %v7951_v19  ;;  %7114 = vmatprep.subr.bf16.mxu1 %v7953_v20  ;;  %v11253_v19 = vld [vmem:[#allocation13_spill] sm:$0xff]  ;;  %v11254_v20 = vld [vmem:[#allocation14_spill] sm:$0xff] }
 0xf39   :  { %4160 = vmatprep.mubr.f32.mxu0 %v10394_v12  ;;  %4231 = vmatprep.mubr.f32.mxu1 %v10394_v12 }
 0xf3b   :  { %7084 = vmatpush1.bf16.msra.mxu0 %v7956_v24  ;;  %7116 = vmatpush1.bf16.msra.mxu1 %v7960_v28  ;;  %v11255_v24 = vld [vmem:[#allocation15_spill] sm:$0xff]  ;;  %v11256_v28 = vld [vmem:[#allocation16_spill] sm:$0xff] }
 0xf3c   :  { %7086 = vmatprep.subr.bf16.mxu0 %v7962_v29  ;;  %7118 = vmatprep.subr.bf16.mxu1 %v7964_v33  ;;  %v11257_v29 = vld [vmem:[#allocation17_spill] sm:$0xff]  ;;  %v11258_v33 = vld [vmem:[#allocation18_spill] sm:$0xff] }
 0xf3f   :  { %7088 = vmatpush1.bf16.msra.mxu0 %v7967_v37  ;;  %7120 = vmatpush1.bf16.msra.mxu1 %v7971_v41  ;;  %v11259_v37 = vld [vmem:[#allocation19_spill] sm:$0xff]  ;;  %v11260_v41 = vld [vmem:[#allocation20_spill] sm:$0xff] }
 0xf40   :  { %7090 = vmatprep.subr.bf16.mxu0 %v7973_v42  ;;  %7122 = vmatprep.subr.bf16.mxu1 %v11251_v11  ;;  %v11261_v42 = vld [vmem:[#allocation21_spill] sm:$0xff] }
 0xf41   :  { %v11277_v11 = vld [vmem:[#allocation37_spill] sm:$0xff] }
 0xf43   :  { %7092 = vmatpush1.bf16.msra.mxu0 %v11252_v15  ;;  %7124 = vmatpush1.bf16.msra.mxu1 %v11253_v19  ;;  %v11278_v15 = vld [vmem:[#allocation38_spill] sm:$0xff]  ;;  %v11279_v19 = vld [vmem:[#allocation39_spill] sm:$0xff] }
 0xf44   :  { %7094 = vmatprep.subr.bf16.mxu0 %v11254_v20  ;;  %7126 = vmatprep.subr.bf16.mxu1 %v11255_v24  ;;  %v11280_v20 = vld [vmem:[#allocation40_spill] sm:$0xff]  ;;  %v11283_v24 = vld [vmem:[#allocation43_spill] sm:$0xff] }
 0xf47   :  { %7096 = vmatpush1.bf16.msra.mxu0 %v11256_v28  ;;  %7128 = vmatpush1.bf16.msra.mxu1 %v11257_v29  ;;  %v11284_v28 = vld [vmem:[#allocation44_spill] sm:$0xff]  ;;  %v11285_v29 = vld [vmem:[#allocation45_spill] sm:$0xff] }
 0xf48   :  { %7098 = vmatprep.subr.bf16.mxu0 %v11258_v33  ;;  %7130 = vmatprep.subr.bf16.mxu1 %v11259_v37  ;;  %v11286_v33 = vld [vmem:[#allocation46_spill] sm:$0xff]  ;;  %v11287_v37 = vld [vmem:[#allocation47_spill] sm:$0xff] }
 0xf4b   :  { %7100 = vmatpush1.bf16.msra.mxu0 %v11260_v41  ;;  %7132 = vmatpush1.bf16.msra.mxu1 %v11261_v42  ;;  %v11288_v41 = vld [vmem:[#allocation48_spill] sm:$0xff]  ;;  %v11289_v42 = vld [vmem:[#allocation49_spill] sm:$0xff] }
 0xf4c   :  { %7102 = vmatprep.subr.bf16.mxu0 %v11262_v51  ;;  %7134 = vmatprep.subr.bf16.mxu1 %v11263_v8  ;;  %v11290_v51 = vld [vmem:[#allocation50_spill] sm:$0xff]  ;;  %v11291_v8 = vld [vmem:[#allocation51_spill] sm:$0xff] }
 0xf4f   :  { %7104 = vmatpush1.bf16.msra.mxu0 %v11264_v4  ;;  %7136 = vmatpush1.bf16.msra.mxu1 %v11265_v32  ;;  %v11292_v4 = vld [vmem:[#allocation52_spill] sm:$0xff]  ;;  %v11293_v32 = vld [vmem:[#allocation53_spill] sm:$0xff] }
 0xf50   :  { %7106 = vmatprep.subr.bf16.mxu0 %v11266_v54  ;;  %7138 = vmatprep.subr.bf16.mxu1 %v11267_v43  ;;  %v11294_v54 = vld [vmem:[#allocation54_spill] sm:$0xff]  ;;  %v11295_v43 = vld [vmem:[#allocation55_spill] sm:$0xff] }
 0xf53   :  { %7108 = vmatpush1.bf16.msra.mxu0 %v11268_v48  ;;  %7140 = vmatpush1.bf16.msra.mxu1 %v11269_v59  ;;  %v11296_v48 = vld [vmem:[#allocation56_spill] sm:$0xff]  ;;  %v11297_v59 = vld [vmem:[#allocation57_spill] sm:$0xff] }
 0xf54   :  { %7142 = vmatprep.subr.bf16.mxu0 %v11270_v55  ;;  %7206 = vmatprep.subr.bf16.mxu1 %v11271_v46  ;;  %v11298_v55 = vld [vmem:[#allocation58_spill] sm:$0xff]  ;;  %v11299_v46 = vld [vmem:[#allocation59_spill] sm:$0xff] }
 0xf56   :  { %4161 = vmatmul.mubr.f32.vlgmr.msra.gmra.mrb[42].mxu0 %v9641_v7  ;;  %4232 = vmatmul.mubr.f32.vlgmr.msra.gmra.mrb[42].mxu1 %v9641_v7  ;;  %v11281_v7 = vld [vmem:[#allocation41_spill] sm:$0xff] }
 0xf57   :  { %4334 = vmatprep.mubr.f32.mxu0 %v3918_v18  ;;  %4405 = vmatprep.mubr.f32.mxu1 %v3918_v18  ;;  %v11282_v18 = vld [vmem:[#allocation42_spill] sm:$0xff] }
 0xf58   :  { %7144 = vmatpush1.bf16.msra.mxu0 %v11272_v22  ;;  %7208 = vmatpush1.bf16.msra.mxu1 %v11273_v2  ;;  %v11300_v22 = vld [vmem:[#allocation60_spill] sm:$0xff]  ;;  %v11301_v2 = vld [vmem:[#allocation61_spill] sm:$0xff] }
 0xf59   :  { %7146 = vmatprep.subr.bf16.mxu0 %v11274_v9  ;;  %7210 = vmatprep.subr.bf16.mxu1 %v11275_v26  ;;  %v11302_v9 = vld [vmem:[#allocation62_spill] sm:$0xff]  ;;  %v11303_v26 = vld [vmem:[#allocation63_spill] sm:$0xff] }
 0xf5c   :  { %7148 = vmatpush1.bf16.msra.mxu0 %v11276_v3  ;;  %7212 = vmatpush1.bf16.msra.mxu1 %v11277_v11  ;;  %v11304_v3 = vld [vmem:[#allocation64_spill] sm:$0xff]  ;;  %v11305_v11 = vld [vmem:[#allocation65_spill] sm:$0xff] }
 0xf5d   :  { %7150 = vmatprep.subr.bf16.mxu0 %v11278_v15  ;;  %7214 = vmatprep.subr.bf16.mxu1 %v11279_v19  ;;  %v11306_v15 = vld [vmem:[#allocation66_spill] sm:$0xff]  ;;  %v11307_v19 = vld [vmem:[#allocation67_spill] sm:$0xff] }
 0xf60   :  { %7152 = vmatpush1.bf16.msra.mxu0 %v11280_v20  ;;  %7216 = vmatpush1.bf16.msra.mxu1 %v11281_v7  ;;  %v11308_v20 = vld [vmem:[#allocation68_spill] sm:$0xff]  ;;  %v11309_v7 = vld [vmem:[#allocation69_spill] sm:$0xff] }
 0xf61   :  { %7154 = vmatprep.subr.bf16.mxu0 %v11282_v18  ;;  %7218 = vmatprep.subr.bf16.mxu1 %v11283_v24  ;;  %v11310_v18 = vld [vmem:[#allocation70_spill] sm:$0xff]  ;;  %v11311_v24 = vld [vmem:[#allocation71_spill] sm:$0xff] }
 0xf64   :  { %7156 = vmatpush1.bf16.msra.mxu0 %v11284_v28  ;;  %7220 = vmatpush1.bf16.msra.mxu1 %v11285_v29  ;;  %v11312_v28 = vld [vmem:[#allocation72_spill] sm:$0xff]  ;;  %v11313_v29 = vld [vmem:[#allocation73_spill] sm:$0xff] }
 0xf65   :  { %7158 = vmatprep.subr.bf16.mxu0 %v11286_v33  ;;  %7222 = vmatprep.subr.bf16.mxu1 %v11287_v37  ;;  %v11314_v33 = vld [vmem:[#allocation74_spill] sm:$0xff]  ;;  %v11315_v37 = vld [vmem:[#allocation75_spill] sm:$0xff] }
 0xf68   :  { %7160 = vmatpush1.bf16.msra.mxu0 %v11288_v41  ;;  %7224 = vmatpush1.bf16.msra.mxu1 %v11289_v42  ;;  %v11316_v41 = vld [vmem:[#allocation76_spill] sm:$0xff]  ;;  %v11317_v42 = vld [vmem:[#allocation77_spill] sm:$0xff] }
 0xf69   :  { %7162 = vmatprep.subr.bf16.mxu0 %v11290_v51  ;;  %7226 = vmatprep.subr.bf16.mxu1 %v11291_v8  ;;  %v11318_v51 = vld [vmem:[#allocation78_spill] sm:$0xff]  ;;  %v11319_v8 = vld [vmem:[#allocation79_spill] sm:$0xff] }
 0xf6c   :  { %7164 = vmatpush1.bf16.msra.mxu0 %v11292_v4  ;;  %7228 = vmatpush1.bf16.msra.mxu1 %v11293_v32  ;;  %v11320_v4 = vld [vmem:[#allocation80_spill] sm:$0xff]  ;;  %v11321_v32 = vld [vmem:[#allocation81_spill] sm:$0xff] }
 0xf6d   :  { %7166 = vmatprep.subr.bf16.mxu0 %v11294_v54  ;;  %7230 = vmatprep.subr.bf16.mxu1 %v11295_v43  ;;  %v11322_v54 = vld [vmem:[#allocation82_spill] sm:$0xff]  ;;  %v11323_v43 = vld [vmem:[#allocation83_spill] sm:$0xff] }
 0xf70   :  { %7168 = vmatpush1.bf16.msra.mxu0 %v11296_v48  ;;  %7232 = vmatpush1.bf16.msra.mxu1 %v11297_v59  ;;  %v11324_v48 = vld [vmem:[#allocation84_spill] sm:$0xff]  ;;  %v11325_v59 = vld [vmem:[#allocation85_spill] sm:$0xff] }
 0xf71   :  { %7170 = vmatprep.subr.bf16.mxu0 %v11298_v55  ;;  %7234 = vmatprep.subr.bf16.mxu1 %v11299_v46  ;;  %v11326_v55 = vld [vmem:[#allocation86_spill] sm:$0xff]  ;;  %v11327_v46 = vld [vmem:[#allocation87_spill] sm:$0xff] }
 0xf74   :  { %7172 = vmatpush1.bf16.msra.mxu0 %v11300_v22  ;;  %7236 = vmatpush1.bf16.msra.mxu1 %v11301_v2  ;;  %v11328_v22 = vld [vmem:[#allocation88_spill] sm:$0xff]  ;;  %v11329_v2 = vld [vmem:[#allocation89_spill] sm:$0xff] }
 0xf75   :  { %7174 = vmatprep.subr.bf16.mxu0 %v11302_v9  ;;  %7238 = vmatprep.subr.bf16.mxu1 %v11303_v26  ;;  %v11330_v9 = vld [vmem:[#allocation90_spill] sm:$0xff]  ;;  %v11331_v26 = vld [vmem:[#allocation91_spill] sm:$0xff] }
 0xf78   :  { %7176 = vmatpush1.bf16.msra.mxu0 %v11304_v3  ;;  %7240 = vmatpush1.bf16.msra.mxu1 %v11305_v11  ;;  %v11332_v3 = vld [vmem:[#allocation92_spill] sm:$0xff]  ;;  %v11333_v11 = vld [vmem:[#allocation93_spill] sm:$0xff] }
 0xf79   :  { %7178 = vmatprep.subr.bf16.mxu0 %v11306_v15  ;;  %7242 = vmatprep.subr.bf16.mxu1 %v11307_v19  ;;  %v11334_v15 = vld [vmem:[#allocation94_spill] sm:$0xff]  ;;  %v11335_v19 = vld [vmem:[#allocation95_spill] sm:$0xff] }
 0xf7c   :  { %7180 = vmatpush1.bf16.msra.mxu0 %v11308_v20  ;;  %7244 = vmatpush1.bf16.msra.mxu1 %v11309_v7 }
 0xf7d   :  { %7182 = vmatprep.subr.bf16.mxu0 %v11310_v18  ;;  %7246 = vmatprep.subr.bf16.mxu1 %v11311_v24  ;;  %v11336_v18 = vld [vmem:[#allocation169_spill] sm:$0xff] }
 0xf80   :  { %7184 = vmatpush1.bf16.msra.mxu0 %v11312_v28  ;;  %7248 = vmatpush1.bf16.msra.mxu1 %v11313_v29 }
 0xf81   :  { %7186 = vmatprep.subr.bf16.mxu0 %v11314_v33  ;;  %7250 = vmatprep.subr.bf16.mxu1 %v11315_v37  ;;  %v11337_v33 = vld [vmem:[#allocation170_spill] sm:$0xff] }
 0xf84   :  { %7188 = vmatpush1.bf16.msra.mxu0 %v11316_v41  ;;  %7252 = vmatpush1.bf16.msra.mxu1 %v11317_v42 }
 0xf85   :  { %7190 = vmatprep.subr.bf16.mxu0 %v11318_v51  ;;  %7254 = vmatprep.subr.bf16.mxu1 %v11319_v8  ;;  %v11338_v51 = vld [vmem:[#allocation171_spill] sm:$0xff] }
 0xf88   :  { %7192 = vmatpush1.bf16.msra.mxu0 %v11320_v4  ;;  %7256 = vmatpush1.bf16.msra.mxu1 %v11321_v32 }
 0xf89   :  { %7194 = vmatprep.subr.bf16.mxu0 %v11322_v54  ;;  %7258 = vmatprep.subr.bf16.mxu1 %v11323_v43 }
 0xf8c   :  { %7196 = vmatpush1.bf16.msra.mxu0 %v11324_v48  ;;  %7260 = vmatpush1.bf16.msra.mxu1 %v11325_v59 }
 0xf8d   :  { %7198 = vmatprep.subr.bf16.mxu0 %v11326_v55  ;;  %7262 = vmatprep.subr.bf16.mxu1 %v11327_v46  ;;  %v4090_v55 = vpop.permute.xlu1 %4089 }
 0xf90   :  { %7200 = vmatpush1.bf16.msra.mxu0 %v11328_v22  ;;  %7264 = vmatpush1.bf16.msra.mxu1 %v11329_v2 }
 0xf91   :  { %7202 = vmatprep.subr.bf16.mxu0 %v11330_v9  ;;  %7266 = vmatprep.subr.bf16.mxu1 %v11331_v26  ;;  %v11339_v9 = vld [vmem:[#allocation96_spill] sm:$0xff] }
 0xf92   :  { %v4092_v26 = vmul.f32 %v4090_v55, %v11339_v9 }
 0xf94   :  { %7204 = vmatpush1.bf16.msra.mxu0 %v11332_v3  ;;  %7268 = vmatpush1.bf16.msra.mxu1 %v11333_v11 }
 0xf95   :  { %7270 = vmatprep.subr.bf16.mxu0 %v11334_v15  ;;  %7334 = vmatprep.subr.bf16.mxu1 %v11335_v19  ;;  %v4093_v15 = vmul.f32 %v4090_v55, %v10657_v44  ;;  %v4094_v44 = vmul.f32 %v4090_v55, %v10522_v49 }
0x1009   :  { %v3985_v20 = vpop.f32.mrb[40].mxu0  ;;  %v4056_v7 = vpop.f32.mrb[40].mxu1 }
0x100a   :  { %v3986_v24 = vadd.f32 %v3985_v20, %v11336_v18  ;;  %v3987_v28 = vpop.f32.mrb[41].mxu0  ;;  %v4058_v29 = vpop.f32.mrb[41].mxu1  ;;  %v4057_v8 = vadd.f32 %v4056_v7, %v11338_v51 }
0x100b   :  { %v3988_v37 = vadd.f32 %v3987_v28, %v11337_v33 }
0x100c   :  { %v4771_v41 = vmul.f32 -1.442695, %v3986_v24 }
0x100d   :  { %v4772_v42 = vmul.f32 -1.442695, %v3988_v37 }
0x100e   :  { %7751 = vpow2.f32 %v4771_v41 }
0x100f   :  { %7753 = vpow2.f32 %v4772_v42  ;;  %v11340_v42 = vld [vmem:[#allocation98_spill] sm:$0xff] }
0x1010   :  { %7755 = vtanh.f32 %v4057_v8  ;;  %v4095_v8 = vmul.f32 %v4090_v55, %v11340_v42 }
0x1018   :  { %v7752_v4 = vpop.eup %7751 }
0x1019   :  { %v7754_v32 = vpop.eup %7753  ;;  %v4067_v54 = vadd.f32 1.0, %v7752_v4 }
0x101a   :  { %v4068_v43 = vadd.f32 1.0, %v7754_v32  ;;  %v7756_v48 = vpop.eup %7755 }
0x101b   :  { %7757 = vrcp.f32 %v4067_v54  ;;  %v4059_v54 = vadd.f32 %v4058_v29, %v8638_v31 }
0x101c   :  { %7759 = vrcp.f32 %v4068_v43 }
0x1025   :  { %v7758_v59 = vpop.eup %7757 }
0x1026   :  { %v7760_v46 = vpop.eup %7759  ;;  %v4081_v22 = vmul.f32 %v7758_v59, %v7756_v48  ;;  %v4773_v59 = vmul.f32 -1.442695, %v4059_v54  ;;  %v11368_v54 = vld [vmem:[#allocation153_spill] sm:$0xff] }
0x1027   :  { %v4080_v2 = vmul.f32 %v7760_v46, %v9627_v50 }
0x1029   :  { %v4162_v3 = vpop.f32.mrb[42].mxu0  ;;  %v4233_v11 = vpop.f32.mrb[42].mxu1  ;;  %v9823_v19 = vadd.f32 %v4081_v22, %v4080_v2 }
0x102a   :  { %v4238_v20 = vadd.f32 %v4162_v3, %v4092_v26  ;;  %v4164_v7 = vpop.f32.mrb[43].mxu0  ;;  %v4235_v24 = vpop.f32.mrb[43].mxu1  ;;  %v4240_v48 = vadd.f32 %v4233_v11, %v4094_v44  ;;  %v11369_v44 = vld [vmem:[#allocation154_spill] sm:$0xff] }
0x102b   :  { %v4239_v28 = vadd.f32 %v4164_v7, %v4093_v15  ;;  %v4241_v32 = vadd.f32 %v4235_v24, %v4095_v8  ;;  %v11364_v8 = vld [vmem:[#allocation149_spill] sm:$0xff] }
0x102c   :  { %v4242_v37 = vadd.f32 %v4238_v20, %v10659_v40  ;;  %v4244_v40 = vadd.f32 %v4240_v48, %v10524_v36  ;;  %v11371_v48 = vld [vmem:[#allocation156_spill] sm:$0xff] }
0x102d   :  { %v4243_v41 = vadd.f32 %v4239_v28, %v10660_v30  ;;  %v4245_v43 = vadd.f32 %v4241_v32, %v10523_v63  ;;  %v11367_v32 = vld [vmem:[#allocation152_spill] sm:$0xff] }
0x102e   :  { %v4775_v4 = vmul.f32 -1.442695, %v4242_v37 }
0x102f   :  { %v4776_v50 = vmul.f32 -1.442695, %v4243_v41  ;;  %v4777_v46 = vmul.f32 -1.442695, %v4245_v43  ;;  %v11370_v43 = vld [vmem:[#allocation155_spill] sm:$0xff] }
0x1030   :  { %7761 = vpow2.f32 %v4775_v4  ;;  %v11365_v4 = vld [vmem:[#allocation150_spill] sm:$0xff] }
0x1031   :  { %7763 = vpow2.f32 %v4776_v50  ;;  %v11366_v50 = vld [vmem:[#allocation151_spill] sm:$0xff] }
0x1032   :  { %7765 = vpow2.f32 %v4773_v59  ;;  %v11372_v59 = vld [vmem:[#allocation157_spill] sm:$0xff] }
0x1033   :  { %7767 = vpow2.f32 %v4777_v46  ;;  %v11373_v46 = vld [vmem:[#allocation158_spill] sm:$0xff] }
0x1034   :  { %7769 = vtanh.f32 %v4244_v40  ;;  %v11374_v40 = vld [vmem:[#allocation159_spill] sm:$0xff] }
0x103a   :  { %v7762_v22 = vpop.eup %7761 }
0x103b   :  { %v7764_v30 = vpop.eup %7763  ;;  %v4252_v2 = vadd.f32 1.0, %v7762_v22  ;;  %v11375_v22 = vld [vmem:[#allocation160_spill] sm:$0xff] }
0x103c   :  { %v4253_v9 = vadd.f32 1.0, %v7764_v30  ;;  %v7766_v26 = vpop.eup %7765  ;;  %v11376_v30 = vld [vmem:[#allocation161_spill] sm:$0xff] }
0x103d   :  { %7771 = vrcp.f32 %v4252_v2  ;;  %v7768_v29 = vpop.eup %7767  ;;  %v4077_v20 = vadd.f32 1.0, %v7766_v26  ;;  %v11377_v2 = vld [vmem:[#allocation162_spill] sm:$0xff]  ;;  %v11379_v26 = vld [vmem:[#allocation164_spill] sm:$0xff] }
0x103e   :  { %7773 = vrcp.f32 %v4253_v9  ;;  %v7770_v3 = vpop.eup %7769  ;;  %v4262_v11 = vadd.f32 1.0, %v7768_v29  ;;  %v11378_v9 = vld [vmem:[#allocation163_spill] sm:$0xff]  ;;  %v11380_v29 = vld [vmem:[#allocation165_spill] sm:$0xff] }
0x103f   :  { %7775 = vtanh.f32 %v9823_v19 }
0x1040   :  { %7777 = vrcp.f32 %v4262_v11 }
0x1047   :  { %v7772_v49 = vpop.eup %7771 }
0x1048   :  { %v7774_v55 = vpop.eup %7773  ;;  %v4266_v63 = vmul.f32 %v7772_v49, %v7770_v3 }
0x1049   :  { %v4265_v15 = vmul.f32 %v7774_v55, %v9637_v21  ;;  %v7776_v7 = vpop.eup %7775  ;;  %v11360_v21 = vld [vmem:[#allocation145_spill] sm:$0xff]  ;;  %v11381_v55 = vld [vmem:[#allocation166_spill] sm:$0xff] }
0x104a   :  { %v7778_v24 = vpop.eup %7777 }
0x104b   :  { %v4267_v36 = vadd.f32 %v4266_v63, %v4265_v15 }
0x104d   :  { %7779 = vtanh.f32 %v4267_v36 }
0x104e   :  { %7781 = vrcp.f32 %v4077_v20 }
0x1057   :  { %v7780_v28 = vpop.eup %7779 }
0x1058   :  { %v7782_v37 = vpop.eup %7781  ;;  %v4269_v41 = vmul.f32 %v7780_v28, %v7778_v24 }
0x1059   :  { %v4084_v42 = vmul.f32 %v7782_v37, %v7776_v7 }
0x105a   :  { %4335 = vmatmul.mubr.f32.vlgmr.msra.gmra.mrb[44].mxu0 %v4269_v41  ;;  %4406 = vmatmul.mubr.f32.vlgmr.msra.gmra.mrb[44].mxu1 %v4269_v41 }
0x105b   :  { %4500 = vmatprep.mubr.f32.mxu0 %v4084_v42  ;;  %4571 = vmatprep.mubr.f32.mxu1 %v4084_v42 }
0x105c   :  { %7272 = vmatpush1.bf16.msra.mxu0 %v10526_v0  ;;  %7336 = vmatpush1.bf16.msra.mxu1 %v10527_v16  ;;  %v11342_v0 = vld [vmem:[#allocation127_spill] sm:$0xff]  ;;  %v11343_v16 = vld [vmem:[#allocation128_spill] sm:$0xff] }
0x105d   :  { %7274 = vmatprep.subr.bf16.mxu0 %v10528_v61  ;;  %7338 = vmatprep.subr.bf16.mxu1 %v10529_v52  ;;  %v11344_v61 = vld [vmem:[#allocation129_spill] sm:$0xff]  ;;  %v11345_v52 = vld [vmem:[#allocation130_spill] sm:$0xff] }
0x1060   :  { %7276 = vmatpush1.bf16.msra.mxu0 %v10530_v38  ;;  %7340 = vmatpush1.bf16.msra.mxu1 %v10531_v13  ;;  %v11346_v38 = vld [vmem:[#allocation131_spill] sm:$0xff]  ;;  %v11347_v13 = vld [vmem:[#allocation132_spill] sm:$0xff] }
0x1061   :  { %7278 = vmatprep.subr.bf16.mxu0 %v8319_v1  ;;  %7342 = vmatprep.subr.bf16.mxu1 %v10661_v35  ;;  %v11341_v1 = vld [vmem:[#allocation126_spill] sm:$0xff]  ;;  %v11348_v35 = vld [vmem:[#allocation133_spill] sm:$0xff] }
0x1064   :  { %7280 = vmatpush1.bf16.msra.mxu0 %v10662_v34  ;;  %7344 = vmatpush1.bf16.msra.mxu1 %v10663_v47  ;;  %v11349_v34 = vld [vmem:[#allocation134_spill] sm:$0xff]  ;;  %v11350_v47 = vld [vmem:[#allocation135_spill] sm:$0xff] }
0x1065   :  { %7282 = vmatprep.subr.bf16.mxu0 %v10797_v10  ;;  %7346 = vmatprep.subr.bf16.mxu1 %v10798_v27  ;;  %v11351_v10 = vld [vmem:[#allocation136_spill] sm:$0xff]  ;;  %v11352_v27 = vld [vmem:[#allocation137_spill] sm:$0xff] }
0x1068   :  { %7284 = vmatpush1.bf16.msra.mxu0 %v10799_v17  ;;  %7348 = vmatpush1.bf16.msra.mxu1 %v10933_v60  ;;  %v11353_v17 = vld [vmem:[#allocation138_spill] sm:$0xff]  ;;  %v11354_v60 = vld [vmem:[#allocation139_spill] sm:$0xff] }
0x1069   :  { %7286 = vmatprep.subr.bf16.mxu0 %v10934_v6  ;;  %7350 = vmatprep.subr.bf16.mxu1 %v10935_v56  ;;  %v11355_v6 = vld [vmem:[#allocation140_spill] sm:$0xff]  ;;  %v11356_v56 = vld [vmem:[#allocation141_spill] sm:$0xff] }
0x106c   :  { %7288 = vmatpush1.bf16.msra.mxu0 %v11069_v39  ;;  %7352 = vmatpush1.bf16.msra.mxu1 %v11070_v57  ;;  %v11357_v39 = vld [vmem:[#allocation142_spill] sm:$0xff]  ;;  %v11358_v57 = vld [vmem:[#allocation143_spill] sm:$0xff] }
0x106d   :  { %7290 = vmatprep.subr.bf16.mxu0 %v11071_v58  ;;  %7354 = vmatprep.subr.bf16.mxu1 %v11205_v14  ;;  %v11359_v58 = vld [vmem:[#allocation144_spill] sm:$0xff]  ;;  %v11361_v14 = vld [vmem:[#allocation146_spill] sm:$0xff] }
0x1070   :  { %7292 = vmatpush1.bf16.msra.mxu0 %v11206_v5  ;;  %7356 = vmatpush1.bf16.msra.mxu1 %v11207_v23  ;;  %v11362_v5 = vld [vmem:[#allocation147_spill] sm:$0xff]  ;;  %v11363_v23 = vld [vmem:[#allocation148_spill] sm:$0xff] }
0x1071   :  { %7294 = vmatprep.subr.bf16.mxu0 %v11341_v1  ;;  %7358 = vmatprep.subr.bf16.mxu1 %v11342_v0 }
0x1074   :  { %7296 = vmatpush1.bf16.msra.mxu0 %v11343_v16  ;;  %7360 = vmatpush1.bf16.msra.mxu1 %v11344_v61 }
0x1075   :  { %7298 = vmatprep.subr.bf16.mxu0 %v11345_v52  ;;  %7362 = vmatprep.subr.bf16.mxu1 %v11346_v38 }
0x1078   :  { %7300 = vmatpush1.bf16.msra.mxu0 %v11347_v13  ;;  %7364 = vmatpush1.bf16.msra.mxu1 %v11348_v35 }
0x1079   :  { %7302 = vmatprep.subr.bf16.mxu0 %v11349_v34  ;;  %7366 = vmatprep.subr.bf16.mxu1 %v11350_v47 }
0x107c   :  { %7304 = vmatpush1.bf16.msra.mxu0 %v11351_v10  ;;  %7368 = vmatpush1.bf16.msra.mxu1 %v11352_v27  ;;  %v4602_v10 = vld [vmem:[%s9963_s5] sm:$0xff]  ;;  %v4603_v27 = vld [vmem:[%s9963_s5 + $0x8] sm:$0xff] }
0x107d   :  { %7306 = vmatprep.subr.bf16.mxu0 %v11353_v17  ;;  %7370 = vmatprep.subr.bf16.mxu1 %v11354_v60  ;;  %v7398_v17 = vpack.c.bf16 %v4603_v27, %v4602_v10  ;;  %v7869_v60 = vmov 0.0|0.0  }
0x1080   :  { %7308 = vmatpush1.bf16.msra.mxu0 %v11355_v6  ;;  %7372 = vmatpush1.bf16.msra.mxu1 %v11356_v56  ;;  %v4605_v6 = vld [vmem:[%s9963_s5 + $0x18] sm:$0xff] }
0x1081   :  { %7310 = vmatprep.subr.bf16.mxu0 %v11357_v39  ;;  %7374 = vmatprep.subr.bf16.mxu1 %v11358_v57  ;;  %v4606_v39 = vld [vmem:[%s9963_s5 + $0x20] sm:$0xff]  ;;  %v4607_v57 = vld [vmem:[%s9963_s5 + $0x28] sm:$0xff] }
0x1084   :  { %7312 = vmatpush1.bf16.msra.mxu0 %v11359_v58  ;;  %7376 = vmatpush1.bf16.msra.mxu1 %v11360_v21  ;;  %v7404_v58 = vpack.c.bf16 %v4607_v57, %v4606_v39  ;;  %v4608_v21 = vld [vmem:[%s9963_s5 + $0x30] sm:$0xff] }
0x1085   :  { %7314 = vmatprep.subr.bf16.mxu0 %v11361_v14  ;;  %7378 = vmatprep.subr.bf16.mxu1 %v11362_v5  ;;  %v4609_v14 = vld [vmem:[%s9963_s5 + $0x38] sm:$0xff] }
0x1086   :  { %v7407_v5 = vpack.c.bf16 %v4609_v14, %v4608_v21 }
0x1088   :  { %7316 = vmatpush1.bf16.msra.mxu0 %v11363_v23  ;;  %7380 = vmatpush1.bf16.msra.mxu1 %v11364_v8  ;;  %v4610_v23 = vld [vmem:[%s9963_s5 + $0x40] sm:$0xff]  ;;  %v4611_v8 = vld [vmem:[%s9963_s5 + $0x48] sm:$0xff] }
0x1089   :  { %7318 = vmatprep.subr.bf16.mxu0 %v11365_v4  ;;  %7382 = vmatprep.subr.bf16.mxu1 %v11366_v50  ;;  %v7410_v4 = vpack.c.bf16 %v4611_v8, %v4610_v23  ;;  %v4612_v50 = vld [vmem:[%s9963_s5 + $0x50] sm:$0xff] }
0x108c   :  { %7320 = vmatpush1.bf16.msra.mxu0 %v11367_v32  ;;  %7384 = vmatpush1.bf16.msra.mxu1 %v11368_v54  ;;  %v4613_v32 = vld [vmem:[%s9963_s5 + $0x58] sm:$0xff]  ;;  %v4614_v54 = vld [vmem:[%s9963_s5 + $0x60] sm:$0xff] }
0x108d   :  { %7322 = vmatprep.subr.bf16.mxu0 %v11369_v44  ;;  %7386 = vmatprep.subr.bf16.mxu1 %v11370_v43  ;;  %v7413_v44 = vpack.c.bf16 %v4613_v32, %v4612_v50  ;;  %v4615_v43 = vld [vmem:[%s9963_s5 + $0x68] sm:$0xff] }
0x1090   :  { %7324 = vmatpush1.bf16.msra.mxu0 %v11371_v48  ;;  %7388 = vmatpush1.bf16.msra.mxu1 %v11372_v59  ;;  %v7416_v48 = vpack.c.bf16 %v4615_v43, %v4614_v54  ;;  %v4616_v59 = vld [vmem:[%s9963_s5 + $0x70] sm:$0xff] }
0x1091   :  { %7326 = vmatprep.subr.bf16.mxu0 %v11373_v46  ;;  %7390 = vmatprep.subr.bf16.mxu1 %v11374_v40  ;;  %v4617_v46 = vld [vmem:[%s9963_s5 + $0x78] sm:$0xff] }
0x1092   :  { %v7419_v40 = vpack.c.bf16 %v4617_v46, %v4616_v59 }
0x1094   :  { %7328 = vmatpush1.bf16.msra.mxu0 %v11375_v22  ;;  %7392 = vmatpush1.bf16.msra.mxu1 %v11376_v30 }
0x1095   :  { %7330 = vmatprep.subr.bf16.mxu0 %v11377_v2  ;;  %7394 = vmatprep.subr.bf16.mxu1 %v11378_v9 }
0x1098   :  { %7332 = vmatpush1.bf16.msra.mxu0 %v11379_v26  ;;  %7396 = vmatpush1.bf16.msra.mxu1 %v11380_v29 }
0x1099   :  { %7397 = vmatprep.subr.bf16.mxu0 %v7869_v60 }
0x112d   :  { %v4336_v3 = vpop.f32.mrb[44].mxu0  ;;  %v4407_v49 = vpop.f32.mrb[44].mxu1 }
0x112e   :  { %v4337_v63 = vadd.f32 %v4336_v3, %v11381_v55  ;;  %v4338_v11 = vpop.f32.mrb[45].mxu0  ;;  %v4409_v15 = vpop.f32.mrb[45].mxu1  ;;  %v4408_v37 = vadd.f32 %v4407_v49, %v8509_v62 }
0x112f   :  { %v4339_v20 = vadd.f32 %v4338_v11, %v10584_v45  ;;  %v4410_v24 = vadd.f32 %v4409_v15, %v10585_v25 }
0x1130   :  { %v4778_v36 = vmul.f32 -1.442695, %v4337_v63 }
0x1131   :  { %v4779_v7 = vmul.f32 -1.442695, %v4339_v20  ;;  %v4780_v28 = vmul.f32 -1.442695, %v4410_v24 }
0x1132   :  { %7783 = vpow2.f32 %v4778_v36 }
0x1133   :  { %7785 = vpow2.f32 %v4779_v7 }
0x1134   :  { %7787 = vpow2.f32 %v4780_v28 }
0x1135   :  { %7789 = vtanh.f32 %v4408_v37 }
0x113c   :  { %v7784_v41 = vpop.eup %7783 }
0x113d   :  { %v7786_v42 = vpop.eup %7785  ;;  %v4418_v1 = vadd.f32 1.0, %v7784_v41 }
0x113e   :  { %v4419_v0 = vadd.f32 1.0, %v7786_v42  ;;  %v7788_v16 = vpop.eup %7787 }
0x113f   :  { %7791 = vrcp.f32 %v4418_v1  ;;  %v7790_v61 = vpop.eup %7789  ;;  %v4428_v13 = vadd.f32 1.0, %v7788_v16 }
0x1140   :  { %7793 = vrcp.f32 %v4419_v0  ;;  %v4784_v0 = vld [vmem:[#allocation2] ss:$0 sm:$0xff] }
0x1141   :  { %7795 = vrcp.f32 %v4428_v13 }
0x1149   :  { %v7792_v45 = vpop.eup %7791 }
0x114a   :  { %v7794_v52 = vpop.eup %7793  ;;  %v4432_v38 = vmul.f32 %v7792_v45, %v7790_v61 }
0x114b   :  { %v4431_v35 = vmul.f32 %v7794_v52, %v9714_v53  ;;  %v7796_v62 = vpop.eup %7795  ;;  %v4604_v53 = vld [vmem:[%s9963_s5 + $0x10] sm:$0xff] }
0x114c   :  { %v7401_v56 = vpack.c.bf16 %v4605_v6, %v4604_v53 }
0x114d   :  { %v4433_v25 = vadd.f32 %v4432_v38, %v4431_v35 }
0x114f   :  { %7797 = vtanh.f32 %v4433_v25 }
0x1159   :  { %v7798_v34 = vpop.eup %7797 }
0x115a   :  { %v4435_v47 = vmul.f32 %v7798_v34, %v7796_v62 }
0x115c   :  { %4501 = vmatmul.mubr.f32.vlgmr.msra.gmra.mrb[46].mxu0 %v4435_v47  ;;  %4572 = vmatmul.mubr.f32.vlgmr.msra.gmra.mrb[46].mxu1 %v4435_v47 }
0x115d   :  { %7399 = vmatpush3.bf16.msra.mxu0 %v7398_v17  ;;  %4834 = vmatprep.mubr.msk.f32.mxu0 %vm7870_vm0, %v10394_v12 }
0x115e   :  { %7400 = vmatprep.subr.bf16.mxu0 %v7869_v60 }
0x1161   :  { %7402 = vmatpush3.bf16.msra.mxu0 %v7401_v56 }
0x1162   :  { %7403 = vmatprep.subr.bf16.mxu0 %v7869_v60 }
0x1165   :  { %7405 = vmatpush3.bf16.msra.mxu0 %v7404_v58 }
0x1166   :  { %7406 = vmatprep.subr.bf16.mxu0 %v7869_v60 }
0x1169   :  { %7408 = vmatpush3.bf16.msra.mxu0 %v7407_v5 }
0x116a   :  { %7409 = vmatprep.subr.bf16.mxu0 %v7869_v60 }
0x116d   :  { %7411 = vmatpush3.bf16.msra.mxu0 %v7410_v4 }
0x116e   :  { %7412 = vmatprep.subr.bf16.mxu0 %v7869_v60 }
0x1171   :  { %7414 = vmatpush3.bf16.msra.mxu0 %v7413_v44 }
0x1172   :  { %7415 = vmatprep.subr.bf16.mxu0 %v7869_v60 }
0x1175   :  { %7417 = vmatpush3.bf16.msra.mxu0 %v7416_v48 }
0x1176   :  { %7418 = vmatprep.subr.bf16.mxu0 %v7869_v60 }
0x1179   :  { %7420 = vmatpush3.bf16.msra.mxu0 %v7419_v40 }
0x122f   :  { %v4502_v22 = vpop.f32.mrb[46].mxu0  ;;  %v4573_v30 = vpop.f32.mrb[46].mxu1 }
0x1230   :  { %v4503_v2 = vadd.f32 %v4502_v22, %v11336_v18  ;;  %v4504_v12 = vpop.f32.mrb[47].mxu0  ;;  %v4575_v9 = vpop.f32.mrb[47].mxu1  ;;  %v4574_v63 = vadd.f32 %v4573_v30, %v11338_v51 }
0x1231   :  { %v4505_v26 = vadd.f32 %v4504_v12, %v11337_v33  ;;  %v4576_v49 = vadd.f32 %v4575_v9, %v8638_v31 }
0x1232   :  { %v4781_v29 = vmul.f32 -1.442695, %v4503_v2 }
0x1233   :  { %v4782_v3 = vmul.f32 -1.442695, %v4505_v26  ;;  %v4783_v55 = vmul.f32 -1.442695, %v4576_v49 }
0x1234   :  { %7799 = vpow2.f32 %v4781_v29 }
0x1235   :  { %7801 = vpow2.f32 %v4782_v3 }
0x1236   :  { %7803 = vpow2.f32 %v4783_v55 }
0x1237   :  { %7805 = vtanh.f32 %v4574_v63 }
0x123e   :  { %v7800_v11 = vpop.eup %7799 }
0x123f   :  { %v7802_v15 = vpop.eup %7801  ;;  %v4584_v20 = vadd.f32 1.0, %v7800_v11 }
0x1240   :  { %v4585_v36 = vadd.f32 1.0, %v7802_v15  ;;  %v7804_v18 = vpop.eup %7803 }
0x1241   :  { %7807 = vrcp.f32 %v4584_v20  ;;  %v7806_v7 = vpop.eup %7805  ;;  %v4594_v37 = vadd.f32 1.0, %v7804_v18 }
0x1242   :  { %7809 = vrcp.f32 %v4585_v36 }
0x1243   :  { %7811 = vrcp.f32 %v4594_v37 }
0x124b   :  { %v7808_v33 = vpop.eup %7807 }
0x124c   :  { %v7810_v24 = vpop.eup %7809  ;;  %v4598_v28 = vmul.f32 %v7808_v33, %v7806_v7 }
0x124d   :  { %v4597_v41 = vmul.f32 %v7810_v24, %v9823_v19  ;;  %v7812_v51 = vpop.eup %7811 }
0x124f   :  { %v4599_v31 = vadd.f32 %v4598_v28, %v4597_v41 }
0x1251   :  { %7813 = vtanh.f32 %v4599_v31 }
0x125b   :  { %v7814_v42 = vpop.eup %7813 }
0x125c   :  { %v4601_v1 = vmul.f32 %v7814_v42, %v7812_v51 }
0x125e   :  { %4835 = vmatmul.mubr.f32.vlgmr.msra.gmra.mrb[48].mxu0 %v4601_v1 }
0x1331   :  { %v4691_v16 = vpop.f32.mrb[48].mxu0 }
0x1332   :  { %v4692_v61 = vadd.f32 %v4784_v0, %v4691_v16  ;;  %v4836_v45 = vpop.f32.mrb[49].mxu0 }
0x1334   :  { %4696 = vst.msk [vmem:[%s9965_s7] sm:$0x3] %vm4695_vm1, %v4692_v61 }
0x1335   :  { %4701 = vsyncpa [#allocation4], 1 }
0x1336   :  { %4702 = vsyncpa [#allocation6], 1 }

</bundles_post_ra>
